<compile_context>
chip_gen: v7x
topology: tpu7x:2x2x1
jax: 0.10.0
libtpu: 0.0.40
codegen_flags: <defaults>
</compile_context>

<pallas_src>
import math
from functools import partial

import jax
import jax.numpy as jnp
from jax.experimental import pallas as pl
from jax.experimental.pallas import tpu as pltpu

D_MODEL = 32
N_HEADS = 4
N_LAYERS = 2
EPS = 1e-5  # nn.LayerNorm default


# ---------------------------------------------------------------------------
# in-kernel helpers (f32 VPU/EUP/XLU math)
# ---------------------------------------------------------------------------
def _erf(x):
    # float32-accurate erf (rational erfc approximation, |rel err| < 1.2e-7).
    # nn.GELU() default is exact (erf-based) GELU.
    a = jnp.abs(x)
    t = 1.0 / (1.0 + 0.5 * a)
    poly = -1.26551223 + t * (1.00002368 + t * (0.37409196 + t * (0.09678418
          + t * (-0.18628806 + t * (0.27886807 + t * (-1.13520398
          + t * (1.48851587 + t * (-0.82215223 + t * 0.17087277))))))))
    erfc = t * jnp.exp(-a * a + poly)
    return jnp.where(x >= 0, 1.0, -1.0) * (1.0 - erfc)


def _gelu_exact(x):
    return 0.5 * x * (1.0 + _erf(x * (1.0 / math.sqrt(2.0))))


def _layernorm(r, gamma, beta):
    mean = jnp.mean(r, axis=-1, keepdims=True)
    var = jnp.mean((r - mean) ** 2, axis=-1, keepdims=True)
    return (r - mean) * jax.lax.rsqrt(var + EPS) * gamma + beta


def _row_to_col(row):
    # (1, N) -> (N, 1) using only iota/select/lane-reduce (avoids a tiny
    # lanes->sublanes relayout for the mask column).
    n = row.shape[-1]
    r = jax.lax.broadcasted_iota(jnp.int32, (n, n), 0)
    c = jax.lax.broadcasted_iota(jnp.int32, (n, n), 1)
    return jnp.sum(jnp.where(r == c, row, 0.0), axis=-1, keepdims=True)


# ---------------------------------------------------------------------------
# fused decoder kernel: whole stack + whole batch in one grid step
# ---------------------------------------------------------------------------
def _make_decoder_kernel(batch, n_layers, n_heads, use_cross):
    def kernel(*refs):
        if use_cross:
            x_ref, c_ref, xm_ref, cm_ref = refs[:4]
            w = refs[4:-1]
            sa, ca, ff = w[:4], w[4:10], w[10:14]
        else:
            x_ref, xm_ref = refs[:2]
            c_ref = cm_ref = None
            w = refs[2:-1]
            sa, ca, ff = w[:4], None, w[4:8]
        out_ref = refs[-1]

        D = x_ref.shape[1]
        T = x_ref.shape[2]
        kc = D // n_heads

        sa_wqkv, sa_bqkv, sa_wo, sa_misc = sa        # (L,D,3D) (L,1,3D) (L,D,D) (L,3,D)
        ff_w1, ff_b1, ff_w2, ff_misc = ff            # (L,D,4D) (L,1,4D) (L,4D,D) (L,3,D)
        if use_cross:
            ca_wq, ca_bq, ca_wkv, ca_bkv, ca_wo, ca_misc = ca

        # causal template, shared across the batch
        rows = jax.lax.broadcasted_iota(jnp.int32, (T, T), 0)
        cols = jax.lax.broadcasted_iota(jnp.int32, (T, T), 1)

        def attend(q, k, v, keep):
            # q: (Tq, D) (scale already folded into Wq/bq), k/v: (Tkv, D)
            outs = []
            for hh in range(n_heads):                # static per-head lane slices
                sl = slice(hh * kc, (hh + 1) * kc)
                s = jax.lax.dot_general(
                    q[:, sl], k[:, sl], (((1,), (1,)), ((), ())),
                    preferred_element_type=jnp.float32)          # (Tq, Tkv)
                s = jnp.where(keep, s, -10000.0)    # masked_fill(mask == 0, -1e4)
                s = s - jnp.max(s, axis=-1, keepdims=True)
                e = jnp.exp(s)
                p = e / jnp.sum(e, axis=-1, keepdims=True)       # exact softmax
                outs.append(jnp.dot(p, v[:, sl],
                                    preferred_element_type=jnp.float32))
            return jnp.concatenate(outs, axis=-1)                # (Tq, D), head-major

        for b in range(batch):                       # static unroll over batch
            xm_row = xm_ref[b]                       # (1, T)
            xm_col = _row_to_col(xm_row)             # (T, 1)
            # reference mask: subsequent_mask(T).bool() + x_mask.bool()  (logical OR)
            keep_self = jnp.logical_or(cols <= rows, xm_row != 0.0)      # (T, T)

            # x = x * x_mask, then to (T, D) so matmuls are lane-dense
            h = jnp.transpose(x_ref[b] * xm_row)     # (T, D)

            if use_cross:
                cm_row = cm_ref[b]                   # (1, Tc)
                c_masked = c_ref[b] * cm_row         # (D, Tc)  c = c * c_mask
                # cross mask: c_mask.unsqueeze(2) * x_mask.unsqueeze(3)
                keep_cross = jnp.logical_and(cm_row != 0.0, xm_col != 0.0)  # (T, Tc)

            for l in range(n_layers):                # static unroll over layers
                # ---- self attention + residual + LayerNorm ------------------
                qkv = jnp.dot(h, sa_wqkv[l],
                              preferred_element_type=jnp.float32) + sa_bqkv[l]  # (T, 3D)
                o = attend(qkv[:, :D], qkv[:, D:2 * D], qkv[:, 2 * D:], keep_self)
                m = sa_misc[l]                       # rows: [b_o, gamma, beta]
                y = jnp.dot(o, sa_wo[l], preferred_element_type=jnp.float32) + m[0:1, :]
                h = _layernorm(h + y, m[1:2, :], m[2:3, :])

                # ---- cross attention + residual + LayerNorm -----------------
                if use_cross:
                    q = jnp.dot(h, ca_wq[l],
                                preferred_element_type=jnp.float32) + ca_bq[l]  # (T, D)
                    # contract over D (dim 0 of c_masked): no explicit transpose of c
                    kv = jax.lax.dot_general(
                        c_masked, ca_wkv[l], (((0,), (0,)), ((), ())),
                        preferred_element_type=jnp.float32) + ca_bkv[l]         # (Tc, 2D)
                    o = attend(q, kv[:, :D], kv[:, D:], keep_cross)
                    m = ca_misc[l]
                    y = jnp.dot(o, ca_wo[l], preferred_element_type=jnp.float32) + m[0:1, :]
                    h = _layernorm(h + y, m[1:2, :], m[2:3, :])

                # ---- FFN (Conv1d-1x1 / GELU / Conv1d-1x1) + residual + LN ----
                t1 = jnp.dot(h * xm_col, ff_w1[l],
                             preferred_element_type=jnp.float32) + ff_b1[l]     # (T, 4D)
                t1 = _gelu_exact(t1)
                m = ff_misc[l]                       # rows: [b2, gamma, beta]
                y = jnp.dot(t1 * xm_col, ff_w2[l],
                            preferred_element_type=jnp.float32) + m[0:1, :]
                y = y * xm_col
                h = _layernorm(h + y, m[1:2, :], m[2:3, :])

            # final x * x_mask, written back directly in (D, T) layout
            out_ref[b] = jnp.transpose(h * xm_col)
    return kernel


# ---------------------------------------------------------------------------
# one-time weight packing (run OUTSIDE the jitted forward):
#   * stack across layers
#   * concatenate Wq|Wk|Wv (and biases) along the output lane axis
#   * fold 1/sqrt(k_channels) into Wq / bq
#   * pack [b_o, gamma, beta] (and [b2, gamma, beta]) into one (L,3,D) array
# ---------------------------------------------------------------------------
def pack_decoder_params(params, n_heads=N_HEADS, use_cross=True):
    d = params[0]["self_attn"][0].shape[0]
    kc = d // n_heads
    scale = 1.0 / math.sqrt(kc)

    def attn_stack(lst):
        wq = jnp.stack([p[0] * scale for p in lst])          # (L, D, D) scale folded
        bq = jnp.stack([p[1] * scale for p in lst])          # (L, 1, D)
        wk = jnp.stack([p[2] for p in lst])
        bk = jnp.stack([p[3] for p in lst])
        wv = jnp.stack([p[4] for p in lst])
        bv = jnp.stack([p[5] for p in lst])
        wo = jnp.stack([p[6] for p in lst])                  # (L, D, D)
        misc = jnp.stack([jnp.concatenate(
            [p[7].reshape(1, d), p[8].reshape(1, d), p[9].reshape(1, d)], axis=0)
            for p in lst])                                   # (L, 3, D)
        return wq, bq, wk, bk, wv, bv, wo, misc

    sa = attn_stack([lp["self_attn"] for lp in params])
    sa_wqkv = jnp.concatenate([sa[0], sa[2], sa[4]], axis=-1)   # (L, D, 3D)
    sa_bqkv = jnp.concatenate([sa[1], sa[3], sa[5]], axis=-1)   # (L, 1, 3D)
    packed = [sa_wqkv, sa_bqkv, sa[6], sa[7]]

    if use_cross:
        ca = attn_stack([lp["cross_attn"] for lp in params])
        ca_wkv = jnp.concatenate([ca[2], ca[4]], axis=-1)       # (L, D, 2D)
        ca_bkv = jnp.concatenate([ca[3], ca[5]], axis=-1)       # (L, 1, 2D)
        packed += [ca[0], ca[1], ca_wkv, ca_bkv, ca[6], ca[7]]

    ffn = [lp["ffn"] for lp in params]
    ff_w1 = jnp.stack([p[0] for p in ffn])                      # (L, D, 4D)
    ff_b1 = jnp.stack([p[1] for p in ffn])                      # (L, 1, 4D)
    ff_w2 = jnp.stack([p[2] for p in ffn])                      # (L, 4D, D)
    ff_misc = jnp.stack([jnp.concatenate(
        [p[3].reshape(1, d), p[4].reshape(1, d), p[5].reshape(1, d)], axis=0)
        for p in ffn])                                          # (L, 3, D)
    packed += [ff_w1, ff_b1, ff_w2, ff_misc]
    return packed


# ---------------------------------------------------------------------------
# decoder forward: exactly one pallas_call, no surrounding XLA layout ops
# ---------------------------------------------------------------------------
def transformer_decoder(x, x_mask, c=None, c_mask=None, packed_params=None,
                        use_cross_attention=True, n_heads=N_HEADS):
    """x: (B, D, T), x_mask: (B, 1, T), c: (B, D, Tc), c_mask: (B, 1, Tc)."""
    B, D, T = x.shape
    n_layers = packed_params[0].shape[0]

    inputs = [x]
    if use_cross_attention:
        inputs.append(c)
    inputs.append(x_mask)
    if use_cross_attention:
        inputs.append(c_mask)
    inputs += list(packed_params)

    def _spec(a):
        nd = a.ndim
        return pl.BlockSpec(a.shape, lambda i, _nd=nd: (0,) * _nd)

    kernel = _make_decoder_kernel(B, n_layers, n_heads, use_cross_attention)
    out = pl.pallas_call(
        kernel,
        out_shape=jax.ShapeDtypeStruct((B, D, T), jnp.float32),
        grid=(1,),
        in_specs=[_spec(a) for a in inputs],
        out_specs=pl.BlockSpec((B, D, T), lambda i: (0, 0, 0)),
        compiler_params=pltpu.CompilerParams(
            dimension_semantics=("arbitrary",)),
    )(*inputs)
    return out


# ---------------------------------------------------------------------------
# deterministic synthetic parameter init (mirrors the module's shapes)
# ---------------------------------------------------------------------------
def init_params(key, d, n_layers, use_cross=True):
    def xavier(k, fi, fo):
        lim = math.sqrt(6.0 / (fi + fo))
        return jax.random.uniform(k, (fi, fo), jnp.float32, -lim, lim)

    def bias(k, fo):
        return jax.random.uniform(k, (1, fo), jnp.float32, -0.1, 0.1)

    def attn(k):
        ks = jax.random.split(k, 8)
        return (xavier(ks[0], d, d), bias(ks[1], d),
                xavier(ks[2], d, d), bias(ks[3], d),
                xavier(ks[4], d, d), bias(ks[5], d),
                xavier(ks[6], d, d), bias(ks[7], d),
                jnp.ones((1, d), jnp.float32), jnp.zeros((1, d), jnp.float32))

    def ffn(k):
        ks = jax.random.split(k, 4)
        return (xavier(ks[0], d, 4 * d), bias(ks[1], 4 * d),
                xavier(ks[2], 4 * d, d), bias(ks[3], d),
                jnp.ones((1, d), jnp.float32), jnp.zeros((1, d), jnp.float32))

    layers = []
    for lk in jax.random.split(key, n_layers):
        k1, k2, k3 = jax.random.split(lk, 3)
        layer = {"self_attn": attn(k1), "ffn": ffn(k3)}
        if use_cross:
            layer["cross_attn"] = attn(k2)
        layers.append(layer)
    return layers


if __name__ == "__main__":
    key = jax.random.PRNGKey(0)
    B, D, T, Tc = 2, D_MODEL, 8, 8
    kx, kc_, kp = jax.random.split(key, 3)

    x = jax.random.normal(kx, (B, D, T), jnp.float32)
    c = jax.random.normal(kc_, (B, D, Tc), jnp.float32)
    x_len = jnp.array([8, 6])
    c_len = jnp.array([8, 5])
    x_mask = (jnp.arange(T)[None, None, :] < x_len[:, None, None]).astype(jnp.float32)
    c_mask = (jnp.arange(Tc)[None, None, :] < c_len[:, None, None]).astype(jnp.float32)

    params = init_params(kp, D, N_LAYERS, use_cross=True)
    packed = jax.block_until_ready(pack_decoder_params(params, use_cross=True))

    fwd = jax.jit(partial(transformer_decoder, use_cross_attention=True))
    out = fwd(x, x_mask, c, c_mask, packed)
    out = jax.block_until_ready(out)

    assert out.shape == (B, D, T)
    assert bool(jnp.all(jnp.isfinite(out)))
    print("KERNEL_OK")
</pallas_src>

<mosaic_0001>
module attributes {stable_mosaic.version = 11 : i64} {
  func.func @kernel(%arg0: i32, %arg1: memref<2x32x8xf32, #tpu.memory_space<vmem>>, %arg2: memref<2x32x8xf32, #tpu.memory_space<vmem>>, %arg3: memref<2x1x8xf32, #tpu.memory_space<vmem>>, %arg4: memref<2x1x8xf32, #tpu.memory_space<vmem>>, %arg5: memref<2x32x96xf32, #tpu.memory_space<vmem>>, %arg6: memref<2x1x96xf32, #tpu.memory_space<vmem>>, %arg7: memref<2x32x32xf32, #tpu.memory_space<vmem>>, %arg8: memref<2x3x32xf32, #tpu.memory_space<vmem>>, %arg9: memref<2x32x32xf32, #tpu.memory_space<vmem>>, %arg10: memref<2x1x32xf32, #tpu.memory_space<vmem>>, %arg11: memref<2x32x64xf32, #tpu.memory_space<vmem>>, %arg12: memref<2x1x64xf32, #tpu.memory_space<vmem>>, %arg13: memref<2x32x32xf32, #tpu.memory_space<vmem>>, %arg14: memref<2x3x32xf32, #tpu.memory_space<vmem>>, %arg15: memref<2x32x128xf32, #tpu.memory_space<vmem>>, %arg16: memref<2x1x128xf32, #tpu.memory_space<vmem>>, %arg17: memref<2x128x32xf32, #tpu.memory_space<vmem>>, %arg18: memref<2x3x32xf32, #tpu.memory_space<vmem>>, %arg19: memref<2x32x8xf32, #tpu.memory_space<vmem>>) attributes {dimension_semantics = [#tpu.dimension_semantics<arbitrary>], iteration_bounds = array<i64: 1>, scalar_prefetch = 0 : i64, scratch_operands = 0 : i64, tpu.core_type = #tpu.core_type<tc>, window_params = [{pipeline_mode = #tpu.pipeline_mode<synchronous>, transform_indices = @transform_0, window_bounds = array<i64: 2, 32, 8>}, {pipeline_mode = #tpu.pipeline_mode<synchronous>, transform_indices = @transform_1, window_bounds = array<i64: 2, 32, 8>}, {pipeline_mode = #tpu.pipeline_mode<synchronous>, transform_indices = @transform_2, window_bounds = array<i64: 2, 1, 8>}, {pipeline_mode = #tpu.pipeline_mode<synchronous>, transform_indices = @transform_3, window_bounds = array<i64: 2, 1, 8>}, {pipeline_mode = #tpu.pipeline_mode<synchronous>, transform_indices = @transform_4, window_bounds = array<i64: 2, 32, 96>}, {pipeline_mode = #tpu.pipeline_mode<synchronous>, transform_indices = @transform_5, window_bounds = array<i64: 2, 1, 96>}, {pipeline_mode = #tpu.pipeline_mode<synchronous>, transform_indices = @transform_6, window_bounds = array<i64: 2, 32, 32>}, {pipeline_mode = #tpu.pipeline_mode<synchronous>, transform_indices = @transform_7, window_bounds = array<i64: 2, 3, 32>}, {pipeline_mode = #tpu.pipeline_mode<synchronous>, transform_indices = @transform_8, window_bounds = array<i64: 2, 32, 32>}, {pipeline_mode = #tpu.pipeline_mode<synchronous>, transform_indices = @transform_9, window_bounds = array<i64: 2, 1, 32>}, {pipeline_mode = #tpu.pipeline_mode<synchronous>, transform_indices = @transform_10, window_bounds = array<i64: 2, 32, 64>}, {pipeline_mode = #tpu.pipeline_mode<synchronous>, transform_indices = @transform_11, window_bounds = array<i64: 2, 1, 64>}, {pipeline_mode = #tpu.pipeline_mode<synchronous>, transform_indices = @transform_12, window_bounds = array<i64: 2, 32, 32>}, {pipeline_mode = #tpu.pipeline_mode<synchronous>, transform_indices = @transform_13, window_bounds = array<i64: 2, 3, 32>}, {pipeline_mode = #tpu.pipeline_mode<synchronous>, transform_indices = @transform_14, window_bounds = array<i64: 2, 32, 128>}, {pipeline_mode = #tpu.pipeline_mode<synchronous>, transform_indices = @transform_15, window_bounds = array<i64: 2, 1, 128>}, {pipeline_mode = #tpu.pipeline_mode<synchronous>, transform_indices = @transform_16, window_bounds = array<i64: 2, 128, 32>}, {pipeline_mode = #tpu.pipeline_mode<synchronous>, transform_indices = @transform_17, window_bounds = array<i64: 2, 3, 32>}, {pipeline_mode = #tpu.pipeline_mode<synchronous>, transform_indices = @transform_18, window_bounds = array<i64: 2, 32, 8>}]} {
    %0 = tpu.iota {dimensions = array<i32: 0>} : vector<8x8xi32>
    %1 = tpu.iota {dimensions = array<i32: 1>} : vector<8x8xi32>
    %c0 = arith.constant 0 : index
    %c0_0 = arith.constant 0 : index
    %c0_1 = arith.constant 0 : index
    %2 = vector.load %arg3[%c0, %c0_0, %c0_1] : memref<2x1x8xf32, #tpu.memory_space<vmem>>, vector<1x1x8xf32>
    %3 = vector.shape_cast %2 : vector<1x1x8xf32> to vector<1x8xf32>
    %4 = tpu.iota {dimensions = array<i32: 0>} : vector<8x8xi32>
    %5 = tpu.iota {dimensions = array<i32: 1>} : vector<8x8xi32>
    %6 = arith.cmpi eq, %4, %5 : vector<8x8xi32>
    %cst = arith.constant 0.000000e+00 : f32
    %7 = vector.shape_cast %3 : vector<1x8xf32> to vector<1x8xf32>
    %8 = vector.broadcast %7 : vector<1x8xf32> to vector<8x8xf32>
    %9 = vector.broadcast %cst : f32 to vector<8x8xf32>
    %10 = arith.select %6, %8, %9 : vector<8x8xi1>, vector<8x8xf32>
    %cst_2 = arith.constant dense<0.000000e+00> : vector<8xf32>
    %11 = vector.multi_reduction <add>, %10, %cst_2 [1] : vector<8x8xf32> to vector<8xf32>
    %12 = vector.shape_cast %11 : vector<8xf32> to vector<8x1xf32>
    %13 = arith.cmpi sle, %1, %0 : vector<8x8xi32>
    %cst_3 = arith.constant 0.000000e+00 : f32
    %14 = vector.broadcast %cst_3 : f32 to vector<1x8xf32>
    %15 = arith.cmpf one, %3, %14 : vector<1x8xf32>
    %16 = vector.broadcast %15 : vector<1x8xi1> to vector<8x8xi1>
    %17 = arith.ori %13, %16 : vector<8x8xi1>
    %c0_4 = arith.constant 0 : index
    %c0_5 = arith.constant 0 : index
    %c0_6 = arith.constant 0 : index
    %18 = vector.load %arg1[%c0_4, %c0_5, %c0_6] : memref<2x32x8xf32, #tpu.memory_space<vmem>>, vector<1x32x8xf32>
    %19 = vector.shape_cast %18 : vector<1x32x8xf32> to vector<32x8xf32>
    %20 = vector.broadcast %3 : vector<1x8xf32> to vector<32x8xf32>
    %21 = arith.mulf %19, %20 : vector<32x8xf32>
    %22 = tpu.transpose %21, [1, 0] : vector<32x8xf32> -> vector<8x32xf32>
    %c0_7 = arith.constant 0 : index
    %c0_8 = arith.constant 0 : index
    %c0_9 = arith.constant 0 : index
    %23 = vector.load %arg4[%c0_7, %c0_8, %c0_9] : memref<2x1x8xf32, #tpu.memory_space<vmem>>, vector<1x1x8xf32>
    %24 = vector.shape_cast %23 : vector<1x1x8xf32> to vector<1x8xf32>
    %c0_10 = arith.constant 0 : index
    %c0_11 = arith.constant 0 : index
    %c0_12 = arith.constant 0 : index
    %25 = vector.load %arg2[%c0_10, %c0_11, %c0_12] : memref<2x32x8xf32, #tpu.memory_space<vmem>>, vector<1x32x8xf32>
    %26 = vector.shape_cast %25 : vector<1x32x8xf32> to vector<32x8xf32>
    %27 = vector.broadcast %24 : vector<1x8xf32> to vector<32x8xf32>
    %28 = arith.mulf %26, %27 : vector<32x8xf32>
    %cst_13 = arith.constant 0.000000e+00 : f32
    %29 = vector.broadcast %cst_13 : f32 to vector<1x8xf32>
    %30 = arith.cmpf one, %24, %29 : vector<1x8xf32>
    %cst_14 = arith.constant 0.000000e+00 : f32
    %31 = vector.broadcast %cst_14 : f32 to vector<8x1xf32>
    %32 = arith.cmpf one, %12, %31 : vector<8x1xf32>
    %33 = vector.broadcast %30 : vector<1x8xi1> to vector<8x8xi1>
    %34 = vector.broadcast %32 : vector<8x1xi1> to vector<8x8xi1>
    %35 = arith.andi %33, %34 : vector<8x8xi1>
    %c0_15 = arith.constant 0 : index
    %c0_16 = arith.constant 0 : index
    %c0_17 = arith.constant 0 : index
    %36 = vector.load %arg5[%c0_15, %c0_16, %c0_17] : memref<2x32x96xf32, #tpu.memory_space<vmem>>, vector<1x32x96xf32>
    %37 = vector.shape_cast %36 : vector<1x32x96xf32> to vector<32x96xf32>
    %cst_18 = arith.constant dense<0.000000e+00> : vector<8x96xf32>
    %38 = tpu.matmul %22, %37, %cst_18 {dimension_numbers = #tpu.dot_dimension_numbers<[1], [0], [0], [1], [0, 0, 1, 1], [], []>} : vector<8x32xf32>, vector<32x96xf32>, vector<8x96xf32> -> vector<8x96xf32>
    %c0_19 = arith.constant 0 : index
    %c0_20 = arith.constant 0 : index
    %c0_21 = arith.constant 0 : index
    %39 = vector.load %arg6[%c0_19, %c0_20, %c0_21] : memref<2x1x96xf32, #tpu.memory_space<vmem>>, vector<1x1x96xf32>
    %40 = vector.shape_cast %39 : vector<1x1x96xf32> to vector<1x96xf32>
    %41 = vector.broadcast %40 : vector<1x96xf32> to vector<8x96xf32>
    %42 = arith.addf %38, %41 : vector<8x96xf32>
    %43 = vector.extract_strided_slice %42 {offsets = [0, 0], sizes = [8, 32], strides = [1, 1]} : vector<8x96xf32> to vector<8x32xf32>
    %44 = vector.extract_strided_slice %42 {offsets = [0, 32], sizes = [8, 32], strides = [1, 1]} : vector<8x96xf32> to vector<8x32xf32>
    %45 = vector.extract_strided_slice %42 {offsets = [0, 64], sizes = [8, 32], strides = [1, 1]} : vector<8x96xf32> to vector<8x32xf32>
    %46 = vector.extract_strided_slice %43 {offsets = [0, 0], sizes = [8, 8], strides = [1, 1]} : vector<8x32xf32> to vector<8x8xf32>
    %47 = vector.extract_strided_slice %44 {offsets = [0, 0], sizes = [8, 8], strides = [1, 1]} : vector<8x32xf32> to vector<8x8xf32>
    %cst_22 = arith.constant dense<0.000000e+00> : vector<8x8xf32>
    %48 = tpu.matmul %46, %47, %cst_22 {dimension_numbers = #tpu.dot_dimension_numbers<[1], [1], [0], [0], [0, 0, 1, 0], [], []>} : vector<8x8xf32>, vector<8x8xf32>, vector<8x8xf32> -> vector<8x8xf32>
    %cst_23 = arith.constant -1.000000e+04 : f32
    %49 = vector.broadcast %cst_23 : f32 to vector<8x8xf32>
    %50 = arith.select %17, %48, %49 : vector<8x8xi1>, vector<8x8xf32>
    %cst_24 = arith.constant dense<0xFF800000> : vector<8xf32>
    %51 = vector.multi_reduction <maximumf>, %50, %cst_24 [1] : vector<8x8xf32> to vector<8xf32>
    %52 = vector.shape_cast %51 : vector<8xf32> to vector<8x1xf32>
    %53 = vector.broadcast %52 : vector<8x1xf32> to vector<8x8xf32>
    %54 = arith.subf %50, %53 : vector<8x8xf32>
    %55 = math.exp %54 : vector<8x8xf32>
    %cst_25 = arith.constant dense<0.000000e+00> : vector<8xf32>
    %56 = vector.multi_reduction <add>, %55, %cst_25 [1] : vector<8x8xf32> to vector<8xf32>
    %57 = vector.shape_cast %56 : vector<8xf32> to vector<8x1xf32>
    %58 = vector.broadcast %57 : vector<8x1xf32> to vector<8x8xf32>
    %59 = arith.divf %55, %58 : vector<8x8xf32>
    %60 = vector.extract_strided_slice %45 {offsets = [0, 0], sizes = [8, 8], strides = [1, 1]} : vector<8x32xf32> to vector<8x8xf32>
    %cst_26 = arith.constant dense<0.000000e+00> : vector<8x8xf32>
    %61 = tpu.matmul %59, %60, %cst_26 {dimension_numbers = #tpu.dot_dimension_numbers<[1], [0], [0], [1], [0, 0, 1, 1], [], []>} : vector<8x8xf32>, vector<8x8xf32>, vector<8x8xf32> -> vector<8x8xf32>
    %62 = vector.extract_strided_slice %43 {offsets = [0, 8], sizes = [8, 8], strides = [1, 1]} : vector<8x32xf32> to vector<8x8xf32>
    %63 = vector.extract_strided_slice %44 {offsets = [0, 8], sizes = [8, 8], strides = [1, 1]} : vector<8x32xf32> to vector<8x8xf32>
    %cst_27 = arith.constant dense<0.000000e+00> : vector<8x8xf32>
    %64 = tpu.matmul %62, %63, %cst_27 {dimension_numbers = #tpu.dot_dimension_numbers<[1], [1], [0], [0], [0, 0, 1, 0], [], []>} : vector<8x8xf32>, vector<8x8xf32>, vector<8x8xf32> -> vector<8x8xf32>
    %cst_28 = arith.constant -1.000000e+04 : f32
    %65 = vector.broadcast %cst_28 : f32 to vector<8x8xf32>
    %66 = arith.select %17, %64, %65 : vector<8x8xi1>, vector<8x8xf32>
    %cst_29 = arith.constant dense<0xFF800000> : vector<8xf32>
    %67 = vector.multi_reduction <maximumf>, %66, %cst_29 [1] : vector<8x8xf32> to vector<8xf32>
    %68 = vector.shape_cast %67 : vector<8xf32> to vector<8x1xf32>
    %69 = vector.broadcast %68 : vector<8x1xf32> to vector<8x8xf32>
    %70 = arith.subf %66, %69 : vector<8x8xf32>
    %71 = math.exp %70 : vector<8x8xf32>
    %cst_30 = arith.constant dense<0.000000e+00> : vector<8xf32>
    %72 = vector.multi_reduction <add>, %71, %cst_30 [1] : vector<8x8xf32> to vector<8xf32>
    %73 = vector.shape_cast %72 : vector<8xf32> to vector<8x1xf32>
    %74 = vector.broadcast %73 : vector<8x1xf32> to vector<8x8xf32>
    %75 = arith.divf %71, %74 : vector<8x8xf32>
    %76 = vector.extract_strided_slice %45 {offsets = [0, 8], sizes = [8, 8], strides = [1, 1]} : vector<8x32xf32> to vector<8x8xf32>
    %cst_31 = arith.constant dense<0.000000e+00> : vector<8x8xf32>
    %77 = tpu.matmul %75, %76, %cst_31 {dimension_numbers = #tpu.dot_dimension_numbers<[1], [0], [0], [1], [0, 0, 1, 1], [], []>} : vector<8x8xf32>, vector<8x8xf32>, vector<8x8xf32> -> vector<8x8xf32>
    %78 = vector.extract_strided_slice %43 {offsets = [0, 16], sizes = [8, 8], strides = [1, 1]} : vector<8x32xf32> to vector<8x8xf32>
    %79 = vector.extract_strided_slice %44 {offsets = [0, 16], sizes = [8, 8], strides = [1, 1]} : vector<8x32xf32> to vector<8x8xf32>
    %cst_32 = arith.constant dense<0.000000e+00> : vector<8x8xf32>
    %80 = tpu.matmul %78, %79, %cst_32 {dimension_numbers = #tpu.dot_dimension_numbers<[1], [1], [0], [0], [0, 0, 1, 0], [], []>} : vector<8x8xf32>, vector<8x8xf32>, vector<8x8xf32> -> vector<8x8xf32>
    %cst_33 = arith.constant -1.000000e+04 : f32
    %81 = vector.broadcast %cst_33 : f32 to vector<8x8xf32>
    %82 = arith.select %17, %80, %81 : vector<8x8xi1>, vector<8x8xf32>
    %cst_34 = arith.constant dense<0xFF800000> : vector<8xf32>
    %83 = vector.multi_reduction <maximumf>, %82, %cst_34 [1] : vector<8x8xf32> to vector<8xf32>
    %84 = vector.shape_cast %83 : vector<8xf32> to vector<8x1xf32>
    %85 = vector.broadcast %84 : vector<8x1xf32> to vector<8x8xf32>
    %86 = arith.subf %82, %85 : vector<8x8xf32>
    %87 = math.exp %86 : vector<8x8xf32>
    %cst_35 = arith.constant dense<0.000000e+00> : vector<8xf32>
    %88 = vector.multi_reduction <add>, %87, %cst_35 [1] : vector<8x8xf32> to vector<8xf32>
    %89 = vector.shape_cast %88 : vector<8xf32> to vector<8x1xf32>
    %90 = vector.broadcast %89 : vector<8x1xf32> to vector<8x8xf32>
    %91 = arith.divf %87, %90 : vector<8x8xf32>
    %92 = vector.extract_strided_slice %45 {offsets = [0, 16], sizes = [8, 8], strides = [1, 1]} : vector<8x32xf32> to vector<8x8xf32>
    %cst_36 = arith.constant dense<0.000000e+00> : vector<8x8xf32>
    %93 = tpu.matmul %91, %92, %cst_36 {dimension_numbers = #tpu.dot_dimension_numbers<[1], [0], [0], [1], [0, 0, 1, 1], [], []>} : vector<8x8xf32>, vector<8x8xf32>, vector<8x8xf32> -> vector<8x8xf32>
    %94 = vector.extract_strided_slice %43 {offsets = [0, 24], sizes = [8, 8], strides = [1, 1]} : vector<8x32xf32> to vector<8x8xf32>
    %95 = vector.extract_strided_slice %44 {offsets = [0, 24], sizes = [8, 8], strides = [1, 1]} : vector<8x32xf32> to vector<8x8xf32>
    %cst_37 = arith.constant dense<0.000000e+00> : vector<8x8xf32>
    %96 = tpu.matmul %94, %95, %cst_37 {dimension_numbers = #tpu.dot_dimension_numbers<[1], [1], [0], [0], [0, 0, 1, 0], [], []>} : vector<8x8xf32>, vector<8x8xf32>, vector<8x8xf32> -> vector<8x8xf32>
    %cst_38 = arith.constant -1.000000e+04 : f32
    %97 = vector.broadcast %cst_38 : f32 to vector<8x8xf32>
    %98 = arith.select %17, %96, %97 : vector<8x8xi1>, vector<8x8xf32>
    %cst_39 = arith.constant dense<0xFF800000> : vector<8xf32>
    %99 = vector.multi_reduction <maximumf>, %98, %cst_39 [1] : vector<8x8xf32> to vector<8xf32>
    %100 = vector.shape_cast %99 : vector<8xf32> to vector<8x1xf32>
    %101 = vector.broadcast %100 : vector<8x1xf32> to vector<8x8xf32>
    %102 = arith.subf %98, %101 : vector<8x8xf32>
    %103 = math.exp %102 : vector<8x8xf32>
    %cst_40 = arith.constant dense<0.000000e+00> : vector<8xf32>
    %104 = vector.multi_reduction <add>, %103, %cst_40 [1] : vector<8x8xf32> to vector<8xf32>
    %105 = vector.shape_cast %104 : vector<8xf32> to vector<8x1xf32>
    %106 = vector.broadcast %105 : vector<8x1xf32> to vector<8x8xf32>
    %107 = arith.divf %103, %106 : vector<8x8xf32>
    %108 = vector.extract_strided_slice %45 {offsets = [0, 24], sizes = [8, 8], strides = [1, 1]} : vector<8x32xf32> to vector<8x8xf32>
    %cst_41 = arith.constant dense<0.000000e+00> : vector<8x8xf32>
    %109 = tpu.matmul %107, %108, %cst_41 {dimension_numbers = #tpu.dot_dimension_numbers<[1], [0], [0], [1], [0, 0, 1, 1], [], []>} : vector<8x8xf32>, vector<8x8xf32>, vector<8x8xf32> -> vector<8x8xf32>
    %110 = tpu.concatenate %61, %77, %93, %109 in 1 : vector<8x8xf32>, vector<8x8xf32>, vector<8x8xf32>, vector<8x8xf32> -> vector<8x32xf32>
    %c0_42 = arith.constant 0 : index
    %c0_43 = arith.constant 0 : index
    %c0_44 = arith.constant 0 : index
    %111 = vector.load %arg8[%c0_42, %c0_43, %c0_44] : memref<2x3x32xf32, #tpu.memory_space<vmem>>, vector<1x3x32xf32>
    %112 = vector.shape_cast %111 : vector<1x3x32xf32> to vector<3x32xf32>
    %c0_45 = arith.constant 0 : index
    %c0_46 = arith.constant 0 : index
    %c0_47 = arith.constant 0 : index
    %113 = vector.load %arg7[%c0_45, %c0_46, %c0_47] : memref<2x32x32xf32, #tpu.memory_space<vmem>>, vector<1x32x32xf32>
    %114 = vector.shape_cast %113 : vector<1x32x32xf32> to vector<32x32xf32>
    %cst_48 = arith.constant dense<0.000000e+00> : vector<8x32xf32>
    %115 = tpu.matmul %110, %114, %cst_48 {dimension_numbers = #tpu.dot_dimension_numbers<[1], [0], [0], [1], [0, 0, 1, 1], [], []>} : vector<8x32xf32>, vector<32x32xf32>, vector<8x32xf32> -> vector<8x32xf32>
    %116 = vector.extract_strided_slice %112 {offsets = [0, 0], sizes = [1, 32], strides = [1, 1]} : vector<3x32xf32> to vector<1x32xf32>
    %117 = vector.broadcast %116 : vector<1x32xf32> to vector<8x32xf32>
    %118 = arith.addf %115, %117 : vector<8x32xf32>
    %119 = arith.addf %22, %118 : vector<8x32xf32>
    %120 = vector.extract_strided_slice %112 {offsets = [1, 0], sizes = [1, 32], strides = [1, 1]} : vector<3x32xf32> to vector<1x32xf32>
    %121 = vector.extract_strided_slice %112 {offsets = [2, 0], sizes = [1, 32], strides = [1, 1]} : vector<3x32xf32> to vector<1x32xf32>
    %cst_49 = arith.constant dense<0.000000e+00> : vector<8xf32>
    %122 = vector.multi_reduction <add>, %119, %cst_49 [1] : vector<8x32xf32> to vector<8xf32>
    %123 = vector.shape_cast %122 : vector<8xf32> to vector<8x1xf32>
    %cst_50 = arith.constant 3.200000e+01 : f32
    %124 = vector.broadcast %cst_50 : f32 to vector<8x1xf32>
    %125 = arith.divf %123, %124 : vector<8x1xf32>
    %126 = vector.broadcast %125 : vector<8x1xf32> to vector<8x32xf32>
    %127 = arith.subf %119, %126 : vector<8x32xf32>
    %128 = arith.mulf %127, %127 : vector<8x32xf32>
    %cst_51 = arith.constant dense<0.000000e+00> : vector<8xf32>
    %129 = vector.multi_reduction <add>, %128, %cst_51 [1] : vector<8x32xf32> to vector<8xf32>
    %130 = vector.shape_cast %129 : vector<8xf32> to vector<8x1xf32>
    %cst_52 = arith.constant 3.200000e+01 : f32
    %131 = vector.broadcast %cst_52 : f32 to vector<8x1xf32>
    %132 = arith.divf %130, %131 : vector<8x1xf32>
    %133 = vector.broadcast %125 : vector<8x1xf32> to vector<8x32xf32>
    %134 = arith.subf %119, %133 : vector<8x32xf32>
    %cst_53 = arith.constant 9.99999974E-6 : f32
    %135 = vector.broadcast %cst_53 : f32 to vector<8x1xf32>
    %136 = arith.addf %132, %135 : vector<8x1xf32>
    %137 = math.rsqrt %136 : vector<8x1xf32>
    %138 = vector.broadcast %137 : vector<8x1xf32> to vector<8x32xf32>
    %139 = arith.mulf %134, %138 : vector<8x32xf32>
    %140 = vector.broadcast %120 : vector<1x32xf32> to vector<8x32xf32>
    %141 = arith.mulf %139, %140 : vector<8x32xf32>
    %142 = vector.broadcast %121 : vector<1x32xf32> to vector<8x32xf32>
    %143 = arith.addf %141, %142 : vector<8x32xf32>
    %c0_54 = arith.constant 0 : index
    %c0_55 = arith.constant 0 : index
    %c0_56 = arith.constant 0 : index
    %144 = vector.load %arg9[%c0_54, %c0_55, %c0_56] : memref<2x32x32xf32, #tpu.memory_space<vmem>>, vector<1x32x32xf32>
    %145 = vector.shape_cast %144 : vector<1x32x32xf32> to vector<32x32xf32>
    %cst_57 = arith.constant dense<0.000000e+00> : vector<8x32xf32>
    %146 = tpu.matmul %143, %145, %cst_57 {dimension_numbers = #tpu.dot_dimension_numbers<[1], [0], [0], [1], [0, 0, 1, 1], [], []>} : vector<8x32xf32>, vector<32x32xf32>, vector<8x32xf32> -> vector<8x32xf32>
    %c0_58 = arith.constant 0 : index
    %c0_59 = arith.constant 0 : index
    %c0_60 = arith.constant 0 : index
    %147 = vector.load %arg10[%c0_58, %c0_59, %c0_60] : memref<2x1x32xf32, #tpu.memory_space<vmem>>, vector<1x1x32xf32>
    %148 = vector.shape_cast %147 : vector<1x1x32xf32> to vector<1x32xf32>
    %149 = vector.broadcast %148 : vector<1x32xf32> to vector<8x32xf32>
    %150 = arith.addf %146, %149 : vector<8x32xf32>
    %c0_61 = arith.constant 0 : index
    %c0_62 = arith.constant 0 : index
    %c0_63 = arith.constant 0 : index
    %151 = vector.load %arg11[%c0_61, %c0_62, %c0_63] : memref<2x32x64xf32, #tpu.memory_space<vmem>>, vector<1x32x64xf32>
    %152 = vector.shape_cast %151 : vector<1x32x64xf32> to vector<32x64xf32>
    %cst_64 = arith.constant dense<0.000000e+00> : vector<8x64xf32>
    %153 = tpu.matmul %28, %152, %cst_64 {dimension_numbers = #tpu.dot_dimension_numbers<[0], [0], [1], [1], [0, 1, 1, 1], [], []>} : vector<32x8xf32>, vector<32x64xf32>, vector<8x64xf32> -> vector<8x64xf32>
    %c0_65 = arith.constant 0 : index
    %c0_66 = arith.constant 0 : index
    %c0_67 = arith.constant 0 : index
    %154 = vector.load %arg12[%c0_65, %c0_66, %c0_67] : memref<2x1x64xf32, #tpu.memory_space<vmem>>, vector<1x1x64xf32>
    %155 = vector.shape_cast %154 : vector<1x1x64xf32> to vector<1x64xf32>
    %156 = vector.broadcast %155 : vector<1x64xf32> to vector<8x64xf32>
    %157 = arith.addf %153, %156 : vector<8x64xf32>
    %158 = vector.extract_strided_slice %157 {offsets = [0, 0], sizes = [8, 32], strides = [1, 1]} : vector<8x64xf32> to vector<8x32xf32>
    %159 = vector.extract_strided_slice %157 {offsets = [0, 32], sizes = [8, 32], strides = [1, 1]} : vector<8x64xf32> to vector<8x32xf32>
    %160 = vector.extract_strided_slice %150 {offsets = [0, 0], sizes = [8, 8], strides = [1, 1]} : vector<8x32xf32> to vector<8x8xf32>
    %161 = vector.extract_strided_slice %158 {offsets = [0, 0], sizes = [8, 8], strides = [1, 1]} : vector<8x32xf32> to vector<8x8xf32>
    %cst_68 = arith.constant dense<0.000000e+00> : vector<8x8xf32>
    %162 = tpu.matmul %160, %161, %cst_68 {dimension_numbers = #tpu.dot_dimension_numbers<[1], [1], [0], [0], [0, 0, 1, 0], [], []>} : vector<8x8xf32>, vector<8x8xf32>, vector<8x8xf32> -> vector<8x8xf32>
    %cst_69 = arith.constant -1.000000e+04 : f32
    %163 = vector.broadcast %cst_69 : f32 to vector<8x8xf32>
    %164 = arith.select %35, %162, %163 : vector<8x8xi1>, vector<8x8xf32>
    %cst_70 = arith.constant dense<0xFF800000> : vector<8xf32>
    %165 = vector.multi_reduction <maximumf>, %164, %cst_70 [1] : vector<8x8xf32> to vector<8xf32>
    %166 = vector.shape_cast %165 : vector<8xf32> to vector<8x1xf32>
    %167 = vector.broadcast %166 : vector<8x1xf32> to vector<8x8xf32>
    %168 = arith.subf %164, %167 : vector<8x8xf32>
    %169 = math.exp %168 : vector<8x8xf32>
    %cst_71 = arith.constant dense<0.000000e+00> : vector<8xf32>
    %170 = vector.multi_reduction <add>, %169, %cst_71 [1] : vector<8x8xf32> to vector<8xf32>
    %171 = vector.shape_cast %170 : vector<8xf32> to vector<8x1xf32>
    %172 = vector.broadcast %171 : vector<8x1xf32> to vector<8x8xf32>
    %173 = arith.divf %169, %172 : vector<8x8xf32>
    %174 = vector.extract_strided_slice %159 {offsets = [0, 0], sizes = [8, 8], strides = [1, 1]} : vector<8x32xf32> to vector<8x8xf32>
    %cst_72 = arith.constant dense<0.000000e+00> : vector<8x8xf32>
    %175 = tpu.matmul %173, %174, %cst_72 {dimension_numbers = #tpu.dot_dimension_numbers<[1], [0], [0], [1], [0, 0, 1, 1], [], []>} : vector<8x8xf32>, vector<8x8xf32>, vector<8x8xf32> -> vector<8x8xf32>
    %176 = vector.extract_strided_slice %150 {offsets = [0, 8], sizes = [8, 8], strides = [1, 1]} : vector<8x32xf32> to vector<8x8xf32>
    %177 = vector.extract_strided_slice %158 {offsets = [0, 8], sizes = [8, 8], strides = [1, 1]} : vector<8x32xf32> to vector<8x8xf32>
    %cst_73 = arith.constant dense<0.000000e+00> : vector<8x8xf32>
    %178 = tpu.matmul %176, %177, %cst_73 {dimension_numbers = #tpu.dot_dimension_numbers<[1], [1], [0], [0], [0, 0, 1, 0], [], []>} : vector<8x8xf32>, vector<8x8xf32>, vector<8x8xf32> -> vector<8x8xf32>
    %cst_74 = arith.constant -1.000000e+04 : f32
    %179 = vector.broadcast %cst_74 : f32 to vector<8x8xf32>
    %180 = arith.select %35, %178, %179 : vector<8x8xi1>, vector<8x8xf32>
    %cst_75 = arith.constant dense<0xFF800000> : vector<8xf32>
    %181 = vector.multi_reduction <maximumf>, %180, %cst_75 [1] : vector<8x8xf32> to vector<8xf32>
    %182 = vector.shape_cast %181 : vector<8xf32> to vector<8x1xf32>
    %183 = vector.broadcast %182 : vector<8x1xf32> to vector<8x8xf32>
    %184 = arith.subf %180, %183 : vector<8x8xf32>
    %185 = math.exp %184 : vector<8x8xf32>
    %cst_76 = arith.constant dense<0.000000e+00> : vector<8xf32>
    %186 = vector.multi_reduction <add>, %185, %cst_76 [1] : vector<8x8xf32> to vector<8xf32>
    %187 = vector.shape_cast %186 : vector<8xf32> to vector<8x1xf32>
    %188 = vector.broadcast %187 : vector<8x1xf32> to vector<8x8xf32>
    %189 = arith.divf %185, %188 : vector<8x8xf32>
    %190 = vector.extract_strided_slice %159 {offsets = [0, 8], sizes = [8, 8], strides = [1, 1]} : vector<8x32xf32> to vector<8x8xf32>
    %cst_77 = arith.constant dense<0.000000e+00> : vector<8x8xf32>
    %191 = tpu.matmul %189, %190, %cst_77 {dimension_numbers = #tpu.dot_dimension_numbers<[1], [0], [0], [1], [0, 0, 1, 1], [], []>} : vector<8x8xf32>, vector<8x8xf32>, vector<8x8xf32> -> vector<8x8xf32>
    %192 = vector.extract_strided_slice %150 {offsets = [0, 16], sizes = [8, 8], strides = [1, 1]} : vector<8x32xf32> to vector<8x8xf32>
    %193 = vector.extract_strided_slice %158 {offsets = [0, 16], sizes = [8, 8], strides = [1, 1]} : vector<8x32xf32> to vector<8x8xf32>
    %cst_78 = arith.constant dense<0.000000e+00> : vector<8x8xf32>
    %194 = tpu.matmul %192, %193, %cst_78 {dimension_numbers = #tpu.dot_dimension_numbers<[1], [1], [0], [0], [0, 0, 1, 0], [], []>} : vector<8x8xf32>, vector<8x8xf32>, vector<8x8xf32> -> vector<8x8xf32>
    %cst_79 = arith.constant -1.000000e+04 : f32
    %195 = vector.broadcast %cst_79 : f32 to vector<8x8xf32>
    %196 = arith.select %35, %194, %195 : vector<8x8xi1>, vector<8x8xf32>
    %cst_80 = arith.constant dense<0xFF800000> : vector<8xf32>
    %197 = vector.multi_reduction <maximumf>, %196, %cst_80 [1] : vector<8x8xf32> to vector<8xf32>
    %198 = vector.shape_cast %197 : vector<8xf32> to vector<8x1xf32>
    %199 = vector.broadcast %198 : vector<8x1xf32> to vector<8x8xf32>
    %200 = arith.subf %196, %199 : vector<8x8xf32>
    %201 = math.exp %200 : vector<8x8xf32>
    %cst_81 = arith.constant dense<0.000000e+00> : vector<8xf32>
    %202 = vector.multi_reduction <add>, %201, %cst_81 [1] : vector<8x8xf32> to vector<8xf32>
    %203 = vector.shape_cast %202 : vector<8xf32> to vector<8x1xf32>
    %204 = vector.broadcast %203 : vector<8x1xf32> to vector<8x8xf32>
    %205 = arith.divf %201, %204 : vector<8x8xf32>
    %206 = vector.extract_strided_slice %159 {offsets = [0, 16], sizes = [8, 8], strides = [1, 1]} : vector<8x32xf32> to vector<8x8xf32>
    %cst_82 = arith.constant dense<0.000000e+00> : vector<8x8xf32>
    %207 = tpu.matmul %205, %206, %cst_82 {dimension_numbers = #tpu.dot_dimension_numbers<[1], [0], [0], [1], [0, 0, 1, 1], [], []>} : vector<8x8xf32>, vector<8x8xf32>, vector<8x8xf32> -> vector<8x8xf32>
    %208 = vector.extract_strided_slice %150 {offsets = [0, 24], sizes = [8, 8], strides = [1, 1]} : vector<8x32xf32> to vector<8x8xf32>
    %209 = vector.extract_strided_slice %158 {offsets = [0, 24], sizes = [8, 8], strides = [1, 1]} : vector<8x32xf32> to vector<8x8xf32>
    %cst_83 = arith.constant dense<0.000000e+00> : vector<8x8xf32>
    %210 = tpu.matmul %208, %209, %cst_83 {dimension_numbers = #tpu.dot_dimension_numbers<[1], [1], [0], [0], [0, 0, 1, 0], [], []>} : vector<8x8xf32>, vector<8x8xf32>, vector<8x8xf32> -> vector<8x8xf32>
    %cst_84 = arith.constant -1.000000e+04 : f32
    %211 = vector.broadcast %cst_84 : f32 to vector<8x8xf32>
    %212 = arith.select %35, %210, %211 : vector<8x8xi1>, vector<8x8xf32>
    %cst_85 = arith.constant dense<0xFF800000> : vector<8xf32>
    %213 = vector.multi_reduction <maximumf>, %212, %cst_85 [1] : vector<8x8xf32> to vector<8xf32>
    %214 = vector.shape_cast %213 : vector<8xf32> to vector<8x1xf32>
    %215 = vector.broadcast %214 : vector<8x1xf32> to vector<8x8xf32>
    %216 = arith.subf %212, %215 : vector<8x8xf32>
    %217 = math.exp %216 : vector<8x8xf32>
    %cst_86 = arith.constant dense<0.000000e+00> : vector<8xf32>
    %218 = vector.multi_reduction <add>, %217, %cst_86 [1] : vector<8x8xf32> to vector<8xf32>
    %219 = vector.shape_cast %218 : vector<8xf32> to vector<8x1xf32>
    %220 = vector.broadcast %219 : vector<8x1xf32> to vector<8x8xf32>
    %221 = arith.divf %217, %220 : vector<8x8xf32>
    %222 = vector.extract_strided_slice %159 {offsets = [0, 24], sizes = [8, 8], strides = [1, 1]} : vector<8x32xf32> to vector<8x8xf32>
    %cst_87 = arith.constant dense<0.000000e+00> : vector<8x8xf32>
    %223 = tpu.matmul %221, %222, %cst_87 {dimension_numbers = #tpu.dot_dimension_numbers<[1], [0], [0], [1], [0, 0, 1, 1], [], []>} : vector<8x8xf32>, vector<8x8xf32>, vector<8x8xf32> -> vector<8x8xf32>
    %224 = tpu.concatenate %175, %191, %207, %223 in 1 : vector<8x8xf32>, vector<8x8xf32>, vector<8x8xf32>, vector<8x8xf32> -> vector<8x32xf32>
    %c0_88 = arith.constant 0 : index
    %c0_89 = arith.constant 0 : index
    %c0_90 = arith.constant 0 : index
    %225 = vector.load %arg14[%c0_88, %c0_89, %c0_90] : memref<2x3x32xf32, #tpu.memory_space<vmem>>, vector<1x3x32xf32>
    %226 = vector.shape_cast %225 : vector<1x3x32xf32> to vector<3x32xf32>
    %c0_91 = arith.constant 0 : index
    %c0_92 = arith.constant 0 : index
    %c0_93 = arith.constant 0 : index
    %227 = vector.load %arg13[%c0_91, %c0_92, %c0_93] : memref<2x32x32xf32, #tpu.memory_space<vmem>>, vector<1x32x32xf32>
    %228 = vector.shape_cast %227 : vector<1x32x32xf32> to vector<32x32xf32>
    %cst_94 = arith.constant dense<0.000000e+00> : vector<8x32xf32>
    %229 = tpu.matmul %224, %228, %cst_94 {dimension_numbers = #tpu.dot_dimension_numbers<[1], [0], [0], [1], [0, 0, 1, 1], [], []>} : vector<8x32xf32>, vector<32x32xf32>, vector<8x32xf32> -> vector<8x32xf32>
    %230 = vector.extract_strided_slice %226 {offsets = [0, 0], sizes = [1, 32], strides = [1, 1]} : vector<3x32xf32> to vector<1x32xf32>
    %231 = vector.broadcast %230 : vector<1x32xf32> to vector<8x32xf32>
    %232 = arith.addf %229, %231 : vector<8x32xf32>
    %233 = arith.addf %143, %232 : vector<8x32xf32>
    %234 = vector.extract_strided_slice %226 {offsets = [1, 0], sizes = [1, 32], strides = [1, 1]} : vector<3x32xf32> to vector<1x32xf32>
    %235 = vector.extract_strided_slice %226 {offsets = [2, 0], sizes = [1, 32], strides = [1, 1]} : vector<3x32xf32> to vector<1x32xf32>
    %cst_95 = arith.constant dense<0.000000e+00> : vector<8xf32>
    %236 = vector.multi_reduction <add>, %233, %cst_95 [1] : vector<8x32xf32> to vector<8xf32>
    %237 = vector.shape_cast %236 : vector<8xf32> to vector<8x1xf32>
    %cst_96 = arith.constant 3.200000e+01 : f32
    %238 = vector.broadcast %cst_96 : f32 to vector<8x1xf32>
    %239 = arith.divf %237, %238 : vector<8x1xf32>
    %240 = vector.broadcast %239 : vector<8x1xf32> to vector<8x32xf32>
    %241 = arith.subf %233, %240 : vector<8x32xf32>
    %242 = arith.mulf %241, %241 : vector<8x32xf32>
    %cst_97 = arith.constant dense<0.000000e+00> : vector<8xf32>
    %243 = vector.multi_reduction <add>, %242, %cst_97 [1] : vector<8x32xf32> to vector<8xf32>
    %244 = vector.shape_cast %243 : vector<8xf32> to vector<8x1xf32>
    %cst_98 = arith.constant 3.200000e+01 : f32
    %245 = vector.broadcast %cst_98 : f32 to vector<8x1xf32>
    %246 = arith.divf %244, %245 : vector<8x1xf32>
    %247 = vector.broadcast %239 : vector<8x1xf32> to vector<8x32xf32>
    %248 = arith.subf %233, %247 : vector<8x32xf32>
    %cst_99 = arith.constant 9.99999974E-6 : f32
    %249 = vector.broadcast %cst_99 : f32 to vector<8x1xf32>
    %250 = arith.addf %246, %249 : vector<8x1xf32>
    %251 = math.rsqrt %250 : vector<8x1xf32>
    %252 = vector.broadcast %251 : vector<8x1xf32> to vector<8x32xf32>
    %253 = arith.mulf %248, %252 : vector<8x32xf32>
    %254 = vector.broadcast %234 : vector<1x32xf32> to vector<8x32xf32>
    %255 = arith.mulf %253, %254 : vector<8x32xf32>
    %256 = vector.broadcast %235 : vector<1x32xf32> to vector<8x32xf32>
    %257 = arith.addf %255, %256 : vector<8x32xf32>
    %258 = vector.broadcast %12 : vector<8x1xf32> to vector<8x32xf32>
    %259 = arith.mulf %257, %258 : vector<8x32xf32>
    %c0_100 = arith.constant 0 : index
    %c0_101 = arith.constant 0 : index
    %c0_102 = arith.constant 0 : index
    %260 = vector.load %arg15[%c0_100, %c0_101, %c0_102] : memref<2x32x128xf32, #tpu.memory_space<vmem>>, vector<1x32x128xf32>
    %261 = vector.shape_cast %260 : vector<1x32x128xf32> to vector<32x128xf32>
    %cst_103 = arith.constant dense<0.000000e+00> : vector<8x128xf32>
    %262 = tpu.matmul %259, %261, %cst_103 {dimension_numbers = #tpu.dot_dimension_numbers<[1], [0], [0], [1], [0, 0, 1, 1], [], []>} : vector<8x32xf32>, vector<32x128xf32>, vector<8x128xf32> -> vector<8x128xf32>
    %c0_104 = arith.constant 0 : index
    %c0_105 = arith.constant 0 : index
    %c0_106 = arith.constant 0 : index
    %263 = vector.load %arg16[%c0_104, %c0_105, %c0_106] : memref<2x1x128xf32, #tpu.memory_space<vmem>>, vector<1x1x128xf32>
    %264 = vector.shape_cast %263 : vector<1x1x128xf32> to vector<1x128xf32>
    %265 = vector.broadcast %264 : vector<1x128xf32> to vector<8x128xf32>
    %266 = arith.addf %262, %265 : vector<8x128xf32>
    %cst_107 = arith.constant 5.000000e-01 : f32
    %267 = vector.broadcast %cst_107 : f32 to vector<8x128xf32>
    %268 = arith.mulf %267, %266 : vector<8x128xf32>
    %cst_108 = arith.constant 0.707106769 : f32
    %269 = vector.broadcast %cst_108 : f32 to vector<8x128xf32>
    %270 = arith.mulf %266, %269 : vector<8x128xf32>
    %271 = math.absf %270 : vector<8x128xf32>
    %cst_109 = arith.constant 5.000000e-01 : f32
    %272 = vector.broadcast %cst_109 : f32 to vector<8x128xf32>
    %273 = arith.mulf %272, %271 : vector<8x128xf32>
    %cst_110 = arith.constant 1.000000e+00 : f32
    %274 = vector.broadcast %cst_110 : f32 to vector<8x128xf32>
    %275 = arith.addf %274, %273 : vector<8x128xf32>
    %cst_111 = arith.constant 1.000000e+00 : f32
    %276 = vector.broadcast %cst_111 : f32 to vector<8x128xf32>
    %277 = arith.divf %276, %275 : vector<8x128xf32>
    %cst_112 = arith.constant 0.170872763 : f32
    %278 = vector.broadcast %cst_112 : f32 to vector<8x128xf32>
    %279 = arith.mulf %277, %278 : vector<8x128xf32>
    %cst_113 = arith.constant -0.822152256 : f32
    %280 = vector.broadcast %cst_113 : f32 to vector<8x128xf32>
    %281 = arith.addf %280, %279 : vector<8x128xf32>
    %282 = arith.mulf %277, %281 : vector<8x128xf32>
    %cst_114 = arith.constant 1.48851585 : f32
    %283 = vector.broadcast %cst_114 : f32 to vector<8x128xf32>
    %284 = arith.addf %283, %282 : vector<8x128xf32>
    %285 = arith.mulf %277, %284 : vector<8x128xf32>
    %cst_115 = arith.constant -1.13520396 : f32
    %286 = vector.broadcast %cst_115 : f32 to vector<8x128xf32>
    %287 = arith.addf %286, %285 : vector<8x128xf32>
    %288 = arith.mulf %277, %287 : vector<8x128xf32>
    %cst_116 = arith.constant 0.278868079 : f32
    %289 = vector.broadcast %cst_116 : f32 to vector<8x128xf32>
    %290 = arith.addf %289, %288 : vector<8x128xf32>
    %291 = arith.mulf %277, %290 : vector<8x128xf32>
    %cst_117 = arith.constant -0.186288059 : f32
    %292 = vector.broadcast %cst_117 : f32 to vector<8x128xf32>
    %293 = arith.addf %292, %291 : vector<8x128xf32>
    %294 = arith.mulf %277, %293 : vector<8x128xf32>
    %cst_118 = arith.constant 0.0967841818 : f32
    %295 = vector.broadcast %cst_118 : f32 to vector<8x128xf32>
    %296 = arith.addf %295, %294 : vector<8x128xf32>
    %297 = arith.mulf %277, %296 : vector<8x128xf32>
    %cst_119 = arith.constant 0.374091953 : f32
    %298 = vector.broadcast %cst_119 : f32 to vector<8x128xf32>
    %299 = arith.addf %298, %297 : vector<8x128xf32>
    %300 = arith.mulf %277, %299 : vector<8x128xf32>
    %cst_120 = arith.constant 1.00002372 : f32
    %301 = vector.broadcast %cst_120 : f32 to vector<8x128xf32>
    %302 = arith.addf %301, %300 : vector<8x128xf32>
    %303 = arith.mulf %277, %302 : vector<8x128xf32>
    %cst_121 = arith.constant -1.26551223 : f32
    %304 = vector.broadcast %cst_121 : f32 to vector<8x128xf32>
    %305 = arith.addf %304, %303 : vector<8x128xf32>
    %cst_122 = arith.constant 0.000000e+00 : f32
    %306 = vector.broadcast %cst_122 : f32 to vector<8x128xf32>
    %307 = arith.subf %306, %271 : vector<8x128xf32>
    %308 = arith.mulf %307, %271 : vector<8x128xf32>
    %309 = arith.addf %308, %305 : vector<8x128xf32>
    %310 = math.exp %309 : vector<8x128xf32>
    %311 = arith.mulf %277, %310 : vector<8x128xf32>
    %cst_123 = arith.constant 0.000000e+00 : f32
    %312 = vector.broadcast %cst_123 : f32 to vector<8x128xf32>
    %313 = arith.cmpf oge, %270, %312 : vector<8x128xf32>
    %cst_124 = arith.constant 1.000000e+00 : f32
    %cst_125 = arith.constant -1.000000e+00 : f32
    %314 = vector.broadcast %cst_124 : f32 to vector<8x128xf32>
    %315 = vector.broadcast %cst_125 : f32 to vector<8x128xf32>
    %316 = arith.select %313, %314, %315 : vector<8x128xi1>, vector<8x128xf32>
    %cst_126 = arith.constant 1.000000e+00 : f32
    %317 = vector.broadcast %cst_126 : f32 to vector<8x128xf32>
    %318 = arith.subf %317, %311 : vector<8x128xf32>
    %319 = arith.mulf %316, %318 : vector<8x128xf32>
    %cst_127 = arith.constant 1.000000e+00 : f32
    %320 = vector.broadcast %cst_127 : f32 to vector<8x128xf32>
    %321 = arith.addf %320, %319 : vector<8x128xf32>
    %322 = arith.mulf %268, %321 : vector<8x128xf32>
    %c0_128 = arith.constant 0 : index
    %c0_129 = arith.constant 0 : index
    %c0_130 = arith.constant 0 : index
    %323 = vector.load %arg18[%c0_128, %c0_129, %c0_130] : memref<2x3x32xf32, #tpu.memory_space<vmem>>, vector<1x3x32xf32>
    %324 = vector.shape_cast %323 : vector<1x3x32xf32> to vector<3x32xf32>
    %325 = vector.broadcast %12 : vector<8x1xf32> to vector<8x128xf32>
    %326 = arith.mulf %322, %325 : vector<8x128xf32>
    %c0_131 = arith.constant 0 : index
    %c0_132 = arith.constant 0 : index
    %c0_133 = arith.constant 0 : index
    %327 = vector.load %arg17[%c0_131, %c0_132, %c0_133] : memref<2x128x32xf32, #tpu.memory_space<vmem>>, vector<1x128x32xf32>
    %328 = vector.shape_cast %327 : vector<1x128x32xf32> to vector<128x32xf32>
    %cst_134 = arith.constant dense<0.000000e+00> : vector<8x32xf32>
    %329 = tpu.matmul %326, %328, %cst_134 {dimension_numbers = #tpu.dot_dimension_numbers<[1], [0], [0], [1], [0, 0, 1, 1], [], []>} : vector<8x128xf32>, vector<128x32xf32>, vector<8x32xf32> -> vector<8x32xf32>
    %330 = vector.extract_strided_slice %324 {offsets = [0, 0], sizes = [1, 32], strides = [1, 1]} : vector<3x32xf32> to vector<1x32xf32>
    %331 = vector.broadcast %330 : vector<1x32xf32> to vector<8x32xf32>
    %332 = arith.addf %329, %331 : vector<8x32xf32>
    %333 = vector.broadcast %12 : vector<8x1xf32> to vector<8x32xf32>
    %334 = arith.mulf %332, %333 : vector<8x32xf32>
    %335 = arith.addf %257, %334 : vector<8x32xf32>
    %336 = vector.extract_strided_slice %324 {offsets = [1, 0], sizes = [1, 32], strides = [1, 1]} : vector<3x32xf32> to vector<1x32xf32>
    %337 = vector.extract_strided_slice %324 {offsets = [2, 0], sizes = [1, 32], strides = [1, 1]} : vector<3x32xf32> to vector<1x32xf32>
    %cst_135 = arith.constant dense<0.000000e+00> : vector<8xf32>
    %338 = vector.multi_reduction <add>, %335, %cst_135 [1] : vector<8x32xf32> to vector<8xf32>
    %339 = vector.shape_cast %338 : vector<8xf32> to vector<8x1xf32>
    %cst_136 = arith.constant 3.200000e+01 : f32
    %340 = vector.broadcast %cst_136 : f32 to vector<8x1xf32>
    %341 = arith.divf %339, %340 : vector<8x1xf32>
    %342 = vector.broadcast %341 : vector<8x1xf32> to vector<8x32xf32>
    %343 = arith.subf %335, %342 : vector<8x32xf32>
    %344 = arith.mulf %343, %343 : vector<8x32xf32>
    %cst_137 = arith.constant dense<0.000000e+00> : vector<8xf32>
    %345 = vector.multi_reduction <add>, %344, %cst_137 [1] : vector<8x32xf32> to vector<8xf32>
    %346 = vector.shape_cast %345 : vector<8xf32> to vector<8x1xf32>
    %cst_138 = arith.constant 3.200000e+01 : f32
    %347 = vector.broadcast %cst_138 : f32 to vector<8x1xf32>
    %348 = arith.divf %346, %347 : vector<8x1xf32>
    %349 = vector.broadcast %341 : vector<8x1xf32> to vector<8x32xf32>
    %350 = arith.subf %335, %349 : vector<8x32xf32>
    %cst_139 = arith.constant 9.99999974E-6 : f32
    %351 = vector.broadcast %cst_139 : f32 to vector<8x1xf32>
    %352 = arith.addf %348, %351 : vector<8x1xf32>
    %353 = math.rsqrt %352 : vector<8x1xf32>
    %354 = vector.broadcast %353 : vector<8x1xf32> to vector<8x32xf32>
    %355 = arith.mulf %350, %354 : vector<8x32xf32>
    %356 = vector.broadcast %336 : vector<1x32xf32> to vector<8x32xf32>
    %357 = arith.mulf %355, %356 : vector<8x32xf32>
    %358 = vector.broadcast %337 : vector<1x32xf32> to vector<8x32xf32>
    %359 = arith.addf %357, %358 : vector<8x32xf32>
    %c1 = arith.constant 1 : index
    %c0_140 = arith.constant 0 : index
    %c0_141 = arith.constant 0 : index
    %360 = vector.load %arg5[%c1, %c0_140, %c0_141] : memref<2x32x96xf32, #tpu.memory_space<vmem>>, vector<1x32x96xf32>
    %361 = vector.shape_cast %360 : vector<1x32x96xf32> to vector<32x96xf32>
    %cst_142 = arith.constant dense<0.000000e+00> : vector<8x96xf32>
    %362 = tpu.matmul %359, %361, %cst_142 {dimension_numbers = #tpu.dot_dimension_numbers<[1], [0], [0], [1], [0, 0, 1, 1], [], []>} : vector<8x32xf32>, vector<32x96xf32>, vector<8x96xf32> -> vector<8x96xf32>
    %c1_143 = arith.constant 1 : index
    %c0_144 = arith.constant 0 : index
    %c0_145 = arith.constant 0 : index
    %363 = vector.load %arg6[%c1_143, %c0_144, %c0_145] : memref<2x1x96xf32, #tpu.memory_space<vmem>>, vector<1x1x96xf32>
    %364 = vector.shape_cast %363 : vector<1x1x96xf32> to vector<1x96xf32>
    %365 = vector.broadcast %364 : vector<1x96xf32> to vector<8x96xf32>
    %366 = arith.addf %362, %365 : vector<8x96xf32>
    %367 = vector.extract_strided_slice %366 {offsets = [0, 0], sizes = [8, 32], strides = [1, 1]} : vector<8x96xf32> to vector<8x32xf32>
    %368 = vector.extract_strided_slice %366 {offsets = [0, 32], sizes = [8, 32], strides = [1, 1]} : vector<8x96xf32> to vector<8x32xf32>
    %369 = vector.extract_strided_slice %366 {offsets = [0, 64], sizes = [8, 32], strides = [1, 1]} : vector<8x96xf32> to vector<8x32xf32>
    %370 = vector.extract_strided_slice %367 {offsets = [0, 0], sizes = [8, 8], strides = [1, 1]} : vector<8x32xf32> to vector<8x8xf32>
    %371 = vector.extract_strided_slice %368 {offsets = [0, 0], sizes = [8, 8], strides = [1, 1]} : vector<8x32xf32> to vector<8x8xf32>
    %cst_146 = arith.constant dense<0.000000e+00> : vector<8x8xf32>
    %372 = tpu.matmul %370, %371, %cst_146 {dimension_numbers = #tpu.dot_dimension_numbers<[1], [1], [0], [0], [0, 0, 1, 0], [], []>} : vector<8x8xf32>, vector<8x8xf32>, vector<8x8xf32> -> vector<8x8xf32>
    %cst_147 = arith.constant -1.000000e+04 : f32
    %373 = vector.broadcast %cst_147 : f32 to vector<8x8xf32>
    %374 = arith.select %17, %372, %373 : vector<8x8xi1>, vector<8x8xf32>
    %cst_148 = arith.constant dense<0xFF800000> : vector<8xf32>
    %375 = vector.multi_reduction <maximumf>, %374, %cst_148 [1] : vector<8x8xf32> to vector<8xf32>
    %376 = vector.shape_cast %375 : vector<8xf32> to vector<8x1xf32>
    %377 = vector.broadcast %376 : vector<8x1xf32> to vector<8x8xf32>
    %378 = arith.subf %374, %377 : vector<8x8xf32>
    %379 = math.exp %378 : vector<8x8xf32>
    %cst_149 = arith.constant dense<0.000000e+00> : vector<8xf32>
    %380 = vector.multi_reduction <add>, %379, %cst_149 [1] : vector<8x8xf32> to vector<8xf32>
    %381 = vector.shape_cast %380 : vector<8xf32> to vector<8x1xf32>
    %382 = vector.broadcast %381 : vector<8x1xf32> to vector<8x8xf32>
    %383 = arith.divf %379, %382 : vector<8x8xf32>
    %384 = vector.extract_strided_slice %369 {offsets = [0, 0], sizes = [8, 8], strides = [1, 1]} : vector<8x32xf32> to vector<8x8xf32>
    %cst_150 = arith.constant dense<0.000000e+00> : vector<8x8xf32>
    %385 = tpu.matmul %383, %384, %cst_150 {dimension_numbers = #tpu.dot_dimension_numbers<[1], [0], [0], [1], [0, 0, 1, 1], [], []>} : vector<8x8xf32>, vector<8x8xf32>, vector<8x8xf32> -> vector<8x8xf32>
    %386 = vector.extract_strided_slice %367 {offsets = [0, 8], sizes = [8, 8], strides = [1, 1]} : vector<8x32xf32> to vector<8x8xf32>
    %387 = vector.extract_strided_slice %368 {offsets = [0, 8], sizes = [8, 8], strides = [1, 1]} : vector<8x32xf32> to vector<8x8xf32>
    %cst_151 = arith.constant dense<0.000000e+00> : vector<8x8xf32>
    %388 = tpu.matmul %386, %387, %cst_151 {dimension_numbers = #tpu.dot_dimension_numbers<[1], [1], [0], [0], [0, 0, 1, 0], [], []>} : vector<8x8xf32>, vector<8x8xf32>, vector<8x8xf32> -> vector<8x8xf32>
    %cst_152 = arith.constant -1.000000e+04 : f32
    %389 = vector.broadcast %cst_152 : f32 to vector<8x8xf32>
    %390 = arith.select %17, %388, %389 : vector<8x8xi1>, vector<8x8xf32>
    %cst_153 = arith.constant dense<0xFF800000> : vector<8xf32>
    %391 = vector.multi_reduction <maximumf>, %390, %cst_153 [1] : vector<8x8xf32> to vector<8xf32>
    %392 = vector.shape_cast %391 : vector<8xf32> to vector<8x1xf32>
    %393 = vector.broadcast %392 : vector<8x1xf32> to vector<8x8xf32>
    %394 = arith.subf %390, %393 : vector<8x8xf32>
    %395 = math.exp %394 : vector<8x8xf32>
    %cst_154 = arith.constant dense<0.000000e+00> : vector<8xf32>
    %396 = vector.multi_reduction <add>, %395, %cst_154 [1] : vector<8x8xf32> to vector<8xf32>
    %397 = vector.shape_cast %396 : vector<8xf32> to vector<8x1xf32>
    %398 = vector.broadcast %397 : vector<8x1xf32> to vector<8x8xf32>
    %399 = arith.divf %395, %398 : vector<8x8xf32>
    %400 = vector.extract_strided_slice %369 {offsets = [0, 8], sizes = [8, 8], strides = [1, 1]} : vector<8x32xf32> to vector<8x8xf32>
    %cst_155 = arith.constant dense<0.000000e+00> : vector<8x8xf32>
    %401 = tpu.matmul %399, %400, %cst_155 {dimension_numbers = #tpu.dot_dimension_numbers<[1], [0], [0], [1], [0, 0, 1, 1], [], []>} : vector<8x8xf32>, vector<8x8xf32>, vector<8x8xf32> -> vector<8x8xf32>
    %402 = vector.extract_strided_slice %367 {offsets = [0, 16], sizes = [8, 8], strides = [1, 1]} : vector<8x32xf32> to vector<8x8xf32>
    %403 = vector.extract_strided_slice %368 {offsets = [0, 16], sizes = [8, 8], strides = [1, 1]} : vector<8x32xf32> to vector<8x8xf32>
    %cst_156 = arith.constant dense<0.000000e+00> : vector<8x8xf32>
    %404 = tpu.matmul %402, %403, %cst_156 {dimension_numbers = #tpu.dot_dimension_numbers<[1], [1], [0], [0], [0, 0, 1, 0], [], []>} : vector<8x8xf32>, vector<8x8xf32>, vector<8x8xf32> -> vector<8x8xf32>
    %cst_157 = arith.constant -1.000000e+04 : f32
    %405 = vector.broadcast %cst_157 : f32 to vector<8x8xf32>
    %406 = arith.select %17, %404, %405 : vector<8x8xi1>, vector<8x8xf32>
    %cst_158 = arith.constant dense<0xFF800000> : vector<8xf32>
    %407 = vector.multi_reduction <maximumf>, %406, %cst_158 [1] : vector<8x8xf32> to vector<8xf32>
    %408 = vector.shape_cast %407 : vector<8xf32> to vector<8x1xf32>
    %409 = vector.broadcast %408 : vector<8x1xf32> to vector<8x8xf32>
    %410 = arith.subf %406, %409 : vector<8x8xf32>
    %411 = math.exp %410 : vector<8x8xf32>
    %cst_159 = arith.constant dense<0.000000e+00> : vector<8xf32>
    %412 = vector.multi_reduction <add>, %411, %cst_159 [1] : vector<8x8xf32> to vector<8xf32>
    %413 = vector.shape_cast %412 : vector<8xf32> to vector<8x1xf32>
    %414 = vector.broadcast %413 : vector<8x1xf32> to vector<8x8xf32>
    %415 = arith.divf %411, %414 : vector<8x8xf32>
    %416 = vector.extract_strided_slice %369 {offsets = [0, 16], sizes = [8, 8], strides = [1, 1]} : vector<8x32xf32> to vector<8x8xf32>
    %cst_160 = arith.constant dense<0.000000e+00> : vector<8x8xf32>
    %417 = tpu.matmul %415, %416, %cst_160 {dimension_numbers = #tpu.dot_dimension_numbers<[1], [0], [0], [1], [0, 0, 1, 1], [], []>} : vector<8x8xf32>, vector<8x8xf32>, vector<8x8xf32> -> vector<8x8xf32>
    %418 = vector.extract_strided_slice %367 {offsets = [0, 24], sizes = [8, 8], strides = [1, 1]} : vector<8x32xf32> to vector<8x8xf32>
    %419 = vector.extract_strided_slice %368 {offsets = [0, 24], sizes = [8, 8], strides = [1, 1]} : vector<8x32xf32> to vector<8x8xf32>
    %cst_161 = arith.constant dense<0.000000e+00> : vector<8x8xf32>
    %420 = tpu.matmul %418, %419, %cst_161 {dimension_numbers = #tpu.dot_dimension_numbers<[1], [1], [0], [0], [0, 0, 1, 0], [], []>} : vector<8x8xf32>, vector<8x8xf32>, vector<8x8xf32> -> vector<8x8xf32>
    %cst_162 = arith.constant -1.000000e+04 : f32
    %421 = vector.broadcast %cst_162 : f32 to vector<8x8xf32>
    %422 = arith.select %17, %420, %421 : vector<8x8xi1>, vector<8x8xf32>
    %cst_163 = arith.constant dense<0xFF800000> : vector<8xf32>
    %423 = vector.multi_reduction <maximumf>, %422, %cst_163 [1] : vector<8x8xf32> to vector<8xf32>
    %424 = vector.shape_cast %423 : vector<8xf32> to vector<8x1xf32>
    %425 = vector.broadcast %424 : vector<8x1xf32> to vector<8x8xf32>
    %426 = arith.subf %422, %425 : vector<8x8xf32>
    %427 = math.exp %426 : vector<8x8xf32>
    %cst_164 = arith.constant dense<0.000000e+00> : vector<8xf32>
    %428 = vector.multi_reduction <add>, %427, %cst_164 [1] : vector<8x8xf32> to vector<8xf32>
    %429 = vector.shape_cast %428 : vector<8xf32> to vector<8x1xf32>
    %430 = vector.broadcast %429 : vector<8x1xf32> to vector<8x8xf32>
    %431 = arith.divf %427, %430 : vector<8x8xf32>
    %432 = vector.extract_strided_slice %369 {offsets = [0, 24], sizes = [8, 8], strides = [1, 1]} : vector<8x32xf32> to vector<8x8xf32>
    %cst_165 = arith.constant dense<0.000000e+00> : vector<8x8xf32>
    %433 = tpu.matmul %431, %432, %cst_165 {dimension_numbers = #tpu.dot_dimension_numbers<[1], [0], [0], [1], [0, 0, 1, 1], [], []>} : vector<8x8xf32>, vector<8x8xf32>, vector<8x8xf32> -> vector<8x8xf32>
    %434 = tpu.concatenate %385, %401, %417, %433 in 1 : vector<8x8xf32>, vector<8x8xf32>, vector<8x8xf32>, vector<8x8xf32> -> vector<8x32xf32>
    %c1_166 = arith.constant 1 : index
    %c0_167 = arith.constant 0 : index
    %c0_168 = arith.constant 0 : index
    %435 = vector.load %arg8[%c1_166, %c0_167, %c0_168] : memref<2x3x32xf32, #tpu.memory_space<vmem>>, vector<1x3x32xf32>
    %436 = vector.shape_cast %435 : vector<1x3x32xf32> to vector<3x32xf32>
    %c1_169 = arith.constant 1 : index
    %c0_170 = arith.constant 0 : index
    %c0_171 = arith.constant 0 : index
    %437 = vector.load %arg7[%c1_169, %c0_170, %c0_171] : memref<2x32x32xf32, #tpu.memory_space<vmem>>, vector<1x32x32xf32>
    %438 = vector.shape_cast %437 : vector<1x32x32xf32> to vector<32x32xf32>
    %cst_172 = arith.constant dense<0.000000e+00> : vector<8x32xf32>
    %439 = tpu.matmul %434, %438, %cst_172 {dimension_numbers = #tpu.dot_dimension_numbers<[1], [0], [0], [1], [0, 0, 1, 1], [], []>} : vector<8x32xf32>, vector<32x32xf32>, vector<8x32xf32> -> vector<8x32xf32>
    %440 = vector.extract_strided_slice %436 {offsets = [0, 0], sizes = [1, 32], strides = [1, 1]} : vector<3x32xf32> to vector<1x32xf32>
    %441 = vector.broadcast %440 : vector<1x32xf32> to vector<8x32xf32>
    %442 = arith.addf %439, %441 : vector<8x32xf32>
    %443 = arith.addf %359, %442 : vector<8x32xf32>
    %444 = vector.extract_strided_slice %436 {offsets = [1, 0], sizes = [1, 32], strides = [1, 1]} : vector<3x32xf32> to vector<1x32xf32>
    %445 = vector.extract_strided_slice %436 {offsets = [2, 0], sizes = [1, 32], strides = [1, 1]} : vector<3x32xf32> to vector<1x32xf32>
    %cst_173 = arith.constant dense<0.000000e+00> : vector<8xf32>
    %446 = vector.multi_reduction <add>, %443, %cst_173 [1] : vector<8x32xf32> to vector<8xf32>
    %447 = vector.shape_cast %446 : vector<8xf32> to vector<8x1xf32>
    %cst_174 = arith.constant 3.200000e+01 : f32
    %448 = vector.broadcast %cst_174 : f32 to vector<8x1xf32>
    %449 = arith.divf %447, %448 : vector<8x1xf32>
    %450 = vector.broadcast %449 : vector<8x1xf32> to vector<8x32xf32>
    %451 = arith.subf %443, %450 : vector<8x32xf32>
    %452 = arith.mulf %451, %451 : vector<8x32xf32>
    %cst_175 = arith.constant dense<0.000000e+00> : vector<8xf32>
    %453 = vector.multi_reduction <add>, %452, %cst_175 [1] : vector<8x32xf32> to vector<8xf32>
    %454 = vector.shape_cast %453 : vector<8xf32> to vector<8x1xf32>
    %cst_176 = arith.constant 3.200000e+01 : f32
    %455 = vector.broadcast %cst_176 : f32 to vector<8x1xf32>
    %456 = arith.divf %454, %455 : vector<8x1xf32>
    %457 = vector.broadcast %449 : vector<8x1xf32> to vector<8x32xf32>
    %458 = arith.subf %443, %457 : vector<8x32xf32>
    %cst_177 = arith.constant 9.99999974E-6 : f32
    %459 = vector.broadcast %cst_177 : f32 to vector<8x1xf32>
    %460 = arith.addf %456, %459 : vector<8x1xf32>
    %461 = math.rsqrt %460 : vector<8x1xf32>
    %462 = vector.broadcast %461 : vector<8x1xf32> to vector<8x32xf32>
    %463 = arith.mulf %458, %462 : vector<8x32xf32>
    %464 = vector.broadcast %444 : vector<1x32xf32> to vector<8x32xf32>
    %465 = arith.mulf %463, %464 : vector<8x32xf32>
    %466 = vector.broadcast %445 : vector<1x32xf32> to vector<8x32xf32>
    %467 = arith.addf %465, %466 : vector<8x32xf32>
    %c1_178 = arith.constant 1 : index
    %c0_179 = arith.constant 0 : index
    %c0_180 = arith.constant 0 : index
    %468 = vector.load %arg9[%c1_178, %c0_179, %c0_180] : memref<2x32x32xf32, #tpu.memory_space<vmem>>, vector<1x32x32xf32>
    %469 = vector.shape_cast %468 : vector<1x32x32xf32> to vector<32x32xf32>
    %cst_181 = arith.constant dense<0.000000e+00> : vector<8x32xf32>
    %470 = tpu.matmul %467, %469, %cst_181 {dimension_numbers = #tpu.dot_dimension_numbers<[1], [0], [0], [1], [0, 0, 1, 1], [], []>} : vector<8x32xf32>, vector<32x32xf32>, vector<8x32xf32> -> vector<8x32xf32>
    %c1_182 = arith.constant 1 : index
    %c0_183 = arith.constant 0 : index
    %c0_184 = arith.constant 0 : index
    %471 = vector.load %arg10[%c1_182, %c0_183, %c0_184] : memref<2x1x32xf32, #tpu.memory_space<vmem>>, vector<1x1x32xf32>
    %472 = vector.shape_cast %471 : vector<1x1x32xf32> to vector<1x32xf32>
    %473 = vector.broadcast %472 : vector<1x32xf32> to vector<8x32xf32>
    %474 = arith.addf %470, %473 : vector<8x32xf32>
    %c1_185 = arith.constant 1 : index
    %c0_186 = arith.constant 0 : index
    %c0_187 = arith.constant 0 : index
    %475 = vector.load %arg11[%c1_185, %c0_186, %c0_187] : memref<2x32x64xf32, #tpu.memory_space<vmem>>, vector<1x32x64xf32>
    %476 = vector.shape_cast %475 : vector<1x32x64xf32> to vector<32x64xf32>
    %cst_188 = arith.constant dense<0.000000e+00> : vector<8x64xf32>
    %477 = tpu.matmul %28, %476, %cst_188 {dimension_numbers = #tpu.dot_dimension_numbers<[0], [0], [1], [1], [0, 1, 1, 1], [], []>} : vector<32x8xf32>, vector<32x64xf32>, vector<8x64xf32> -> vector<8x64xf32>
    %c1_189 = arith.constant 1 : index
    %c0_190 = arith.constant 0 : index
    %c0_191 = arith.constant 0 : index
    %478 = vector.load %arg12[%c1_189, %c0_190, %c0_191] : memref<2x1x64xf32, #tpu.memory_space<vmem>>, vector<1x1x64xf32>
    %479 = vector.shape_cast %478 : vector<1x1x64xf32> to vector<1x64xf32>
    %480 = vector.broadcast %479 : vector<1x64xf32> to vector<8x64xf32>
    %481 = arith.addf %477, %480 : vector<8x64xf32>
    %482 = vector.extract_strided_slice %481 {offsets = [0, 0], sizes = [8, 32], strides = [1, 1]} : vector<8x64xf32> to vector<8x32xf32>
    %483 = vector.extract_strided_slice %481 {offsets = [0, 32], sizes = [8, 32], strides = [1, 1]} : vector<8x64xf32> to vector<8x32xf32>
    %484 = vector.extract_strided_slice %474 {offsets = [0, 0], sizes = [8, 8], strides = [1, 1]} : vector<8x32xf32> to vector<8x8xf32>
    %485 = vector.extract_strided_slice %482 {offsets = [0, 0], sizes = [8, 8], strides = [1, 1]} : vector<8x32xf32> to vector<8x8xf32>
    %cst_192 = arith.constant dense<0.000000e+00> : vector<8x8xf32>
    %486 = tpu.matmul %484, %485, %cst_192 {dimension_numbers = #tpu.dot_dimension_numbers<[1], [1], [0], [0], [0, 0, 1, 0], [], []>} : vector<8x8xf32>, vector<8x8xf32>, vector<8x8xf32> -> vector<8x8xf32>
    %cst_193 = arith.constant -1.000000e+04 : f32
    %487 = vector.broadcast %cst_193 : f32 to vector<8x8xf32>
    %488 = arith.select %35, %486, %487 : vector<8x8xi1>, vector<8x8xf32>
    %cst_194 = arith.constant dense<0xFF800000> : vector<8xf32>
    %489 = vector.multi_reduction <maximumf>, %488, %cst_194 [1] : vector<8x8xf32> to vector<8xf32>
    %490 = vector.shape_cast %489 : vector<8xf32> to vector<8x1xf32>
    %491 = vector.broadcast %490 : vector<8x1xf32> to vector<8x8xf32>
    %492 = arith.subf %488, %491 : vector<8x8xf32>
    %493 = math.exp %492 : vector<8x8xf32>
    %cst_195 = arith.constant dense<0.000000e+00> : vector<8xf32>
    %494 = vector.multi_reduction <add>, %493, %cst_195 [1] : vector<8x8xf32> to vector<8xf32>
    %495 = vector.shape_cast %494 : vector<8xf32> to vector<8x1xf32>
    %496 = vector.broadcast %495 : vector<8x1xf32> to vector<8x8xf32>
    %497 = arith.divf %493, %496 : vector<8x8xf32>
    %498 = vector.extract_strided_slice %483 {offsets = [0, 0], sizes = [8, 8], strides = [1, 1]} : vector<8x32xf32> to vector<8x8xf32>
    %cst_196 = arith.constant dense<0.000000e+00> : vector<8x8xf32>
    %499 = tpu.matmul %497, %498, %cst_196 {dimension_numbers = #tpu.dot_dimension_numbers<[1], [0], [0], [1], [0, 0, 1, 1], [], []>} : vector<8x8xf32>, vector<8x8xf32>, vector<8x8xf32> -> vector<8x8xf32>
    %500 = vector.extract_strided_slice %474 {offsets = [0, 8], sizes = [8, 8], strides = [1, 1]} : vector<8x32xf32> to vector<8x8xf32>
    %501 = vector.extract_strided_slice %482 {offsets = [0, 8], sizes = [8, 8], strides = [1, 1]} : vector<8x32xf32> to vector<8x8xf32>
    %cst_197 = arith.constant dense<0.000000e+00> : vector<8x8xf32>
    %502 = tpu.matmul %500, %501, %cst_197 {dimension_numbers = #tpu.dot_dimension_numbers<[1], [1], [0], [0], [0, 0, 1, 0], [], []>} : vector<8x8xf32>, vector<8x8xf32>, vector<8x8xf32> -> vector<8x8xf32>
    %cst_198 = arith.constant -1.000000e+04 : f32
    %503 = vector.broadcast %cst_198 : f32 to vector<8x8xf32>
    %504 = arith.select %35, %502, %503 : vector<8x8xi1>, vector<8x8xf32>
    %cst_199 = arith.constant dense<0xFF800000> : vector<8xf32>
    %505 = vector.multi_reduction <maximumf>, %504, %cst_199 [1] : vector<8x8xf32> to vector<8xf32>
    %506 = vector.shape_cast %505 : vector<8xf32> to vector<8x1xf32>
    %507 = vector.broadcast %506 : vector<8x1xf32> to vector<8x8xf32>
    %508 = arith.subf %504, %507 : vector<8x8xf32>
    %509 = math.exp %508 : vector<8x8xf32>
    %cst_200 = arith.constant dense<0.000000e+00> : vector<8xf32>
    %510 = vector.multi_reduction <add>, %509, %cst_200 [1] : vector<8x8xf32> to vector<8xf32>
    %511 = vector.shape_cast %510 : vector<8xf32> to vector<8x1xf32>
    %512 = vector.broadcast %511 : vector<8x1xf32> to vector<8x8xf32>
    %513 = arith.divf %509, %512 : vector<8x8xf32>
    %514 = vector.extract_strided_slice %483 {offsets = [0, 8], sizes = [8, 8], strides = [1, 1]} : vector<8x32xf32> to vector<8x8xf32>
    %cst_201 = arith.constant dense<0.000000e+00> : vector<8x8xf32>
    %515 = tpu.matmul %513, %514, %cst_201 {dimension_numbers = #tpu.dot_dimension_numbers<[1], [0], [0], [1], [0, 0, 1, 1], [], []>} : vector<8x8xf32>, vector<8x8xf32>, vector<8x8xf32> -> vector<8x8xf32>
    %516 = vector.extract_strided_slice %474 {offsets = [0, 16], sizes = [8, 8], strides = [1, 1]} : vector<8x32xf32> to vector<8x8xf32>
    %517 = vector.extract_strided_slice %482 {offsets = [0, 16], sizes = [8, 8], strides = [1, 1]} : vector<8x32xf32> to vector<8x8xf32>
    %cst_202 = arith.constant dense<0.000000e+00> : vector<8x8xf32>
    %518 = tpu.matmul %516, %517, %cst_202 {dimension_numbers = #tpu.dot_dimension_numbers<[1], [1], [0], [0], [0, 0, 1, 0], [], []>} : vector<8x8xf32>, vector<8x8xf32>, vector<8x8xf32> -> vector<8x8xf32>
    %cst_203 = arith.constant -1.000000e+04 : f32
    %519 = vector.broadcast %cst_203 : f32 to vector<8x8xf32>
    %520 = arith.select %35, %518, %519 : vector<8x8xi1>, vector<8x8xf32>
    %cst_204 = arith.constant dense<0xFF800000> : vector<8xf32>
    %521 = vector.multi_reduction <maximumf>, %520, %cst_204 [1] : vector<8x8xf32> to vector<8xf32>
    %522 = vector.shape_cast %521 : vector<8xf32> to vector<8x1xf32>
    %523 = vector.broadcast %522 : vector<8x1xf32> to vector<8x8xf32>
    %524 = arith.subf %520, %523 : vector<8x8xf32>
    %525 = math.exp %524 : vector<8x8xf32>
    %cst_205 = arith.constant dense<0.000000e+00> : vector<8xf32>
    %526 = vector.multi_reduction <add>, %525, %cst_205 [1] : vector<8x8xf32> to vector<8xf32>
    %527 = vector.shape_cast %526 : vector<8xf32> to vector<8x1xf32>
    %528 = vector.broadcast %527 : vector<8x1xf32> to vector<8x8xf32>
    %529 = arith.divf %525, %528 : vector<8x8xf32>
    %530 = vector.extract_strided_slice %483 {offsets = [0, 16], sizes = [8, 8], strides = [1, 1]} : vector<8x32xf32> to vector<8x8xf32>
    %cst_206 = arith.constant dense<0.000000e+00> : vector<8x8xf32>
    %531 = tpu.matmul %529, %530, %cst_206 {dimension_numbers = #tpu.dot_dimension_numbers<[1], [0], [0], [1], [0, 0, 1, 1], [], []>} : vector<8x8xf32>, vector<8x8xf32>, vector<8x8xf32> -> vector<8x8xf32>
    %532 = vector.extract_strided_slice %474 {offsets = [0, 24], sizes = [8, 8], strides = [1, 1]} : vector<8x32xf32> to vector<8x8xf32>
    %533 = vector.extract_strided_slice %482 {offsets = [0, 24], sizes = [8, 8], strides = [1, 1]} : vector<8x32xf32> to vector<8x8xf32>
    %cst_207 = arith.constant dense<0.000000e+00> : vector<8x8xf32>
    %534 = tpu.matmul %532, %533, %cst_207 {dimension_numbers = #tpu.dot_dimension_numbers<[1], [1], [0], [0], [0, 0, 1, 0], [], []>} : vector<8x8xf32>, vector<8x8xf32>, vector<8x8xf32> -> vector<8x8xf32>
    %cst_208 = arith.constant -1.000000e+04 : f32
    %535 = vector.broadcast %cst_208 : f32 to vector<8x8xf32>
    %536 = arith.select %35, %534, %535 : vector<8x8xi1>, vector<8x8xf32>
    %cst_209 = arith.constant dense<0xFF800000> : vector<8xf32>
    %537 = vector.multi_reduction <maximumf>, %536, %cst_209 [1] : vector<8x8xf32> to vector<8xf32>
    %538 = vector.shape_cast %537 : vector<8xf32> to vector<8x1xf32>
    %539 = vector.broadcast %538 : vector<8x1xf32> to vector<8x8xf32>
    %540 = arith.subf %536, %539 : vector<8x8xf32>
    %541 = math.exp %540 : vector<8x8xf32>
    %cst_210 = arith.constant dense<0.000000e+00> : vector<8xf32>
    %542 = vector.multi_reduction <add>, %541, %cst_210 [1] : vector<8x8xf32> to vector<8xf32>
    %543 = vector.shape_cast %542 : vector<8xf32> to vector<8x1xf32>
    %544 = vector.broadcast %543 : vector<8x1xf32> to vector<8x8xf32>
    %545 = arith.divf %541, %544 : vector<8x8xf32>
    %546 = vector.extract_strided_slice %483 {offsets = [0, 24], sizes = [8, 8], strides = [1, 1]} : vector<8x32xf32> to vector<8x8xf32>
    %cst_211 = arith.constant dense<0.000000e+00> : vector<8x8xf32>
    %547 = tpu.matmul %545, %546, %cst_211 {dimension_numbers = #tpu.dot_dimension_numbers<[1], [0], [0], [1], [0, 0, 1, 1], [], []>} : vector<8x8xf32>, vector<8x8xf32>, vector<8x8xf32> -> vector<8x8xf32>
    %548 = tpu.concatenate %499, %515, %531, %547 in 1 : vector<8x8xf32>, vector<8x8xf32>, vector<8x8xf32>, vector<8x8xf32> -> vector<8x32xf32>
    %c1_212 = arith.constant 1 : index
    %c0_213 = arith.constant 0 : index
    %c0_214 = arith.constant 0 : index
    %549 = vector.load %arg14[%c1_212, %c0_213, %c0_214] : memref<2x3x32xf32, #tpu.memory_space<vmem>>, vector<1x3x32xf32>
    %550 = vector.shape_cast %549 : vector<1x3x32xf32> to vector<3x32xf32>
    %c1_215 = arith.constant 1 : index
    %c0_216 = arith.constant 0 : index
    %c0_217 = arith.constant 0 : index
    %551 = vector.load %arg13[%c1_215, %c0_216, %c0_217] : memref<2x32x32xf32, #tpu.memory_space<vmem>>, vector<1x32x32xf32>
    %552 = vector.shape_cast %551 : vector<1x32x32xf32> to vector<32x32xf32>
    %cst_218 = arith.constant dense<0.000000e+00> : vector<8x32xf32>
    %553 = tpu.matmul %548, %552, %cst_218 {dimension_numbers = #tpu.dot_dimension_numbers<[1], [0], [0], [1], [0, 0, 1, 1], [], []>} : vector<8x32xf32>, vector<32x32xf32>, vector<8x32xf32> -> vector<8x32xf32>
    %554 = vector.extract_strided_slice %550 {offsets = [0, 0], sizes = [1, 32], strides = [1, 1]} : vector<3x32xf32> to vector<1x32xf32>
    %555 = vector.broadcast %554 : vector<1x32xf32> to vector<8x32xf32>
    %556 = arith.addf %553, %555 : vector<8x32xf32>
    %557 = arith.addf %467, %556 : vector<8x32xf32>
    %558 = vector.extract_strided_slice %550 {offsets = [1, 0], sizes = [1, 32], strides = [1, 1]} : vector<3x32xf32> to vector<1x32xf32>
    %559 = vector.extract_strided_slice %550 {offsets = [2, 0], sizes = [1, 32], strides = [1, 1]} : vector<3x32xf32> to vector<1x32xf32>
    %cst_219 = arith.constant dense<0.000000e+00> : vector<8xf32>
    %560 = vector.multi_reduction <add>, %557, %cst_219 [1] : vector<8x32xf32> to vector<8xf32>
    %561 = vector.shape_cast %560 : vector<8xf32> to vector<8x1xf32>
    %cst_220 = arith.constant 3.200000e+01 : f32
    %562 = vector.broadcast %cst_220 : f32 to vector<8x1xf32>
    %563 = arith.divf %561, %562 : vector<8x1xf32>
    %564 = vector.broadcast %563 : vector<8x1xf32> to vector<8x32xf32>
    %565 = arith.subf %557, %564 : vector<8x32xf32>
    %566 = arith.mulf %565, %565 : vector<8x32xf32>
    %cst_221 = arith.constant dense<0.000000e+00> : vector<8xf32>
    %567 = vector.multi_reduction <add>, %566, %cst_221 [1] : vector<8x32xf32> to vector<8xf32>
    %568 = vector.shape_cast %567 : vector<8xf32> to vector<8x1xf32>
    %cst_222 = arith.constant 3.200000e+01 : f32
    %569 = vector.broadcast %cst_222 : f32 to vector<8x1xf32>
    %570 = arith.divf %568, %569 : vector<8x1xf32>
    %571 = vector.broadcast %563 : vector<8x1xf32> to vector<8x32xf32>
    %572 = arith.subf %557, %571 : vector<8x32xf32>
    %cst_223 = arith.constant 9.99999974E-6 : f32
    %573 = vector.broadcast %cst_223 : f32 to vector<8x1xf32>
    %574 = arith.addf %570, %573 : vector<8x1xf32>
    %575 = math.rsqrt %574 : vector<8x1xf32>
    %576 = vector.broadcast %575 : vector<8x1xf32> to vector<8x32xf32>
    %577 = arith.mulf %572, %576 : vector<8x32xf32>
    %578 = vector.broadcast %558 : vector<1x32xf32> to vector<8x32xf32>
    %579 = arith.mulf %577, %578 : vector<8x32xf32>
    %580 = vector.broadcast %559 : vector<1x32xf32> to vector<8x32xf32>
    %581 = arith.addf %579, %580 : vector<8x32xf32>
    %582 = vector.broadcast %12 : vector<8x1xf32> to vector<8x32xf32>
    %583 = arith.mulf %581, %582 : vector<8x32xf32>
    %c1_224 = arith.constant 1 : index
    %c0_225 = arith.constant 0 : index
    %c0_226 = arith.constant 0 : index
    %584 = vector.load %arg15[%c1_224, %c0_225, %c0_226] : memref<2x32x128xf32, #tpu.memory_space<vmem>>, vector<1x32x128xf32>
    %585 = vector.shape_cast %584 : vector<1x32x128xf32> to vector<32x128xf32>
    %cst_227 = arith.constant dense<0.000000e+00> : vector<8x128xf32>
    %586 = tpu.matmul %583, %585, %cst_227 {dimension_numbers = #tpu.dot_dimension_numbers<[1], [0], [0], [1], [0, 0, 1, 1], [], []>} : vector<8x32xf32>, vector<32x128xf32>, vector<8x128xf32> -> vector<8x128xf32>
    %c1_228 = arith.constant 1 : index
    %c0_229 = arith.constant 0 : index
    %c0_230 = arith.constant 0 : index
    %587 = vector.load %arg16[%c1_228, %c0_229, %c0_230] : memref<2x1x128xf32, #tpu.memory_space<vmem>>, vector<1x1x128xf32>
    %588 = vector.shape_cast %587 : vector<1x1x128xf32> to vector<1x128xf32>
    %589 = vector.broadcast %588 : vector<1x128xf32> to vector<8x128xf32>
    %590 = arith.addf %586, %589 : vector<8x128xf32>
    %cst_231 = arith.constant 5.000000e-01 : f32
    %591 = vector.broadcast %cst_231 : f32 to vector<8x128xf32>
    %592 = arith.mulf %591, %590 : vector<8x128xf32>
    %cst_232 = arith.constant 0.707106769 : f32
    %593 = vector.broadcast %cst_232 : f32 to vector<8x128xf32>
    %594 = arith.mulf %590, %593 : vector<8x128xf32>
    %595 = math.absf %594 : vector<8x128xf32>
    %cst_233 = arith.constant 5.000000e-01 : f32
    %596 = vector.broadcast %cst_233 : f32 to vector<8x128xf32>
    %597 = arith.mulf %596, %595 : vector<8x128xf32>
    %cst_234 = arith.constant 1.000000e+00 : f32
    %598 = vector.broadcast %cst_234 : f32 to vector<8x128xf32>
    %599 = arith.addf %598, %597 : vector<8x128xf32>
    %cst_235 = arith.constant 1.000000e+00 : f32
    %600 = vector.broadcast %cst_235 : f32 to vector<8x128xf32>
    %601 = arith.divf %600, %599 : vector<8x128xf32>
    %cst_236 = arith.constant 0.170872763 : f32
    %602 = vector.broadcast %cst_236 : f32 to vector<8x128xf32>
    %603 = arith.mulf %601, %602 : vector<8x128xf32>
    %cst_237 = arith.constant -0.822152256 : f32
    %604 = vector.broadcast %cst_237 : f32 to vector<8x128xf32>
    %605 = arith.addf %604, %603 : vector<8x128xf32>
    %606 = arith.mulf %601, %605 : vector<8x128xf32>
    %cst_238 = arith.constant 1.48851585 : f32
    %607 = vector.broadcast %cst_238 : f32 to vector<8x128xf32>
    %608 = arith.addf %607, %606 : vector<8x128xf32>
    %609 = arith.mulf %601, %608 : vector<8x128xf32>
    %cst_239 = arith.constant -1.13520396 : f32
    %610 = vector.broadcast %cst_239 : f32 to vector<8x128xf32>
    %611 = arith.addf %610, %609 : vector<8x128xf32>
    %612 = arith.mulf %601, %611 : vector<8x128xf32>
    %cst_240 = arith.constant 0.278868079 : f32
    %613 = vector.broadcast %cst_240 : f32 to vector<8x128xf32>
    %614 = arith.addf %613, %612 : vector<8x128xf32>
    %615 = arith.mulf %601, %614 : vector<8x128xf32>
    %cst_241 = arith.constant -0.186288059 : f32
    %616 = vector.broadcast %cst_241 : f32 to vector<8x128xf32>
    %617 = arith.addf %616, %615 : vector<8x128xf32>
    %618 = arith.mulf %601, %617 : vector<8x128xf32>
    %cst_242 = arith.constant 0.0967841818 : f32
    %619 = vector.broadcast %cst_242 : f32 to vector<8x128xf32>
    %620 = arith.addf %619, %618 : vector<8x128xf32>
    %621 = arith.mulf %601, %620 : vector<8x128xf32>
    %cst_243 = arith.constant 0.374091953 : f32
    %622 = vector.broadcast %cst_243 : f32 to vector<8x128xf32>
    %623 = arith.addf %622, %621 : vector<8x128xf32>
    %624 = arith.mulf %601, %623 : vector<8x128xf32>
    %cst_244 = arith.constant 1.00002372 : f32
    %625 = vector.broadcast %cst_244 : f32 to vector<8x128xf32>
    %626 = arith.addf %625, %624 : vector<8x128xf32>
    %627 = arith.mulf %601, %626 : vector<8x128xf32>
    %cst_245 = arith.constant -1.26551223 : f32
    %628 = vector.broadcast %cst_245 : f32 to vector<8x128xf32>
    %629 = arith.addf %628, %627 : vector<8x128xf32>
    %cst_246 = arith.constant 0.000000e+00 : f32
    %630 = vector.broadcast %cst_246 : f32 to vector<8x128xf32>
    %631 = arith.subf %630, %595 : vector<8x128xf32>
    %632 = arith.mulf %631, %595 : vector<8x128xf32>
    %633 = arith.addf %632, %629 : vector<8x128xf32>
    %634 = math.exp %633 : vector<8x128xf32>
    %635 = arith.mulf %601, %634 : vector<8x128xf32>
    %cst_247 = arith.constant 0.000000e+00 : f32
    %636 = vector.broadcast %cst_247 : f32 to vector<8x128xf32>
    %637 = arith.cmpf oge, %594, %636 : vector<8x128xf32>
    %cst_248 = arith.constant 1.000000e+00 : f32
    %cst_249 = arith.constant -1.000000e+00 : f32
    %638 = vector.broadcast %cst_248 : f32 to vector<8x128xf32>
    %639 = vector.broadcast %cst_249 : f32 to vector<8x128xf32>
    %640 = arith.select %637, %638, %639 : vector<8x128xi1>, vector<8x128xf32>
    %cst_250 = arith.constant 1.000000e+00 : f32
    %641 = vector.broadcast %cst_250 : f32 to vector<8x128xf32>
    %642 = arith.subf %641, %635 : vector<8x128xf32>
    %643 = arith.mulf %640, %642 : vector<8x128xf32>
    %cst_251 = arith.constant 1.000000e+00 : f32
    %644 = vector.broadcast %cst_251 : f32 to vector<8x128xf32>
    %645 = arith.addf %644, %643 : vector<8x128xf32>
    %646 = arith.mulf %592, %645 : vector<8x128xf32>
    %c1_252 = arith.constant 1 : index
    %c0_253 = arith.constant 0 : index
    %c0_254 = arith.constant 0 : index
    %647 = vector.load %arg18[%c1_252, %c0_253, %c0_254] : memref<2x3x32xf32, #tpu.memory_space<vmem>>, vector<1x3x32xf32>
    %648 = vector.shape_cast %647 : vector<1x3x32xf32> to vector<3x32xf32>
    %649 = vector.broadcast %12 : vector<8x1xf32> to vector<8x128xf32>
    %650 = arith.mulf %646, %649 : vector<8x128xf32>
    %c1_255 = arith.constant 1 : index
    %c0_256 = arith.constant 0 : index
    %c0_257 = arith.constant 0 : index
    %651 = vector.load %arg17[%c1_255, %c0_256, %c0_257] : memref<2x128x32xf32, #tpu.memory_space<vmem>>, vector<1x128x32xf32>
    %652 = vector.shape_cast %651 : vector<1x128x32xf32> to vector<128x32xf32>
    %cst_258 = arith.constant dense<0.000000e+00> : vector<8x32xf32>
    %653 = tpu.matmul %650, %652, %cst_258 {dimension_numbers = #tpu.dot_dimension_numbers<[1], [0], [0], [1], [0, 0, 1, 1], [], []>} : vector<8x128xf32>, vector<128x32xf32>, vector<8x32xf32> -> vector<8x32xf32>
    %654 = vector.extract_strided_slice %648 {offsets = [0, 0], sizes = [1, 32], strides = [1, 1]} : vector<3x32xf32> to vector<1x32xf32>
    %655 = vector.broadcast %654 : vector<1x32xf32> to vector<8x32xf32>
    %656 = arith.addf %653, %655 : vector<8x32xf32>
    %657 = vector.broadcast %12 : vector<8x1xf32> to vector<8x32xf32>
    %658 = arith.mulf %656, %657 : vector<8x32xf32>
    %659 = arith.addf %581, %658 : vector<8x32xf32>
    %660 = vector.extract_strided_slice %648 {offsets = [1, 0], sizes = [1, 32], strides = [1, 1]} : vector<3x32xf32> to vector<1x32xf32>
    %661 = vector.extract_strided_slice %648 {offsets = [2, 0], sizes = [1, 32], strides = [1, 1]} : vector<3x32xf32> to vector<1x32xf32>
    %cst_259 = arith.constant dense<0.000000e+00> : vector<8xf32>
    %662 = vector.multi_reduction <add>, %659, %cst_259 [1] : vector<8x32xf32> to vector<8xf32>
    %663 = vector.shape_cast %662 : vector<8xf32> to vector<8x1xf32>
    %cst_260 = arith.constant 3.200000e+01 : f32
    %664 = vector.broadcast %cst_260 : f32 to vector<8x1xf32>
    %665 = arith.divf %663, %664 : vector<8x1xf32>
    %666 = vector.broadcast %665 : vector<8x1xf32> to vector<8x32xf32>
    %667 = arith.subf %659, %666 : vector<8x32xf32>
    %668 = arith.mulf %667, %667 : vector<8x32xf32>
    %cst_261 = arith.constant dense<0.000000e+00> : vector<8xf32>
    %669 = vector.multi_reduction <add>, %668, %cst_261 [1] : vector<8x32xf32> to vector<8xf32>
    %670 = vector.shape_cast %669 : vector<8xf32> to vector<8x1xf32>
    %cst_262 = arith.constant 3.200000e+01 : f32
    %671 = vector.broadcast %cst_262 : f32 to vector<8x1xf32>
    %672 = arith.divf %670, %671 : vector<8x1xf32>
    %673 = vector.broadcast %665 : vector<8x1xf32> to vector<8x32xf32>
    %674 = arith.subf %659, %673 : vector<8x32xf32>
    %cst_263 = arith.constant 9.99999974E-6 : f32
    %675 = vector.broadcast %cst_263 : f32 to vector<8x1xf32>
    %676 = arith.addf %672, %675 : vector<8x1xf32>
    %677 = math.rsqrt %676 : vector<8x1xf32>
    %678 = vector.broadcast %677 : vector<8x1xf32> to vector<8x32xf32>
    %679 = arith.mulf %674, %678 : vector<8x32xf32>
    %680 = vector.broadcast %660 : vector<1x32xf32> to vector<8x32xf32>
    %681 = arith.mulf %679, %680 : vector<8x32xf32>
    %682 = vector.broadcast %661 : vector<1x32xf32> to vector<8x32xf32>
    %683 = arith.addf %681, %682 : vector<8x32xf32>
    %684 = vector.broadcast %12 : vector<8x1xf32> to vector<8x32xf32>
    %685 = arith.mulf %683, %684 : vector<8x32xf32>
    %686 = tpu.transpose %685, [1, 0] : vector<8x32xf32> -> vector<32x8xf32>
    %c0_264 = arith.constant 0 : index
    %c0_265 = arith.constant 0 : index
    %c0_266 = arith.constant 0 : index
    %687 = vector.load %arg19[%c0_264, %c0_265, %c0_266] : memref<2x32x8xf32, #tpu.memory_space<vmem>>, vector<1x32x8xf32>
    %688 = vector.shape_cast %687 : vector<1x32x8xf32> to vector<32x8xf32>
    %689 = vector.shape_cast %686 : vector<32x8xf32> to vector<1x32x8xf32>
    tpu.vector_store %arg19[%c0_264, %c0_265, %c0_266], %689 {strides = array<i32>} : memref<2x32x8xf32, #tpu.memory_space<vmem>>, vector<1x32x8xf32>,
    %c1_267 = arith.constant 1 : index
    %c0_268 = arith.constant 0 : index
    %c0_269 = arith.constant 0 : index
    %690 = vector.load %arg3[%c1_267, %c0_268, %c0_269] : memref<2x1x8xf32, #tpu.memory_space<vmem>>, vector<1x1x8xf32>
    %691 = vector.shape_cast %690 : vector<1x1x8xf32> to vector<1x8xf32>
    %692 = tpu.iota {dimensions = array<i32: 0>} : vector<8x8xi32>
    %693 = tpu.iota {dimensions = array<i32: 1>} : vector<8x8xi32>
    %694 = arith.cmpi eq, %692, %693 : vector<8x8xi32>
    %cst_270 = arith.constant 0.000000e+00 : f32
    %695 = vector.shape_cast %691 : vector<1x8xf32> to vector<1x8xf32>
    %696 = vector.broadcast %695 : vector<1x8xf32> to vector<8x8xf32>
    %697 = vector.broadcast %cst_270 : f32 to vector<8x8xf32>
    %698 = arith.select %694, %696, %697 : vector<8x8xi1>, vector<8x8xf32>
    %cst_271 = arith.constant dense<0.000000e+00> : vector<8xf32>
    %699 = vector.multi_reduction <add>, %698, %cst_271 [1] : vector<8x8xf32> to vector<8xf32>
    %700 = vector.shape_cast %699 : vector<8xf32> to vector<8x1xf32>
    %701 = arith.cmpi sle, %1, %0 : vector<8x8xi32>
    %cst_272 = arith.constant 0.000000e+00 : f32
    %702 = vector.broadcast %cst_272 : f32 to vector<1x8xf32>
    %703 = arith.cmpf one, %691, %702 : vector<1x8xf32>
    %704 = vector.broadcast %703 : vector<1x8xi1> to vector<8x8xi1>
    %705 = arith.ori %701, %704 : vector<8x8xi1>
    %c1_273 = arith.constant 1 : index
    %c0_274 = arith.constant 0 : index
    %c0_275 = arith.constant 0 : index
    %706 = vector.load %arg1[%c1_273, %c0_274, %c0_275] : memref<2x32x8xf32, #tpu.memory_space<vmem>>, vector<1x32x8xf32>
    %707 = vector.shape_cast %706 : vector<1x32x8xf32> to vector<32x8xf32>
    %708 = vector.broadcast %691 : vector<1x8xf32> to vector<32x8xf32>
    %709 = arith.mulf %707, %708 : vector<32x8xf32>
    %710 = tpu.transpose %709, [1, 0] : vector<32x8xf32> -> vector<8x32xf32>
    %c1_276 = arith.constant 1 : index
    %c0_277 = arith.constant 0 : index
    %c0_278 = arith.constant 0 : index
    %711 = vector.load %arg4[%c1_276, %c0_277, %c0_278] : memref<2x1x8xf32, #tpu.memory_space<vmem>>, vector<1x1x8xf32>
    %712 = vector.shape_cast %711 : vector<1x1x8xf32> to vector<1x8xf32>
    %c1_279 = arith.constant 1 : index
    %c0_280 = arith.constant 0 : index
    %c0_281 = arith.constant 0 : index
    %713 = vector.load %arg2[%c1_279, %c0_280, %c0_281] : memref<2x32x8xf32, #tpu.memory_space<vmem>>, vector<1x32x8xf32>
    %714 = vector.shape_cast %713 : vector<1x32x8xf32> to vector<32x8xf32>
    %715 = vector.broadcast %712 : vector<1x8xf32> to vector<32x8xf32>
    %716 = arith.mulf %714, %715 : vector<32x8xf32>
    %cst_282 = arith.constant 0.000000e+00 : f32
    %717 = vector.broadcast %cst_282 : f32 to vector<1x8xf32>
    %718 = arith.cmpf one, %712, %717 : vector<1x8xf32>
    %cst_283 = arith.constant 0.000000e+00 : f32
    %719 = vector.broadcast %cst_283 : f32 to vector<8x1xf32>
    %720 = arith.cmpf one, %700, %719 : vector<8x1xf32>
    %721 = vector.broadcast %718 : vector<1x8xi1> to vector<8x8xi1>
    %722 = vector.broadcast %720 : vector<8x1xi1> to vector<8x8xi1>
    %723 = arith.andi %721, %722 : vector<8x8xi1>
    %c0_284 = arith.constant 0 : index
    %c0_285 = arith.constant 0 : index
    %c0_286 = arith.constant 0 : index
    %724 = vector.load %arg5[%c0_284, %c0_285, %c0_286] : memref<2x32x96xf32, #tpu.memory_space<vmem>>, vector<1x32x96xf32>
    %725 = vector.shape_cast %724 : vector<1x32x96xf32> to vector<32x96xf32>
    %cst_287 = arith.constant dense<0.000000e+00> : vector<8x96xf32>
    %726 = tpu.matmul %710, %725, %cst_287 {dimension_numbers = #tpu.dot_dimension_numbers<[1], [0], [0], [1], [0, 0, 1, 1], [], []>} : vector<8x32xf32>, vector<32x96xf32>, vector<8x96xf32> -> vector<8x96xf32>
    %c0_288 = arith.constant 0 : index
    %c0_289 = arith.constant 0 : index
    %c0_290 = arith.constant 0 : index
    %727 = vector.load %arg6[%c0_288, %c0_289, %c0_290] : memref<2x1x96xf32, #tpu.memory_space<vmem>>, vector<1x1x96xf32>
    %728 = vector.shape_cast %727 : vector<1x1x96xf32> to vector<1x96xf32>
    %729 = vector.broadcast %728 : vector<1x96xf32> to vector<8x96xf32>
    %730 = arith.addf %726, %729 : vector<8x96xf32>
    %731 = vector.extract_strided_slice %730 {offsets = [0, 0], sizes = [8, 32], strides = [1, 1]} : vector<8x96xf32> to vector<8x32xf32>
    %732 = vector.extract_strided_slice %730 {offsets = [0, 32], sizes = [8, 32], strides = [1, 1]} : vector<8x96xf32> to vector<8x32xf32>
    %733 = vector.extract_strided_slice %730 {offsets = [0, 64], sizes = [8, 32], strides = [1, 1]} : vector<8x96xf32> to vector<8x32xf32>
    %734 = vector.extract_strided_slice %731 {offsets = [0, 0], sizes = [8, 8], strides = [1, 1]} : vector<8x32xf32> to vector<8x8xf32>
    %735 = vector.extract_strided_slice %732 {offsets = [0, 0], sizes = [8, 8], strides = [1, 1]} : vector<8x32xf32> to vector<8x8xf32>
    %cst_291 = arith.constant dense<0.000000e+00> : vector<8x8xf32>
    %736 = tpu.matmul %734, %735, %cst_291 {dimension_numbers = #tpu.dot_dimension_numbers<[1], [1], [0], [0], [0, 0, 1, 0], [], []>} : vector<8x8xf32>, vector<8x8xf32>, vector<8x8xf32> -> vector<8x8xf32>
    %cst_292 = arith.constant -1.000000e+04 : f32
    %737 = vector.broadcast %cst_292 : f32 to vector<8x8xf32>
    %738 = arith.select %705, %736, %737 : vector<8x8xi1>, vector<8x8xf32>
    %cst_293 = arith.constant dense<0xFF800000> : vector<8xf32>
    %739 = vector.multi_reduction <maximumf>, %738, %cst_293 [1] : vector<8x8xf32> to vector<8xf32>
    %740 = vector.shape_cast %739 : vector<8xf32> to vector<8x1xf32>
    %741 = vector.broadcast %740 : vector<8x1xf32> to vector<8x8xf32>
    %742 = arith.subf %738, %741 : vector<8x8xf32>
    %743 = math.exp %742 : vector<8x8xf32>
    %cst_294 = arith.constant dense<0.000000e+00> : vector<8xf32>
    %744 = vector.multi_reduction <add>, %743, %cst_294 [1] : vector<8x8xf32> to vector<8xf32>
    %745 = vector.shape_cast %744 : vector<8xf32> to vector<8x1xf32>
    %746 = vector.broadcast %745 : vector<8x1xf32> to vector<8x8xf32>
    %747 = arith.divf %743, %746 : vector<8x8xf32>
    %748 = vector.extract_strided_slice %733 {offsets = [0, 0], sizes = [8, 8], strides = [1, 1]} : vector<8x32xf32> to vector<8x8xf32>
    %cst_295 = arith.constant dense<0.000000e+00> : vector<8x8xf32>
    %749 = tpu.matmul %747, %748, %cst_295 {dimension_numbers = #tpu.dot_dimension_numbers<[1], [0], [0], [1], [0, 0, 1, 1], [], []>} : vector<8x8xf32>, vector<8x8xf32>, vector<8x8xf32> -> vector<8x8xf32>
    %750 = vector.extract_strided_slice %731 {offsets = [0, 8], sizes = [8, 8], strides = [1, 1]} : vector<8x32xf32> to vector<8x8xf32>
    %751 = vector.extract_strided_slice %732 {offsets = [0, 8], sizes = [8, 8], strides = [1, 1]} : vector<8x32xf32> to vector<8x8xf32>
    %cst_296 = arith.constant dense<0.000000e+00> : vector<8x8xf32>
    %752 = tpu.matmul %750, %751, %cst_296 {dimension_numbers = #tpu.dot_dimension_numbers<[1], [1], [0], [0], [0, 0, 1, 0], [], []>} : vector<8x8xf32>, vector<8x8xf32>, vector<8x8xf32> -> vector<8x8xf32>
    %cst_297 = arith.constant -1.000000e+04 : f32
    %753 = vector.broadcast %cst_297 : f32 to vector<8x8xf32>
    %754 = arith.select %705, %752, %753 : vector<8x8xi1>, vector<8x8xf32>
    %cst_298 = arith.constant dense<0xFF800000> : vector<8xf32>
    %755 = vector.multi_reduction <maximumf>, %754, %cst_298 [1] : vector<8x8xf32> to vector<8xf32>
    %756 = vector.shape_cast %755 : vector<8xf32> to vector<8x1xf32>
    %757 = vector.broadcast %756 : vector<8x1xf32> to vector<8x8xf32>
    %758 = arith.subf %754, %757 : vector<8x8xf32>
    %759 = math.exp %758 : vector<8x8xf32>
    %cst_299 = arith.constant dense<0.000000e+00> : vector<8xf32>
    %760 = vector.multi_reduction <add>, %759, %cst_299 [1] : vector<8x8xf32> to vector<8xf32>
    %761 = vector.shape_cast %760 : vector<8xf32> to vector<8x1xf32>
    %762 = vector.broadcast %761 : vector<8x1xf32> to vector<8x8xf32>
    %763 = arith.divf %759, %762 : vector<8x8xf32>
    %764 = vector.extract_strided_slice %733 {offsets = [0, 8], sizes = [8, 8], strides = [1, 1]} : vector<8x32xf32> to vector<8x8xf32>
    %cst_300 = arith.constant dense<0.000000e+00> : vector<8x8xf32>
    %765 = tpu.matmul %763, %764, %cst_300 {dimension_numbers = #tpu.dot_dimension_numbers<[1], [0], [0], [1], [0, 0, 1, 1], [], []>} : vector<8x8xf32>, vector<8x8xf32>, vector<8x8xf32> -> vector<8x8xf32>
    %766 = vector.extract_strided_slice %731 {offsets = [0, 16], sizes = [8, 8], strides = [1, 1]} : vector<8x32xf32> to vector<8x8xf32>
    %767 = vector.extract_strided_slice %732 {offsets = [0, 16], sizes = [8, 8], strides = [1, 1]} : vector<8x32xf32> to vector<8x8xf32>
    %cst_301 = arith.constant dense<0.000000e+00> : vector<8x8xf32>
    %768 = tpu.matmul %766, %767, %cst_301 {dimension_numbers = #tpu.dot_dimension_numbers<[1], [1], [0], [0], [0, 0, 1, 0], [], []>} : vector<8x8xf32>, vector<8x8xf32>, vector<8x8xf32> -> vector<8x8xf32>
    %cst_302 = arith.constant -1.000000e+04 : f32
    %769 = vector.broadcast %cst_302 : f32 to vector<8x8xf32>
    %770 = arith.select %705, %768, %769 : vector<8x8xi1>, vector<8x8xf32>
    %cst_303 = arith.constant dense<0xFF800000> : vector<8xf32>
    %771 = vector.multi_reduction <maximumf>, %770, %cst_303 [1] : vector<8x8xf32> to vector<8xf32>
    %772 = vector.shape_cast %771 : vector<8xf32> to vector<8x1xf32>
    %773 = vector.broadcast %772 : vector<8x1xf32> to vector<8x8xf32>
    %774 = arith.subf %770, %773 : vector<8x8xf32>
    %775 = math.exp %774 : vector<8x8xf32>
    %cst_304 = arith.constant dense<0.000000e+00> : vector<8xf32>
    %776 = vector.multi_reduction <add>, %775, %cst_304 [1] : vector<8x8xf32> to vector<8xf32>
    %777 = vector.shape_cast %776 : vector<8xf32> to vector<8x1xf32>
    %778 = vector.broadcast %777 : vector<8x1xf32> to vector<8x8xf32>
    %779 = arith.divf %775, %778 : vector<8x8xf32>
    %780 = vector.extract_strided_slice %733 {offsets = [0, 16], sizes = [8, 8], strides = [1, 1]} : vector<8x32xf32> to vector<8x8xf32>
    %cst_305 = arith.constant dense<0.000000e+00> : vector<8x8xf32>
    %781 = tpu.matmul %779, %780, %cst_305 {dimension_numbers = #tpu.dot_dimension_numbers<[1], [0], [0], [1], [0, 0, 1, 1], [], []>} : vector<8x8xf32>, vector<8x8xf32>, vector<8x8xf32> -> vector<8x8xf32>
    %782 = vector.extract_strided_slice %731 {offsets = [0, 24], sizes = [8, 8], strides = [1, 1]} : vector<8x32xf32> to vector<8x8xf32>
    %783 = vector.extract_strided_slice %732 {offsets = [0, 24], sizes = [8, 8], strides = [1, 1]} : vector<8x32xf32> to vector<8x8xf32>
    %cst_306 = arith.constant dense<0.000000e+00> : vector<8x8xf32>
    %784 = tpu.matmul %782, %783, %cst_306 {dimension_numbers = #tpu.dot_dimension_numbers<[1], [1], [0], [0], [0, 0, 1, 0], [], []>} : vector<8x8xf32>, vector<8x8xf32>, vector<8x8xf32> -> vector<8x8xf32>
    %cst_307 = arith.constant -1.000000e+04 : f32
    %785 = vector.broadcast %cst_307 : f32 to vector<8x8xf32>
    %786 = arith.select %705, %784, %785 : vector<8x8xi1>, vector<8x8xf32>
    %cst_308 = arith.constant dense<0xFF800000> : vector<8xf32>
    %787 = vector.multi_reduction <maximumf>, %786, %cst_308 [1] : vector<8x8xf32> to vector<8xf32>
    %788 = vector.shape_cast %787 : vector<8xf32> to vector<8x1xf32>
    %789 = vector.broadcast %788 : vector<8x1xf32> to vector<8x8xf32>
    %790 = arith.subf %786, %789 : vector<8x8xf32>
    %791 = math.exp %790 : vector<8x8xf32>
    %cst_309 = arith.constant dense<0.000000e+00> : vector<8xf32>
    %792 = vector.multi_reduction <add>, %791, %cst_309 [1] : vector<8x8xf32> to vector<8xf32>
    %793 = vector.shape_cast %792 : vector<8xf32> to vector<8x1xf32>
    %794 = vector.broadcast %793 : vector<8x1xf32> to vector<8x8xf32>
    %795 = arith.divf %791, %794 : vector<8x8xf32>
    %796 = vector.extract_strided_slice %733 {offsets = [0, 24], sizes = [8, 8], strides = [1, 1]} : vector<8x32xf32> to vector<8x8xf32>
    %cst_310 = arith.constant dense<0.000000e+00> : vector<8x8xf32>
    %797 = tpu.matmul %795, %796, %cst_310 {dimension_numbers = #tpu.dot_dimension_numbers<[1], [0], [0], [1], [0, 0, 1, 1], [], []>} : vector<8x8xf32>, vector<8x8xf32>, vector<8x8xf32> -> vector<8x8xf32>
    %798 = tpu.concatenate %749, %765, %781, %797 in 1 : vector<8x8xf32>, vector<8x8xf32>, vector<8x8xf32>, vector<8x8xf32> -> vector<8x32xf32>
    %c0_311 = arith.constant 0 : index
    %c0_312 = arith.constant 0 : index
    %c0_313 = arith.constant 0 : index
    %799 = vector.load %arg8[%c0_311, %c0_312, %c0_313] : memref<2x3x32xf32, #tpu.memory_space<vmem>>, vector<1x3x32xf32>
    %800 = vector.shape_cast %799 : vector<1x3x32xf32> to vector<3x32xf32>
    %c0_314 = arith.constant 0 : index
    %c0_315 = arith.constant 0 : index
    %c0_316 = arith.constant 0 : index
    %801 = vector.load %arg7[%c0_314, %c0_315, %c0_316] : memref<2x32x32xf32, #tpu.memory_space<vmem>>, vector<1x32x32xf32>
    %802 = vector.shape_cast %801 : vector<1x32x32xf32> to vector<32x32xf32>
    %cst_317 = arith.constant dense<0.000000e+00> : vector<8x32xf32>
    %803 = tpu.matmul %798, %802, %cst_317 {dimension_numbers = #tpu.dot_dimension_numbers<[1], [0], [0], [1], [0, 0, 1, 1], [], []>} : vector<8x32xf32>, vector<32x32xf32>, vector<8x32xf32> -> vector<8x32xf32>
    %804 = vector.extract_strided_slice %800 {offsets = [0, 0], sizes = [1, 32], strides = [1, 1]} : vector<3x32xf32> to vector<1x32xf32>
    %805 = vector.broadcast %804 : vector<1x32xf32> to vector<8x32xf32>
    %806 = arith.addf %803, %805 : vector<8x32xf32>
    %807 = arith.addf %710, %806 : vector<8x32xf32>
    %808 = vector.extract_strided_slice %800 {offsets = [1, 0], sizes = [1, 32], strides = [1, 1]} : vector<3x32xf32> to vector<1x32xf32>
    %809 = vector.extract_strided_slice %800 {offsets = [2, 0], sizes = [1, 32], strides = [1, 1]} : vector<3x32xf32> to vector<1x32xf32>
    %cst_318 = arith.constant dense<0.000000e+00> : vector<8xf32>
    %810 = vector.multi_reduction <add>, %807, %cst_318 [1] : vector<8x32xf32> to vector<8xf32>
    %811 = vector.shape_cast %810 : vector<8xf32> to vector<8x1xf32>
    %cst_319 = arith.constant 3.200000e+01 : f32
    %812 = vector.broadcast %cst_319 : f32 to vector<8x1xf32>
    %813 = arith.divf %811, %812 : vector<8x1xf32>
    %814 = vector.broadcast %813 : vector<8x1xf32> to vector<8x32xf32>
    %815 = arith.subf %807, %814 : vector<8x32xf32>
    %816 = arith.mulf %815, %815 : vector<8x32xf32>
    %cst_320 = arith.constant dense<0.000000e+00> : vector<8xf32>
    %817 = vector.multi_reduction <add>, %816, %cst_320 [1] : vector<8x32xf32> to vector<8xf32>
    %818 = vector.shape_cast %817 : vector<8xf32> to vector<8x1xf32>
    %cst_321 = arith.constant 3.200000e+01 : f32
    %819 = vector.broadcast %cst_321 : f32 to vector<8x1xf32>
    %820 = arith.divf %818, %819 : vector<8x1xf32>
    %821 = vector.broadcast %813 : vector<8x1xf32> to vector<8x32xf32>
    %822 = arith.subf %807, %821 : vector<8x32xf32>
    %cst_322 = arith.constant 9.99999974E-6 : f32
    %823 = vector.broadcast %cst_322 : f32 to vector<8x1xf32>
    %824 = arith.addf %820, %823 : vector<8x1xf32>
    %825 = math.rsqrt %824 : vector<8x1xf32>
    %826 = vector.broadcast %825 : vector<8x1xf32> to vector<8x32xf32>
    %827 = arith.mulf %822, %826 : vector<8x32xf32>
    %828 = vector.broadcast %808 : vector<1x32xf32> to vector<8x32xf32>
    %829 = arith.mulf %827, %828 : vector<8x32xf32>
    %830 = vector.broadcast %809 : vector<1x32xf32> to vector<8x32xf32>
    %831 = arith.addf %829, %830 : vector<8x32xf32>
    %c0_323 = arith.constant 0 : index
    %c0_324 = arith.constant 0 : index
    %c0_325 = arith.constant 0 : index
    %832 = vector.load %arg9[%c0_323, %c0_324, %c0_325] : memref<2x32x32xf32, #tpu.memory_space<vmem>>, vector<1x32x32xf32>
    %833 = vector.shape_cast %832 : vector<1x32x32xf32> to vector<32x32xf32>
    %cst_326 = arith.constant dense<0.000000e+00> : vector<8x32xf32>
    %834 = tpu.matmul %831, %833, %cst_326 {dimension_numbers = #tpu.dot_dimension_numbers<[1], [0], [0], [1], [0, 0, 1, 1], [], []>} : vector<8x32xf32>, vector<32x32xf32>, vector<8x32xf32> -> vector<8x32xf32>
    %c0_327 = arith.constant 0 : index
    %c0_328 = arith.constant 0 : index
    %c0_329 = arith.constant 0 : index
    %835 = vector.load %arg10[%c0_327, %c0_328, %c0_329] : memref<2x1x32xf32, #tpu.memory_space<vmem>>, vector<1x1x32xf32>
    %836 = vector.shape_cast %835 : vector<1x1x32xf32> to vector<1x32xf32>
    %837 = vector.broadcast %836 : vector<1x32xf32> to vector<8x32xf32>
    %838 = arith.addf %834, %837 : vector<8x32xf32>
    %c0_330 = arith.constant 0 : index
    %c0_331 = arith.constant 0 : index
    %c0_332 = arith.constant 0 : index
    %839 = vector.load %arg11[%c0_330, %c0_331, %c0_332] : memref<2x32x64xf32, #tpu.memory_space<vmem>>, vector<1x32x64xf32>
    %840 = vector.shape_cast %839 : vector<1x32x64xf32> to vector<32x64xf32>
    %cst_333 = arith.constant dense<0.000000e+00> : vector<8x64xf32>
    %841 = tpu.matmul %716, %840, %cst_333 {dimension_numbers = #tpu.dot_dimension_numbers<[0], [0], [1], [1], [0, 1, 1, 1], [], []>} : vector<32x8xf32>, vector<32x64xf32>, vector<8x64xf32> -> vector<8x64xf32>
    %c0_334 = arith.constant 0 : index
    %c0_335 = arith.constant 0 : index
    %c0_336 = arith.constant 0 : index
    %842 = vector.load %arg12[%c0_334, %c0_335, %c0_336] : memref<2x1x64xf32, #tpu.memory_space<vmem>>, vector<1x1x64xf32>
    %843 = vector.shape_cast %842 : vector<1x1x64xf32> to vector<1x64xf32>
    %844 = vector.broadcast %843 : vector<1x64xf32> to vector<8x64xf32>
    %845 = arith.addf %841, %844 : vector<8x64xf32>
    %846 = vector.extract_strided_slice %845 {offsets = [0, 0], sizes = [8, 32], strides = [1, 1]} : vector<8x64xf32> to vector<8x32xf32>
    %847 = vector.extract_strided_slice %845 {offsets = [0, 32], sizes = [8, 32], strides = [1, 1]} : vector<8x64xf32> to vector<8x32xf32>
    %848 = vector.extract_strided_slice %838 {offsets = [0, 0], sizes = [8, 8], strides = [1, 1]} : vector<8x32xf32> to vector<8x8xf32>
    %849 = vector.extract_strided_slice %846 {offsets = [0, 0], sizes = [8, 8], strides = [1, 1]} : vector<8x32xf32> to vector<8x8xf32>
    %cst_337 = arith.constant dense<0.000000e+00> : vector<8x8xf32>
    %850 = tpu.matmul %848, %849, %cst_337 {dimension_numbers = #tpu.dot_dimension_numbers<[1], [1], [0], [0], [0, 0, 1, 0], [], []>} : vector<8x8xf32>, vector<8x8xf32>, vector<8x8xf32> -> vector<8x8xf32>
    %cst_338 = arith.constant -1.000000e+04 : f32
    %851 = vector.broadcast %cst_338 : f32 to vector<8x8xf32>
    %852 = arith.select %723, %850, %851 : vector<8x8xi1>, vector<8x8xf32>
    %cst_339 = arith.constant dense<0xFF800000> : vector<8xf32>
    %853 = vector.multi_reduction <maximumf>, %852, %cst_339 [1] : vector<8x8xf32> to vector<8xf32>
    %854 = vector.shape_cast %853 : vector<8xf32> to vector<8x1xf32>
    %855 = vector.broadcast %854 : vector<8x1xf32> to vector<8x8xf32>
    %856 = arith.subf %852, %855 : vector<8x8xf32>
    %857 = math.exp %856 : vector<8x8xf32>
    %cst_340 = arith.constant dense<0.000000e+00> : vector<8xf32>
    %858 = vector.multi_reduction <add>, %857, %cst_340 [1] : vector<8x8xf32> to vector<8xf32>
    %859 = vector.shape_cast %858 : vector<8xf32> to vector<8x1xf32>
    %860 = vector.broadcast %859 : vector<8x1xf32> to vector<8x8xf32>
    %861 = arith.divf %857, %860 : vector<8x8xf32>
    %862 = vector.extract_strided_slice %847 {offsets = [0, 0], sizes = [8, 8], strides = [1, 1]} : vector<8x32xf32> to vector<8x8xf32>
    %cst_341 = arith.constant dense<0.000000e+00> : vector<8x8xf32>
    %863 = tpu.matmul %861, %862, %cst_341 {dimension_numbers = #tpu.dot_dimension_numbers<[1], [0], [0], [1], [0, 0, 1, 1], [], []>} : vector<8x8xf32>, vector<8x8xf32>, vector<8x8xf32> -> vector<8x8xf32>
    %864 = vector.extract_strided_slice %838 {offsets = [0, 8], sizes = [8, 8], strides = [1, 1]} : vector<8x32xf32> to vector<8x8xf32>
    %865 = vector.extract_strided_slice %846 {offsets = [0, 8], sizes = [8, 8], strides = [1, 1]} : vector<8x32xf32> to vector<8x8xf32>
    %cst_342 = arith.constant dense<0.000000e+00> : vector<8x8xf32>
    %866 = tpu.matmul %864, %865, %cst_342 {dimension_numbers = #tpu.dot_dimension_numbers<[1], [1], [0], [0], [0, 0, 1, 0], [], []>} : vector<8x8xf32>, vector<8x8xf32>, vector<8x8xf32> -> vector<8x8xf32>
    %cst_343 = arith.constant -1.000000e+04 : f32
    %867 = vector.broadcast %cst_343 : f32 to vector<8x8xf32>
    %868 = arith.select %723, %866, %867 : vector<8x8xi1>, vector<8x8xf32>
    %cst_344 = arith.constant dense<0xFF800000> : vector<8xf32>
    %869 = vector.multi_reduction <maximumf>, %868, %cst_344 [1] : vector<8x8xf32> to vector<8xf32>
    %870 = vector.shape_cast %869 : vector<8xf32> to vector<8x1xf32>
    %871 = vector.broadcast %870 : vector<8x1xf32> to vector<8x8xf32>
    %872 = arith.subf %868, %871 : vector<8x8xf32>
    %873 = math.exp %872 : vector<8x8xf32>
    %cst_345 = arith.constant dense<0.000000e+00> : vector<8xf32>
    %874 = vector.multi_reduction <add>, %873, %cst_345 [1] : vector<8x8xf32> to vector<8xf32>
    %875 = vector.shape_cast %874 : vector<8xf32> to vector<8x1xf32>
    %876 = vector.broadcast %875 : vector<8x1xf32> to vector<8x8xf32>
    %877 = arith.divf %873, %876 : vector<8x8xf32>
    %878 = vector.extract_strided_slice %847 {offsets = [0, 8], sizes = [8, 8], strides = [1, 1]} : vector<8x32xf32> to vector<8x8xf32>
    %cst_346 = arith.constant dense<0.000000e+00> : vector<8x8xf32>
    %879 = tpu.matmul %877, %878, %cst_346 {dimension_numbers = #tpu.dot_dimension_numbers<[1], [0], [0], [1], [0, 0, 1, 1], [], []>} : vector<8x8xf32>, vector<8x8xf32>, vector<8x8xf32> -> vector<8x8xf32>
    %880 = vector.extract_strided_slice %838 {offsets = [0, 16], sizes = [8, 8], strides = [1, 1]} : vector<8x32xf32> to vector<8x8xf32>
    %881 = vector.extract_strided_slice %846 {offsets = [0, 16], sizes = [8, 8], strides = [1, 1]} : vector<8x32xf32> to vector<8x8xf32>
    %cst_347 = arith.constant dense<0.000000e+00> : vector<8x8xf32>
    %882 = tpu.matmul %880, %881, %cst_347 {dimension_numbers = #tpu.dot_dimension_numbers<[1], [1], [0], [0], [0, 0, 1, 0], [], []>} : vector<8x8xf32>, vector<8x8xf32>, vector<8x8xf32> -> vector<8x8xf32>
    %cst_348 = arith.constant -1.000000e+04 : f32
    %883 = vector.broadcast %cst_348 : f32 to vector<8x8xf32>
    %884 = arith.select %723, %882, %883 : vector<8x8xi1>, vector<8x8xf32>
    %cst_349 = arith.constant dense<0xFF800000> : vector<8xf32>
    %885 = vector.multi_reduction <maximumf>, %884, %cst_349 [1] : vector<8x8xf32> to vector<8xf32>
    %886 = vector.shape_cast %885 : vector<8xf32> to vector<8x1xf32>
    %887 = vector.broadcast %886 : vector<8x1xf32> to vector<8x8xf32>
    %888 = arith.subf %884, %887 : vector<8x8xf32>
    %889 = math.exp %888 : vector<8x8xf32>
    %cst_350 = arith.constant dense<0.000000e+00> : vector<8xf32>
    %890 = vector.multi_reduction <add>, %889, %cst_350 [1] : vector<8x8xf32> to vector<8xf32>
    %891 = vector.shape_cast %890 : vector<8xf32> to vector<8x1xf32>
    %892 = vector.broadcast %891 : vector<8x1xf32> to vector<8x8xf32>
    %893 = arith.divf %889, %892 : vector<8x8xf32>
    %894 = vector.extract_strided_slice %847 {offsets = [0, 16], sizes = [8, 8], strides = [1, 1]} : vector<8x32xf32> to vector<8x8xf32>
    %cst_351 = arith.constant dense<0.000000e+00> : vector<8x8xf32>
    %895 = tpu.matmul %893, %894, %cst_351 {dimension_numbers = #tpu.dot_dimension_numbers<[1], [0], [0], [1], [0, 0, 1, 1], [], []>} : vector<8x8xf32>, vector<8x8xf32>, vector<8x8xf32> -> vector<8x8xf32>
    %896 = vector.extract_strided_slice %838 {offsets = [0, 24], sizes = [8, 8], strides = [1, 1]} : vector<8x32xf32> to vector<8x8xf32>
    %897 = vector.extract_strided_slice %846 {offsets = [0, 24], sizes = [8, 8], strides = [1, 1]} : vector<8x32xf32> to vector<8x8xf32>
    %cst_352 = arith.constant dense<0.000000e+00> : vector<8x8xf32>
    %898 = tpu.matmul %896, %897, %cst_352 {dimension_numbers = #tpu.dot_dimension_numbers<[1], [1], [0], [0], [0, 0, 1, 0], [], []>} : vector<8x8xf32>, vector<8x8xf32>, vector<8x8xf32> -> vector<8x8xf32>
    %cst_353 = arith.constant -1.000000e+04 : f32
    %899 = vector.broadcast %cst_353 : f32 to vector<8x8xf32>
    %900 = arith.select %723, %898, %899 : vector<8x8xi1>, vector<8x8xf32>
    %cst_354 = arith.constant dense<0xFF800000> : vector<8xf32>
    %901 = vector.multi_reduction <maximumf>, %900, %cst_354 [1] : vector<8x8xf32> to vector<8xf32>
    %902 = vector.shape_cast %901 : vector<8xf32> to vector<8x1xf32>
    %903 = vector.broadcast %902 : vector<8x1xf32> to vector<8x8xf32>
    %904 = arith.subf %900, %903 : vector<8x8xf32>
    %905 = math.exp %904 : vector<8x8xf32>
    %cst_355 = arith.constant dense<0.000000e+00> : vector<8xf32>
    %906 = vector.multi_reduction <add>, %905, %cst_355 [1] : vector<8x8xf32> to vector<8xf32>
    %907 = vector.shape_cast %906 : vector<8xf32> to vector<8x1xf32>
    %908 = vector.broadcast %907 : vector<8x1xf32> to vector<8x8xf32>
    %909 = arith.divf %905, %908 : vector<8x8xf32>
    %910 = vector.extract_strided_slice %847 {offsets = [0, 24], sizes = [8, 8], strides = [1, 1]} : vector<8x32xf32> to vector<8x8xf32>
    %cst_356 = arith.constant dense<0.000000e+00> : vector<8x8xf32>
    %911 = tpu.matmul %909, %910, %cst_356 {dimension_numbers = #tpu.dot_dimension_numbers<[1], [0], [0], [1], [0, 0, 1, 1], [], []>} : vector<8x8xf32>, vector<8x8xf32>, vector<8x8xf32> -> vector<8x8xf32>
    %912 = tpu.concatenate %863, %879, %895, %911 in 1 : vector<8x8xf32>, vector<8x8xf32>, vector<8x8xf32>, vector<8x8xf32> -> vector<8x32xf32>
    %c0_357 = arith.constant 0 : index
    %c0_358 = arith.constant 0 : index
    %c0_359 = arith.constant 0 : index
    %913 = vector.load %arg14[%c0_357, %c0_358, %c0_359] : memref<2x3x32xf32, #tpu.memory_space<vmem>>, vector<1x3x32xf32>
    %914 = vector.shape_cast %913 : vector<1x3x32xf32> to vector<3x32xf32>
    %c0_360 = arith.constant 0 : index
    %c0_361 = arith.constant 0 : index
    %c0_362 = arith.constant 0 : index
    %915 = vector.load %arg13[%c0_360, %c0_361, %c0_362] : memref<2x32x32xf32, #tpu.memory_space<vmem>>, vector<1x32x32xf32>
    %916 = vector.shape_cast %915 : vector<1x32x32xf32> to vector<32x32xf32>
    %cst_363 = arith.constant dense<0.000000e+00> : vector<8x32xf32>
    %917 = tpu.matmul %912, %916, %cst_363 {dimension_numbers = #tpu.dot_dimension_numbers<[1], [0], [0], [1], [0, 0, 1, 1], [], []>} : vector<8x32xf32>, vector<32x32xf32>, vector<8x32xf32> -> vector<8x32xf32>
    %918 = vector.extract_strided_slice %914 {offsets = [0, 0], sizes = [1, 32], strides = [1, 1]} : vector<3x32xf32> to vector<1x32xf32>
    %919 = vector.broadcast %918 : vector<1x32xf32> to vector<8x32xf32>
    %920 = arith.addf %917, %919 : vector<8x32xf32>
    %921 = arith.addf %831, %920 : vector<8x32xf32>
    %922 = vector.extract_strided_slice %914 {offsets = [1, 0], sizes = [1, 32], strides = [1, 1]} : vector<3x32xf32> to vector<1x32xf32>
    %923 = vector.extract_strided_slice %914 {offsets = [2, 0], sizes = [1, 32], strides = [1, 1]} : vector<3x32xf32> to vector<1x32xf32>
    %cst_364 = arith.constant dense<0.000000e+00> : vector<8xf32>
    %924 = vector.multi_reduction <add>, %921, %cst_364 [1] : vector<8x32xf32> to vector<8xf32>
    %925 = vector.shape_cast %924 : vector<8xf32> to vector<8x1xf32>
    %cst_365 = arith.constant 3.200000e+01 : f32
    %926 = vector.broadcast %cst_365 : f32 to vector<8x1xf32>
    %927 = arith.divf %925, %926 : vector<8x1xf32>
    %928 = vector.broadcast %927 : vector<8x1xf32> to vector<8x32xf32>
    %929 = arith.subf %921, %928 : vector<8x32xf32>
    %930 = arith.mulf %929, %929 : vector<8x32xf32>
    %cst_366 = arith.constant dense<0.000000e+00> : vector<8xf32>
    %931 = vector.multi_reduction <add>, %930, %cst_366 [1] : vector<8x32xf32> to vector<8xf32>
    %932 = vector.shape_cast %931 : vector<8xf32> to vector<8x1xf32>
    %cst_367 = arith.constant 3.200000e+01 : f32
    %933 = vector.broadcast %cst_367 : f32 to vector<8x1xf32>
    %934 = arith.divf %932, %933 : vector<8x1xf32>
    %935 = vector.broadcast %927 : vector<8x1xf32> to vector<8x32xf32>
    %936 = arith.subf %921, %935 : vector<8x32xf32>
    %cst_368 = arith.constant 9.99999974E-6 : f32
    %937 = vector.broadcast %cst_368 : f32 to vector<8x1xf32>
    %938 = arith.addf %934, %937 : vector<8x1xf32>
    %939 = math.rsqrt %938 : vector<8x1xf32>
    %940 = vector.broadcast %939 : vector<8x1xf32> to vector<8x32xf32>
    %941 = arith.mulf %936, %940 : vector<8x32xf32>
    %942 = vector.broadcast %922 : vector<1x32xf32> to vector<8x32xf32>
    %943 = arith.mulf %941, %942 : vector<8x32xf32>
    %944 = vector.broadcast %923 : vector<1x32xf32> to vector<8x32xf32>
    %945 = arith.addf %943, %944 : vector<8x32xf32>
    %946 = vector.broadcast %700 : vector<8x1xf32> to vector<8x32xf32>
    %947 = arith.mulf %945, %946 : vector<8x32xf32>
    %c0_369 = arith.constant 0 : index
    %c0_370 = arith.constant 0 : index
    %c0_371 = arith.constant 0 : index
    %948 = vector.load %arg15[%c0_369, %c0_370, %c0_371] : memref<2x32x128xf32, #tpu.memory_space<vmem>>, vector<1x32x128xf32>
    %949 = vector.shape_cast %948 : vector<1x32x128xf32> to vector<32x128xf32>
    %cst_372 = arith.constant dense<0.000000e+00> : vector<8x128xf32>
    %950 = tpu.matmul %947, %949, %cst_372 {dimension_numbers = #tpu.dot_dimension_numbers<[1], [0], [0], [1], [0, 0, 1, 1], [], []>} : vector<8x32xf32>, vector<32x128xf32>, vector<8x128xf32> -> vector<8x128xf32>
    %c0_373 = arith.constant 0 : index
    %c0_374 = arith.constant 0 : index
    %c0_375 = arith.constant 0 : index
    %951 = vector.load %arg16[%c0_373, %c0_374, %c0_375] : memref<2x1x128xf32, #tpu.memory_space<vmem>>, vector<1x1x128xf32>
    %952 = vector.shape_cast %951 : vector<1x1x128xf32> to vector<1x128xf32>
    %953 = vector.broadcast %952 : vector<1x128xf32> to vector<8x128xf32>
    %954 = arith.addf %950, %953 : vector<8x128xf32>
    %cst_376 = arith.constant 5.000000e-01 : f32
    %955 = vector.broadcast %cst_376 : f32 to vector<8x128xf32>
    %956 = arith.mulf %955, %954 : vector<8x128xf32>
    %cst_377 = arith.constant 0.707106769 : f32
    %957 = vector.broadcast %cst_377 : f32 to vector<8x128xf32>
    %958 = arith.mulf %954, %957 : vector<8x128xf32>
    %959 = math.absf %958 : vector<8x128xf32>
    %cst_378 = arith.constant 5.000000e-01 : f32
    %960 = vector.broadcast %cst_378 : f32 to vector<8x128xf32>
    %961 = arith.mulf %960, %959 : vector<8x128xf32>
    %cst_379 = arith.constant 1.000000e+00 : f32
    %962 = vector.broadcast %cst_379 : f32 to vector<8x128xf32>
    %963 = arith.addf %962, %961 : vector<8x128xf32>
    %cst_380 = arith.constant 1.000000e+00 : f32
    %964 = vector.broadcast %cst_380 : f32 to vector<8x128xf32>
    %965 = arith.divf %964, %963 : vector<8x128xf32>
    %cst_381 = arith.constant 0.170872763 : f32
    %966 = vector.broadcast %cst_381 : f32 to vector<8x128xf32>
    %967 = arith.mulf %965, %966 : vector<8x128xf32>
    %cst_382 = arith.constant -0.822152256 : f32
    %968 = vector.broadcast %cst_382 : f32 to vector<8x128xf32>
    %969 = arith.addf %968, %967 : vector<8x128xf32>
    %970 = arith.mulf %965, %969 : vector<8x128xf32>
    %cst_383 = arith.constant 1.48851585 : f32
    %971 = vector.broadcast %cst_383 : f32 to vector<8x128xf32>
    %972 = arith.addf %971, %970 : vector<8x128xf32>
    %973 = arith.mulf %965, %972 : vector<8x128xf32>
    %cst_384 = arith.constant -1.13520396 : f32
    %974 = vector.broadcast %cst_384 : f32 to vector<8x128xf32>
    %975 = arith.addf %974, %973 : vector<8x128xf32>
    %976 = arith.mulf %965, %975 : vector<8x128xf32>
    %cst_385 = arith.constant 0.278868079 : f32
    %977 = vector.broadcast %cst_385 : f32 to vector<8x128xf32>
    %978 = arith.addf %977, %976 : vector<8x128xf32>
    %979 = arith.mulf %965, %978 : vector<8x128xf32>
    %cst_386 = arith.constant -0.186288059 : f32
    %980 = vector.broadcast %cst_386 : f32 to vector<8x128xf32>
    %981 = arith.addf %980, %979 : vector<8x128xf32>
    %982 = arith.mulf %965, %981 : vector<8x128xf32>
    %cst_387 = arith.constant 0.0967841818 : f32
    %983 = vector.broadcast %cst_387 : f32 to vector<8x128xf32>
    %984 = arith.addf %983, %982 : vector<8x128xf32>
    %985 = arith.mulf %965, %984 : vector<8x128xf32>
    %cst_388 = arith.constant 0.374091953 : f32
    %986 = vector.broadcast %cst_388 : f32 to vector<8x128xf32>
    %987 = arith.addf %986, %985 : vector<8x128xf32>
    %988 = arith.mulf %965, %987 : vector<8x128xf32>
    %cst_389 = arith.constant 1.00002372 : f32
    %989 = vector.broadcast %cst_389 : f32 to vector<8x128xf32>
    %990 = arith.addf %989, %988 : vector<8x128xf32>
    %991 = arith.mulf %965, %990 : vector<8x128xf32>
    %cst_390 = arith.constant -1.26551223 : f32
    %992 = vector.broadcast %cst_390 : f32 to vector<8x128xf32>
    %993 = arith.addf %992, %991 : vector<8x128xf32>
    %cst_391 = arith.constant 0.000000e+00 : f32
    %994 = vector.broadcast %cst_391 : f32 to vector<8x128xf32>
    %995 = arith.subf %994, %959 : vector<8x128xf32>
    %996 = arith.mulf %995, %959 : vector<8x128xf32>
    %997 = arith.addf %996, %993 : vector<8x128xf32>
    %998 = math.exp %997 : vector<8x128xf32>
    %999 = arith.mulf %965, %998 : vector<8x128xf32>
    %cst_392 = arith.constant 0.000000e+00 : f32
    %1000 = vector.broadcast %cst_392 : f32 to vector<8x128xf32>
    %1001 = arith.cmpf oge, %958, %1000 : vector<8x128xf32>
    %cst_393 = arith.constant 1.000000e+00 : f32
    %cst_394 = arith.constant -1.000000e+00 : f32
    %1002 = vector.broadcast %cst_393 : f32 to vector<8x128xf32>
    %1003 = vector.broadcast %cst_394 : f32 to vector<8x128xf32>
    %1004 = arith.select %1001, %1002, %1003 : vector<8x128xi1>, vector<8x128xf32>
    %cst_395 = arith.constant 1.000000e+00 : f32
    %1005 = vector.broadcast %cst_395 : f32 to vector<8x128xf32>
    %1006 = arith.subf %1005, %999 : vector<8x128xf32>
    %1007 = arith.mulf %1004, %1006 : vector<8x128xf32>
    %cst_396 = arith.constant 1.000000e+00 : f32
    %1008 = vector.broadcast %cst_396 : f32 to vector<8x128xf32>
    %1009 = arith.addf %1008, %1007 : vector<8x128xf32>
    %1010 = arith.mulf %956, %1009 : vector<8x128xf32>
    %c0_397 = arith.constant 0 : index
    %c0_398 = arith.constant 0 : index
    %c0_399 = arith.constant 0 : index
    %1011 = vector.load %arg18[%c0_397, %c0_398, %c0_399] : memref<2x3x32xf32, #tpu.memory_space<vmem>>, vector<1x3x32xf32>
    %1012 = vector.shape_cast %1011 : vector<1x3x32xf32> to vector<3x32xf32>
    %1013 = vector.broadcast %700 : vector<8x1xf32> to vector<8x128xf32>
    %1014 = arith.mulf %1010, %1013 : vector<8x128xf32>
    %c0_400 = arith.constant 0 : index
    %c0_401 = arith.constant 0 : index
    %c0_402 = arith.constant 0 : index
    %1015 = vector.load %arg17[%c0_400, %c0_401, %c0_402] : memref<2x128x32xf32, #tpu.memory_space<vmem>>, vector<1x128x32xf32>
    %1016 = vector.shape_cast %1015 : vector<1x128x32xf32> to vector<128x32xf32>
    %cst_403 = arith.constant dense<0.000000e+00> : vector<8x32xf32>
    %1017 = tpu.matmul %1014, %1016, %cst_403 {dimension_numbers = #tpu.dot_dimension_numbers<[1], [0], [0], [1], [0, 0, 1, 1], [], []>} : vector<8x128xf32>, vector<128x32xf32>, vector<8x32xf32> -> vector<8x32xf32>
    %1018 = vector.extract_strided_slice %1012 {offsets = [0, 0], sizes = [1, 32], strides = [1, 1]} : vector<3x32xf32> to vector<1x32xf32>
    %1019 = vector.broadcast %1018 : vector<1x32xf32> to vector<8x32xf32>
    %1020 = arith.addf %1017, %1019 : vector<8x32xf32>
    %1021 = vector.broadcast %700 : vector<8x1xf32> to vector<8x32xf32>
    %1022 = arith.mulf %1020, %1021 : vector<8x32xf32>
    %1023 = arith.addf %945, %1022 : vector<8x32xf32>
    %1024 = vector.extract_strided_slice %1012 {offsets = [1, 0], sizes = [1, 32], strides = [1, 1]} : vector<3x32xf32> to vector<1x32xf32>
    %1025 = vector.extract_strided_slice %1012 {offsets = [2, 0], sizes = [1, 32], strides = [1, 1]} : vector<3x32xf32> to vector<1x32xf32>
    %cst_404 = arith.constant dense<0.000000e+00> : vector<8xf32>
    %1026 = vector.multi_reduction <add>, %1023, %cst_404 [1] : vector<8x32xf32> to vector<8xf32>
    %1027 = vector.shape_cast %1026 : vector<8xf32> to vector<8x1xf32>
    %cst_405 = arith.constant 3.200000e+01 : f32
    %1028 = vector.broadcast %cst_405 : f32 to vector<8x1xf32>
    %1029 = arith.divf %1027, %1028 : vector<8x1xf32>
    %1030 = vector.broadcast %1029 : vector<8x1xf32> to vector<8x32xf32>
    %1031 = arith.subf %1023, %1030 : vector<8x32xf32>
    %1032 = arith.mulf %1031, %1031 : vector<8x32xf32>
    %cst_406 = arith.constant dense<0.000000e+00> : vector<8xf32>
    %1033 = vector.multi_reduction <add>, %1032, %cst_406 [1] : vector<8x32xf32> to vector<8xf32>
    %1034 = vector.shape_cast %1033 : vector<8xf32> to vector<8x1xf32>
    %cst_407 = arith.constant 3.200000e+01 : f32
    %1035 = vector.broadcast %cst_407 : f32 to vector<8x1xf32>
    %1036 = arith.divf %1034, %1035 : vector<8x1xf32>
    %1037 = vector.broadcast %1029 : vector<8x1xf32> to vector<8x32xf32>
    %1038 = arith.subf %1023, %1037 : vector<8x32xf32>
    %cst_408 = arith.constant 9.99999974E-6 : f32
    %1039 = vector.broadcast %cst_408 : f32 to vector<8x1xf32>
    %1040 = arith.addf %1036, %1039 : vector<8x1xf32>
    %1041 = math.rsqrt %1040 : vector<8x1xf32>
    %1042 = vector.broadcast %1041 : vector<8x1xf32> to vector<8x32xf32>
    %1043 = arith.mulf %1038, %1042 : vector<8x32xf32>
    %1044 = vector.broadcast %1024 : vector<1x32xf32> to vector<8x32xf32>
    %1045 = arith.mulf %1043, %1044 : vector<8x32xf32>
    %1046 = vector.broadcast %1025 : vector<1x32xf32> to vector<8x32xf32>
    %1047 = arith.addf %1045, %1046 : vector<8x32xf32>
    %c1_409 = arith.constant 1 : index
    %c0_410 = arith.constant 0 : index
    %c0_411 = arith.constant 0 : index
    %1048 = vector.load %arg5[%c1_409, %c0_410, %c0_411] : memref<2x32x96xf32, #tpu.memory_space<vmem>>, vector<1x32x96xf32>
    %1049 = vector.shape_cast %1048 : vector<1x32x96xf32> to vector<32x96xf32>
    %cst_412 = arith.constant dense<0.000000e+00> : vector<8x96xf32>
    %1050 = tpu.matmul %1047, %1049, %cst_412 {dimension_numbers = #tpu.dot_dimension_numbers<[1], [0], [0], [1], [0, 0, 1, 1], [], []>} : vector<8x32xf32>, vector<32x96xf32>, vector<8x96xf32> -> vector<8x96xf32>
    %c1_413 = arith.constant 1 : index
    %c0_414 = arith.constant 0 : index
    %c0_415 = arith.constant 0 : index
    %1051 = vector.load %arg6[%c1_413, %c0_414, %c0_415] : memref<2x1x96xf32, #tpu.memory_space<vmem>>, vector<1x1x96xf32>
    %1052 = vector.shape_cast %1051 : vector<1x1x96xf32> to vector<1x96xf32>
    %1053 = vector.broadcast %1052 : vector<1x96xf32> to vector<8x96xf32>
    %1054 = arith.addf %1050, %1053 : vector<8x96xf32>
    %1055 = vector.extract_strided_slice %1054 {offsets = [0, 0], sizes = [8, 32], strides = [1, 1]} : vector<8x96xf32> to vector<8x32xf32>
    %1056 = vector.extract_strided_slice %1054 {offsets = [0, 32], sizes = [8, 32], strides = [1, 1]} : vector<8x96xf32> to vector<8x32xf32>
    %1057 = vector.extract_strided_slice %1054 {offsets = [0, 64], sizes = [8, 32], strides = [1, 1]} : vector<8x96xf32> to vector<8x32xf32>
    %1058 = vector.extract_strided_slice %1055 {offsets = [0, 0], sizes = [8, 8], strides = [1, 1]} : vector<8x32xf32> to vector<8x8xf32>
    %1059 = vector.extract_strided_slice %1056 {offsets = [0, 0], sizes = [8, 8], strides = [1, 1]} : vector<8x32xf32> to vector<8x8xf32>
    %cst_416 = arith.constant dense<0.000000e+00> : vector<8x8xf32>
    %1060 = tpu.matmul %1058, %1059, %cst_416 {dimension_numbers = #tpu.dot_dimension_numbers<[1], [1], [0], [0], [0, 0, 1, 0], [], []>} : vector<8x8xf32>, vector<8x8xf32>, vector<8x8xf32> -> vector<8x8xf32>
    %cst_417 = arith.constant -1.000000e+04 : f32
    %1061 = vector.broadcast %cst_417 : f32 to vector<8x8xf32>
    %1062 = arith.select %705, %1060, %1061 : vector<8x8xi1>, vector<8x8xf32>
    %cst_418 = arith.constant dense<0xFF800000> : vector<8xf32>
    %1063 = vector.multi_reduction <maximumf>, %1062, %cst_418 [1] : vector<8x8xf32> to vector<8xf32>
    %1064 = vector.shape_cast %1063 : vector<8xf32> to vector<8x1xf32>
    %1065 = vector.broadcast %1064 : vector<8x1xf32> to vector<8x8xf32>
    %1066 = arith.subf %1062, %1065 : vector<8x8xf32>
    %1067 = math.exp %1066 : vector<8x8xf32>
    %cst_419 = arith.constant dense<0.000000e+00> : vector<8xf32>
    %1068 = vector.multi_reduction <add>, %1067, %cst_419 [1] : vector<8x8xf32> to vector<8xf32>
    %1069 = vector.shape_cast %1068 : vector<8xf32> to vector<8x1xf32>
    %1070 = vector.broadcast %1069 : vector<8x1xf32> to vector<8x8xf32>
    %1071 = arith.divf %1067, %1070 : vector<8x8xf32>
    %1072 = vector.extract_strided_slice %1057 {offsets = [0, 0], sizes = [8, 8], strides = [1, 1]} : vector<8x32xf32> to vector<8x8xf32>
    %cst_420 = arith.constant dense<0.000000e+00> : vector<8x8xf32>
    %1073 = tpu.matmul %1071, %1072, %cst_420 {dimension_numbers = #tpu.dot_dimension_numbers<[1], [0], [0], [1], [0, 0, 1, 1], [], []>} : vector<8x8xf32>, vector<8x8xf32>, vector<8x8xf32> -> vector<8x8xf32>
    %1074 = vector.extract_strided_slice %1055 {offsets = [0, 8], sizes = [8, 8], strides = [1, 1]} : vector<8x32xf32> to vector<8x8xf32>
    %1075 = vector.extract_strided_slice %1056 {offsets = [0, 8], sizes = [8, 8], strides = [1, 1]} : vector<8x32xf32> to vector<8x8xf32>
    %cst_421 = arith.constant dense<0.000000e+00> : vector<8x8xf32>
    %1076 = tpu.matmul %1074, %1075, %cst_421 {dimension_numbers = #tpu.dot_dimension_numbers<[1], [1], [0], [0], [0, 0, 1, 0], [], []>} : vector<8x8xf32>, vector<8x8xf32>, vector<8x8xf32> -> vector<8x8xf32>
    %cst_422 = arith.constant -1.000000e+04 : f32
    %1077 = vector.broadcast %cst_422 : f32 to vector<8x8xf32>
    %1078 = arith.select %705, %1076, %1077 : vector<8x8xi1>, vector<8x8xf32>
    %cst_423 = arith.constant dense<0xFF800000> : vector<8xf32>
    %1079 = vector.multi_reduction <maximumf>, %1078, %cst_423 [1] : vector<8x8xf32> to vector<8xf32>
    %1080 = vector.shape_cast %1079 : vector<8xf32> to vector<8x1xf32>
    %1081 = vector.broadcast %1080 : vector<8x1xf32> to vector<8x8xf32>
    %1082 = arith.subf %1078, %1081 : vector<8x8xf32>
    %1083 = math.exp %1082 : vector<8x8xf32>
    %cst_424 = arith.constant dense<0.000000e+00> : vector<8xf32>
    %1084 = vector.multi_reduction <add>, %1083, %cst_424 [1] : vector<8x8xf32> to vector<8xf32>
    %1085 = vector.shape_cast %1084 : vector<8xf32> to vector<8x1xf32>
    %1086 = vector.broadcast %1085 : vector<8x1xf32> to vector<8x8xf32>
    %1087 = arith.divf %1083, %1086 : vector<8x8xf32>
    %1088 = vector.extract_strided_slice %1057 {offsets = [0, 8], sizes = [8, 8], strides = [1, 1]} : vector<8x32xf32> to vector<8x8xf32>
    %cst_425 = arith.constant dense<0.000000e+00> : vector<8x8xf32>
    %1089 = tpu.matmul %1087, %1088, %cst_425 {dimension_numbers = #tpu.dot_dimension_numbers<[1], [0], [0], [1], [0, 0, 1, 1], [], []>} : vector<8x8xf32>, vector<8x8xf32>, vector<8x8xf32> -> vector<8x8xf32>
    %1090 = vector.extract_strided_slice %1055 {offsets = [0, 16], sizes = [8, 8], strides = [1, 1]} : vector<8x32xf32> to vector<8x8xf32>
    %1091 = vector.extract_strided_slice %1056 {offsets = [0, 16], sizes = [8, 8], strides = [1, 1]} : vector<8x32xf32> to vector<8x8xf32>
    %cst_426 = arith.constant dense<0.000000e+00> : vector<8x8xf32>
    %1092 = tpu.matmul %1090, %1091, %cst_426 {dimension_numbers = #tpu.dot_dimension_numbers<[1], [1], [0], [0], [0, 0, 1, 0], [], []>} : vector<8x8xf32>, vector<8x8xf32>, vector<8x8xf32> -> vector<8x8xf32>
    %cst_427 = arith.constant -1.000000e+04 : f32
    %1093 = vector.broadcast %cst_427 : f32 to vector<8x8xf32>
    %1094 = arith.select %705, %1092, %1093 : vector<8x8xi1>, vector<8x8xf32>
    %cst_428 = arith.constant dense<0xFF800000> : vector<8xf32>
    %1095 = vector.multi_reduction <maximumf>, %1094, %cst_428 [1] : vector<8x8xf32> to vector<8xf32>
    %1096 = vector.shape_cast %1095 : vector<8xf32> to vector<8x1xf32>
    %1097 = vector.broadcast %1096 : vector<8x1xf32> to vector<8x8xf32>
    %1098 = arith.subf %1094, %1097 : vector<8x8xf32>
    %1099 = math.exp %1098 : vector<8x8xf32>
    %cst_429 = arith.constant dense<0.000000e+00> : vector<8xf32>
    %1100 = vector.multi_reduction <add>, %1099, %cst_429 [1] : vector<8x8xf32> to vector<8xf32>
    %1101 = vector.shape_cast %1100 : vector<8xf32> to vector<8x1xf32>
    %1102 = vector.broadcast %1101 : vector<8x1xf32> to vector<8x8xf32>
    %1103 = arith.divf %1099, %1102 : vector<8x8xf32>
    %1104 = vector.extract_strided_slice %1057 {offsets = [0, 16], sizes = [8, 8], strides = [1, 1]} : vector<8x32xf32> to vector<8x8xf32>
    %cst_430 = arith.constant dense<0.000000e+00> : vector<8x8xf32>
    %1105 = tpu.matmul %1103, %1104, %cst_430 {dimension_numbers = #tpu.dot_dimension_numbers<[1], [0], [0], [1], [0, 0, 1, 1], [], []>} : vector<8x8xf32>, vector<8x8xf32>, vector<8x8xf32> -> vector<8x8xf32>
    %1106 = vector.extract_strided_slice %1055 {offsets = [0, 24], sizes = [8, 8], strides = [1, 1]} : vector<8x32xf32> to vector<8x8xf32>
    %1107 = vector.extract_strided_slice %1056 {offsets = [0, 24], sizes = [8, 8], strides = [1, 1]} : vector<8x32xf32> to vector<8x8xf32>
    %cst_431 = arith.constant dense<0.000000e+00> : vector<8x8xf32>
    %1108 = tpu.matmul %1106, %1107, %cst_431 {dimension_numbers = #tpu.dot_dimension_numbers<[1], [1], [0], [0], [0, 0, 1, 0], [], []>} : vector<8x8xf32>, vector<8x8xf32>, vector<8x8xf32> -> vector<8x8xf32>
    %cst_432 = arith.constant -1.000000e+04 : f32
    %1109 = vector.broadcast %cst_432 : f32 to vector<8x8xf32>
    %1110 = arith.select %705, %1108, %1109 : vector<8x8xi1>, vector<8x8xf32>
    %cst_433 = arith.constant dense<0xFF800000> : vector<8xf32>
    %1111 = vector.multi_reduction <maximumf>, %1110, %cst_433 [1] : vector<8x8xf32> to vector<8xf32>
    %1112 = vector.shape_cast %1111 : vector<8xf32> to vector<8x1xf32>
    %1113 = vector.broadcast %1112 : vector<8x1xf32> to vector<8x8xf32>
    %1114 = arith.subf %1110, %1113 : vector<8x8xf32>
    %1115 = math.exp %1114 : vector<8x8xf32>
    %cst_434 = arith.constant dense<0.000000e+00> : vector<8xf32>
    %1116 = vector.multi_reduction <add>, %1115, %cst_434 [1] : vector<8x8xf32> to vector<8xf32>
    %1117 = vector.shape_cast %1116 : vector<8xf32> to vector<8x1xf32>
    %1118 = vector.broadcast %1117 : vector<8x1xf32> to vector<8x8xf32>
    %1119 = arith.divf %1115, %1118 : vector<8x8xf32>
    %1120 = vector.extract_strided_slice %1057 {offsets = [0, 24], sizes = [8, 8], strides = [1, 1]} : vector<8x32xf32> to vector<8x8xf32>
    %cst_435 = arith.constant dense<0.000000e+00> : vector<8x8xf32>
    %1121 = tpu.matmul %1119, %1120, %cst_435 {dimension_numbers = #tpu.dot_dimension_numbers<[1], [0], [0], [1], [0, 0, 1, 1], [], []>} : vector<8x8xf32>, vector<8x8xf32>, vector<8x8xf32> -> vector<8x8xf32>
    %1122 = tpu.concatenate %1073, %1089, %1105, %1121 in 1 : vector<8x8xf32>, vector<8x8xf32>, vector<8x8xf32>, vector<8x8xf32> -> vector<8x32xf32>
    %c1_436 = arith.constant 1 : index
    %c0_437 = arith.constant 0 : index
    %c0_438 = arith.constant 0 : index
    %1123 = vector.load %arg8[%c1_436, %c0_437, %c0_438] : memref<2x3x32xf32, #tpu.memory_space<vmem>>, vector<1x3x32xf32>
    %1124 = vector.shape_cast %1123 : vector<1x3x32xf32> to vector<3x32xf32>
    %c1_439 = arith.constant 1 : index
    %c0_440 = arith.constant 0 : index
    %c0_441 = arith.constant 0 : index
    %1125 = vector.load %arg7[%c1_439, %c0_440, %c0_441] : memref<2x32x32xf32, #tpu.memory_space<vmem>>, vector<1x32x32xf32>
    %1126 = vector.shape_cast %1125 : vector<1x32x32xf32> to vector<32x32xf32>
    %cst_442 = arith.constant dense<0.000000e+00> : vector<8x32xf32>
    %1127 = tpu.matmul %1122, %1126, %cst_442 {dimension_numbers = #tpu.dot_dimension_numbers<[1], [0], [0], [1], [0, 0, 1, 1], [], []>} : vector<8x32xf32>, vector<32x32xf32>, vector<8x32xf32> -> vector<8x32xf32>
    %1128 = vector.extract_strided_slice %1124 {offsets = [0, 0], sizes = [1, 32], strides = [1, 1]} : vector<3x32xf32> to vector<1x32xf32>
    %1129 = vector.broadcast %1128 : vector<1x32xf32> to vector<8x32xf32>
    %1130 = arith.addf %1127, %1129 : vector<8x32xf32>
    %1131 = arith.addf %1047, %1130 : vector<8x32xf32>
    %1132 = vector.extract_strided_slice %1124 {offsets = [1, 0], sizes = [1, 32], strides = [1, 1]} : vector<3x32xf32> to vector<1x32xf32>
    %1133 = vector.extract_strided_slice %1124 {offsets = [2, 0], sizes = [1, 32], strides = [1, 1]} : vector<3x32xf32> to vector<1x32xf32>
    %cst_443 = arith.constant dense<0.000000e+00> : vector<8xf32>
    %1134 = vector.multi_reduction <add>, %1131, %cst_443 [1] : vector<8x32xf32> to vector<8xf32>
    %1135 = vector.shape_cast %1134 : vector<8xf32> to vector<8x1xf32>
    %cst_444 = arith.constant 3.200000e+01 : f32
    %1136 = vector.broadcast %cst_444 : f32 to vector<8x1xf32>
    %1137 = arith.divf %1135, %1136 : vector<8x1xf32>
    %1138 = vector.broadcast %1137 : vector<8x1xf32> to vector<8x32xf32>
    %1139 = arith.subf %1131, %1138 : vector<8x32xf32>
    %1140 = arith.mulf %1139, %1139 : vector<8x32xf32>
    %cst_445 = arith.constant dense<0.000000e+00> : vector<8xf32>
    %1141 = vector.multi_reduction <add>, %1140, %cst_445 [1] : vector<8x32xf32> to vector<8xf32>
    %1142 = vector.shape_cast %1141 : vector<8xf32> to vector<8x1xf32>
    %cst_446 = arith.constant 3.200000e+01 : f32
    %1143 = vector.broadcast %cst_446 : f32 to vector<8x1xf32>
    %1144 = arith.divf %1142, %1143 : vector<8x1xf32>
    %1145 = vector.broadcast %1137 : vector<8x1xf32> to vector<8x32xf32>
    %1146 = arith.subf %1131, %1145 : vector<8x32xf32>
    %cst_447 = arith.constant 9.99999974E-6 : f32
    %1147 = vector.broadcast %cst_447 : f32 to vector<8x1xf32>
    %1148 = arith.addf %1144, %1147 : vector<8x1xf32>
    %1149 = math.rsqrt %1148 : vector<8x1xf32>
    %1150 = vector.broadcast %1149 : vector<8x1xf32> to vector<8x32xf32>
    %1151 = arith.mulf %1146, %1150 : vector<8x32xf32>
    %1152 = vector.broadcast %1132 : vector<1x32xf32> to vector<8x32xf32>
    %1153 = arith.mulf %1151, %1152 : vector<8x32xf32>
    %1154 = vector.broadcast %1133 : vector<1x32xf32> to vector<8x32xf32>
    %1155 = arith.addf %1153, %1154 : vector<8x32xf32>
    %c1_448 = arith.constant 1 : index
    %c0_449 = arith.constant 0 : index
    %c0_450 = arith.constant 0 : index
    %1156 = vector.load %arg9[%c1_448, %c0_449, %c0_450] : memref<2x32x32xf32, #tpu.memory_space<vmem>>, vector<1x32x32xf32>
    %1157 = vector.shape_cast %1156 : vector<1x32x32xf32> to vector<32x32xf32>
    %cst_451 = arith.constant dense<0.000000e+00> : vector<8x32xf32>
    %1158 = tpu.matmul %1155, %1157, %cst_451 {dimension_numbers = #tpu.dot_dimension_numbers<[1], [0], [0], [1], [0, 0, 1, 1], [], []>} : vector<8x32xf32>, vector<32x32xf32>, vector<8x32xf32> -> vector<8x32xf32>
    %c1_452 = arith.constant 1 : index
    %c0_453 = arith.constant 0 : index
    %c0_454 = arith.constant 0 : index
    %1159 = vector.load %arg10[%c1_452, %c0_453, %c0_454] : memref<2x1x32xf32, #tpu.memory_space<vmem>>, vector<1x1x32xf32>
    %1160 = vector.shape_cast %1159 : vector<1x1x32xf32> to vector<1x32xf32>
    %1161 = vector.broadcast %1160 : vector<1x32xf32> to vector<8x32xf32>
    %1162 = arith.addf %1158, %1161 : vector<8x32xf32>
    %c1_455 = arith.constant 1 : index
    %c0_456 = arith.constant 0 : index
    %c0_457 = arith.constant 0 : index
    %1163 = vector.load %arg11[%c1_455, %c0_456, %c0_457] : memref<2x32x64xf32, #tpu.memory_space<vmem>>, vector<1x32x64xf32>
    %1164 = vector.shape_cast %1163 : vector<1x32x64xf32> to vector<32x64xf32>
    %cst_458 = arith.constant dense<0.000000e+00> : vector<8x64xf32>
    %1165 = tpu.matmul %716, %1164, %cst_458 {dimension_numbers = #tpu.dot_dimension_numbers<[0], [0], [1], [1], [0, 1, 1, 1], [], []>} : vector<32x8xf32>, vector<32x64xf32>, vector<8x64xf32> -> vector<8x64xf32>
    %c1_459 = arith.constant 1 : index
    %c0_460 = arith.constant 0 : index
    %c0_461 = arith.constant 0 : index
    %1166 = vector.load %arg12[%c1_459, %c0_460, %c0_461] : memref<2x1x64xf32, #tpu.memory_space<vmem>>, vector<1x1x64xf32>
    %1167 = vector.shape_cast %1166 : vector<1x1x64xf32> to vector<1x64xf32>
    %1168 = vector.broadcast %1167 : vector<1x64xf32> to vector<8x64xf32>
    %1169 = arith.addf %1165, %1168 : vector<8x64xf32>
    %1170 = vector.extract_strided_slice %1169 {offsets = [0, 0], sizes = [8, 32], strides = [1, 1]} : vector<8x64xf32> to vector<8x32xf32>
    %1171 = vector.extract_strided_slice %1169 {offsets = [0, 32], sizes = [8, 32], strides = [1, 1]} : vector<8x64xf32> to vector<8x32xf32>
    %1172 = vector.extract_strided_slice %1162 {offsets = [0, 0], sizes = [8, 8], strides = [1, 1]} : vector<8x32xf32> to vector<8x8xf32>
    %1173 = vector.extract_strided_slice %1170 {offsets = [0, 0], sizes = [8, 8], strides = [1, 1]} : vector<8x32xf32> to vector<8x8xf32>
    %cst_462 = arith.constant dense<0.000000e+00> : vector<8x8xf32>
    %1174 = tpu.matmul %1172, %1173, %cst_462 {dimension_numbers = #tpu.dot_dimension_numbers<[1], [1], [0], [0], [0, 0, 1, 0], [], []>} : vector<8x8xf32>, vector<8x8xf32>, vector<8x8xf32> -> vector<8x8xf32>
    %cst_463 = arith.constant -1.000000e+04 : f32
    %1175 = vector.broadcast %cst_463 : f32 to vector<8x8xf32>
    %1176 = arith.select %723, %1174, %1175 : vector<8x8xi1>, vector<8x8xf32>
    %cst_464 = arith.constant dense<0xFF800000> : vector<8xf32>
    %1177 = vector.multi_reduction <maximumf>, %1176, %cst_464 [1] : vector<8x8xf32> to vector<8xf32>
    %1178 = vector.shape_cast %1177 : vector<8xf32> to vector<8x1xf32>
    %1179 = vector.broadcast %1178 : vector<8x1xf32> to vector<8x8xf32>
    %1180 = arith.subf %1176, %1179 : vector<8x8xf32>
    %1181 = math.exp %1180 : vector<8x8xf32>
    %cst_465 = arith.constant dense<0.000000e+00> : vector<8xf32>
    %1182 = vector.multi_reduction <add>, %1181, %cst_465 [1] : vector<8x8xf32> to vector<8xf32>
    %1183 = vector.shape_cast %1182 : vector<8xf32> to vector<8x1xf32>
    %1184 = vector.broadcast %1183 : vector<8x1xf32> to vector<8x8xf32>
    %1185 = arith.divf %1181, %1184 : vector<8x8xf32>
    %1186 = vector.extract_strided_slice %1171 {offsets = [0, 0], sizes = [8, 8], strides = [1, 1]} : vector<8x32xf32> to vector<8x8xf32>
    %cst_466 = arith.constant dense<0.000000e+00> : vector<8x8xf32>
    %1187 = tpu.matmul %1185, %1186, %cst_466 {dimension_numbers = #tpu.dot_dimension_numbers<[1], [0], [0], [1], [0, 0, 1, 1], [], []>} : vector<8x8xf32>, vector<8x8xf32>, vector<8x8xf32> -> vector<8x8xf32>
    %1188 = vector.extract_strided_slice %1162 {offsets = [0, 8], sizes = [8, 8], strides = [1, 1]} : vector<8x32xf32> to vector<8x8xf32>
    %1189 = vector.extract_strided_slice %1170 {offsets = [0, 8], sizes = [8, 8], strides = [1, 1]} : vector<8x32xf32> to vector<8x8xf32>
    %cst_467 = arith.constant dense<0.000000e+00> : vector<8x8xf32>
    %1190 = tpu.matmul %1188, %1189, %cst_467 {dimension_numbers = #tpu.dot_dimension_numbers<[1], [1], [0], [0], [0, 0, 1, 0], [], []>} : vector<8x8xf32>, vector<8x8xf32>, vector<8x8xf32> -> vector<8x8xf32>
    %cst_468 = arith.constant -1.000000e+04 : f32
    %1191 = vector.broadcast %cst_468 : f32 to vector<8x8xf32>
    %1192 = arith.select %723, %1190, %1191 : vector<8x8xi1>, vector<8x8xf32>
    %cst_469 = arith.constant dense<0xFF800000> : vector<8xf32>
    %1193 = vector.multi_reduction <maximumf>, %1192, %cst_469 [1] : vector<8x8xf32> to vector<8xf32>
    %1194 = vector.shape_cast %1193 : vector<8xf32> to vector<8x1xf32>
    %1195 = vector.broadcast %1194 : vector<8x1xf32> to vector<8x8xf32>
    %1196 = arith.subf %1192, %1195 : vector<8x8xf32>
    %1197 = math.exp %1196 : vector<8x8xf32>
    %cst_470 = arith.constant dense<0.000000e+00> : vector<8xf32>
    %1198 = vector.multi_reduction <add>, %1197, %cst_470 [1] : vector<8x8xf32> to vector<8xf32>
    %1199 = vector.shape_cast %1198 : vector<8xf32> to vector<8x1xf32>
    %1200 = vector.broadcast %1199 : vector<8x1xf32> to vector<8x8xf32>
    %1201 = arith.divf %1197, %1200 : vector<8x8xf32>
    %1202 = vector.extract_strided_slice %1171 {offsets = [0, 8], sizes = [8, 8], strides = [1, 1]} : vector<8x32xf32> to vector<8x8xf32>
    %cst_471 = arith.constant dense<0.000000e+00> : vector<8x8xf32>
    %1203 = tpu.matmul %1201, %1202, %cst_471 {dimension_numbers = #tpu.dot_dimension_numbers<[1], [0], [0], [1], [0, 0, 1, 1], [], []>} : vector<8x8xf32>, vector<8x8xf32>, vector<8x8xf32> -> vector<8x8xf32>
    %1204 = vector.extract_strided_slice %1162 {offsets = [0, 16], sizes = [8, 8], strides = [1, 1]} : vector<8x32xf32> to vector<8x8xf32>
    %1205 = vector.extract_strided_slice %1170 {offsets = [0, 16], sizes = [8, 8], strides = [1, 1]} : vector<8x32xf32> to vector<8x8xf32>
    %cst_472 = arith.constant dense<0.000000e+00> : vector<8x8xf32>
    %1206 = tpu.matmul %1204, %1205, %cst_472 {dimension_numbers = #tpu.dot_dimension_numbers<[1], [1], [0], [0], [0, 0, 1, 0], [], []>} : vector<8x8xf32>, vector<8x8xf32>, vector<8x8xf32> -> vector<8x8xf32>
    %cst_473 = arith.constant -1.000000e+04 : f32
    %1207 = vector.broadcast %cst_473 : f32 to vector<8x8xf32>
    %1208 = arith.select %723, %1206, %1207 : vector<8x8xi1>, vector<8x8xf32>
    %cst_474 = arith.constant dense<0xFF800000> : vector<8xf32>
    %1209 = vector.multi_reduction <maximumf>, %1208, %cst_474 [1] : vector<8x8xf32> to vector<8xf32>
    %1210 = vector.shape_cast %1209 : vector<8xf32> to vector<8x1xf32>
    %1211 = vector.broadcast %1210 : vector<8x1xf32> to vector<8x8xf32>
    %1212 = arith.subf %1208, %1211 : vector<8x8xf32>
    %1213 = math.exp %1212 : vector<8x8xf32>
    %cst_475 = arith.constant dense<0.000000e+00> : vector<8xf32>
    %1214 = vector.multi_reduction <add>, %1213, %cst_475 [1] : vector<8x8xf32> to vector<8xf32>
    %1215 = vector.shape_cast %1214 : vector<8xf32> to vector<8x1xf32>
    %1216 = vector.broadcast %1215 : vector<8x1xf32> to vector<8x8xf32>
    %1217 = arith.divf %1213, %1216 : vector<8x8xf32>
    %1218 = vector.extract_strided_slice %1171 {offsets = [0, 16], sizes = [8, 8], strides = [1, 1]} : vector<8x32xf32> to vector<8x8xf32>
    %cst_476 = arith.constant dense<0.000000e+00> : vector<8x8xf32>
    %1219 = tpu.matmul %1217, %1218, %cst_476 {dimension_numbers = #tpu.dot_dimension_numbers<[1], [0], [0], [1], [0, 0, 1, 1], [], []>} : vector<8x8xf32>, vector<8x8xf32>, vector<8x8xf32> -> vector<8x8xf32>
    %1220 = vector.extract_strided_slice %1162 {offsets = [0, 24], sizes = [8, 8], strides = [1, 1]} : vector<8x32xf32> to vector<8x8xf32>
    %1221 = vector.extract_strided_slice %1170 {offsets = [0, 24], sizes = [8, 8], strides = [1, 1]} : vector<8x32xf32> to vector<8x8xf32>
    %cst_477 = arith.constant dense<0.000000e+00> : vector<8x8xf32>
    %1222 = tpu.matmul %1220, %1221, %cst_477 {dimension_numbers = #tpu.dot_dimension_numbers<[1], [1], [0], [0], [0, 0, 1, 0], [], []>} : vector<8x8xf32>, vector<8x8xf32>, vector<8x8xf32> -> vector<8x8xf32>
    %cst_478 = arith.constant -1.000000e+04 : f32
    %1223 = vector.broadcast %cst_478 : f32 to vector<8x8xf32>
    %1224 = arith.select %723, %1222, %1223 : vector<8x8xi1>, vector<8x8xf32>
    %cst_479 = arith.constant dense<0xFF800000> : vector<8xf32>
    %1225 = vector.multi_reduction <maximumf>, %1224, %cst_479 [1] : vector<8x8xf32> to vector<8xf32>
    %1226 = vector.shape_cast %1225 : vector<8xf32> to vector<8x1xf32>
    %1227 = vector.broadcast %1226 : vector<8x1xf32> to vector<8x8xf32>
    %1228 = arith.subf %1224, %1227 : vector<8x8xf32>
    %1229 = math.exp %1228 : vector<8x8xf32>
    %cst_480 = arith.constant dense<0.000000e+00> : vector<8xf32>
    %1230 = vector.multi_reduction <add>, %1229, %cst_480 [1] : vector<8x8xf32> to vector<8xf32>
    %1231 = vector.shape_cast %1230 : vector<8xf32> to vector<8x1xf32>
    %1232 = vector.broadcast %1231 : vector<8x1xf32> to vector<8x8xf32>
    %1233 = arith.divf %1229, %1232 : vector<8x8xf32>
    %1234 = vector.extract_strided_slice %1171 {offsets = [0, 24], sizes = [8, 8], strides = [1, 1]} : vector<8x32xf32> to vector<8x8xf32>
    %cst_481 = arith.constant dense<0.000000e+00> : vector<8x8xf32>
    %1235 = tpu.matmul %1233, %1234, %cst_481 {dimension_numbers = #tpu.dot_dimension_numbers<[1], [0], [0], [1], [0, 0, 1, 1], [], []>} : vector<8x8xf32>, vector<8x8xf32>, vector<8x8xf32> -> vector<8x8xf32>
    %1236 = tpu.concatenate %1187, %1203, %1219, %1235 in 1 : vector<8x8xf32>, vector<8x8xf32>, vector<8x8xf32>, vector<8x8xf32> -> vector<8x32xf32>
    %c1_482 = arith.constant 1 : index
    %c0_483 = arith.constant 0 : index
    %c0_484 = arith.constant 0 : index
    %1237 = vector.load %arg14[%c1_482, %c0_483, %c0_484] : memref<2x3x32xf32, #tpu.memory_space<vmem>>, vector<1x3x32xf32>
    %1238 = vector.shape_cast %1237 : vector<1x3x32xf32> to vector<3x32xf32>
    %c1_485 = arith.constant 1 : index
    %c0_486 = arith.constant 0 : index
    %c0_487 = arith.constant 0 : index
    %1239 = vector.load %arg13[%c1_485, %c0_486, %c0_487] : memref<2x32x32xf32, #tpu.memory_space<vmem>>, vector<1x32x32xf32>
    %1240 = vector.shape_cast %1239 : vector<1x32x32xf32> to vector<32x32xf32>
    %cst_488 = arith.constant dense<0.000000e+00> : vector<8x32xf32>
    %1241 = tpu.matmul %1236, %1240, %cst_488 {dimension_numbers = #tpu.dot_dimension_numbers<[1], [0], [0], [1], [0, 0, 1, 1], [], []>} : vector<8x32xf32>, vector<32x32xf32>, vector<8x32xf32> -> vector<8x32xf32>
    %1242 = vector.extract_strided_slice %1238 {offsets = [0, 0], sizes = [1, 32], strides = [1, 1]} : vector<3x32xf32> to vector<1x32xf32>
    %1243 = vector.broadcast %1242 : vector<1x32xf32> to vector<8x32xf32>
    %1244 = arith.addf %1241, %1243 : vector<8x32xf32>
    %1245 = arith.addf %1155, %1244 : vector<8x32xf32>
    %1246 = vector.extract_strided_slice %1238 {offsets = [1, 0], sizes = [1, 32], strides = [1, 1]} : vector<3x32xf32> to vector<1x32xf32>
    %1247 = vector.extract_strided_slice %1238 {offsets = [2, 0], sizes = [1, 32], strides = [1, 1]} : vector<3x32xf32> to vector<1x32xf32>
    %cst_489 = arith.constant dense<0.000000e+00> : vector<8xf32>
    %1248 = vector.multi_reduction <add>, %1245, %cst_489 [1] : vector<8x32xf32> to vector<8xf32>
    %1249 = vector.shape_cast %1248 : vector<8xf32> to vector<8x1xf32>
    %cst_490 = arith.constant 3.200000e+01 : f32
    %1250 = vector.broadcast %cst_490 : f32 to vector<8x1xf32>
    %1251 = arith.divf %1249, %1250 : vector<8x1xf32>
    %1252 = vector.broadcast %1251 : vector<8x1xf32> to vector<8x32xf32>
    %1253 = arith.subf %1245, %1252 : vector<8x32xf32>
    %1254 = arith.mulf %1253, %1253 : vector<8x32xf32>
    %cst_491 = arith.constant dense<0.000000e+00> : vector<8xf32>
    %1255 = vector.multi_reduction <add>, %1254, %cst_491 [1] : vector<8x32xf32> to vector<8xf32>
    %1256 = vector.shape_cast %1255 : vector<8xf32> to vector<8x1xf32>
    %cst_492 = arith.constant 3.200000e+01 : f32
    %1257 = vector.broadcast %cst_492 : f32 to vector<8x1xf32>
    %1258 = arith.divf %1256, %1257 : vector<8x1xf32>
    %1259 = vector.broadcast %1251 : vector<8x1xf32> to vector<8x32xf32>
    %1260 = arith.subf %1245, %1259 : vector<8x32xf32>
    %cst_493 = arith.constant 9.99999974E-6 : f32
    %1261 = vector.broadcast %cst_493 : f32 to vector<8x1xf32>
    %1262 = arith.addf %1258, %1261 : vector<8x1xf32>
    %1263 = math.rsqrt %1262 : vector<8x1xf32>
    %1264 = vector.broadcast %1263 : vector<8x1xf32> to vector<8x32xf32>
    %1265 = arith.mulf %1260, %1264 : vector<8x32xf32>
    %1266 = vector.broadcast %1246 : vector<1x32xf32> to vector<8x32xf32>
    %1267 = arith.mulf %1265, %1266 : vector<8x32xf32>
    %1268 = vector.broadcast %1247 : vector<1x32xf32> to vector<8x32xf32>
    %1269 = arith.addf %1267, %1268 : vector<8x32xf32>
    %1270 = vector.broadcast %700 : vector<8x1xf32> to vector<8x32xf32>
    %1271 = arith.mulf %1269, %1270 : vector<8x32xf32>
    %c1_494 = arith.constant 1 : index
    %c0_495 = arith.constant 0 : index
    %c0_496 = arith.constant 0 : index
    %1272 = vector.load %arg15[%c1_494, %c0_495, %c0_496] : memref<2x32x128xf32, #tpu.memory_space<vmem>>, vector<1x32x128xf32>
    %1273 = vector.shape_cast %1272 : vector<1x32x128xf32> to vector<32x128xf32>
    %cst_497 = arith.constant dense<0.000000e+00> : vector<8x128xf32>
    %1274 = tpu.matmul %1271, %1273, %cst_497 {dimension_numbers = #tpu.dot_dimension_numbers<[1], [0], [0], [1], [0, 0, 1, 1], [], []>} : vector<8x32xf32>, vector<32x128xf32>, vector<8x128xf32> -> vector<8x128xf32>
    %c1_498 = arith.constant 1 : index
    %c0_499 = arith.constant 0 : index
    %c0_500 = arith.constant 0 : index
    %1275 = vector.load %arg16[%c1_498, %c0_499, %c0_500] : memref<2x1x128xf32, #tpu.memory_space<vmem>>, vector<1x1x128xf32>
    %1276 = vector.shape_cast %1275 : vector<1x1x128xf32> to vector<1x128xf32>
    %1277 = vector.broadcast %1276 : vector<1x128xf32> to vector<8x128xf32>
    %1278 = arith.addf %1274, %1277 : vector<8x128xf32>
    %cst_501 = arith.constant 5.000000e-01 : f32
    %1279 = vector.broadcast %cst_501 : f32 to vector<8x128xf32>
    %1280 = arith.mulf %1279, %1278 : vector<8x128xf32>
    %cst_502 = arith.constant 0.707106769 : f32
    %1281 = vector.broadcast %cst_502 : f32 to vector<8x128xf32>
    %1282 = arith.mulf %1278, %1281 : vector<8x128xf32>
    %1283 = math.absf %1282 : vector<8x128xf32>
    %cst_503 = arith.constant 5.000000e-01 : f32
    %1284 = vector.broadcast %cst_503 : f32 to vector<8x128xf32>
    %1285 = arith.mulf %1284, %1283 : vector<8x128xf32>
    %cst_504 = arith.constant 1.000000e+00 : f32
    %1286 = vector.broadcast %cst_504 : f32 to vector<8x128xf32>
    %1287 = arith.addf %1286, %1285 : vector<8x128xf32>
    %cst_505 = arith.constant 1.000000e+00 : f32
    %1288 = vector.broadcast %cst_505 : f32 to vector<8x128xf32>
    %1289 = arith.divf %1288, %1287 : vector<8x128xf32>
    %cst_506 = arith.constant 0.170872763 : f32
    %1290 = vector.broadcast %cst_506 : f32 to vector<8x128xf32>
    %1291 = arith.mulf %1289, %1290 : vector<8x128xf32>
    %cst_507 = arith.constant -0.822152256 : f32
    %1292 = vector.broadcast %cst_507 : f32 to vector<8x128xf32>
    %1293 = arith.addf %1292, %1291 : vector<8x128xf32>
    %1294 = arith.mulf %1289, %1293 : vector<8x128xf32>
    %cst_508 = arith.constant 1.48851585 : f32
    %1295 = vector.broadcast %cst_508 : f32 to vector<8x128xf32>
    %1296 = arith.addf %1295, %1294 : vector<8x128xf32>
    %1297 = arith.mulf %1289, %1296 : vector<8x128xf32>
    %cst_509 = arith.constant -1.13520396 : f32
    %1298 = vector.broadcast %cst_509 : f32 to vector<8x128xf32>
    %1299 = arith.addf %1298, %1297 : vector<8x128xf32>
    %1300 = arith.mulf %1289, %1299 : vector<8x128xf32>
    %cst_510 = arith.constant 0.278868079 : f32
    %1301 = vector.broadcast %cst_510 : f32 to vector<8x128xf32>
    %1302 = arith.addf %1301, %1300 : vector<8x128xf32>
    %1303 = arith.mulf %1289, %1302 : vector<8x128xf32>
    %cst_511 = arith.constant -0.186288059 : f32
    %1304 = vector.broadcast %cst_511 : f32 to vector<8x128xf32>
    %1305 = arith.addf %1304, %1303 : vector<8x128xf32>
    %1306 = arith.mulf %1289, %1305 : vector<8x128xf32>
    %cst_512 = arith.constant 0.0967841818 : f32
    %1307 = vector.broadcast %cst_512 : f32 to vector<8x128xf32>
    %1308 = arith.addf %1307, %1306 : vector<8x128xf32>
    %1309 = arith.mulf %1289, %1308 : vector<8x128xf32>
    %cst_513 = arith.constant 0.374091953 : f32
    %1310 = vector.broadcast %cst_513 : f32 to vector<8x128xf32>
    %1311 = arith.addf %1310, %1309 : vector<8x128xf32>
    %1312 = arith.mulf %1289, %1311 : vector<8x128xf32>
    %cst_514 = arith.constant 1.00002372 : f32
    %1313 = vector.broadcast %cst_514 : f32 to vector<8x128xf32>
    %1314 = arith.addf %1313, %1312 : vector<8x128xf32>
    %1315 = arith.mulf %1289, %1314 : vector<8x128xf32>
    %cst_515 = arith.constant -1.26551223 : f32
    %1316 = vector.broadcast %cst_515 : f32 to vector<8x128xf32>
    %1317 = arith.addf %1316, %1315 : vector<8x128xf32>
    %cst_516 = arith.constant 0.000000e+00 : f32
    %1318 = vector.broadcast %cst_516 : f32 to vector<8x128xf32>
    %1319 = arith.subf %1318, %1283 : vector<8x128xf32>
    %1320 = arith.mulf %1319, %1283 : vector<8x128xf32>
    %1321 = arith.addf %1320, %1317 : vector<8x128xf32>
    %1322 = math.exp %1321 : vector<8x128xf32>
    %1323 = arith.mulf %1289, %1322 : vector<8x128xf32>
    %cst_517 = arith.constant 0.000000e+00 : f32
    %1324 = vector.broadcast %cst_517 : f32 to vector<8x128xf32>
    %1325 = arith.cmpf oge, %1282, %1324 : vector<8x128xf32>
    %cst_518 = arith.constant 1.000000e+00 : f32
    %cst_519 = arith.constant -1.000000e+00 : f32
    %1326 = vector.broadcast %cst_518 : f32 to vector<8x128xf32>
    %1327 = vector.broadcast %cst_519 : f32 to vector<8x128xf32>
    %1328 = arith.select %1325, %1326, %1327 : vector<8x128xi1>, vector<8x128xf32>
    %cst_520 = arith.constant 1.000000e+00 : f32
    %1329 = vector.broadcast %cst_520 : f32 to vector<8x128xf32>
    %1330 = arith.subf %1329, %1323 : vector<8x128xf32>
    %1331 = arith.mulf %1328, %1330 : vector<8x128xf32>
    %cst_521 = arith.constant 1.000000e+00 : f32
    %1332 = vector.broadcast %cst_521 : f32 to vector<8x128xf32>
    %1333 = arith.addf %1332, %1331 : vector<8x128xf32>
    %1334 = arith.mulf %1280, %1333 : vector<8x128xf32>
    %c1_522 = arith.constant 1 : index
    %c0_523 = arith.constant 0 : index
    %c0_524 = arith.constant 0 : index
    %1335 = vector.load %arg18[%c1_522, %c0_523, %c0_524] : memref<2x3x32xf32, #tpu.memory_space<vmem>>, vector<1x3x32xf32>
    %1336 = vector.shape_cast %1335 : vector<1x3x32xf32> to vector<3x32xf32>
    %1337 = vector.broadcast %700 : vector<8x1xf32> to vector<8x128xf32>
    %1338 = arith.mulf %1334, %1337 : vector<8x128xf32>
    %c1_525 = arith.constant 1 : index
    %c0_526 = arith.constant 0 : index
    %c0_527 = arith.constant 0 : index
    %1339 = vector.load %arg17[%c1_525, %c0_526, %c0_527] : memref<2x128x32xf32, #tpu.memory_space<vmem>>, vector<1x128x32xf32>
    %1340 = vector.shape_cast %1339 : vector<1x128x32xf32> to vector<128x32xf32>
    %cst_528 = arith.constant dense<0.000000e+00> : vector<8x32xf32>
    %1341 = tpu.matmul %1338, %1340, %cst_528 {dimension_numbers = #tpu.dot_dimension_numbers<[1], [0], [0], [1], [0, 0, 1, 1], [], []>} : vector<8x128xf32>, vector<128x32xf32>, vector<8x32xf32> -> vector<8x32xf32>
    %1342 = vector.extract_strided_slice %1336 {offsets = [0, 0], sizes = [1, 32], strides = [1, 1]} : vector<3x32xf32> to vector<1x32xf32>
    %1343 = vector.broadcast %1342 : vector<1x32xf32> to vector<8x32xf32>
    %1344 = arith.addf %1341, %1343 : vector<8x32xf32>
    %1345 = vector.broadcast %700 : vector<8x1xf32> to vector<8x32xf32>
    %1346 = arith.mulf %1344, %1345 : vector<8x32xf32>
    %1347 = arith.addf %1269, %1346 : vector<8x32xf32>
    %1348 = vector.extract_strided_slice %1336 {offsets = [1, 0], sizes = [1, 32], strides = [1, 1]} : vector<3x32xf32> to vector<1x32xf32>
    %1349 = vector.extract_strided_slice %1336 {offsets = [2, 0], sizes = [1, 32], strides = [1, 1]} : vector<3x32xf32> to vector<1x32xf32>
    %cst_529 = arith.constant dense<0.000000e+00> : vector<8xf32>
    %1350 = vector.multi_reduction <add>, %1347, %cst_529 [1] : vector<8x32xf32> to vector<8xf32>
    %1351 = vector.shape_cast %1350 : vector<8xf32> to vector<8x1xf32>
    %cst_530 = arith.constant 3.200000e+01 : f32
    %1352 = vector.broadcast %cst_530 : f32 to vector<8x1xf32>
    %1353 = arith.divf %1351, %1352 : vector<8x1xf32>
    %1354 = vector.broadcast %1353 : vector<8x1xf32> to vector<8x32xf32>
    %1355 = arith.subf %1347, %1354 : vector<8x32xf32>
    %1356 = arith.mulf %1355, %1355 : vector<8x32xf32>
    %cst_531 = arith.constant dense<0.000000e+00> : vector<8xf32>
    %1357 = vector.multi_reduction <add>, %1356, %cst_531 [1] : vector<8x32xf32> to vector<8xf32>
    %1358 = vector.shape_cast %1357 : vector<8xf32> to vector<8x1xf32>
    %cst_532 = arith.constant 3.200000e+01 : f32
    %1359 = vector.broadcast %cst_532 : f32 to vector<8x1xf32>
    %1360 = arith.divf %1358, %1359 : vector<8x1xf32>
    %1361 = vector.broadcast %1353 : vector<8x1xf32> to vector<8x32xf32>
    %1362 = arith.subf %1347, %1361 : vector<8x32xf32>
    %cst_533 = arith.constant 9.99999974E-6 : f32
    %1363 = vector.broadcast %cst_533 : f32 to vector<8x1xf32>
    %1364 = arith.addf %1360, %1363 : vector<8x1xf32>
    %1365 = math.rsqrt %1364 : vector<8x1xf32>
    %1366 = vector.broadcast %1365 : vector<8x1xf32> to vector<8x32xf32>
    %1367 = arith.mulf %1362, %1366 : vector<8x32xf32>
    %1368 = vector.broadcast %1348 : vector<1x32xf32> to vector<8x32xf32>
    %1369 = arith.mulf %1367, %1368 : vector<8x32xf32>
    %1370 = vector.broadcast %1349 : vector<1x32xf32> to vector<8x32xf32>
    %1371 = arith.addf %1369, %1370 : vector<8x32xf32>
    %1372 = vector.broadcast %700 : vector<8x1xf32> to vector<8x32xf32>
    %1373 = arith.mulf %1371, %1372 : vector<8x32xf32>
    %1374 = tpu.transpose %1373, [1, 0] : vector<8x32xf32> -> vector<32x8xf32>
    %c1_534 = arith.constant 1 : index
    %c0_535 = arith.constant 0 : index
    %c0_536 = arith.constant 0 : index
    %1375 = vector.load %arg19[%c1_534, %c0_535, %c0_536] : memref<2x32x8xf32, #tpu.memory_space<vmem>>, vector<1x32x8xf32>
    %1376 = vector.shape_cast %1375 : vector<1x32x8xf32> to vector<32x8xf32>
    %1377 = vector.shape_cast %1374 : vector<32x8xf32> to vector<1x32x8xf32>
    tpu.vector_store %arg19[%c1_534, %c0_535, %c0_536], %1377 {strides = array<i32>} : memref<2x32x8xf32, #tpu.memory_space<vmem>>, vector<1x32x8xf32>,
    return
  }
  func.func @transform_0(%arg0: i32) -> (i32, i32, i32) {
    %c0_i32 = arith.constant 0 : i32
    %c0_i32_0 = arith.constant 0 : i32
    %c0_i32_1 = arith.constant 0 : i32
    %c0_i32_2 = arith.constant 0 : i32
    return %c0_i32, %c0_i32_0, %c0_i32_1 : i32, i32, i32
  }
  func.func @transform_1(%arg0: i32) -> (i32, i32, i32) {
    %c0_i32 = arith.constant 0 : i32
    %c0_i32_0 = arith.constant 0 : i32
    %c0_i32_1 = arith.constant 0 : i32
    %c0_i32_2 = arith.constant 0 : i32
    return %c0_i32, %c0_i32_0, %c0_i32_1 : i32, i32, i32
  }
  func.func @transform_2(%arg0: i32) -> (i32, i32, i32) {
    %c0_i32 = arith.constant 0 : i32
    %c0_i32_0 = arith.constant 0 : i32
    %c0_i32_1 = arith.constant 0 : i32
    %c0_i32_2 = arith.constant 0 : i32
    return %c0_i32, %c0_i32_0, %c0_i32_1 : i32, i32, i32
  }
  func.func @transform_3(%arg0: i32) -> (i32, i32, i32) {
    %c0_i32 = arith.constant 0 : i32
    %c0_i32_0 = arith.constant 0 : i32
    %c0_i32_1 = arith.constant 0 : i32
    %c0_i32_2 = arith.constant 0 : i32
    return %c0_i32, %c0_i32_0, %c0_i32_1 : i32, i32, i32
  }
  func.func @transform_4(%arg0: i32) -> (i32, i32, i32) {
    %c0_i32 = arith.constant 0 : i32
    %c0_i32_0 = arith.constant 0 : i32
    %c0_i32_1 = arith.constant 0 : i32
    %c0_i32_2 = arith.constant 0 : i32
    return %c0_i32, %c0_i32_0, %c0_i32_1 : i32, i32, i32
  }
  func.func @transform_5(%arg0: i32) -> (i32, i32, i32) {
    %c0_i32 = arith.constant 0 : i32
    %c0_i32_0 = arith.constant 0 : i32
    %c0_i32_1 = arith.constant 0 : i32
    %c0_i32_2 = arith.constant 0 : i32
    return %c0_i32, %c0_i32_0, %c0_i32_1 : i32, i32, i32
  }
  func.func @transform_6(%arg0: i32) -> (i32, i32, i32) {
    %c0_i32 = arith.constant 0 : i32
    %c0_i32_0 = arith.constant 0 : i32
    %c0_i32_1 = arith.constant 0 : i32
    %c0_i32_2 = arith.constant 0 : i32
    return %c0_i32, %c0_i32_0, %c0_i32_1 : i32, i32, i32
  }
  func.func @transform_7(%arg0: i32) -> (i32, i32, i32) {
    %c0_i32 = arith.constant 0 : i32
    %c0_i32_0 = arith.constant 0 : i32
    %c0_i32_1 = arith.constant 0 : i32
    %c0_i32_2 = arith.constant 0 : i32
    return %c0_i32, %c0_i32_0, %c0_i32_1 : i32, i32, i32
  }
  func.func @transform_8(%arg0: i32) -> (i32, i32, i32) {
    %c0_i32 = arith.constant 0 : i32
    %c0_i32_0 = arith.constant 0 : i32
    %c0_i32_1 = arith.constant 0 : i32
    %c0_i32_2 = arith.constant 0 : i32
    return %c0_i32, %c0_i32_0, %c0_i32_1 : i32, i32, i32
  }
  func.func @transform_9(%arg0: i32) -> (i32, i32, i32) {
    %c0_i32 = arith.constant 0 : i32
    %c0_i32_0 = arith.constant 0 : i32
    %c0_i32_1 = arith.constant 0 : i32
    %c0_i32_2 = arith.constant 0 : i32
    return %c0_i32, %c0_i32_0, %c0_i32_1 : i32, i32, i32
  }
  func.func @transform_10(%arg0: i32) -> (i32, i32, i32) {
    %c0_i32 = arith.constant 0 : i32
    %c0_i32_0 = arith.constant 0 : i32
    %c0_i32_1 = arith.constant 0 : i32
    %c0_i32_2 = arith.constant 0 : i32
    return %c0_i32, %c0_i32_0, %c0_i32_1 : i32, i32, i32
  }
  func.func @transform_11(%arg0: i32) -> (i32, i32, i32) {
    %c0_i32 = arith.constant 0 : i32
    %c0_i32_0 = arith.constant 0 : i32
    %c0_i32_1 = arith.constant 0 : i32
    %c0_i32_2 = arith.constant 0 : i32
    return %c0_i32, %c0_i32_0, %c0_i32_1 : i32, i32, i32
  }
  func.func @transform_12(%arg0: i32) -> (i32, i32, i32) {
    %c0_i32 = arith.constant 0 : i32
    %c0_i32_0 = arith.constant 0 : i32
    %c0_i32_1 = arith.constant 0 : i32
    %c0_i32_2 = arith.constant 0 : i32
    return %c0_i32, %c0_i32_0, %c0_i32_1 : i32, i32, i32
  }
  func.func @transform_13(%arg0: i32) -> (i32, i32, i32) {
    %c0_i32 = arith.constant 0 : i32
    %c0_i32_0 = arith.constant 0 : i32
    %c0_i32_1 = arith.constant 0 : i32
    %c0_i32_2 = arith.constant 0 : i32
    return %c0_i32, %c0_i32_0, %c0_i32_1 : i32, i32, i32
  }
  func.func @transform_14(%arg0: i32) -> (i32, i32, i32) {
    %c0_i32 = arith.constant 0 : i32
    %c0_i32_0 = arith.constant 0 : i32
    %c0_i32_1 = arith.constant 0 : i32
    %c0_i32_2 = arith.constant 0 : i32
    return %c0_i32, %c0_i32_0, %c0_i32_1 : i32, i32, i32
  }
  func.func @transform_15(%arg0: i32) -> (i32, i32, i32) {
    %c0_i32 = arith.constant 0 : i32
    %c0_i32_0 = arith.constant 0 : i32
    %c0_i32_1 = arith.constant 0 : i32
    %c0_i32_2 = arith.constant 0 : i32
    return %c0_i32, %c0_i32_0, %c0_i32_1 : i32, i32, i32
  }
  func.func @transform_16(%arg0: i32) -> (i32, i32, i32) {
    %c0_i32 = arith.constant 0 : i32
    %c0_i32_0 = arith.constant 0 : i32
    %c0_i32_1 = arith.constant 0 : i32
    %c0_i32_2 = arith.constant 0 : i32
    return %c0_i32, %c0_i32_0, %c0_i32_1 : i32, i32, i32
  }
  func.func @transform_17(%arg0: i32) -> (i32, i32, i32) {
    %c0_i32 = arith.constant 0 : i32
    %c0_i32_0 = arith.constant 0 : i32
    %c0_i32_1 = arith.constant 0 : i32
    %c0_i32_2 = arith.constant 0 : i32
    return %c0_i32, %c0_i32_0, %c0_i32_1 : i32, i32, i32
  }
  func.func @transform_18(%arg0: i32) -> (i32, i32, i32) {
    %c0_i32 = arith.constant 0 : i32
    %c0_i32_0 = arith.constant 0 : i32
    %c0_i32_1 = arith.constant 0 : i32
    %c0_i32_2 = arith.constant 0 : i32
    return %c0_i32, %c0_i32_0, %c0_i32_1 : i32, i32, i32
  }
}

</mosaic_0001>

<bundles_post_ra>
// kernel: transformer_decoder.1
= control target key start
LH: loop header
LB: loop body
LE: loop exit
PB: predicated region body
PF: predicated region fallthrough
CT: control target
= control target key end

     0   :  { %v59_v0 = vlaneseq  ;;  %v10338_v1 = vmov 0.0|0.0   ;;  %v10339_v2 = vmov 0.0   ;;  %vm10340_vm0 = vmmov 0   ;;  %s12208_s23 = smov 96   ;;  %s12190_s24 = smov 88   ;;  %s12160_s2 = inlined_call_operand.vmem [shape: f32[2,1,8], index: 2, kind: input, shape index: {}]   ;;  %s12161_s4 = inlined_call_operand.vmem [shape: f32[2,32,96], index: 4, kind: input, shape index: {}]   ;;  %s12162_s0 = inlined_call_operand.vmem [shape: f32[2,32,8], index: 0, kind: input, shape index: {}]   ;;  %s12163_s5 = inlined_call_operand.vmem [shape: f32[2,1,96], index: 5, kind: input, shape index: {}]   ;;  %s12164_s6 = inlined_call_operand.vmem [shape: f32[2,32,32], index: 6, kind: input, shape index: {}]   ;;  %s12165_s7 = inlined_call_operand.vmem [shape: f32[2,3,32], index: 7, kind: input, shape index: {}]   ;;  %s12166_s10 = inlined_call_operand.vmem [shape: f32[2,32,64], index: 10, kind: input, shape index: {}]   ;;  %s12167_s3 = inlined_call_operand.vmem [shape: f32[2,1,8], index: 3, kind: input, shape index: {}]   ;;  %s12168_s1 = inlined_call_operand.vmem [shape: f32[2,32,8], index: 1, kind: input, shape index: {}]   ;;  %s12169_s8 = inlined_call_operand.vmem [shape: f32[2,32,32], index: 8, kind: input, shape index: {}]   ;;  %s12170_s11 = inlined_call_operand.vmem [shape: f32[2,1,64], index: 11, kind: input, shape index: {}]   ;;  %s12171_s9 = inlined_call_operand.vmem [shape: f32[2,1,32], index: 9, kind: input, shape index: {}]   ;;  %s12172_s12 = inlined_call_operand.vmem [shape: f32[2,32,32], index: 12, kind: input, shape index: {}]   ;;  %s12173_s13 = inlined_call_operand.vmem [shape: f32[2,3,32], index: 13, kind: input, shape index: {}]   ;;  %s12174_s14 = inlined_call_operand.vmem [shape: f32[2,32,128], index: 14, kind: input, shape index: {}]   ;;  %s12175_s16 = inlined_call_operand.vmem [shape: f32[2,128,32], index: 16, kind: input, shape index: {}]   ;;  %s12176_s15 = inlined_call_operand.vmem [shape: f32[2,1,128], index: 15, kind: input, shape index: {}]   ;;  %s12177_s17 = inlined_call_operand.vmem [shape: f32[2,3,32], index: 17, kind: input, shape index: {}]   ;;  %s12178_s18 = inlined_call_operand.vmem [shape: f32[2,32,8], index: 18, kind: output, shape index: {}]  }
   0x1   :  { %12223 = sst [smem:[#allocation2_spill]] %s12160_s2  ;;  %9911 = vmatprep.subr.bf16.mxu1 %v10338_v1  ;;  %9208 = vmatprep.subr.mxu0 %v10339_v2  ;;  %vm162_vm1 = vcmask 261120   ;;  %v8627_v22 = vld [vmem:[%s12163_s5] ss:$0 sm:$0xff]  ;;  %s12206_s25 = smov 120   ;;  %vm72_vm2 = vcmask 64512  }
   0x2   :  { %12224 = sst [smem:[#allocation3_spill]] %s12161_s4  ;;  %v10455_v3 = vshrl.u32 %v59_v0, 7  ;;  %s12234_s29 = sld [smem:[#allocation2_spill]]  ;;  %9195 = vmatprep.mubr.msk.f32.mxu1 %vm10340_vm0, %v10339_v2  ;;  %9210 = vmatprep.mubr.msk.f32.mxu0 %vm10340_vm0, %v10339_v2  ;;  %v10348_v33 = vmov 0   ;;  %v10553_v36 = vand.u32 127, %v59_v0  ;;  %vm912_vm7 = vcmask 130048  }
   0x3   :  { %12225 = sst [smem:[#allocation4_spill]] %s12162_s0  ;;  %s12235_s19 = sld [smem:[#allocation3_spill]]  ;;  %vm914_vm8 = vcmask 195584  }
   0x4   :  { %12226 = sst [smem:[#allocation5_spill]] %s12163_s5  ;;  %v10476_v8 = vsub.s32 0, %v10455_v3  ;;  %s12236_s26 = sld [smem:[#allocation4_spill]]  ;;  %vm76_vm5 = vcmp.le.s32.totalorder %v10553_v36, %v10455_v3  ;;  %vm64_vm9 = vcmp.eq.s32.totalorder %v10455_v3, %v10553_v36 }
   0x5   :  { %12227 = sst [smem:[#allocation6_spill]] %s12165_s7  ;;  %s12204_s0 = smov 112  }
   0x6   :  { %12228 = sst [smem:[#allocation7_spill]] %s12166_s10  ;;  %s12194_s27 = smov 80  }
   0x7   :  { %12229 = sst [smem:[#allocation8_spill]] %s12167_s3  ;;  %s12192_s28 = smov 72  }
   0x8   :  { %12230 = sst [smem:[#allocation9_spill]] %s12168_s1  ;;  %v10460_v4 = vld [vmem:[%s12234_s29] sm:$0x1]  ;;  %s12202_s30 = smov 104  }
   0x9   :  { %12231 = sst [smem:[#allocation10_spill]] %s12176_s15  ;;  %v151_v5 = vld [vmem:[%s12235_s19] sm:$0xff]  ;;  %v152_v6 = vld [vmem:[%s12235_s19 + $0x8] sm:$0xff]  ;;  %v153_v7 = vld [vmem:[%s12235_s19 + $0x10] sm:$0xff]  ;;  %v10486_v12 = vrot.slane %v10460_v4, %v10476_v8  ;;  %vm77_vm3 = vcmp.ne.f32.partialorder %v10460_v4, 0.0  ;;  %s12186_s2 = smov 56  }
   0xa   :  { %12232 = sst [smem:[#allocation11_spill]] %s12177_s17  ;;  %v9912_v9 = vpack.c.bf16 %v152_v6, %v151_v5  ;;  %v154_v10 = vld [vmem:[%s12235_s19 + $0x18] sm:$0xff]  ;;  %v85_v11 = vld [vmem:[%s12236_s26] sm:$0xff]  ;;  %v86_v14 = vld [vmem:[%s12236_s26 + $0x8] sm:$0xff]  ;;  %v78_v34 = vsel %vm77_vm3, 1, %v10348_v33  ;;  %s12188_s4 = smov 64  }
   0xb   :  { %12233 = sst [smem:[#allocation12_spill]] %s12178_s18  ;;  %v9915_v13 = vpack.c.bf16 %v154_v10, %v153_v7  ;;  %v89_v15 = vmul.f32 %v85_v11, %v10486_v12  ;;  %v90_v16 = vmul.f32 %v86_v14, %v10486_v12  ;;  %v87_v17 = vld [vmem:[%s12236_s26 + $0x10] sm:$0xff]  ;;  %v88_v19 = vld [vmem:[%s12236_s26 + $0x18] sm:$0xff]  ;;  %v82_v35 = vrot.slane %v78_v34, %v10476_v8  ;;  %s12184_s20 = smov 48   ;;  %v918_v34 = vld [vmem:[%s12164_s6 + $0x8] sm:$0xff] }
   0xc   :  { %9913 = vmatpush3.bf16.msra.mxu1 %v9912_v9  ;;  %v91_v18 = vmul.f32 %v87_v17, %v10486_v12  ;;  %v92_v20 = vmul.f32 %v88_v19, %v10486_v12  ;;  %s12182_s21 = smov 40   ;;  %s12246_s22 = smov 24  }
   0xd   :  { %9914 = vmatprep.subr.bf16.mxu1 %v10338_v1  ;;  %93 = vxpose.xlu0.b32.start [1/4] (short) (narrow) %v89_v15, 8  ;;  %vm83_vm4 = vcmp.eq.s32.totalorder %v82_v35, 1  ;;  %s12250_s18 = smov 112  }
   0xe   :  { %vm10560_vm6 = vmor %vm76_vm5, %vm83_vm4 }
  0x10   :  { %9916 = vmatpush3.bf16.msra.mxu1 %v9915_v13 }
  0x11   :  { %9198 = vmatprep.subr.mxu1 %v10339_v2  ;;  %94 = vxpose.xlu0.b32.cont [2/4] (short) (narrow) %v90_v16, 8 }
  0x15   :  { %95 = vxpose.xlu0.b32.cont [3/4] (short) (narrow) %v91_v18, 8 }
  0x19   :  { %96 = vxpose.xlu0.b32.end [4/4] (short) (narrow) %v92_v20, 8 }
  0x8d   :  { %v10503_v21 = vpop.trf.xlu0 }
  0x8e   :  { %9196 = vmatmul.mubr.msk.f32.vlgmr.msra.gmra.mrb[0].mxu1 %vm162_vm1, %v10503_v21 }
  0x8f   :  { %9200 = vmatprep.mubr.msk.f32.mxu1 %vm10340_vm0, %v10339_v2 }
 0x161   :  { %v232_v23 = vpop.f32.mrb[0].mxu1 }
 0x162   :  { %v10512_v24 = vadd.f32 %v8627_v22, %v232_v23  ;;  %v9197_v25 = vpop.f32.mrb[1].mxu1 }
 0x164   :  { %567 = vrot.lane.b32.xlu0 %v10512_v24, %s12204_s0  ;;  %237 = vrot.lane.b32.xlu1 %v10512_v24, %s12208_s23 }
 0x168   :  { %403 = vrot.lane.b32.xlu1 %v10512_v24, %s12190_s24  ;;  %s12196_s24 = smov 24  }
 0x16c   :  { %401 = vrot.lane.b32.xlu1 %v10512_v24, %s12206_s25 }
 0x170   :  { %569 = vrot.lane.b32.xlu1 %v10512_v24, %s12194_s27  ;;  %s12241_s27 = smov 80  }
 0x174   :  { %735 = vrot.lane.b32.xlu1 %v10512_v24, %s12192_s28  ;;  %s12242_s28 = smov 72  }
 0x178   :  { %733 = vrot.lane.b32.xlu1 %v10512_v24, %s12202_s30 }
 0x1d6   :  { %v238_v26 = vpop.permute.xlu1 %237  ;;  %v568_v30 = vpop.permute.xlu0 %567 }
 0x1d7   :  { %9199 = vmatpush3.xpose.msk.msra.mxu1 %vm72_vm2, %v238_v26 }
 0x1d8   :  { %9203 = vmatprep.subr.mxu1 %v10339_v2 }
 0x1da   :  { %9201 = vmatmul.mubr.msk.f32.vlgmr.msra.gmra.mrb[2].mxu1 %vm72_vm2, %v10512_v24  ;;  %v404_v27 = vpop.permute.xlu1 %403 }
 0x1db   :  { %9209 = vmatpush3.xpose.msk.msra.mxu0 %vm72_vm2, %v404_v27  ;;  %9205 = vmatprep.mubr.msk.f32.mxu1 %vm10340_vm0, %v10339_v2 }
 0x1dc   :  { %9218 = vmatprep.subr.mxu0 %v10339_v2 }
 0x1de   :  { %v402_v28 = vpop.permute.xlu1 %401 }
 0x1df   :  { %9211 = vmatmul.mubr.msk.f32.vlgmr.msra.gmra.mrb[0].mxu0 %vm72_vm2, %v402_v28 }
 0x1e0   :  { %9220 = vmatprep.mubr.msk.f32.mxu0 %vm10340_vm0, %v10339_v2 }
 0x1e2   :  { %v570_v29 = vpop.permute.xlu1 %569 }
 0x1e3   :  { %9219 = vmatpush3.xpose.msk.msra.mxu0 %vm72_vm2, %v570_v29 }
 0x1e4   :  { %9228 = vmatprep.subr.mxu0 %v10339_v2 }
 0x1e6   :  { %9221 = vmatmul.mubr.msk.f32.vlgmr.msra.gmra.mrb[2].mxu0 %vm72_vm2, %v568_v30  ;;  %v736_v31 = vpop.permute.xlu1 %735 }
 0x1e7   :  { %9229 = vmatpush3.xpose.msk.msra.mxu0 %vm72_vm2, %v736_v31  ;;  %9230 = vmatprep.mubr.msk.f32.mxu0 %vm10340_vm0, %v10339_v2 }
 0x1e8   :  { %9929 = vmatprep.subr.bf16.mxu0 %v10338_v1 }
 0x1ea   :  { %v734_v32 = vpop.permute.xlu1 %733 }
 0x1eb   :  { %9231 = vmatmul.mubr.msk.f32.vlgmr.msra.gmra.mrb[4].mxu0 %vm72_vm2, %v734_v32  ;;  %v917_v32 = vld [vmem:[%s12164_s6] sm:$0xff] }
 0x1ec   :  { %9268 = vmatprep.mubr.msk.f32.mxu0 %vm10340_vm0, %v10339_v2  ;;  %v9918_v35 = vpack.c.bf16 %v918_v34, %v917_v32 }
 0x2ad   :  { %v309_v38 = vpop.f32.mrb[2].mxu1 }
 0x2ae   :  { %v313_v39 = vsel %vm10560_vm6, %v309_v38, -10000.0  ;;  %v9202_v40 = vpop.f32.mrb[3].mxu1 }
 0x2af   :  { %v314_v41 = vsel %vm72_vm2, %v313_v39, -inf  ;;  %v920_v40 = vld [vmem:[%s12164_s6 + $0x18] sm:$0xff] }
 0x2b0   :  { %315 = vmax.xlane.f32.xlu1 %v314_v41 }
 0x2b2   :  { %v475_v42 = vpop.f32.mrb[0].mxu0 }
 0x2b3   :  { %v479_v43 = vsel %vm10560_vm6, %v475_v42, -10000.0  ;;  %v9212_v44 = vpop.f32.mrb[1].mxu0 }
 0x2b4   :  { %v480_v45 = vsel %vm72_vm2, %v479_v43, -inf }
 0x2b5   :  { %481 = vmax.xlane.f32.xlu0 %v480_v45 }
 0x2b9   :  { %v641_v46 = vpop.f32.mrb[2].mxu0 }
 0x2ba   :  { %v645_v47 = vsel %vm10560_vm6, %v641_v46, -10000.0  ;;  %v9222_v48 = vpop.f32.mrb[3].mxu0 }
 0x2bb   :  { %v646_v49 = vsel %vm72_vm2, %v645_v47, -inf }
 0x2bc   :  { %647 = vmax.xlane.f32.xlu1 %v646_v49 }
 0x2be   :  { %v807_v50 = vpop.f32.mrb[4].mxu0 }
 0x2bf   :  { %v811_v51 = vsel %vm10560_vm6, %v807_v50, -10000.0  ;;  %v9232_v52 = vpop.f32.mrb[5].mxu0 }
 0x2c0   :  { %v812_v53 = vsel %vm72_vm2, %v811_v51, -inf }
 0x2c1   :  { %813 = vmax.xlane.f32.xlu1 %v812_v53 }
 0x2cb   :  { %491 = vrot.lane.b32.xlu0 %v10512_v24, %s12186_s2  ;;  %s12200_s2 = smov 8  }
 0x2d2   :  { %325 = vrot.lane.b32.xlu1 %v10512_v24, %s12188_s4  ;;  %s12243_s4 = smov 88  }
 0x2d6   :  { %657 = vrot.lane.b32.xlu1 %v10512_v24, %s12184_s20  ;;  %s12198_s20 = smov 16  }
 0x33d   :  { %v316_v54 = vpop.xlane.xlu1 %315 }
 0x33e   :  { %v317_v55 = vsub.f32 %v313_v39, %v316_v54  ;;  %v919_v39 = vld [vmem:[%s12164_s6 + $0x10] sm:$0xff] }
 0x33f   :  { %v9921_v42 = vpack.c.bf16 %v920_v40, %v919_v39 }
 0x340   :  { %v318_v56 = vmul.f32 1.442695, %v317_v55  ;;  %v10630_v55 = vld [vmem:[%s12165_s7] sm:$0x7] }
 0x342   :  { %10170 = vpow2.f32 %v318_v56  ;;  %v482_v57 = vpop.xlane.xlu0 %481  ;;  %v924_v56 = vrot.slane %v10630_v55, %v10476_v8 }
 0x343   :  { %v483_v58 = vsub.f32 %v479_v43, %v482_v57 }
 0x345   :  { %v484_v59 = vmul.f32 1.442695, %v483_v58 }
 0x346   :  { %v492_v23 = vpop.permute.xlu0 %491 }
 0x347   :  { %10172 = vpow2.f32 %v484_v59 }
 0x349   :  { %v648_v60 = vpop.xlane.xlu1 %647 }
 0x34a   :  { %v649_v61 = vsub.f32 %v645_v47, %v648_v60 }
 0x34c   :  { %v10171_v62 = vpop.eup %10170  ;;  %v650_v63 = vmul.f32 1.442695, %v649_v61 }
 0x34d   :  { %v320_v0 = vsel %vm72_vm2, %v10171_v62, 0.0 }
 0x34e   :  { %10174 = vpow2.f32 %v650_v63  ;;  %321 = vadd.xlane.f32.xlu1 %v320_v0  ;;  %v814_v4 = vpop.xlane.xlu1 %813  ;;  %v1108_v63 = vld [vmem:[%s12166_s10 + $0x8] sm:$0xff]  ;;  %v1109_v0 = vld [vmem:[%s12166_s10 + $0x10] sm:$0xff] }
 0x34f   :  { %v815_v5 = vsub.f32 %v811_v51, %v814_v4  ;;  %v1110_v4 = vld [vmem:[%s12166_s10 + $0x18] sm:$0xff] }
 0x351   :  { %v10173_v6 = vpop.eup %10172  ;;  %v816_v7 = vmul.f32 1.442695, %v815_v5  ;;  %v9933_v5 = vpack.c.bf16 %v1110_v4, %v1109_v0 }
 0x352   :  { %v326_v9 = vpop.permute.xlu1 %325  ;;  %v486_v10 = vsel %vm72_vm2, %v10173_v6, 0.0 }
 0x353   :  { %10176 = vpow2.f32 %v816_v7  ;;  %487 = vadd.xlane.f32.xlu1 %v486_v10  ;;  %9204 = vmatpush3.msra.mxu1 %v326_v9  ;;  %v126_v9 = vld [vmem:[%s12168_s1] sm:$0xff] }
 0x354   :  { %9213 = vmatprep.subr.mxu1 %v10339_v2 }
 0x356   :  { %v658_v16 = vpop.permute.xlu1 %657 }
 0x358   :  { %v10175_v11 = vpop.eup %10174 }
 0x359   :  { %v652_v13 = vsel %vm72_vm2, %v10175_v11, 0.0 }
 0x35a   :  { %653 = vadd.xlane.f32.xlu1 %v652_v13 }
 0x35d   :  { %v10177_v14 = vpop.eup %10176 }
 0x35e   :  { %v818_v15 = vsel %vm72_vm2, %v10177_v14, 0.0 }
 0x35f   :  { %819 = vadd.xlane.f32.xlu1 %v818_v15 }
 0x370   :  { %823 = vrot.lane.b32.xlu1 %v10512_v24, %s12182_s21  ;;  %s12244_s21 = smov 8  }
 0x3db   :  { %v322_v17 = vpop.xlane.xlu1 %321 }
 0x3dc   :  { %10178 = vrcp.f32 %v322_v17 }
 0x3e0   :  { %v488_v18 = vpop.xlane.xlu1 %487 }
 0x3e1   :  { %10180 = vrcp.f32 %v488_v18 }
 0x3e6   :  { %v10179_v19 = vpop.eup %10178 }
 0x3e7   :  { %v654_v20 = vpop.xlane.xlu1 %653  ;;  %v324_v22 = vmul.f32 %v10179_v19, %v10171_v62  ;;  %v1107_v62 = vld [vmem:[%s12166_s10] sm:$0xff] }
 0x3e8   :  { %10182 = vrcp.f32 %v654_v20 }
 0x3e9   :  { %9206 = vmatmul.mubr.msk.f32.vlgmr.msra.gmra.mrb[4].mxu1 %vm72_vm2, %v324_v22 }
 0x3ea   :  { %9214 = vmatpush3.msra.mxu1 %v492_v23  ;;  %9215 = vmatprep.mubr.msk.f32.mxu1 %vm10340_vm0, %v10339_v2 }
 0x3eb   :  { %v10181_v25 = vpop.eup %10180  ;;  %9223 = vmatprep.subr.mxu1 %v10339_v2 }
 0x3ec   :  { %v820_v24 = vpop.xlane.xlu1 %819  ;;  %v490_v26 = vmul.f32 %v10181_v25, %v10173_v6  ;;  %v10653_v6 = vld [vmem:[%s12167_s3] sm:$0x1] }
 0x3ed   :  { %10184 = vrcp.f32 %v820_v24  ;;  %v134_v7 = vrot.slane %v10653_v6, %v10476_v8  ;;  %v1023_v24 = vld [vmem:[%s12169_s8] sm:$0xff]  ;;  %vm140_vm10 = vcmp.ne.f32.partialorder %v10653_v6, 0.0 }
 0x3ee   :  { %9216 = vmatmul.mubr.msk.f32.vlgmr.msra.gmra.mrb[6].mxu1 %vm72_vm2, %v490_v26  ;;  %v1024_v26 = vld [vmem:[%s12169_s8 + $0x8] sm:$0xff] }
 0x3ef   :  { %9224 = vmatpush3.msra.mxu1 %v658_v16  ;;  %9225 = vmatprep.mubr.msk.f32.mxu1 %vm10340_vm0, %v10339_v2  ;;  %v136_v10 = vmul.f32 %v134_v7, %v126_v9  ;;  %v129_v16 = vld [vmem:[%s12168_s1 + $0x18] sm:$0xff] }
 0x3f0   :  { %9233 = vmatprep.subr.mxu1 %v10339_v2  ;;  %v824_v29 = vpop.permute.xlu1 %823  ;;  %v139_v17 = vmul.f32 %v134_v7, %v129_v16 }
 0x3f2   :  { %v10183_v27 = vpop.eup %10182 }
 0x3f3   :  { %v656_v28 = vmul.f32 %v10183_v27, %v10175_v11  ;;  %v127_v11 = vld [vmem:[%s12168_s1 + $0x8] sm:$0xff]  ;;  %v9924_v27 = vpack.c.bf16 %v1024_v26, %v1023_v24 }
 0x3f4   :  { %v137_v13 = vmul.f32 %v134_v7, %v127_v11 }
 0x3f5   :  { %9226 = vmatmul.mubr.msk.f32.vlgmr.msra.gmra.mrb[8].mxu1 %vm72_vm2, %v656_v28  ;;  %v1025_v28 = vld [vmem:[%s12169_s8 + $0x10] sm:$0xff] }
 0x3f6   :  { %9234 = vmatpush3.msra.mxu1 %v824_v29  ;;  %9235 = vmatprep.mubr.msk.f32.mxu1 %vm10340_vm0, %v10339_v2  ;;  %v1026_v29 = vld [vmem:[%s12169_s8 + $0x18] sm:$0xff] }
 0x3f7   :  { %v10185_v30 = vpop.eup %10184  ;;  %9917 = vmatprep.subr.bf16.mxu1 %v10338_v1 }
 0x3f8   :  { %v822_v31 = vmul.f32 %v10185_v30, %v10177_v14  ;;  %v128_v14 = vld [vmem:[%s12168_s1 + $0x10] sm:$0xff]  ;;  %v9927_v30 = vpack.c.bf16 %v1026_v29, %v1025_v28  ;;  %s12249_s1 = smov 64  }
 0x3f9   :  { %v138_v15 = vmul.f32 %v134_v7, %v128_v14 }
 0x3fa   :  { %9236 = vmatmul.mubr.msk.f32.vlgmr.msra.gmra.mrb[10].mxu1 %vm72_vm2, %v822_v31 }
 0x3fb   :  { %9246 = vmatprep.mubr.msk.f32.mxu1 %vm10340_vm0, %v10339_v2  ;;  %9919 = vmatpush3.bf16.msra.mxu1 %v9918_v35  ;;  %v10691_v35 = vsub.s32 1, %v10455_v3 }
 0x3fc   :  { %9920 = vmatprep.subr.bf16.mxu1 %v10338_v1 }
 0x3fd   :  { %v1016_v39 = vrot.slane %v10630_v55, %v10691_v35 }
 0x3ff   :  { %9922 = vmatpush3.bf16.msra.mxu1 %v9921_v42 }
 0x400   :  { %9923 = vmatprep.subr.bf16.mxu1 %v10338_v1 }
 0x4bc   :  { %v397_v38 = vpop.f32.mrb[4].mxu1 }
 0x4bd   :  { %v9207_v41 = vpop.f32.mrb[5].mxu1 }
 0x4c1   :  { %v563_v43 = vpop.f32.mrb[6].mxu1 }
 0x4c2   :  { %900 = vrot.lane.b32.xlu1 %v563_v43, %s12200_s2  ;;  %v9217_v44 = vpop.f32.mrb[7].mxu1  ;;  %s12253_s2 = smov 48  }
 0x4c8   :  { %v729_v45 = vpop.f32.mrb[8].mxu1 }
 0x4c9   :  { %904 = vrot.lane.b32.xlu0 %v729_v45, %s12198_s20  ;;  %v9227_v46 = vpop.f32.mrb[9].mxu1  ;;  %v8644_v45 = vld [vmem:[%s12170_s11] ss:$0 sm:$0xff]  ;;  %s12254_s20 = smov 40  }
 0x4cd   :  { %v895_v47 = vpop.f32.mrb[10].mxu1 }
 0x4ce   :  { %908 = vrot.lane.b32.xlu1 %v895_v47, %s12196_s24  ;;  %v9237_v48 = vpop.f32.mrb[11].mxu1  ;;  %s12245_s24 = smov 16  }
 0x534   :  { %v901_v49 = vpop.permute.xlu1 %900 }
 0x535   :  { %v911_v51 = vsel %vm72_vm2, %v397_v38, %v901_v49  ;;  %v10694_v38 = vsub.s32 2, %v10455_v3 }
 0x537   :  { %v1021_v41 = vrot.slane %v10630_v55, %v10694_v38 }
 0x53b   :  { %v905_v50 = vpop.permute.xlu0 %904 }
 0x53c   :  { %v913_v52 = vsel %vm912_vm7, %v911_v51, %v905_v50  ;;  %v8642_v50 = vld [vmem:[%s12171_s9] ss:$0 sm:$0xff] }
 0x540   :  { %v909_v53 = vpop.permute.xlu1 %908 }
 0x541   :  { %v915_v54 = vsel %vm914_vm8, %v913_v52, %v909_v53 }
 0x542   :  { %9247 = vmatmul.mubr.msk.f32.vlgmr.msra.gmra.mrb[12].mxu1 %vm162_vm1, %v915_v54  ;;  %v71_v54 = vsel %vm64_vm9, %v10486_v12, 0.0 }
 0x543   :  { %9257 = vmatprep.mubr.msk.f32.mxu1 %vm10340_vm0, %v10339_v2  ;;  %9925 = vmatpush3.bf16.msra.mxu1 %v9924_v27  ;;  %v73_v55 = vsel %vm72_vm2, %v71_v54, 0.0 }
 0x544   :  { %9926 = vmatprep.subr.bf16.mxu1 %v10338_v1 }
 0x547   :  { %9928 = vmatpush3.bf16.msra.mxu1 %v9927_v30 }
 0x548   :  { %9271 = vmatprep.subr.mxu1 %v10339_v2 }
 0x615   :  { %v994_v57 = vpop.f32.mrb[12].mxu1 }
 0x616   :  { %v995_v58 = vadd.f32 %v994_v57, %v924_v56  ;;  %v9248_v59 = vpop.f32.mrb[13].mxu1 }
 0x618   :  { %v998_v60 = vadd.f32 %v995_v58, %v10503_v21  ;;  %v9930_v21 = vpack.c.bf16 %v1108_v63, %v1107_v62 }
 0x61a   :  { %v999_v61 = vsel %vm162_vm1, %v998_v60, 0.0  ;;  %9931 = vmatpush3.bf16.msra.mxu0 %v9930_v21 }
 0x61b   :  { %1000 = vadd.xlane.f32.xlu0 %v999_v61  ;;  %9932 = vmatprep.subr.bf16.mxu0 %v10338_v1 }
 0x61e   :  { %9934 = vmatpush3.bf16.msra.mxu0 %v9933_v5 }
 0x61f   :  { %9281 = vmatprep.subr.mxu0 %v10339_v2 }
 0x648   :  { %1118 = vxpose.xlu0.b32.start [1/4] (short) (narrow) %v136_v10, 8 }
 0x64c   :  { %1119 = vxpose.xlu0.b32.cont [2/4] (short) (narrow) %v137_v13, 8 }
 0x650   :  { %1120 = vxpose.xlu0.b32.cont [3/4] (short) (narrow) %v138_v15, 8 }
 0x654   :  { %1121 = vxpose.xlu0.b32.end [4/4] (short) (narrow) %v139_v17, 8 }
 0x6a8   :  { %v1001_v18 = vpop.xlane.xlu0 %1000 }
 0x6a9   :  { %v1003_v19 = vmul.f32 0.03125, %v1001_v18 }
 0x6ab   :  { %v1004_v20 = vsub.f32 %v998_v60, %v1003_v19  ;;  %v142_v60 = vsel %vm140_vm10, 1, %v10348_v33 }
 0x6ac   :  { %v146_v61 = vrot.slane %v142_v60, %v10476_v8 }
 0x6ad   :  { %v1005_v22 = vmul.f32 %v1004_v20, %v1004_v20 }
 0x6ae   :  { %vm147_vm11 = vcmp.eq.s32.totalorder %v146_v61, 1 }
 0x6af   :  { %v1006_v23 = vsel %vm162_vm1, %v1005_v22, 0.0 }
 0x6b0   :  { %1007 = vadd.xlane.f32.xlu1 %v1006_v23 }
 0x6c8   :  { %v10670_v25 = vpop.trf.xlu0 }
 0x6c9   :  { %9269 = vmatmul.mubr.msk.f32.vlgmr.msra.gmra.mrb[6].mxu0 %vm162_vm1, %v10670_v25 }
 0x6ca   :  { %9283 = vmatprep.mubr.msk.f32.mxu0 %vm10340_vm0, %v10339_v2 }
 0x73d   :  { %v1008_v31 = vpop.xlane.xlu1 %1007 }
 0x73e   :  { %v1009_v32 = vmul.f32 0.03125, %v1008_v31 }
 0x740   :  { %v1010_v34 = vadd.f32 1e-05, %v1009_v32 }
 0x742   :  { %10186 = vrsqrt.f32 %v1010_v34 }
 0x74c   :  { %v10187_v40 = vpop.eup %10186 }
 0x74d   :  { %v1012_v42 = vmul.f32 %v10187_v40, %v1004_v20 }
 0x74f   :  { %v1017_v43 = vmul.f32 %v1016_v39, %v1012_v42 }
 0x751   :  { %v10700_v44 = vadd.f32 %v1021_v41, %v1017_v43 }
 0x753   :  { %9258 = vmatmul.mubr.msk.f32.vlgmr.msra.gmra.mrb[14].mxu1 %vm162_vm1, %v10700_v44 }
 0x754   :  { %9273 = vmatprep.mubr.msk.f32.mxu1 %vm10340_vm0, %v10339_v2 }
 0x79c   :  { %v1219_v46 = vpop.f32.mrb[6].mxu0 }
 0x79d   :  { %v10709_v47 = vadd.f32 %v8644_v45, %v1219_v46  ;;  %v9270_v48 = vpop.f32.mrb[7].mxu0 }
 0x79f   :  { %1389 = vrot.lane.b32.xlu1 %v10709_v47, %s12206_s25  ;;  %9272 = vmatpush3.xpose.msk.msra.mxu1 %vm72_vm2, %v10709_v47 }
 0x7a0   :  { %9276 = vmatprep.subr.mxu1 %v10339_v2 }
 0x7a3   :  { %1555 = vrot.lane.b32.xlu1 %v10709_v47, %s12204_s0 }
 0x7a7   :  { %1721 = vrot.lane.b32.xlu1 %v10709_v47, %s12202_s30 }
 0x811   :  { %v1390_v49 = vpop.permute.xlu1 %1389 }
 0x812   :  { %9282 = vmatpush3.xpose.msk.msra.mxu0 %vm72_vm2, %v1390_v49 }
 0x813   :  { %9291 = vmatprep.subr.mxu0 %v10339_v2 }
 0x815   :  { %v1556_v56 = vpop.permute.xlu1 %1555 }
 0x819   :  { %v1722_v57 = vpop.permute.xlu1 %1721 }
 0x826   :  { %v1103_v51 = vpop.f32.mrb[14].mxu1 }
 0x827   :  { %v1104_v52 = vadd.f32 %v8642_v50, %v1103_v51  ;;  %v9259_v53 = vpop.f32.mrb[15].mxu1 }
 0x829   :  { %1387 = vrot.lane.b32.xlu1 %v1104_v52, %s12206_s25  ;;  %9274 = vmatmul.mubr.msk.f32.vlgmr.msra.gmra.mrb[16].mxu1 %vm72_vm2, %v1104_v52  ;;  %s12248_s25 = smov 120  }
 0x82a   :  { %9278 = vmatprep.mubr.msk.f32.mxu1 %vm10340_vm0, %v10339_v2 }
 0x82d   :  { %1553 = vrot.lane.b32.xlu1 %v1104_v52, %s12204_s0  ;;  %s12247_s0 = smov 96  }
 0x831   :  { %1719 = vrot.lane.b32.xlu1 %v1104_v52, %s12202_s30  ;;  %s12252_s30 = smov 56  }
 0x855   :  { %74 = vadd.xlane.f32.xlu1 %v73_v55 }
 0x89b   :  { %v1388_v58 = vpop.permute.xlu1 %1387 }
 0x89c   :  { %9284 = vmatmul.mubr.msk.f32.vlgmr.msra.gmra.mrb[8].mxu0 %vm72_vm2, %v1388_v58 }
 0x89d   :  { %9292 = vmatpush3.xpose.msk.msra.mxu0 %vm72_vm2, %v1556_v56  ;;  %9293 = vmatprep.mubr.msk.f32.mxu0 %vm10340_vm0, %v10339_v2 }
 0x89e   :  { %9301 = vmatprep.subr.mxu0 %v10339_v2 }
 0x89f   :  { %v1554_v59 = vpop.permute.xlu1 %1553 }
 0x8a0   :  { %9294 = vmatmul.mubr.msk.f32.vlgmr.msra.gmra.mrb[10].mxu0 %vm72_vm2, %v1554_v59 }
 0x8a1   :  { %9302 = vmatpush3.xpose.msk.msra.mxu0 %vm72_vm2, %v1722_v57  ;;  %9303 = vmatprep.mubr.msk.f32.mxu0 %vm10340_vm0, %v10339_v2 }
 0x8a2   :  { %9935 = vmatprep.subr.bf16.mxu0 %v10338_v1 }
 0x8a3   :  { %v1720_v12 = vpop.permute.xlu1 %1719 }
 0x8a4   :  { %9304 = vmatmul.mubr.msk.f32.vlgmr.msra.gmra.mrb[12].mxu0 %vm72_vm2, %v1720_v12 }
 0x8a5   :  { %9319 = vmatprep.mubr.msk.f32.mxu0 %vm10340_vm0, %v10339_v2 }
 0x8e2   :  { %v10754_v62 = vpop.xlane.xlu1 %74 }
 0x8e3   :  { %vm141_vm12 = vcmp.ne.f32.partialorder %v10754_v62, 0.0 }
 0x8e4   :  { %vm10757_vm13 = vmand %vm147_vm11, %vm141_vm12 }
 0x8fc   :  { %v1295_v0 = vpop.f32.mrb[16].mxu1 }
 0x8fd   :  { %v1299_v4 = vsel %vm10757_vm13, %v1295_v0, -10000.0  ;;  %v9275_v21 = vpop.f32.mrb[17].mxu1 }
 0x8fe   :  { %v1300_v5 = vsel %vm72_vm2, %v1299_v4, -inf }
 0x8ff   :  { %1301 = vmax.xlane.f32.xlu0 %v1300_v5  ;;  %v1901_v5 = vld [vmem:[%s12172_s12] sm:$0xff] }
 0x96f   :  { %v1461_v6 = vpop.f32.mrb[8].mxu0 }
 0x970   :  { %v1465_v7 = vsel %vm10757_vm13, %v1461_v6, -10000.0  ;;  %v9285_v9 = vpop.f32.mrb[9].mxu0  ;;  %v1902_v6 = vld [vmem:[%s12172_s12 + $0x8] sm:$0xff] }
 0x971   :  { %v1466_v10 = vsel %vm72_vm2, %v1465_v7, -inf  ;;  %v1903_v9 = vld [vmem:[%s12172_s12 + $0x10] sm:$0xff] }
 0x972   :  { %1467 = vmax.xlane.f32.xlu1 %v1466_v10  ;;  %v1904_v10 = vld [vmem:[%s12172_s12 + $0x18] sm:$0xff] }
 0x973   :  { %v1627_v11 = vpop.f32.mrb[10].mxu0 }
 0x974   :  { %v1631_v13 = vsel %vm10757_vm13, %v1627_v11, -10000.0  ;;  %v9295_v14 = vpop.f32.mrb[11].mxu0  ;;  %v9939_v11 = vpack.c.bf16 %v1904_v10, %v1903_v9  ;;  %v2136_v9 = vld [vmem:[%s12175_s16 + $0x30] sm:$0xff]  ;;  %v2137_v10 = vld [vmem:[%s12175_s16 + $0x38] sm:$0xff] }
 0x975   :  { %v1632_v15 = vsel %vm72_vm2, %v1631_v13, -inf }
 0x976   :  { %1633 = vmax.xlane.f32.xlu1 %v1632_v15 }
 0x977   :  { %v1793_v16 = vpop.f32.mrb[12].mxu0 }
 0x978   :  { %v1797_v17 = vsel %vm10757_vm13, %v1793_v16, -10000.0  ;;  %v9305_v18 = vpop.f32.mrb[13].mxu0 }
 0x979   :  { %v1798_v19 = vsel %vm72_vm2, %v1797_v17, -inf }
 0x97a   :  { %1799 = vmax.xlane.f32.xlu1 %v1798_v19 }
 0x98b   :  { %1311 = vrot.lane.b32.xlu1 %v10709_v47, %s12208_s23  ;;  %s12251_s23 = smov 104  }
 0x98c   :  { %v1302_v20 = vpop.xlane.xlu0 %1301 }
 0x98d   :  { %v1303_v22 = vsub.f32 %v1299_v4, %v1302_v20 }
 0x98f   :  { %v1304_v23 = vmul.f32 1.442695, %v1303_v22 }
 0x991   :  { %10188 = vpow2.f32 %v1304_v23 }
 0x99b   :  { %v10189_v24 = vpop.eup %10188 }
 0x99c   :  { %v1306_v26 = vsel %vm72_vm2, %v10189_v24, 0.0 }
 0x9af   :  { %1307 = vadd.xlane.f32.xlu1 %v1306_v26 }
 0x9ff   :  { %v1468_v27 = vpop.xlane.xlu1 %1467 }
 0xa00   :  { %v1469_v28 = vsub.f32 %v1465_v7, %v1468_v27  ;;  %v9936_v7 = vpack.c.bf16 %v1902_v6, %v1901_v5  ;;  %v1900_v27 = vld [vmem:[%s12173_s13] sm:$0x7]  ;;  %v2135_v6 = vld [vmem:[%s12175_s16 + $0x28] sm:$0xff] }
 0xa01   :  { %v2134_v5 = vld [vmem:[%s12175_s16 + $0x20] sm:$0xff] }
 0xa02   :  { %v1470_v29 = vmul.f32 1.442695, %v1469_v28  ;;  %9937 = vmatpush3.bf16.msra.mxu0 %v9936_v7  ;;  %v1908_v28 = vrot.slane %v1900_v27, %v10476_v8  ;;  %v9954_v7 = vpack.c.bf16 %v2135_v6, %v2134_v5  ;;  %v10356_v6 = vmov -1.0  }
 0xa03   :  { %v1634_v30 = vpop.xlane.xlu1 %1633  ;;  %9938 = vmatprep.subr.bf16.mxu0 %v10338_v1 }
 0xa04   :  { %10190 = vpow2.f32 %v1470_v29  ;;  %v1635_v31 = vsub.f32 %v1631_v13, %v1634_v30 }
 0xa06   :  { %v1636_v32 = vmul.f32 1.442695, %v1635_v31  ;;  %9940 = vmatpush3.bf16.msra.mxu0 %v9939_v11  ;;  %v9957_v11 = vpack.c.bf16 %v2137_v10, %v2136_v9 }
 0xa07   :  { %v1800_v34 = vpop.xlane.xlu1 %1799  ;;  %9947 = vmatprep.subr.bf16.mxu0 %v10338_v1 }
 0xa08   :  { %10192 = vpow2.f32 %v1636_v32  ;;  %v1801_v39 = vsub.f32 %v1797_v17, %v1800_v34 }
 0xa0a   :  { %v1802_v40 = vmul.f32 1.442695, %v1801_v39 }
 0xa0b   :  { %v1312_v41 = vpop.permute.xlu1 %1311 }
 0xa0c   :  { %10194 = vpow2.f32 %v1802_v40  ;;  %9277 = vmatpush3.msra.mxu1 %v1312_v41 }
 0xa0d   :  { %9286 = vmatprep.subr.mxu1 %v10339_v2 }
 0xa0e   :  { %v10191_v42 = vpop.eup %10190 }
 0xa0f   :  { %v1472_v43 = vsel %vm72_vm2, %v10191_v42, 0.0 }
 0xa10   :  { %1473 = vadd.xlane.f32.xlu1 %v1472_v43 }
 0xa12   :  { %v10193_v45 = vpop.eup %10192 }
 0xa13   :  { %v1638_v46 = vsel %vm72_vm2, %v10193_v45, 0.0 }
 0xa14   :  { %1639 = vadd.xlane.f32.xlu1 %v1638_v46  ;;  %v2008_v46 = vld [vmem:[%s12174_s14 + $0x8] sm:$0xff] }
 0xa16   :  { %v10195_v48 = vpop.eup %10194 }
 0xa17   :  { %v1804_v49 = vsel %vm72_vm2, %v10195_v48, 0.0 }
 0xa18   :  { %1805 = vadd.xlane.f32.xlu0 %v1804_v49  ;;  %v2010_v49 = vld [vmem:[%s12174_s14 + $0x18] sm:$0xff] }
 0xa25   :  { %1643 = vrot.lane.b32.xlu1 %v10709_v47, %s12241_s27 }
 0xa29   :  { %1809 = vrot.lane.b32.xlu1 %v10709_v47, %s12242_s28 }
 0xa2e   :  { %1477 = vrot.lane.b32.xlu0 %v10709_v47, %s12243_s4 }
 0xa3c   :  { %v1308_v50 = vpop.xlane.xlu1 %1307 }
 0xa3d   :  { %10196 = vrcp.f32 %v1308_v50 }
 0xa47   :  { %v10197_v51 = vpop.eup %10196 }
 0xa48   :  { %v1310_v52 = vmul.f32 %v10197_v51, %v10189_v24 }
 0xa4a   :  { %9279 = vmatmul.mubr.msk.f32.vlgmr.msra.gmra.mrb[18].mxu1 %vm72_vm2, %v1310_v52 }
 0xa4b   :  { %9288 = vmatprep.mubr.msk.f32.mxu1 %vm10340_vm0, %v10339_v2 }
 0xa9d   :  { %v1474_v53 = vpop.xlane.xlu1 %1473 }
 0xa9e   :  { %10198 = vrcp.f32 %v1474_v53 }
 0xaa1   :  { %v1640_v54 = vpop.xlane.xlu1 %1639 }
 0xaa2   :  { %10200 = vrcp.f32 %v1640_v54  ;;  %v1999_v54 = vrot.slane %v1900_v27, %v10691_v35 }
 0xaa5   :  { %v1806_v55 = vpop.xlane.xlu0 %1805  ;;  %v1644_v57 = vpop.permute.xlu1 %1643 }
 0xaa6   :  { %10202 = vrcp.f32 %v1806_v55 }
 0xaa8   :  { %v10199_v56 = vpop.eup %10198 }
 0xaa9   :  { %v1478_v58 = vpop.permute.xlu0 %1477  ;;  %v1476_v59 = vmul.f32 %v10199_v56, %v10191_v42  ;;  %v1810_v60 = vpop.permute.xlu1 %1809  ;;  %v2004_v56 = vrot.slane %v1900_v27, %v10694_v38  ;;  %v8659_v27 = vld [vmem:[%s12176_s15] ss:$0 sm:$0xff]  ;;  %s12256_s15 = sld [smem:[#allocation5_spill]] }
 0xaaa   :  { %9287 = vmatpush3.msra.mxu1 %v1478_v58 }
 0xaab   :  { %9289 = vmatmul.mubr.msk.f32.vlgmr.msra.gmra.mrb[20].mxu1 %vm72_vm2, %v1476_v59  ;;  %9296 = vmatprep.subr.mxu1 %v10339_v2 }
 0xaac   :  { %v10201_v47 = vpop.eup %10200  ;;  %9297 = vmatpush3.msra.mxu1 %v1644_v57  ;;  %9298 = vmatprep.mubr.msk.f32.mxu1 %vm10340_vm0, %v10339_v2 }
 0xaad   :  { %9306 = vmatprep.subr.mxu1 %v10339_v2  ;;  %v1642_v12 = vmul.f32 %v10201_v47, %v10193_v45  ;;  %v2007_v45 = vld [vmem:[%s12174_s14] sm:$0xff] }
 0xaaf   :  { %9299 = vmatmul.mubr.msk.f32.vlgmr.msra.gmra.mrb[22].mxu1 %vm72_vm2, %v1642_v12  ;;  %v2130_v12 = vld [vmem:[%s12175_s16] sm:$0xff] }
 0xab0   :  { %v10203_v61 = vpop.eup %10202  ;;  %9307 = vmatpush3.msra.mxu1 %v1810_v60  ;;  %9308 = vmatprep.mubr.msk.f32.mxu1 %vm10340_vm0, %v10339_v2  ;;  %v2131_v60 = vld [vmem:[%s12175_s16 + $0x8] sm:$0xff] }
 0xab1   :  { %v1808_v0 = vmul.f32 %v10203_v61, %v10195_v48  ;;  %9941 = vmatprep.subr.bf16.mxu1 %v10338_v1  ;;  %v9942_v48 = vpack.c.bf16 %v2008_v46, %v2007_v45  ;;  %v9948_v61 = vpack.c.bf16 %v2131_v60, %v2130_v12 }
 0xab3   :  { %9309 = vmatmul.mubr.msk.f32.vlgmr.msra.gmra.mrb[24].mxu1 %vm72_vm2, %v1808_v0  ;;  %v2132_v0 = vld [vmem:[%s12175_s16 + $0x10] sm:$0xff] }
 0xab4   :  { %9330 = vmatprep.mubr.msk.f32.mxu1 %vm10340_vm0, %v10339_v2  ;;  %9943 = vmatpush3.bf16.msra.mxu1 %v9942_v48 }
 0xab5   :  { %9944 = vmatprep.subr.bf16.mxu1 %v10338_v1 }
 0xb1d   :  { %v1383_v4 = vpop.f32.mrb[18].mxu1 }
 0xb1e   :  { %v9280_v21 = vpop.f32.mrb[19].mxu1 }
 0xb7e   :  { %v1549_v13 = vpop.f32.mrb[20].mxu1 }
 0xb7f   :  { %1886 = vrot.lane.b32.xlu0 %v1549_v13, %s12244_s21  ;;  %v9290_v14 = vpop.f32.mrb[21].mxu1  ;;  %v2138_v13 = vld [vmem:[%s12175_s16 + $0x40] sm:$0xff] }
 0xb80   :  { %v2139_v14 = vld [vmem:[%s12175_s16 + $0x48] sm:$0xff] }
 0xb82   :  { %v1715_v15 = vpop.f32.mrb[22].mxu1 }
 0xb83   :  { %1890 = vrot.lane.b32.xlu1 %v1715_v15, %s12245_s24  ;;  %v9300_v16 = vpop.f32.mrb[23].mxu1  ;;  %v9960_v15 = vpack.c.bf16 %v2139_v14, %v2138_v13 }
 0xb84   :  { %v2140_v16 = vld [vmem:[%s12175_s16 + $0x50] sm:$0xff] }
 0xb86   :  { %v1881_v17 = vpop.f32.mrb[24].mxu1 }
 0xb87   :  { %1894 = vrot.lane.b32.xlu0 %v1881_v17, %s12246_s22  ;;  %v9310_v18 = vpop.f32.mrb[25].mxu1  ;;  %v2141_v17 = vld [vmem:[%s12175_s16 + $0x58] sm:$0xff] }
 0xb88   :  { %v9963_v18 = vpack.c.bf16 %v2141_v17, %v2140_v16 }
 0xbf1   :  { %v1887_v19 = vpop.permute.xlu0 %1886 }
 0xbf2   :  { %v1897_v22 = vsel %vm72_vm2, %v1383_v4, %v1887_v19  ;;  %v2133_v4 = vld [vmem:[%s12175_s16 + $0x18] sm:$0xff]  ;;  %v2142_v19 = vld [vmem:[%s12175_s16 + $0x60] sm:$0xff] }
 0xbf3   :  { %v9951_v21 = vpack.c.bf16 %v2133_v4, %v2132_v0 }
 0xbf5   :  { %v1891_v20 = vpop.permute.xlu1 %1890 }
 0xbf6   :  { %v1898_v23 = vsel %vm912_vm7, %v1897_v22, %v1891_v20  ;;  %v2143_v20 = vld [vmem:[%s12175_s16 + $0x68] sm:$0xff] }
 0xbf7   :  { %v9966_v22 = vpack.c.bf16 %v2143_v20, %v2142_v19 }
 0xbf9   :  { %v1895_v24 = vpop.permute.xlu0 %1894 }
 0xbfa   :  { %v1899_v26 = vsel %vm914_vm8, %v1898_v23, %v1895_v24  ;;  %v2144_v23 = vld [vmem:[%s12175_s16 + $0x70] sm:$0xff]  ;;  %v2145_v24 = vld [vmem:[%s12175_s16 + $0x78] sm:$0xff] }
 0xbfb   :  { %9320 = vmatmul.mubr.msk.f32.vlgmr.msra.gmra.mrb[14].mxu0 %vm162_vm1, %v1899_v26  ;;  %v9969_v26 = vpack.c.bf16 %v2145_v24, %v2144_v23 }
 0xbfc   :  { %9365 = vmatprep.mubr.msk.f32.mxu0 %vm10340_vm0, %v10339_v2  ;;  %9949 = vmatpush3.bf16.msra.mxu0 %v9948_v61 }
 0xbfd   :  { %9950 = vmatprep.subr.bf16.mxu0 %v10338_v1 }
 0xc00   :  { %9952 = vmatpush3.bf16.msra.mxu0 %v9951_v21 }
 0xc01   :  { %9953 = vmatprep.subr.bf16.mxu0 %v10338_v1 }
 0xc04   :  { %9955 = vmatpush3.bf16.msra.mxu0 %v9954_v7 }
 0xc05   :  { %9956 = vmatprep.subr.bf16.mxu0 %v10338_v1 }
 0xc08   :  { %9958 = vmatpush3.bf16.msra.mxu0 %v9957_v11 }
 0xc09   :  { %9959 = vmatprep.subr.bf16.mxu0 %v10338_v1 }
 0xc0c   :  { %9961 = vmatpush3.bf16.msra.mxu0 %v9960_v15  ;;  %v2128_v15 = vld [vmem:[%s12177_s17] sm:$0x7]  ;;  %s12255_s17 = sld [smem:[#allocation10_spill]] }
 0xc0d   :  { %9962 = vmatprep.subr.bf16.mxu0 %v10338_v1  ;;  %v2149_v16 = vrot.slane %v2128_v15, %v10476_v8 }
 0xc10   :  { %9964 = vmatpush3.bf16.msra.mxu0 %v9963_v18 }
 0xc11   :  { %9965 = vmatprep.subr.bf16.mxu0 %v10338_v1 }
 0xc14   :  { %9967 = vmatpush3.bf16.msra.mxu0 %v9966_v22 }
 0xc15   :  { %9968 = vmatprep.subr.bf16.mxu0 %v10338_v1 }
 0xc18   :  { %9970 = vmatpush3.bf16.msra.mxu0 %v9969_v26 }
 0xc19   :  { %9409 = vmatprep.subr.mxu0 %v10339_v2 }
 0xcce   :  { %v1978_v29 = vpop.f32.mrb[14].mxu0 }
 0xccf   :  { %v1979_v30 = vadd.f32 %v1978_v29, %v1908_v28  ;;  %v9321_v31 = vpop.f32.mrb[15].mxu0 }
 0xcd1   :  { %v1982_v32 = vadd.f32 %v1979_v30, %v10700_v44  ;;  %v2009_v44 = vld [vmem:[%s12174_s14 + $0x10] sm:$0xff] }
 0xcd2   :  { %v9945_v50 = vpack.c.bf16 %v2010_v49, %v2009_v44 }
 0xcd3   :  { %v1983_v34 = vsel %vm162_vm1, %v1982_v32, 0.0 }
 0xcd4   :  { %1984 = vadd.xlane.f32.xlu1 %v1983_v34  ;;  %9946 = vmatpush3.bf16.msra.mxu1 %v9945_v50 }
 0xcd5   :  { %9971 = vmatprep.subr.bf16.mxu1 %v10338_v1 }
 0xd61   :  { %v1985_v39 = vpop.xlane.xlu1 %1984 }
 0xd62   :  { %v1986_v40 = vmul.f32 0.03125, %v1985_v39 }
 0xd64   :  { %v1987_v41 = vsub.f32 %v1982_v32, %v1986_v40 }
 0xd66   :  { %v1988_v42 = vmul.f32 %v1987_v41, %v1987_v41 }
 0xd68   :  { %v1989_v43 = vsel %vm162_vm1, %v1988_v42, 0.0 }
 0xd69   :  { %1990 = vadd.xlane.f32.xlu0 %v1989_v43 }
 0xdf6   :  { %v1991_v51 = vpop.xlane.xlu0 %1990 }
 0xdf7   :  { %v1992_v52 = vmul.f32 0.03125, %v1991_v51 }
 0xdf9   :  { %v1993_v53 = vadd.f32 1e-05, %v1992_v52 }
 0xdfb   :  { %10204 = vrsqrt.f32 %v1993_v53 }
 0xe05   :  { %v10205_v55 = vpop.eup %10204 }
 0xe06   :  { %v1995_v57 = vmul.f32 %v10205_v55, %v1987_v41 }
 0xe08   :  { %v2000_v58 = vmul.f32 %v1999_v54, %v1995_v57 }
 0xe0a   :  { %v10847_v59 = vadd.f32 %v2004_v56, %v2000_v58 }
 0xe0c   :  { %v2006_v47 = vmul.f32 %v10847_v59, %v10754_v62 }
 0xe0e   :  { %9331 = vmatmul.mubr.msk.f32.vlgmr.msra.gmra.mrb[26].mxu1 %vm162_vm1, %v2006_v47 }
 0xe0f   :  { %9376 = vmatprep.mubr.msk.f32.mxu1 %vm10340_vm0, %v10339_v2 }
 0xee1   :  { %v2087_v28 = vpop.f32.mrb[26].mxu1 }
 0xee2   :  { %v2088_v29 = vadd.f32 %v8659_v27, %v2087_v28  ;;  %v9332_v30 = vpop.f32.mrb[27].mxu1 }
 0xee3   :  { %v8661_v30 = vld [vmem:[%s12235_s19 + $0x20] sm:$0xff] }
 0xee4   :  { %v2092_v31 = vmul.f32 0.70710677, %v2088_v29  ;;  %v2091_v10 = vmul.f32 0.5, %v2088_v29 }
 0xee6   :  { %v2093_v32 = vand.u32 2147483647, %v2092_v31  ;;  %vm2122_vm14 = vcmp.ge.f32.partialorder %v2092_v31, 0.0  ;;  %v8662_v31 = vld [vmem:[%s12235_s19 + $0x28] sm:$0xff] }
 0xee7   :  { %v2123_v7 = vsel %vm2122_vm14, 1.0, %v10356_v6 }
 0xee8   :  { %v2094_v34 = vmul.f32 0.5, %v2093_v32  ;;  %v2116_v58 = vsub.f32 0.0, %v2093_v32 }
 0xeea   :  { %v2095_v39 = vadd.f32 1.0, %v2094_v34  ;;  %v2117_v60 = vmul.f32 %v2116_v58, %v2093_v32  ;;  %v9972_v32 = vpack.c.bf16 %v8662_v31, %v8661_v30  ;;  %v8664_v34 = vld [vmem:[%s12235_s19 + $0x38] sm:$0xff] }
 0xeec   :  { %10206 = vrcp.f32 %v2095_v39  ;;  %9973 = vmatpush3.bf16.msra.mxu1 %v9972_v32 }
 0xeed   :  { %9974 = vmatprep.subr.bf16.mxu1 %v10338_v1 }
 0xef6   :  { %v10207_v40 = vpop.eup %10206 }
 0xef7   :  { %v2098_v41 = vmul.f32 0.17087276, %v10207_v40 }
 0xef9   :  { %v2099_v42 = vadd.f32 -0.82215226, %v2098_v41 }
 0xefb   :  { %v2100_v43 = vmul.f32 %v10207_v40, %v2099_v42 }
 0xefd   :  { %v2101_v45 = vadd.f32 1.4885159, %v2100_v43  ;;  %v2238_v43 = vrot.slane %v2128_v15, %v10691_v35 }
 0xeff   :  { %v2102_v46 = vmul.f32 %v10207_v40, %v2101_v45 }
 0xf01   :  { %v2103_v48 = vadd.f32 -1.135204, %v2102_v46  ;;  %v2243_v46 = vrot.slane %v2128_v15, %v10694_v38 }
 0xf03   :  { %v2104_v44 = vmul.f32 %v10207_v40, %v2103_v48 }
 0xf05   :  { %v2105_v49 = vadd.f32 0.27886808, %v2104_v44 }
 0xf07   :  { %v2106_v50 = vmul.f32 %v10207_v40, %v2105_v49 }
 0xf09   :  { %v2107_v51 = vadd.f32 -0.18628806, %v2106_v50  ;;  %v8666_v50 = vld [vmem:[%s12163_s5 + $0x1] ss:$0 sm:$0xff]  ;;  %s12264_s5 = sld [smem:[#allocation9_spill]] }
 0xf0b   :  { %v2108_v52 = vmul.f32 %v10207_v40, %v2107_v51 }
 0xf0d   :  { %v2109_v53 = vadd.f32 0.09678418, %v2108_v52 }
 0xf0f   :  { %v2110_v54 = vmul.f32 %v10207_v40, %v2109_v53 }
 0xf11   :  { %v2111_v55 = vadd.f32 0.37409195, %v2110_v54 }
 0xf13   :  { %v2112_v56 = vmul.f32 %v10207_v40, %v2111_v55 }
 0xf15   :  { %v2113_v57 = vadd.f32 1.0000237, %v2112_v56 }
 0xf17   :  { %v2114_v47 = vmul.f32 %v10207_v40, %v2113_v57 }
 0xf19   :  { %v2115_v12 = vadd.f32 -1.2655122, %v2114_v47 }
 0xf1b   :  { %v2118_v61 = vadd.f32 %v2117_v60, %v2115_v12 }
 0xf1d   :  { %v2119_v0 = vmul.f32 1.442695, %v2118_v61 }
 0xf1f   :  { %10208 = vpow2.f32 %v2119_v0 }
 0xf29   :  { %v10209_v4 = vpop.eup %10208 }
 0xf2a   :  { %v2121_v21 = vmul.f32 %v10209_v4, %v10207_v40 }
 0xf2c   :  { %v2124_v5 = vsub.f32 1.0, %v2121_v21 }
 0xf2e   :  { %v2125_v9 = vmul.f32 %v2124_v5, %v2123_v7 }
 0xf30   :  { %v2126_v11 = vadd.f32 1.0, %v2125_v9 }
 0xf32   :  { %v2127_v13 = vmul.f32 %v2126_v11, %v2091_v10 }
 0xf34   :  { %v2129_v14 = vmul.f32 %v2127_v13, %v10754_v62 }
 0xf36   :  { %9366 = vmatmul.mubr.f32.vlgmr.msra.gmra.mrb[16].mxu0 %v2129_v14 }
 0xf37   :  { %9411 = vmatprep.mubr.msk.f32.mxu0 %vm10340_vm0, %v10339_v2 }
0x1009   :  { %v2216_v17 = vpop.f32.mrb[16].mxu0 }
0x100a   :  { %v2217_v18 = vadd.f32 %v2216_v17, %v2149_v16  ;;  %v9367_v19 = vpop.f32.mrb[17].mxu0 }
0x100c   :  { %v2220_v20 = vmul.f32 %v2217_v18, %v10754_v62 }
0x100e   :  { %v2221_v22 = vadd.f32 %v2220_v20, %v10847_v59  ;;  %v8663_v59 = vld [vmem:[%s12235_s19 + $0x30] sm:$0xff] }
0x100f   :  { %v9975_v39 = vpack.c.bf16 %v8664_v34, %v8663_v59 }
0x1010   :  { %v2222_v23 = vsel %vm162_vm1, %v2221_v22, 0.0 }
0x1011   :  { %2223 = vadd.xlane.f32.xlu0 %v2222_v23  ;;  %9976 = vmatpush3.bf16.msra.mxu1 %v9975_v39 }
0x1012   :  { %9379 = vmatprep.subr.mxu1 %v10339_v2 }
0x109e   :  { %v2224_v24 = vpop.xlane.xlu0 %2223 }
0x109f   :  { %v2225_v26 = vmul.f32 0.03125, %v2224_v24 }
0x10a1   :  { %v2226_v27 = vsub.f32 %v2221_v22, %v2225_v26 }
0x10a3   :  { %v2227_v28 = vmul.f32 %v2226_v27, %v2226_v27 }
0x10a5   :  { %v2228_v29 = vsel %vm162_vm1, %v2227_v28, 0.0 }
0x10a6   :  { %2229 = vadd.xlane.f32.xlu1 %v2228_v29 }
0x1133   :  { %v2230_v40 = vpop.xlane.xlu1 %2229 }
0x1134   :  { %v2231_v41 = vmul.f32 0.03125, %v2230_v40 }
0x1136   :  { %v2232_v42 = vadd.f32 1e-05, %v2231_v41 }
0x1138   :  { %10210 = vrsqrt.f32 %v2232_v42 }
0x1142   :  { %v10211_v45 = vpop.eup %10210 }
0x1143   :  { %v2234_v48 = vmul.f32 %v10211_v45, %v2226_v27 }
0x1145   :  { %v2239_v44 = vmul.f32 %v2238_v43, %v2234_v48 }
0x1147   :  { %v10941_v49 = vadd.f32 %v2243_v46, %v2239_v44 }
0x1149   :  { %9377 = vmatmul.mubr.msk.f32.vlgmr.msra.gmra.mrb[28].mxu1 %vm162_vm1, %v10941_v49 }
0x114a   :  { %9381 = vmatprep.mubr.msk.f32.mxu1 %vm10340_vm0, %v10339_v2 }
0x121c   :  { %v2327_v51 = vpop.f32.mrb[28].mxu1 }
0x121d   :  { %v10950_v52 = vadd.f32 %v8666_v50, %v2327_v51  ;;  %v9378_v53 = vpop.f32.mrb[29].mxu1 }
0x121f   :  { %2332 = vrot.lane.b32.xlu0 %v10950_v52, %s12247_s0 }
0x1223   :  { %2498 = vrot.lane.b32.xlu0 %v10950_v52, %s12243_s4 }
0x1227   :  { %2496 = vrot.lane.b32.xlu0 %v10950_v52, %s12248_s25 }
0x1291   :  { %v2333_v54 = vpop.permute.xlu0 %2332 }
0x1292   :  { %9380 = vmatpush3.xpose.msk.msra.mxu1 %vm72_vm2, %v2333_v54 }
0x1293   :  { %9384 = vmatprep.subr.mxu1 %v10339_v2 }
0x1295   :  { %9382 = vmatmul.mubr.msk.f32.vlgmr.msra.gmra.mrb[30].mxu1 %vm72_vm2, %v10950_v52  ;;  %v2499_v7 = vpop.permute.xlu0 %2498 }
0x1296   :  { %9386 = vmatprep.mubr.msk.f32.mxu1 %vm10340_vm0, %v10339_v2 }
0x1299   :  { %v2497_v10 = vpop.permute.xlu0 %2496 }
0x1368   :  { %v2404_v55 = vpop.f32.mrb[30].mxu1 }
0x1369   :  { %v2408_v56 = vsel %vm10560_vm6, %v2404_v55, -10000.0  ;;  %v9383_v57 = vpop.f32.mrb[31].mxu1 }
0x136a   :  { %v2409_v58 = vsel %vm72_vm2, %v2408_v56, -inf }
0x136b   :  { %2410 = vmax.xlane.f32.xlu1 %v2409_v58 }
0x13f8   :  { %v2411_v47 = vpop.xlane.xlu1 %2410 }
0x13f9   :  { %v2412_v12 = vsub.f32 %v2408_v56, %v2411_v47 }
0x13fb   :  { %v2413_v60 = vmul.f32 1.442695, %v2412_v12 }
0x13fd   :  { %10212 = vpow2.f32 %v2413_v60 }
0x1407   :  { %v10213_v61 = vpop.eup %10212 }
0x1408   :  { %v2415_v0 = vsel %vm72_vm2, %v10213_v61, 0.0 }
0x1409   :  { %2416 = vadd.xlane.f32.xlu1 %v2415_v0 }
0x141a   :  { %2420 = vrot.lane.b32.xlu1 %v10950_v52, %s12249_s1 }
0x1496   :  { %v2417_v4 = vpop.xlane.xlu1 %2416 }
0x1497   :  { %10214 = vrcp.f32 %v2417_v4 }
0x149a   :  { %v2421_v21 = vpop.permute.xlu1 %2420 }
0x149b   :  { %9385 = vmatpush3.msra.mxu1 %v2421_v21 }
0x149c   :  { %9389 = vmatprep.subr.mxu1 %v10339_v2 }
0x14a1   :  { %v10215_v5 = vpop.eup %10214 }
0x14a2   :  { %v2419_v9 = vmul.f32 %v10215_v5, %v10213_v61 }
0x14a4   :  { %9387 = vmatmul.mubr.msk.f32.vlgmr.msra.gmra.mrb[32].mxu1 %vm72_vm2, %v2419_v9 }
0x14a5   :  { %9390 = vmatpush3.xpose.msk.msra.mxu1 %vm72_vm2, %v2499_v7  ;;  %9391 = vmatprep.mubr.msk.f32.mxu1 %vm10340_vm0, %v10339_v2  ;;  %v8682_v7 = vld [vmem:[%s12164_s6 + $0x28] sm:$0xff] }
0x14a6   :  { %9394 = vmatprep.subr.mxu1 %v10339_v2 }
0x14a8   :  { %9392 = vmatmul.mubr.msk.f32.vlgmr.msra.gmra.mrb[34].mxu1 %vm72_vm2, %v2497_v10  ;;  %v8683_v10 = vld [vmem:[%s12164_s6 + $0x30] sm:$0xff] }
0x14a9   :  { %9396 = vmatprep.mubr.msk.f32.mxu1 %vm10340_vm0, %v10339_v2 }
0x1577   :  { %v10979_v11 = vpop.f32.mrb[32].mxu1 }
0x1578   :  { %v9388_v13 = vpop.f32.mrb[33].mxu1 }
0x1579   :  { %v8684_v13 = vld [vmem:[%s12164_s6 + $0x38] sm:$0xff] }
0x157b   :  { %v2570_v14 = vpop.f32.mrb[34].mxu1 }
0x157c   :  { %v2574_v15 = vsel %vm10560_vm6, %v2570_v14, -10000.0  ;;  %v9393_v16 = vpop.f32.mrb[35].mxu1  ;;  %v9981_v14 = vpack.c.bf16 %v8684_v13, %v8683_v10 }
0x157d   :  { %v2575_v17 = vsel %vm72_vm2, %v2574_v15, -inf }
0x157e   :  { %2576 = vmax.xlane.f32.xlu1 %v2575_v17 }
0x158f   :  { %2664 = vrot.lane.b32.xlu1 %v10950_v52, %s12241_s27 }
0x1593   :  { %2662 = vrot.lane.b32.xlu1 %v10950_v52, %s12250_s18 }
0x1597   :  { %2828 = vrot.lane.b32.xlu1 %v10950_v52, %s12251_s23 }
0x160b   :  { %v2577_v18 = vpop.xlane.xlu1 %2576 }
0x160c   :  { %v2578_v19 = vsub.f32 %v2574_v15, %v2577_v18 }
0x160e   :  { %v2579_v20 = vmul.f32 1.442695, %v2578_v19 }
0x160f   :  { %v2665_v24 = vpop.permute.xlu1 %2664 }
0x1610   :  { %10216 = vpow2.f32 %v2579_v20  ;;  %v8693_v20 = vld [vmem:[%s12166_s10 + $0x20] sm:$0xff] }
0x1613   :  { %v2663_v28 = vpop.permute.xlu1 %2662 }
0x1617   :  { %v2829_v31 = vpop.permute.xlu1 %2828 }
0x161a   :  { %v10217_v22 = vpop.eup %10216 }
0x161b   :  { %v2581_v23 = vsel %vm72_vm2, %v10217_v22, 0.0 }
0x161c   :  { %2582 = vadd.xlane.f32.xlu0 %v2581_v23 }
0x1632   :  { %2586 = vrot.lane.b32.xlu0 %v10950_v52, %s12252_s30  ;;  %s12260_s30 = smov 56  }
0x1636   :  { %2830 = vrot.lane.b32.xlu0 %v10950_v52, %s12242_s28 }
0x16a9   :  { %v2583_v26 = vpop.xlane.xlu0 %2582 }
0x16aa   :  { %10218 = vrcp.f32 %v2583_v26 }
0x16ad   :  { %v2587_v27 = vpop.permute.xlu0 %2586 }
0x16ae   :  { %9395 = vmatpush3.msra.mxu1 %v2587_v27 }
0x16af   :  { %9399 = vmatprep.subr.mxu1 %v10339_v2 }
0x16b1   :  { %v2831_v29 = vpop.permute.xlu0 %2830 }
0x16b2   :  { %9410 = vmatpush3.xpose.msk.msra.mxu0 %vm72_vm2, %v2831_v29  ;;  %v8695_v29 = vld [vmem:[%s12166_s10 + $0x30] sm:$0xff] }
0x16b3   :  { %9977 = vmatprep.subr.bf16.mxu0 %v10338_v1 }
0x16b4   :  { %v10219_v30 = vpop.eup %10218 }
0x16b5   :  { %9412 = vmatmul.mubr.msk.f32.vlgmr.msra.gmra.mrb[18].mxu0 %vm72_vm2, %v2829_v31  ;;  %v2585_v32 = vmul.f32 %v10219_v30, %v10217_v22  ;;  %v8694_v22 = vld [vmem:[%s12166_s10 + $0x28] sm:$0xff]  ;;  %v8696_v30 = vld [vmem:[%s12166_s10 + $0x38] sm:$0xff] }
0x16b6   :  { %9427 = vmatprep.mubr.msk.f32.mxu0 %vm10340_vm0, %v10339_v2  ;;  %v9990_v26 = vpack.c.bf16 %v8694_v22, %v8693_v20 }
0x16b7   :  { %9397 = vmatmul.mubr.msk.f32.vlgmr.msra.gmra.mrb[36].mxu1 %vm72_vm2, %v2585_v32  ;;  %v9993_v32 = vpack.c.bf16 %v8696_v30, %v8695_v29 }
0x16b8   :  { %9400 = vmatpush3.xpose.msk.msra.mxu1 %vm72_vm2, %v2665_v24  ;;  %9401 = vmatprep.mubr.msk.f32.mxu1 %vm10340_vm0, %v10339_v2 }
0x16b9   :  { %9404 = vmatprep.subr.mxu1 %v10339_v2 }
0x16bb   :  { %9402 = vmatmul.mubr.msk.f32.vlgmr.msra.gmra.mrb[38].mxu1 %vm72_vm2, %v2663_v28 }
0x16bc   :  { %9406 = vmatprep.mubr.msk.f32.mxu1 %vm10340_vm0, %v10339_v2 }
0x1788   :  { %v2902_v59 = vpop.f32.mrb[18].mxu0 }
0x1789   :  { %v2906_v34 = vsel %vm10560_vm6, %v2902_v59, -10000.0  ;;  %v9413_v39 = vpop.f32.mrb[19].mxu0 }
0x178a   :  { %v2658_v40 = vpop.f32.mrb[36].mxu1  ;;  %v2907_v41 = vsel %vm72_vm2, %v2906_v34, -inf }
0x178b   :  { %2908 = vmax.xlane.f32.xlu1 %v2907_v41  ;;  %v9398_v42 = vpop.f32.mrb[37].mxu1 }
0x178e   :  { %v2736_v43 = vpop.f32.mrb[38].mxu1 }
0x178f   :  { %v2740_v45 = vsel %vm10560_vm6, %v2736_v43, -10000.0  ;;  %v9403_v46 = vpop.f32.mrb[39].mxu1 }
0x1790   :  { %v2741_v48 = vsel %vm72_vm2, %v2740_v45, -inf }
0x1791   :  { %2742 = vmax.xlane.f32.xlu0 %v2741_v48 }
0x179c   :  { %2752 = vrot.lane.b32.xlu1 %v10950_v52, %s12253_s2  ;;  %s12261_s2 = smov 40  }
0x17a0   :  { %2995 = vrot.lane.b32.xlu1 %v2658_v40, %s12244_s21 }
0x1818   :  { %v2909_v44 = vpop.xlane.xlu1 %2908 }
0x1819   :  { %v2910_v50 = vsub.f32 %v2906_v34, %v2909_v44 }
0x181b   :  { %v2911_v51 = vmul.f32 1.442695, %v2910_v50 }
0x181c   :  { %v2753_v53 = vpop.permute.xlu1 %2752 }
0x181d   :  { %10220 = vpow2.f32 %v2911_v51  ;;  %9405 = vmatpush3.msra.mxu1 %v2753_v53  ;;  %v8698_v51 = vld [vmem:[%s12170_s11 + $0x1] ss:$0 sm:$0xff] }
0x181e   :  { %v2743_v54 = vpop.xlane.xlu0 %2742  ;;  %9414 = vmatprep.subr.mxu1 %v10339_v2 }
0x181f   :  { %v2744_v37 = vsub.f32 %v2740_v45, %v2743_v54  ;;  %v8687_v54 = vld [vmem:[%s12169_s8 + $0x28] sm:$0xff] }
0x1820   :  { %v2996_v19 = vpop.permute.xlu1 %2995 }
0x1821   :  { %v2745_v55 = vmul.f32 1.442695, %v2744_v37  ;;  %v3006_v24 = vsel %vm72_vm2, %v10979_v11, %v2996_v19  ;;  %v8680_v11 = vld [vmem:[%s12165_s7 + $0x4] sm:$0x7] }
0x1822   :  { %v3019_v59 = vrot.slane %v8680_v11, %v10476_v8 }
0x1823   :  { %10222 = vpow2.f32 %v2745_v55  ;;  %v8688_v55 = vld [vmem:[%s12169_s8 + $0x30] sm:$0xff] }
0x1827   :  { %v10221_v56 = vpop.eup %10220 }
0x1828   :  { %v2913_v57 = vsel %vm72_vm2, %v10221_v56, 0.0 }
0x1829   :  { %2914 = vadd.xlane.f32.xlu0 %v2913_v57 }
0x182d   :  { %v10223_v58 = vpop.eup %10222 }
0x182e   :  { %v2747_v47 = vsel %vm72_vm2, %v10223_v58, 0.0 }
0x182f   :  { %2748 = vadd.xlane.f32.xlu0 %v2747_v47 }
0x1845   :  { %2918 = vrot.lane.b32.xlu0 %v10950_v52, %s12254_s20  ;;  %v8681_v52 = vld [vmem:[%s12164_s6 + $0x20] sm:$0xff]  ;;  %s12263_s20 = sld [smem:[#allocation8_spill]] }
0x1846   :  { %v9978_v9 = vpack.c.bf16 %v8682_v7, %v8681_v52  ;;  %v8691_v7 = vld [vmem:[%s12171_s9 + $0x1] ss:$0 sm:$0xff] }
0x1848   :  { %9979 = vmatpush3.bf16.msra.mxu0 %v9978_v9 }
0x1849   :  { %9980 = vmatprep.subr.bf16.mxu0 %v10338_v1 }
0x184c   :  { %9982 = vmatpush3.bf16.msra.mxu0 %v9981_v14 }
0x184d   :  { %9989 = vmatprep.subr.bf16.mxu0 %v10338_v1 }
0x18b6   :  { %v2915_v12 = vpop.xlane.xlu0 %2914 }
0x18bc   :  { %v2749_v60 = vpop.xlane.xlu0 %2748 }
0x18bd   :  { %10224 = vrcp.f32 %v2749_v60 }
0x18be   :  { %10226 = vrcp.f32 %v2915_v12 }
0x18c0   :  { %v2919_v21 = vpop.permute.xlu0 %2918 }
0x18c7   :  { %v10225_v61 = vpop.eup %10224 }
0x18c8   :  { %v2751_v0 = vmul.f32 %v10225_v61, %v10223_v58  ;;  %v10227_v4 = vpop.eup %10226  ;;  %v3110_v61 = vrot.slane %v8680_v11, %v10691_v35 }
0x18c9   :  { %v2917_v5 = vmul.f32 %v10227_v4, %v10221_v56  ;;  %v8689_v56 = vld [vmem:[%s12169_s8 + $0x38] sm:$0xff]  ;;  %v3115_v4 = vrot.slane %v8680_v11, %v10694_v38 }
0x18ca   :  { %9407 = vmatmul.mubr.msk.f32.vlgmr.msra.gmra.mrb[40].mxu1 %vm72_vm2, %v2751_v0  ;;  %v9987_v57 = vpack.c.bf16 %v8689_v56, %v8688_v55 }
0x18cb   :  { %9415 = vmatpush3.msra.mxu1 %v2919_v21  ;;  %9416 = vmatprep.mubr.msk.f32.mxu1 %vm10340_vm0, %v10339_v2 }
0x18cc   :  { %9983 = vmatprep.subr.bf16.mxu1 %v10338_v1 }
0x18ce   :  { %9417 = vmatmul.mubr.msk.f32.vlgmr.msra.gmra.mrb[42].mxu1 %vm72_vm2, %v2917_v5 }
0x18cf   :  { %9438 = vmatprep.mubr.msk.f32.mxu1 %vm10340_vm0, %v10339_v2 }
0x199d   :  { %v2824_v15 = vpop.f32.mrb[40].mxu1 }
0x199e   :  { %2999 = vrot.lane.b32.xlu1 %v2824_v15, %s12245_s24  ;;  %v9408_v16 = vpop.f32.mrb[41].mxu1 }
0x19a1   :  { %v2990_v17 = vpop.f32.mrb[42].mxu1 }
0x19a2   :  { %3003 = vrot.lane.b32.xlu0 %v2990_v17, %s12246_s22  ;;  %v9418_v18 = vpop.f32.mrb[43].mxu1 }
0x1a10   :  { %v3000_v23 = vpop.permute.xlu1 %2999 }
0x1a11   :  { %v3007_v27 = vsel %vm912_vm7, %v3006_v24, %v3000_v23 }
0x1a14   :  { %v3004_v28 = vpop.permute.xlu0 %3003 }
0x1a15   :  { %v3008_v31 = vsel %vm914_vm8, %v3007_v27, %v3004_v28 }
0x1a16   :  { %9428 = vmatmul.mubr.msk.f32.vlgmr.msra.gmra.mrb[20].mxu0 %vm162_vm1, %v3008_v31 }
0x1a17   :  { %9991 = vmatpush3.bf16.msra.mxu0 %v9990_v26  ;;  %9449 = vmatprep.mubr.msk.f32.mxu0 %vm10340_vm0, %v10339_v2 }
0x1a18   :  { %9992 = vmatprep.subr.bf16.mxu0 %v10338_v1 }
0x1a1b   :  { %9994 = vmatpush3.bf16.msra.mxu0 %v9993_v32 }
0x1a1c   :  { %9462 = vmatprep.subr.mxu0 %v10339_v2 }
0x1a1e   :  { %9450 = vmatmul.mubr.msk.f32.vlgmr.msra.gmra.mrb[22].mxu0 %vm162_vm1, %v10670_v25 }
0x1a1f   :  { %9464 = vmatprep.mubr.msk.f32.mxu0 %vm10340_vm0, %v10339_v2 }
0x1ae9   :  { %v3089_v34 = vpop.f32.mrb[20].mxu0 }
0x1aea   :  { %v3090_v39 = vadd.f32 %v3089_v34, %v3019_v59  ;;  %v9429_v40 = vpop.f32.mrb[21].mxu0 }
0x1aec   :  { %v3093_v41 = vadd.f32 %v3090_v39, %v10941_v49  ;;  %v8686_v49 = vld [vmem:[%s12169_s8 + $0x20] sm:$0xff] }
0x1aed   :  { %v9984_v37 = vpack.c.bf16 %v8687_v54, %v8686_v49 }
0x1aee   :  { %v3094_v42 = vsel %vm162_vm1, %v3093_v41, 0.0 }
0x1aef   :  { %3095 = vadd.xlane.f32.xlu1 %v3094_v42  ;;  %9985 = vmatpush3.bf16.msra.mxu1 %v9984_v37 }
0x1af0   :  { %9986 = vmatprep.subr.bf16.mxu1 %v10338_v1 }
0x1af1   :  { %v3282_v43 = vpop.f32.mrb[22].mxu0 }
0x1af2   :  { %v9451_v45 = vpop.f32.mrb[23].mxu0  ;;  %v11081_v53 = vadd.f32 %v8698_v51, %v3282_v43 }
0x1af3   :  { %9988 = vmatpush3.bf16.msra.mxu1 %v9987_v57 }
0x1af4   :  { %9452 = vmatprep.subr.mxu1 %v10339_v2 }
0x1b7c   :  { %v3096_v25 = vpop.xlane.xlu1 %3095 }
0x1b7d   :  { %v3097_v46 = vmul.f32 0.03125, %v3096_v25 }
0x1b7f   :  { %v3098_v48 = vsub.f32 %v3093_v41, %v3097_v46 }
0x1b81   :  { %v3099_v44 = vmul.f32 %v3098_v48, %v3098_v48 }
0x1b83   :  { %v3100_v50 = vsel %vm162_vm1, %v3099_v44, 0.0 }
0x1b84   :  { %3101 = vadd.xlane.f32.xlu0 %v3100_v50 }
0x1b9a   :  { %3452 = vrot.lane.b32.xlu0 %v11081_v53, %s12248_s25 }
0x1c11   :  { %v3102_v58 = vpop.xlane.xlu0 %3101 }
0x1c12   :  { %v3103_v47 = vmul.f32 0.03125, %v3102_v58 }
0x1c14   :  { %v3104_v12 = vadd.f32 1e-05, %v3103_v47 }
0x1c15   :  { %v3453_v60 = vpop.permute.xlu0 %3452 }
0x1c16   :  { %10228 = vrsqrt.f32 %v3104_v12  ;;  %9463 = vmatpush3.xpose.msk.msra.mxu0 %vm72_vm2, %v3453_v60 }
0x1c17   :  { %9472 = vmatprep.subr.mxu0 %v10339_v2 }
0x1c20   :  { %v10229_v0 = vpop.eup %10228 }
0x1c21   :  { %v3106_v21 = vmul.f32 %v10229_v0, %v3098_v48 }
0x1c23   :  { %v3111_v5 = vmul.f32 %v3110_v61, %v3106_v21 }
0x1c25   :  { %v11103_v52 = vadd.f32 %v3115_v4, %v3111_v5 }
0x1c27   :  { %9439 = vmatmul.mubr.msk.f32.vlgmr.msra.gmra.mrb[44].mxu1 %vm162_vm1, %v11103_v52 }
0x1c28   :  { %9453 = vmatpush3.xpose.msk.msra.mxu1 %vm72_vm2, %v11081_v53  ;;  %9454 = vmatprep.mubr.msk.f32.mxu1 %vm10340_vm0, %v10339_v2 }
0x1c29   :  { %9457 = vmatprep.subr.mxu1 %v10339_v2 }
0x1cfa   :  { %v3199_v9 = vpop.f32.mrb[44].mxu1 }
0x1cfb   :  { %v3200_v10 = vadd.f32 %v8691_v7, %v3199_v9  ;;  %v9440_v13 = vpop.f32.mrb[45].mxu1 }
0x1cfd   :  { %3616 = vrot.lane.b32.xlu0 %v3200_v10, %s12250_s18  ;;  %3450 = vrot.lane.b32.xlu1 %v3200_v10, %s12248_s25 }
0x1cfe   :  { %9455 = vmatmul.mubr.msk.f32.vlgmr.msra.gmra.mrb[46].mxu1 %vm72_vm2, %v3200_v10 }
0x1cff   :  { %9459 = vmatprep.mubr.msk.f32.mxu1 %vm10340_vm0, %v10339_v2 }
0x1d01   :  { %3782 = vrot.lane.b32.xlu0 %v3200_v10, %s12251_s23  ;;  %3618 = vrot.lane.b32.xlu1 %v11081_v53, %s12250_s18 }
0x1d05   :  { %3784 = vrot.lane.b32.xlu1 %v11081_v53, %s12251_s23 }
0x1d6f   :  { %v3451_v14 = vpop.permute.xlu1 %3450  ;;  %v3617_v16 = vpop.permute.xlu0 %3616 }
0x1d70   :  { %9465 = vmatmul.mubr.msk.f32.vlgmr.msra.gmra.mrb[24].mxu0 %vm72_vm2, %v3451_v14 }
0x1d71   :  { %9474 = vmatprep.mubr.msk.f32.mxu0 %vm10340_vm0, %v10339_v2 }
0x1d73   :  { %v3619_v15 = vpop.permute.xlu1 %3618  ;;  %v3783_v18 = vpop.permute.xlu0 %3782 }
0x1d74   :  { %9473 = vmatpush3.xpose.msk.msra.mxu0 %vm72_vm2, %v3619_v15 }
0x1d75   :  { %9482 = vmatprep.subr.mxu0 %v10339_v2 }
0x1d77   :  { %9475 = vmatmul.mubr.msk.f32.vlgmr.msra.gmra.mrb[26].mxu0 %vm72_vm2, %v3617_v16  ;;  %v3785_v17 = vpop.permute.xlu1 %3784 }
0x1d78   :  { %9483 = vmatpush3.xpose.msk.msra.mxu0 %vm72_vm2, %v3785_v17  ;;  %9484 = vmatprep.mubr.msk.f32.mxu0 %vm10340_vm0, %v10339_v2 }
0x1d79   :  { %9995 = vmatprep.subr.bf16.mxu0 %v10338_v1 }
0x1d7b   :  { %9485 = vmatmul.mubr.msk.f32.vlgmr.msra.gmra.mrb[28].mxu0 %vm72_vm2, %v3783_v18 }
0x1d7c   :  { %9500 = vmatprep.mubr.msk.f32.mxu0 %vm10340_vm0, %v10339_v2 }
0x1dd1   :  { %v3358_v19 = vpop.f32.mrb[46].mxu1 }
0x1dd2   :  { %v3362_v20 = vsel %vm10757_vm13, %v3358_v19, -10000.0  ;;  %v9456_v22 = vpop.f32.mrb[47].mxu1 }
0x1dd3   :  { %v3363_v23 = vsel %vm72_vm2, %v3362_v20, -inf  ;;  %v8714_v22 = vld [vmem:[%s12172_s12 + $0x28] sm:$0xff] }
0x1dd4   :  { %3364 = vmax.xlane.f32.xlu1 %v3363_v23 }
0x1e43   :  { %v3524_v24 = vpop.f32.mrb[24].mxu0 }
0x1e44   :  { %v3528_v26 = vsel %vm10757_vm13, %v3524_v24, -10000.0  ;;  %v9466_v27 = vpop.f32.mrb[25].mxu0  ;;  %v8715_v24 = vld [vmem:[%s12172_s12 + $0x30] sm:$0xff] }
0x1e45   :  { %v3529_v28 = vsel %vm72_vm2, %v3528_v26, -inf }
0x1e46   :  { %3530 = vmax.xlane.f32.xlu0 %v3529_v28 }
0x1e4a   :  { %v3690_v29 = vpop.f32.mrb[26].mxu0 }
0x1e4b   :  { %v3694_v30 = vsel %vm10757_vm13, %v3690_v29, -10000.0  ;;  %v9476_v31 = vpop.f32.mrb[27].mxu0 }
0x1e4c   :  { %v3695_v32 = vsel %vm72_vm2, %v3694_v30, -inf }
0x1e4d   :  { %3696 = vmax.xlane.f32.xlu0 %v3695_v32 }
0x1e4e   :  { %v3856_v11 = vpop.f32.mrb[28].mxu0 }
0x1e4f   :  { %v3860_v59 = vsel %vm10757_vm13, %v3856_v11, -10000.0  ;;  %v9486_v34 = vpop.f32.mrb[29].mxu0 }
0x1e50   :  { %v3861_v39 = vsel %vm72_vm2, %v3860_v59, -inf }
0x1e51   :  { %3862 = vmax.xlane.f32.xlu1 %v3861_v39 }
0x1e61   :  { %v3365_v40 = vpop.xlane.xlu1 %3364 }
0x1e62   :  { %v3366_v41 = vsub.f32 %v3362_v20, %v3365_v40  ;;  %3540 = vrot.lane.b32.xlu1 %v11081_v53, %s12243_s4  ;;  %v8713_v20 = vld [vmem:[%s12172_s12 + $0x20] sm:$0xff] }
0x1e63   :  { %v9996_v23 = vpack.c.bf16 %v8714_v22, %v8713_v20  ;;  %v4440_v20 = vld [vmem:[%s12235_s19] sm:$0xff]  ;;  %v4441_v22 = vld [vmem:[%s12235_s19 + $0x8] sm:$0xff] }
0x1e64   :  { %v3367_v42 = vmul.f32 1.442695, %v3366_v41 }
0x1e65   :  { %9997 = vmatpush3.bf16.msra.mxu0 %v9996_v23 }
0x1e66   :  { %10230 = vpow2.f32 %v3367_v42  ;;  %9998 = vmatprep.subr.bf16.mxu0 %v10338_v1 }
0x1e70   :  { %v10231_v43 = vpop.eup %10230 }
0x1e71   :  { %v3369_v45 = vsel %vm72_vm2, %v10231_v43, 0.0 }
0x1e72   :  { %3370 = vadd.xlane.f32.xlu0 %v3369_v45 }
0x1e88   :  { %3374 = vrot.lane.b32.xlu0 %v11081_v53, %s12247_s0 }
0x1ed3   :  { %v3531_v63 = vpop.xlane.xlu0 %3530 }
0x1ed4   :  { %v3532_v25 = vsub.f32 %v3528_v26, %v3531_v63  ;;  %v8716_v26 = vld [vmem:[%s12172_s12 + $0x38] sm:$0xff] }
0x1ed5   :  { %v9999_v27 = vpack.c.bf16 %v8716_v26, %v8715_v24  ;;  %v10032_v24 = vpack.c.bf16 %v4441_v22, %v4440_v20 }
0x1ed6   :  { %v3533_v46 = vmul.f32 1.442695, %v3532_v25 }
0x1ed7   :  { %10000 = vmatpush3.bf16.msra.mxu0 %v9999_v27  ;;  %v4442_v27 = vld [vmem:[%s12235_s19 + $0x10] sm:$0xff] }
0x1ed8   :  { %10232 = vpow2.f32 %v3533_v46  ;;  %10007 = vmatprep.subr.bf16.mxu0 %v10338_v1 }
0x1eda   :  { %v3697_v48 = vpop.xlane.xlu0 %3696 }
0x1edb   :  { %v3698_v44 = vsub.f32 %v3694_v30, %v3697_v48 }
0x1edd   :  { %v3699_v50 = vmul.f32 1.442695, %v3698_v44 }
0x1ede   :  { %v3863_v51 = vpop.xlane.xlu1 %3862 }
0x1edf   :  { %10234 = vpow2.f32 %v3699_v50  ;;  %v3864_v49 = vsub.f32 %v3860_v59, %v3863_v51  ;;  %v11210_v50 = vld [vmem:[%s12234_s29 + $0x1] sm:$0x1]  ;;  %s12262_s29 = smov 48  }
0x1ee0   :  { %v11214_v51 = vrot.slane %v11210_v50, %v10476_v8  ;;  %vm4363_vm3 = vcmp.ne.f32.partialorder %v11210_v50, 0.0 }
0x1ee1   :  { %v3865_v54 = vmul.f32 1.442695, %v3864_v49  ;;  %v8743_v49 = vld [vmem:[%s12236_s26 + $0x20] sm:$0xff] }
0x1ee2   :  { %v10233_v37 = vpop.eup %10232  ;;  %v3541_v4 = vpop.permute.xlu1 %3540 }
0x1ee3   :  { %10236 = vpow2.f32 %v3865_v54  ;;  %v3535_v55 = vsel %vm72_vm2, %v10233_v37, 0.0  ;;  %v4376_v54 = vmul.f32 %v8743_v49, %v11214_v51  ;;  %v8737_v49 = vld [vmem:[%s12175_s16 + $0xd8] sm:$0xff] }
0x1ee4   :  { %3536 = vadd.xlane.f32.xlu1 %v3535_v55  ;;  %v8745_v55 = vld [vmem:[%s12236_s26 + $0x30] sm:$0xff] }
0x1ee9   :  { %v10235_v56 = vpop.eup %10234 }
0x1eea   :  { %v3701_v57 = vsel %vm72_vm2, %v10235_v56, 0.0 }
0x1eeb   :  { %3702 = vadd.xlane.f32.xlu0 %v3701_v57  ;;  %v8746_v57 = vld [vmem:[%s12236_s26 + $0x38] sm:$0xff] }
0x1eed   :  { %v10237_v58 = vpop.eup %10236 }
0x1eee   :  { %v3867_v47 = vsel %vm72_vm2, %v10237_v58, 0.0 }
0x1eef   :  { %3868 = vadd.xlane.f32.xlu1 %v3867_v47 }
0x1eff   :  { %v3371_v12 = vpop.xlane.xlu0 %3370 }
0x1f00   :  { %10238 = vrcp.f32 %v3371_v12  ;;  %3706 = vrot.lane.b32.xlu1 %v11081_v53, %s12241_s27 }
0x1f01   :  { %3872 = vrot.lane.b32.xlu0 %v11081_v53, %s12242_s28 }
0x1f03   :  { %v3375_v60 = vpop.permute.xlu0 %3374 }
0x1f04   :  { %9458 = vmatpush3.msra.mxu1 %v3375_v60 }
0x1f05   :  { %9467 = vmatprep.subr.mxu1 %v10339_v2 }
0x1f0a   :  { %v10239_v61 = vpop.eup %10238 }
0x1f0b   :  { %v3373_v0 = vmul.f32 %v10239_v61, %v10231_v43  ;;  %v8712_v43 = vld [vmem:[%s12173_s13 + $0x4] sm:$0x7] }
0x1f0c   :  { %v3973_v45 = vrot.slane %v8712_v43, %v10476_v8 }
0x1f0d   :  { %9460 = vmatmul.mubr.msk.f32.vlgmr.msra.gmra.mrb[48].mxu1 %vm72_vm2, %v3373_v0 }
0x1f0e   :  { %9468 = vmatpush3.msra.mxu1 %v3541_v4  ;;  %9469 = vmatprep.mubr.msk.f32.mxu1 %vm10340_vm0, %v10339_v2  ;;  %v8718_v4 = vld [vmem:[%s12174_s14 + $0x20] sm:$0xff] }
0x1f0f   :  { %9477 = vmatprep.subr.mxu1 %v10339_v2 }
0x1f71   :  { %v3537_v21 = vpop.xlane.xlu1 %3536 }
0x1f72   :  { %10240 = vrcp.f32 %v3537_v21  ;;  %v8719_v21 = vld [vmem:[%s12174_s14 + $0x28] sm:$0xff] }
0x1f78   :  { %v3703_v5 = vpop.xlane.xlu0 %3702 }
0x1f79   :  { %10242 = vrcp.f32 %v3703_v5  ;;  %v10002_v5 = vpack.c.bf16 %v8719_v21, %v8718_v4  ;;  %v8752_v21 = vld [vmem:[%s12256_s15] ss:$0 sm:$0xff] }
0x1f7c   :  { %v10241_v53 = vpop.eup %10240  ;;  %v3869_v7 = vpop.xlane.xlu1 %3868 }
0x1f7d   :  { %10244 = vrcp.f32 %v3869_v7  ;;  %v3539_v9 = vmul.f32 %v10241_v53, %v10233_v37  ;;  %v3873_v15 = vpop.permute.xlu0 %3872  ;;  %v8720_v53 = vld [vmem:[%s12174_s14 + $0x30] sm:$0xff]  ;;  %v8721_v7 = vld [vmem:[%s12174_s14 + $0x38] sm:$0xff] }
0x1f7f   :  { %9470 = vmatmul.mubr.msk.f32.vlgmr.msra.gmra.mrb[50].mxu1 %vm72_vm2, %v3539_v9  ;;  %v10005_v9 = vpack.c.bf16 %v8721_v7, %v8720_v53 }
0x1f80   :  { %v3707_v10 = vpop.permute.xlu1 %3706  ;;  %9479 = vmatprep.mubr.msk.f32.mxu1 %vm10340_vm0, %v10339_v2 }
0x1f81   :  { %9478 = vmatpush3.msra.mxu1 %v3707_v10 }
0x1f82   :  { %9487 = vmatprep.subr.mxu1 %v10339_v2 }
0x1f83   :  { %v10243_v13 = vpop.eup %10242 }
0x1f84   :  { %v3705_v14 = vmul.f32 %v10243_v13, %v10235_v56  ;;  %v4378_v56 = vmul.f32 %v8745_v55, %v11214_v51 }
0x1f86   :  { %9480 = vmatmul.mubr.msk.f32.vlgmr.msra.gmra.mrb[52].mxu1 %vm72_vm2, %v3705_v14 }
0x1f87   :  { %v10245_v16 = vpop.eup %10244  ;;  %9488 = vmatpush3.msra.mxu1 %v3873_v15  ;;  %9489 = vmatprep.mubr.msk.f32.mxu1 %vm10340_vm0, %v10339_v2  ;;  %v4064_v15 = vrot.slane %v8712_v43, %v10691_v35 }
0x1f88   :  { %v3871_v17 = vmul.f32 %v10245_v16, %v10237_v58  ;;  %10001 = vmatprep.subr.bf16.mxu1 %v10338_v1  ;;  %v4379_v58 = vmul.f32 %v8746_v57, %v11214_v51  ;;  %v8741_v57 = vld [vmem:[%s12175_s16 + $0xf8] sm:$0xff] }
0x1f8a   :  { %9490 = vmatmul.mubr.msk.f32.vlgmr.msra.gmra.mrb[54].mxu1 %vm72_vm2, %v3871_v17  ;;  %v4069_v17 = vrot.slane %v8712_v43, %v10694_v38  ;;  %v8732_v43 = vld [vmem:[%s12175_s16 + $0xb0] sm:$0xff] }
0x1f8b   :  { %9511 = vmatprep.mubr.msk.f32.mxu1 %vm10340_vm0, %v10339_v2  ;;  %10003 = vmatpush3.bf16.msra.mxu1 %v10002_v5 }
0x1f8c   :  { %10004 = vmatprep.subr.bf16.mxu1 %v10338_v1 }
0x1f8f   :  { %10006 = vmatpush3.bf16.msra.mxu1 %v10005_v9 }
0x1f90   :  { %10031 = vmatprep.subr.bf16.mxu1 %v10338_v1 }
0x1fe0   :  { %v3446_v18 = vpop.f32.mrb[48].mxu1 }
0x1fe1   :  { %v9461_v19 = vpop.f32.mrb[49].mxu1 }
0x2052   :  { %v3612_v28 = vpop.f32.mrb[50].mxu1 }
0x2053   :  { %3949 = vrot.lane.b32.xlu1 %v3612_v28, %s12244_s21  ;;  %v9471_v29 = vpop.f32.mrb[51].mxu1  ;;  %v4443_v28 = vld [vmem:[%s12235_s19 + $0x18] sm:$0xff] }
0x2054   :  { %v10035_v29 = vpack.c.bf16 %v4443_v28, %v4442_v27 }
0x2059   :  { %v3778_v30 = vpop.f32.mrb[52].mxu1 }
0x205a   :  { %3953 = vrot.lane.b32.xlu0 %v3778_v30, %s12245_s24  ;;  %v9481_v31 = vpop.f32.mrb[53].mxu1 }
0x205b   :  { %v8726_v31 = vld [vmem:[%s12175_s16 + $0x80] sm:$0xff] }
0x205d   :  { %v3944_v32 = vpop.f32.mrb[54].mxu1 }
0x205e   :  { %3957 = vrot.lane.b32.xlu1 %v3944_v32, %s12246_s22  ;;  %v9491_v11 = vpop.f32.mrb[55].mxu1  ;;  %v8727_v32 = vld [vmem:[%s12175_s16 + $0x88] sm:$0xff] }
0x205f   :  { %v10008_v11 = vpack.c.bf16 %v8727_v32, %v8726_v31 }
0x20c5   :  { %v3950_v59 = vpop.permute.xlu1 %3949 }
0x20c6   :  { %v3960_v39 = vsel %vm72_vm2, %v3446_v18, %v3950_v59  ;;  %v8728_v59 = vld [vmem:[%s12175_s16 + $0x90] sm:$0xff] }
0x20cc   :  { %v3954_v34 = vpop.permute.xlu0 %3953 }
0x20cd   :  { %v3961_v40 = vsel %vm912_vm7, %v3960_v39, %v3954_v34  ;;  %v8729_v34 = vld [vmem:[%s12175_s16 + $0x98] sm:$0xff] }
0x20ce   :  { %v10011_v39 = vpack.c.bf16 %v8729_v34, %v8728_v59 }
0x20d0   :  { %v3958_v41 = vpop.permute.xlu1 %3957 }
0x20d1   :  { %v3962_v42 = vsel %vm914_vm8, %v3961_v40, %v3958_v41  ;;  %v8730_v40 = vld [vmem:[%s12175_s16 + $0xa0] sm:$0xff]  ;;  %v8731_v41 = vld [vmem:[%s12175_s16 + $0xa8] sm:$0xff] }
0x20d2   :  { %9501 = vmatmul.mubr.msk.f32.vlgmr.msra.gmra.mrb[30].mxu0 %vm162_vm1, %v3962_v42  ;;  %v10014_v42 = vpack.c.bf16 %v8731_v41, %v8730_v40 }
0x20d3   :  { %9546 = vmatprep.mubr.msk.f32.mxu0 %vm10340_vm0, %v10339_v2  ;;  %10009 = vmatpush3.bf16.msra.mxu0 %v10008_v11 }
0x20d4   :  { %10010 = vmatprep.subr.bf16.mxu0 %v10338_v1 }
0x20d7   :  { %10012 = vmatpush3.bf16.msra.mxu0 %v10011_v39 }
0x20d8   :  { %10013 = vmatprep.subr.bf16.mxu0 %v10338_v1 }
0x20db   :  { %10015 = vmatpush3.bf16.msra.mxu0 %v10014_v42 }
0x20dc   :  { %10016 = vmatprep.subr.bf16.mxu0 %v10338_v1 }
0x21a5   :  { %v4043_v63 = vpop.f32.mrb[30].mxu0 }
0x21a6   :  { %v4044_v25 = vadd.f32 %v4043_v63, %v3973_v45  ;;  %v9502_v46 = vpop.f32.mrb[31].mxu0  ;;  %v8733_v45 = vld [vmem:[%s12175_s16 + $0xb8] sm:$0xff] }
0x21a7   :  { %v10017_v63 = vpack.c.bf16 %v8733_v45, %v8732_v43  ;;  %v8735_v46 = vld [vmem:[%s12175_s16 + $0xc8] sm:$0xff] }
0x21a8   :  { %v4047_v48 = vadd.f32 %v4044_v25, %v11103_v52  ;;  %v8744_v52 = vld [vmem:[%s12236_s26 + $0x28] sm:$0xff]  ;;  %v8734_v25 = vld [vmem:[%s12175_s16 + $0xc0] sm:$0xff]  ;;  %s12259_s26 = smov 64  }
0x21a9   :  { %v4377_v37 = vmul.f32 %v8744_v52, %v11214_v51  ;;  %10018 = vmatpush3.bf16.msra.mxu0 %v10017_v63  ;;  %v8738_v52 = vld [vmem:[%s12175_s16 + $0xe0] sm:$0xff] }
0x21aa   :  { %v4048_v44 = vsel %vm162_vm1, %v4047_v48, 0.0  ;;  %10019 = vmatprep.subr.bf16.mxu0 %v10338_v1 }
0x21ab   :  { %4049 = vadd.xlane.f32.xlu0 %v4048_v44  ;;  %v8736_v44 = vld [vmem:[%s12175_s16 + $0xd0] sm:$0xff] }
0x21d8   :  { %4380 = vxpose.xlu0.b32.start [1/4] (short) (narrow) %v4376_v54, 8  ;;  %v10023_v54 = vpack.c.bf16 %v8737_v49, %v8736_v44 }
0x21dc   :  { %4381 = vxpose.xlu0.b32.cont [2/4] (short) (narrow) %v4377_v37, 8  ;;  %v8739_v37 = vld [vmem:[%s12175_s16 + $0xe8] sm:$0xff] }
0x21dd   :  { %v10026_v55 = vpack.c.bf16 %v8739_v37, %v8738_v52 }
0x21e0   :  { %4382 = vxpose.xlu0.b32.cont [3/4] (short) (narrow) %v4378_v56, 8  ;;  %v8740_v56 = vld [vmem:[%s12175_s16 + $0xf0] sm:$0xff] }
0x21e4   :  { %4383 = vxpose.xlu0.b32.end [4/4] (short) (narrow) %v4379_v58, 8  ;;  %v10029_v58 = vpack.c.bf16 %v8741_v57, %v8740_v56  ;;  %v4364_v56 = vsel %vm4363_vm3, 1, %v10348_v33 }
0x21e5   :  { %v4368_v57 = vrot.slane %v4364_v56, %v10476_v8 }
0x21e7   :  { %vm4369_vm4 = vcmp.eq.s32.totalorder %v4368_v57, 1 }
0x21e8   :  { %vm11360_vm6 = vmor %vm76_vm5, %vm4369_vm4 }
0x2238   :  { %v4050_v47 = vpop.xlane.xlu0 %4049 }
0x2239   :  { %v4051_v12 = vmul.f32 0.03125, %v4050_v47  ;;  %v8723_v47 = vld [vmem:[%s12255_s17 + $0x1] ss:$0 sm:$0xff] }
0x223b   :  { %v4052_v60 = vsub.f32 %v4047_v48, %v4051_v12  ;;  %v10020_v48 = vpack.c.bf16 %v8735_v46, %v8734_v25 }
0x223d   :  { %v4053_v61 = vmul.f32 %v4052_v60, %v4052_v60  ;;  %10021 = vmatpush3.bf16.msra.mxu0 %v10020_v48 }
0x223e   :  { %10022 = vmatprep.subr.bf16.mxu0 %v10338_v1 }
0x223f   :  { %v4054_v0 = vsel %vm162_vm1, %v4053_v61, 0.0 }
0x2240   :  { %4055 = vadd.xlane.f32.xlu1 %v4054_v0 }
0x2241   :  { %10024 = vmatpush3.bf16.msra.mxu0 %v10023_v54 }
0x2242   :  { %10025 = vmatprep.subr.bf16.mxu0 %v10338_v1 }
0x2245   :  { %10027 = vmatpush3.bf16.msra.mxu0 %v10026_v55 }
0x2246   :  { %10028 = vmatprep.subr.bf16.mxu0 %v10338_v1 }
0x2249   :  { %10030 = vmatpush3.bf16.msra.mxu0 %v10029_v58 }
0x224a   :  { %9590 = vmatprep.subr.mxu0 %v10339_v2 }
0x2258   :  { %v11269_v30 = vpop.trf.xlu0 }
0x22cd   :  { %v4056_v10 = vpop.xlane.xlu1 %4055 }
0x22ce   :  { %v4057_v13 = vmul.f32 0.03125, %v4056_v10 }
0x22d0   :  { %v4058_v14 = vadd.f32 1e-05, %v4057_v13 }
0x22d2   :  { %10246 = vrsqrt.f32 %v4058_v14 }
0x22dc   :  { %v10247_v16 = vpop.eup %10246 }
0x22dd   :  { %v4060_v18 = vmul.f32 %v10247_v16, %v4052_v60 }
0x22df   :  { %v4065_v19 = vmul.f32 %v4064_v15, %v4060_v18 }
0x22e1   :  { %v11255_v23 = vadd.f32 %v4069_v17, %v4065_v19 }
0x22e3   :  { %v4071_v26 = vmul.f32 %v11255_v23, %v10754_v62 }
0x22e5   :  { %9512 = vmatmul.mubr.msk.f32.vlgmr.msra.gmra.mrb[56].mxu1 %vm162_vm1, %v4071_v26 }
0x22e6   :  { %10033 = vmatpush3.bf16.msra.mxu1 %v10032_v24  ;;  %9557 = vmatprep.mubr.msk.f32.mxu1 %vm10340_vm0, %v10339_v2 }
0x22e7   :  { %10034 = vmatprep.subr.bf16.mxu1 %v10338_v1 }
0x22ea   :  { %10036 = vmatpush3.bf16.msra.mxu1 %v10035_v29 }
0x22eb   :  { %9560 = vmatprep.subr.mxu1 %v10339_v2 }
0x22ed   :  { %9558 = vmatmul.mubr.msk.f32.vlgmr.msra.gmra.mrb[58].mxu1 %vm162_vm1, %v11269_v30 }
0x22ee   :  { %9562 = vmatprep.mubr.msk.f32.mxu1 %vm10340_vm0, %v10339_v2 }
0x23b8   :  { %v4154_v12 = vpop.f32.mrb[56].mxu1 }
0x23b9   :  { %v4155_v60 = vadd.f32 %v8723_v47, %v4154_v12  ;;  %v9513_v61 = vpop.f32.mrb[57].mxu1 }
0x23bb   :  { %v4159_v0 = vmul.f32 0.70710677, %v4155_v60  ;;  %v4158_v48 = vmul.f32 0.5, %v4155_v60 }
0x23bd   :  { %v4160_v4 = vand.u32 2147483647, %v4159_v0  ;;  %vm4189_vm15 = vcmp.ge.f32.partialorder %v4159_v0, 0.0 }
0x23be   :  { %v4190_v25 = vsel %vm4189_vm15, 1.0, %v10356_v6 }
0x23bf   :  { %v4161_v5 = vmul.f32 0.5, %v4160_v4  ;;  %v4183_v59 = vsub.f32 0.0, %v4160_v4 }
0x23c0   :  { %v4520_v53 = vpop.f32.mrb[58].mxu1 }
0x23c1   :  { %v4162_v7 = vadd.f32 1.0, %v4161_v5  ;;  %v11338_v9 = vadd.f32 %v8752_v21, %v4520_v53  ;;  %v9559_v10 = vpop.f32.mrb[59].mxu1  ;;  %v4184_v40 = vmul.f32 %v4183_v59, %v4160_v4 }
0x23c3   :  { %10248 = vrcp.f32 %v4162_v7  ;;  %4525 = vrot.lane.b32.xlu1 %v11338_v9, %s12247_s0 }
0x23cd   :  { %v10249_v13 = vpop.eup %10248 }
0x23ce   :  { %v4165_v14 = vmul.f32 0.17087276, %v10249_v13 }
0x23d0   :  { %v4166_v15 = vadd.f32 -0.82215226, %v4165_v14 }
0x23d2   :  { %v4167_v16 = vmul.f32 %v10249_v13, %v4166_v15 }
0x23d4   :  { %v4168_v17 = vadd.f32 1.4885159, %v4167_v16 }
0x23d6   :  { %v4169_v18 = vmul.f32 %v10249_v13, %v4168_v17 }
0x23d8   :  { %v4170_v19 = vadd.f32 -1.135204, %v4169_v18 }
0x23da   :  { %v4171_v20 = vmul.f32 %v10249_v13, %v4170_v19 }
0x23dc   :  { %v4172_v22 = vadd.f32 0.27886808, %v4171_v20 }
0x23de   :  { %v4173_v24 = vmul.f32 %v10249_v13, %v4172_v22 }
0x23e0   :  { %v4174_v26 = vadd.f32 -0.18628806, %v4173_v24 }
0x23e2   :  { %v4175_v27 = vmul.f32 %v10249_v13, %v4174_v26 }
0x23e4   :  { %v4176_v28 = vadd.f32 0.09678418, %v4175_v27 }
0x23e6   :  { %v4177_v29 = vmul.f32 %v10249_v13, %v4176_v28 }
0x23e8   :  { %v4178_v31 = vadd.f32 0.37409195, %v4177_v29 }
0x23ea   :  { %v4179_v32 = vmul.f32 %v10249_v13, %v4178_v31 }
0x23ec   :  { %v4180_v11 = vadd.f32 1.0000237, %v4179_v32 }
0x23ee   :  { %v4181_v34 = vmul.f32 %v10249_v13, %v4180_v11 }
0x23f0   :  { %v4182_v39 = vadd.f32 -1.2655122, %v4181_v34 }
0x23f2   :  { %v4185_v41 = vadd.f32 %v4184_v40, %v4182_v39 }
0x23f4   :  { %v4186_v42 = vmul.f32 1.442695, %v4185_v41 }
0x23f6   :  { %10250 = vpow2.f32 %v4186_v42 }
0x2400   :  { %v10251_v43 = vpop.eup %10250 }
0x2401   :  { %v4188_v45 = vmul.f32 %v10251_v43, %v10249_v13 }
0x2403   :  { %v4191_v63 = vsub.f32 1.0, %v4188_v45 }
0x2405   :  { %v4192_v46 = vmul.f32 %v4191_v63, %v4190_v25 }
0x2407   :  { %v4193_v44 = vadd.f32 1.0, %v4192_v46 }
0x2409   :  { %v4194_v49 = vmul.f32 %v4193_v44, %v4158_v48 }
0x240b   :  { %v4197_v54 = vmul.f32 %v4194_v49, %v10754_v62 }
0x240d   :  { %9547 = vmatmul.mubr.f32.vlgmr.msra.gmra.mrb[32].mxu0 %v4197_v54 }
0x240e   :  { %9592 = vmatprep.mubr.msk.f32.mxu0 %vm10340_vm0, %v10339_v2 }
0x2435   :  { %v4526_v52 = vpop.permute.xlu1 %4525 }
0x2436   :  { %9561 = vmatpush3.xpose.msk.msra.mxu1 %vm72_vm2, %v4526_v52 }
0x2437   :  { %9565 = vmatprep.subr.mxu1 %v10339_v2 }
0x2439   :  { %9563 = vmatmul.mubr.msk.f32.vlgmr.msra.gmra.mrb[60].mxu1 %vm72_vm2, %v11338_v9 }
0x243a   :  { %9567 = vmatprep.mubr.msk.f32.mxu1 %vm10340_vm0, %v10339_v2 }
0x24e0   :  { %v11352_v37 = vpop.f32.mrb[32].mxu0 }
0x24e1   :  { %v9548_v55 = vpop.f32.mrb[33].mxu0 }
0x250c   :  { %v4597_v47 = vpop.f32.mrb[60].mxu1 }
0x250d   :  { %v4601_v12 = vsel %vm11360_vm6, %v4597_v47, -10000.0  ;;  %v9564_v60 = vpop.f32.mrb[61].mxu1 }
0x250e   :  { %v4602_v61 = vsel %vm72_vm2, %v4601_v12, -inf }
0x250f   :  { %4603 = vmax.xlane.f32.xlu1 %v4602_v61 }
0x2520   :  { %4613 = vrot.lane.b32.xlu1 %v11338_v9, %s12259_s26  ;;  %s12267_s26 = sld [smem:[#allocation11_spill]] }
0x2524   :  { %4691 = vrot.lane.b32.xlu1 %v11338_v9, %s12243_s4 }
0x2528   :  { %4689 = vrot.lane.b32.xlu1 %v11338_v9, %s12248_s25 }
0x259c   :  { %v4604_v50 = vpop.xlane.xlu1 %4603 }
0x259d   :  { %v4605_v0 = vsub.f32 %v4601_v12, %v4604_v50 }
0x259f   :  { %v4606_v4 = vmul.f32 1.442695, %v4605_v0 }
0x25a0   :  { %v4614_v21 = vpop.permute.xlu1 %4613 }
0x25a1   :  { %10252 = vpow2.f32 %v4606_v4  ;;  %9566 = vmatpush3.msra.mxu1 %v4614_v21 }
0x25a2   :  { %9570 = vmatprep.subr.mxu1 %v10339_v2 }
0x25a4   :  { %v4692_v13 = vpop.permute.xlu1 %4691 }
0x25a8   :  { %v4690_v15 = vpop.permute.xlu1 %4689 }
0x25ab   :  { %v10253_v5 = vpop.eup %10252 }
0x25ac   :  { %v4608_v53 = vsel %vm72_vm2, %v10253_v5, 0.0 }
0x25ad   :  { %4609 = vadd.xlane.f32.xlu0 %v4608_v53 }
0x25c3   :  { %4779 = vrot.lane.b32.xlu0 %v11338_v9, %s12260_s30  ;;  %s12269_s30 = smov 56  }
0x25c7   :  { %4855 = vrot.lane.b32.xlu0 %v11338_v9, %s12250_s18 }
0x263a   :  { %v4610_v7 = vpop.xlane.xlu0 %4609 }
0x263b   :  { %10254 = vrcp.f32 %v4610_v7 }
0x263e   :  { %v4780_v16 = vpop.permute.xlu0 %4779 }
0x2642   :  { %v4856_v32 = vpop.permute.xlu0 %4855 }
0x2645   :  { %v10255_v10 = vpop.eup %10254 }
0x2646   :  { %v4612_v14 = vmul.f32 %v10255_v10, %v10253_v5 }
0x2648   :  { %9568 = vmatmul.mubr.msk.f32.vlgmr.msra.gmra.mrb[62].mxu1 %vm72_vm2, %v4612_v14 }
0x2649   :  { %9571 = vmatpush3.xpose.msk.msra.mxu1 %vm72_vm2, %v4692_v13  ;;  %9572 = vmatprep.mubr.msk.f32.mxu1 %vm10340_vm0, %v10339_v2 }
0x264a   :  { %9575 = vmatprep.subr.mxu1 %v10339_v2 }
0x264c   :  { %9573 = vmatmul.mubr.msk.f32.vlgmr.msra.gmra.mrb[64].mxu1 %vm72_vm2, %v4690_v15  ;;  %v5204_v15 = vld [vmem:[%s12164_s6 + $0x8] sm:$0xff] }
0x264d   :  { %9576 = vmatpush3.msra.mxu1 %v4780_v16  ;;  %9577 = vmatprep.mubr.msk.f32.mxu1 %vm10340_vm0, %v10339_v2 }
0x264e   :  { %9580 = vmatprep.subr.mxu1 %v10339_v2 }
0x271b   :  { %v11388_v17 = vpop.f32.mrb[62].mxu1 }
0x271c   :  { %v9569_v18 = vpop.f32.mrb[63].mxu1 }
0x271d   :  { %v5205_v18 = vld [vmem:[%s12164_s6 + $0x10] sm:$0xff] }
0x271f   :  { %v4763_v19 = vpop.f32.mrb[64].mxu1 }
0x2720   :  { %v4767_v20 = vsel %vm11360_vm6, %v4763_v19, -10000.0  ;;  %v9574_v22 = vpop.f32.mrb[65].mxu1  ;;  %v5206_v19 = vld [vmem:[%s12164_s6 + $0x18] sm:$0xff] }
0x2721   :  { %v4768_v24 = vsel %vm72_vm2, %v4767_v20, -inf }
0x2722   :  { %4769 = vmax.xlane.f32.xlu1 %v4768_v24 }
0x2733   :  { %4857 = vrot.lane.b32.xlu1 %v11338_v9, %s12241_s27 }
0x27af   :  { %v4770_v26 = vpop.xlane.xlu1 %4769 }
0x27b0   :  { %v4771_v27 = vsub.f32 %v4767_v20, %v4770_v26  ;;  %v10041_v20 = vpack.c.bf16 %v5206_v19, %v5205_v18 }
0x27b2   :  { %v4772_v28 = vmul.f32 1.442695, %v4771_v27 }
0x27b3   :  { %v4858_v41 = vpop.permute.xlu1 %4857 }
0x27b4   :  { %10256 = vpow2.f32 %v4772_v28 }
0x27be   :  { %v10257_v29 = vpop.eup %10256 }
0x27bf   :  { %v4774_v31 = vsel %vm72_vm2, %v10257_v29, 0.0 }
0x27c0   :  { %4775 = vadd.xlane.f32.xlu0 %v4774_v31 }
0x27d6   :  { %5023 = vrot.lane.b32.xlu0 %v11338_v9, %s12242_s28 }
0x27da   :  { %5021 = vrot.lane.b32.xlu0 %v11338_v9, %s12251_s23 }
0x284d   :  { %v4776_v11 = vpop.xlane.xlu0 %4775 }
0x284e   :  { %10258 = vrcp.f32 %v4776_v11 }
0x2851   :  { %v5024_v59 = vpop.permute.xlu0 %5023 }
0x2852   :  { %9591 = vmatpush3.xpose.msk.msra.mxu0 %vm72_vm2, %v5024_v59 }
0x2853   :  { %10037 = vmatprep.subr.bf16.mxu0 %v10338_v1 }
0x2855   :  { %v5022_v34 = vpop.permute.xlu0 %5021 }
0x2856   :  { %9593 = vmatmul.mubr.msk.f32.vlgmr.msra.gmra.mrb[34].mxu0 %vm72_vm2, %v5022_v34  ;;  %v5202_v34 = vld [vmem:[%s12165_s7] sm:$0x7] }
0x2857   :  { %9608 = vmatprep.mubr.msk.f32.mxu0 %vm10340_vm0, %v10339_v2  ;;  %v5301_v19 = vrot.slane %v5202_v34, %v10691_v35 }
0x2858   :  { %v10259_v39 = vpop.eup %10258 }
0x2859   :  { %v4778_v40 = vmul.f32 %v10259_v39, %v10257_v29  ;;  %v5210_v39 = vrot.slane %v5202_v34, %v10476_v8 }
0x285b   :  { %9578 = vmatmul.mubr.msk.f32.vlgmr.msra.gmra.mrb[66].mxu1 %vm72_vm2, %v4778_v40 }
0x285c   :  { %9581 = vmatpush3.xpose.msk.msra.mxu1 %vm72_vm2, %v4858_v41  ;;  %9582 = vmatprep.mubr.msk.f32.mxu1 %vm10340_vm0, %v10339_v2 }
0x285d   :  { %9585 = vmatprep.subr.mxu1 %v10339_v2 }
0x285f   :  { %9583 = vmatmul.mubr.msk.f32.vlgmr.msra.gmra.mrb[68].mxu1 %vm72_vm2, %v4856_v32 }
0x2860   :  { %9587 = vmatprep.mubr.msk.f32.mxu1 %vm10340_vm0, %v10339_v2 }
0x2929   :  { %v5095_v42 = vpop.f32.mrb[34].mxu0 }
0x292a   :  { %v5099_v43 = vsel %vm11360_vm6, %v5095_v42, -10000.0  ;;  %v9594_v45 = vpop.f32.mrb[35].mxu0 }
0x292b   :  { %v5100_v63 = vsel %vm72_vm2, %v5099_v43, -inf  ;;  %v5392_v45 = vld [vmem:[%s12166_s10] sm:$0xff] }
0x292c   :  { %5101 = vmax.xlane.f32.xlu0 %v5100_v63  ;;  %v5393_v63 = vld [vmem:[%s12166_s10 + $0x8] sm:$0xff] }
0x292e   :  { %v4851_v25 = vpop.f32.mrb[66].mxu1 }
0x292f   :  { %v9579_v46 = vpop.f32.mrb[67].mxu1 }
0x2930   :  { %v5395_v46 = vld [vmem:[%s12166_s10 + $0x18] sm:$0xff] }
0x2932   :  { %v4929_v48 = vpop.f32.mrb[68].mxu1 }
0x2933   :  { %v4933_v44 = vsel %vm11360_vm6, %v4929_v48, -10000.0  ;;  %v9584_v49 = vpop.f32.mrb[69].mxu1 }
0x2934   :  { %v4934_v54 = vsel %vm72_vm2, %v4933_v44, -inf }
0x2935   :  { %4935 = vmax.xlane.f32.xlu1 %v4934_v54  ;;  %v8748_v54 = vld [vmem:[%s12264_s5 + $0x20] sm:$0xff] }
0x29b9   :  { %v5102_v52 = vpop.xlane.xlu0 %5101 }
0x29ba   :  { %v5103_v55 = vsub.f32 %v5099_v43, %v5102_v52 }
0x29bc   :  { %v5104_v56 = vmul.f32 1.442695, %v5103_v55  ;;  %v8749_v55 = vld [vmem:[%s12264_s5 + $0x28] sm:$0xff] }
0x29be   :  { %10260 = vpow2.f32 %v5104_v56 }
0x29c2   :  { %v4936_v57 = vpop.xlane.xlu1 %4935 }
0x29c3   :  { %v4937_v47 = vsub.f32 %v4933_v44, %v4936_v57  ;;  %v11480_v44 = vld [vmem:[%s12263_s20 + $0x1] sm:$0x1]  ;;  %v8750_v57 = vld [vmem:[%s12264_s5 + $0x30] sm:$0xff] }
0x29c4   :  { %v4423_v49 = vrot.slane %v11480_v44, %v10476_v8  ;;  %vm4429_vm5 = vcmp.ne.f32.partialorder %v11480_v44, 0.0 }
0x29c5   :  { %v4938_v12 = vmul.f32 1.442695, %v4937_v47  ;;  %v4431_v36 = vsel %vm4429_vm5, 1, %v10348_v33 }
0x29c6   :  { %v4425_v52 = vmul.f32 %v8748_v54, %v4423_v49  ;;  %v4426_v56 = vmul.f32 %v8749_v55, %v4423_v49  ;;  %v4427_v47 = vmul.f32 %v8750_v57, %v4423_v49 }
0x29c7   :  { %10262 = vpow2.f32 %v4938_v12  ;;  %v8751_v12 = vld [vmem:[%s12264_s5 + $0x38] sm:$0xff] }
0x29c8   :  { %v10261_v60 = vpop.eup %10260 }
0x29c9   :  { %v5106_v61 = vsel %vm72_vm2, %v10261_v60, 0.0 }
0x29ca   :  { %5107 = vadd.xlane.f32.xlu1 %v5106_v61 }
0x29d1   :  { %v10263_v50 = vpop.eup %10262 }
0x29d2   :  { %v4940_v0 = vsel %vm72_vm2, %v10263_v50, 0.0 }
0x29d3   :  { %4941 = vadd.xlane.f32.xlu0 %v4940_v0 }
0x29db   :  { %5111 = vrot.lane.b32.xlu1 %v11338_v9, %s12261_s2  ;;  %s12270_s2 = smov 48  }
0x29df   :  { %5188 = vrot.lane.b32.xlu1 %v4851_v25, %s12244_s21  ;;  %v5394_v25 = vld [vmem:[%s12166_s10 + $0x10] sm:$0xff] }
0x29e0   :  { %v10053_v48 = vpack.c.bf16 %v5395_v46, %v5394_v25 }
0x29e9   :  { %4945 = vrot.lane.b32.xlu0 %v11338_v9, %s12262_s29  ;;  %v5203_v9 = vld [vmem:[%s12164_s6] sm:$0xff]  ;;  %s12271_s29 = smov 40  }
0x29ea   :  { %v10038_v16 = vpack.c.bf16 %v5204_v15, %v5203_v9 }
0x29ec   :  { %10039 = vmatpush3.bf16.msra.mxu0 %v10038_v16 }
0x29ed   :  { %10040 = vmatprep.subr.bf16.mxu0 %v10338_v1 }
0x29f0   :  { %10042 = vmatpush3.bf16.msra.mxu0 %v10041_v20 }
0x29f1   :  { %10049 = vmatprep.subr.bf16.mxu0 %v10338_v1 }
0x2a57   :  { %v5108_v4 = vpop.xlane.xlu1 %5107 }
0x2a5b   :  { %v5112_v13 = vpop.permute.xlu1 %5111 }
0x2a5f   :  { %v5189_v28 = vpop.permute.xlu1 %5188 }
0x2a60   :  { %v4942_v21 = vpop.xlane.xlu0 %4941  ;;  %v5199_v31 = vsel %vm72_vm2, %v11388_v17, %v5189_v28  ;;  %v8769_v28 = vld [vmem:[%s12170_s11] ss:$0 sm:$0xff] }
0x2a61   :  { %10264 = vrcp.f32 %v4942_v21 }
0x2a62   :  { %10266 = vrcp.f32 %v5108_v4 }
0x2a64   :  { %v4946_v5 = vpop.permute.xlu0 %4945 }
0x2a65   :  { %9586 = vmatpush3.msra.mxu1 %v4946_v5 }
0x2a66   :  { %9595 = vmatprep.subr.mxu1 %v10339_v2 }
0x2a6b   :  { %v10265_v53 = vpop.eup %10264 }
0x2a6c   :  { %v4944_v7 = vmul.f32 %v10265_v53, %v10263_v50  ;;  %v10267_v10 = vpop.eup %10266  ;;  %v5308_v53 = vld [vmem:[%s12169_s8] sm:$0xff] }
0x2a6d   :  { %v5110_v14 = vmul.f32 %v10267_v10, %v10261_v60  ;;  %v4428_v60 = vmul.f32 %v8751_v12, %v4423_v49 }
0x2a6e   :  { %9588 = vmatmul.mubr.msk.f32.vlgmr.msra.gmra.mrb[70].mxu1 %vm72_vm2, %v4944_v7  ;;  %v5309_v7 = vld [vmem:[%s12169_s8 + $0x8] sm:$0xff] }
0x2a6f   :  { %9596 = vmatpush3.msra.mxu1 %v5112_v13  ;;  %9597 = vmatprep.mubr.msk.f32.mxu1 %vm10340_vm0, %v10339_v2  ;;  %v10044_v10 = vpack.c.bf16 %v5309_v7, %v5308_v53  ;;  %v5310_v13 = vld [vmem:[%s12169_s8 + $0x10] sm:$0xff] }
0x2a70   :  { %10043 = vmatprep.subr.bf16.mxu1 %v10338_v1 }
0x2a72   :  { %9598 = vmatmul.mubr.msk.f32.vlgmr.msra.gmra.mrb[72].mxu1 %vm72_vm2, %v5110_v14  ;;  %v5311_v14 = vld [vmem:[%s12169_s8 + $0x18] sm:$0xff] }
0x2a73   :  { %9619 = vmatprep.mubr.msk.f32.mxu1 %vm10340_vm0, %v10339_v2  ;;  %10045 = vmatpush3.bf16.msra.mxu1 %v10044_v10  ;;  %v10047_v9 = vpack.c.bf16 %v5311_v14, %v5310_v13 }
0x2a74   :  { %10046 = vmatprep.subr.bf16.mxu1 %v10338_v1 }
0x2a77   :  { %10048 = vmatpush3.bf16.msra.mxu1 %v10047_v9 }
0x2a78   :  { %9633 = vmatprep.subr.mxu1 %v10339_v2 }
0x2b41   :  { %v5017_v22 = vpop.f32.mrb[70].mxu1 }
0x2b42   :  { %5192 = vrot.lane.b32.xlu0 %v5017_v22, %s12245_s24  ;;  %v9589_v24 = vpop.f32.mrb[71].mxu1  ;;  %v5306_v22 = vrot.slane %v5202_v34, %v10694_v38 }
0x2b45   :  { %v5183_v26 = vpop.f32.mrb[72].mxu1 }
0x2b46   :  { %5196 = vrot.lane.b32.xlu1 %v5183_v26, %s12246_s22  ;;  %v9599_v27 = vpop.f32.mrb[73].mxu1 }
0x2bb4   :  { %v5193_v29 = vpop.permute.xlu0 %5192 }
0x2bb5   :  { %v5200_v32 = vsel %vm912_vm7, %v5199_v31, %v5193_v29 }
0x2bb8   :  { %v5197_v11 = vpop.permute.xlu1 %5196 }
0x2bb9   :  { %v5201_v59 = vsel %vm914_vm8, %v5200_v32, %v5197_v11 }
0x2bba   :  { %9609 = vmatmul.mubr.msk.f32.vlgmr.msra.gmra.mrb[36].mxu0 %vm162_vm1, %v5201_v59  ;;  %v8767_v59 = vld [vmem:[%s12171_s9] ss:$0 sm:$0xff] }
0x2bbb   :  { %9630 = vmatprep.mubr.msk.f32.mxu0 %vm10340_vm0, %v10339_v2 }
0x2c8d   :  { %v5280_v40 = vpop.f32.mrb[36].mxu0 }
0x2c8e   :  { %v5281_v41 = vadd.f32 %v5280_v40, %v5210_v39  ;;  %v9610_v42 = vpop.f32.mrb[37].mxu0 }
0x2c90   :  { %v5284_v17 = vadd.f32 %v5281_v41, %v11269_v30  ;;  %v10050_v30 = vpack.c.bf16 %v5393_v63, %v5392_v45  ;;  %v4359_v41 = vsel %vm64_vm9, %v11214_v51, 0.0  ;;  %v4435_v51 = vrot.slane %v4431_v36, %v10476_v8 }
0x2c91   :  { %v4360_v42 = vsel %vm72_vm2, %v4359_v41, 0.0 }
0x2c92   :  { %v5285_v43 = vsel %vm162_vm1, %v5284_v17, 0.0  ;;  %10051 = vmatpush3.bf16.msra.mxu0 %v10050_v30  ;;  %vm4436_vm10 = vcmp.eq.s32.totalorder %v4435_v51, 1 }
0x2c93   :  { %5286 = vadd.xlane.f32.xlu0 %v5285_v43  ;;  %10052 = vmatprep.subr.bf16.mxu0 %v10338_v1 }
0x2c96   :  { %10054 = vmatpush3.bf16.msra.mxu0 %v10053_v48 }
0x2c97   :  { %9643 = vmatprep.subr.mxu0 %v10339_v2 }
0x2cc0   :  { %5403 = vxpose.xlu0.b32.start [1/4] (short) (narrow) %v4425_v52, 8 }
0x2cc4   :  { %5404 = vxpose.xlu0.b32.cont [2/4] (short) (narrow) %v4426_v56, 8 }
0x2cc8   :  { %5405 = vxpose.xlu0.b32.cont [3/4] (short) (narrow) %v4427_v47, 8 }
0x2ccc   :  { %5406 = vxpose.xlu0.b32.end [4/4] (short) (narrow) %v4428_v60, 8 }
0x2d20   :  { %v5287_v61 = vpop.xlane.xlu0 %5286 }
0x2d21   :  { %v5288_v50 = vmul.f32 0.03125, %v5287_v61 }
0x2d23   :  { %v5289_v0 = vsub.f32 %v5284_v17, %v5288_v50 }
0x2d25   :  { %v5290_v4 = vmul.f32 %v5289_v0, %v5289_v0 }
0x2d27   :  { %v5291_v21 = vsel %vm162_vm1, %v5290_v4, 0.0 }
0x2d28   :  { %5292 = vadd.xlane.f32.xlu1 %v5291_v21 }
0x2d40   :  { %v11497_v5 = vpop.trf.xlu0 }
0x2d41   :  { %9631 = vmatmul.mubr.msk.f32.vlgmr.msra.gmra.mrb[38].mxu0 %vm162_vm1, %v11497_v5 }
0x2d42   :  { %9645 = vmatprep.mubr.msk.f32.mxu0 %vm10340_vm0, %v10339_v2 }
0x2db5   :  { %v5293_v15 = vpop.xlane.xlu1 %5292 }
0x2db6   :  { %v5294_v16 = vmul.f32 0.03125, %v5293_v15 }
0x2db8   :  { %v5295_v18 = vadd.f32 1e-05, %v5294_v16 }
0x2dba   :  { %10268 = vrsqrt.f32 %v5295_v18 }
0x2dc4   :  { %v10269_v20 = vpop.eup %10268 }
0x2dc5   :  { %v5297_v24 = vmul.f32 %v10269_v20, %v5289_v0 }
0x2dc7   :  { %v5302_v26 = vmul.f32 %v5301_v19, %v5297_v24 }
0x2dc9   :  { %v11519_v27 = vadd.f32 %v5306_v22, %v5302_v26 }
0x2dcb   :  { %9620 = vmatmul.mubr.msk.f32.vlgmr.msra.gmra.mrb[74].mxu1 %vm162_vm1, %v11519_v27 }
0x2dcc   :  { %9635 = vmatprep.mubr.msk.f32.mxu1 %vm10340_vm0, %v10339_v2 }
0x2e14   :  { %v5504_v29 = vpop.f32.mrb[38].mxu0 }
0x2e15   :  { %v11528_v31 = vadd.f32 %v8769_v28, %v5504_v29  ;;  %v9632_v32 = vpop.f32.mrb[39].mxu0 }
0x2e17   :  { %5674 = vrot.lane.b32.xlu1 %v11528_v31, %s12248_s25  ;;  %9634 = vmatpush3.xpose.msk.msra.mxu1 %vm72_vm2, %v11528_v31 }
0x2e18   :  { %9638 = vmatprep.subr.mxu1 %v10339_v2 }
0x2e1b   :  { %5840 = vrot.lane.b32.xlu1 %v11528_v31, %s12250_s18 }
0x2e1f   :  { %6006 = vrot.lane.b32.xlu1 %v11528_v31, %s12251_s23 }
0x2e89   :  { %v5675_v11 = vpop.permute.xlu1 %5674 }
0x2e8a   :  { %9644 = vmatpush3.xpose.msk.msra.mxu0 %vm72_vm2, %v5675_v11 }
0x2e8b   :  { %9653 = vmatprep.subr.mxu0 %v10339_v2 }
0x2e8d   :  { %v5841_v17 = vpop.permute.xlu1 %5840 }
0x2e91   :  { %v6007_v43 = vpop.permute.xlu1 %6006 }
0x2e9e   :  { %v5388_v34 = vpop.f32.mrb[74].mxu1 }
0x2e9f   :  { %v5389_v39 = vadd.f32 %v8767_v59, %v5388_v34  ;;  %v9621_v40 = vpop.f32.mrb[75].mxu1 }
0x2ea1   :  { %5672 = vrot.lane.b32.xlu1 %v5389_v39, %s12248_s25  ;;  %9636 = vmatmul.mubr.msk.f32.vlgmr.msra.gmra.mrb[76].mxu1 %vm72_vm2, %v5389_v39 }
0x2ea2   :  { %9640 = vmatprep.mubr.msk.f32.mxu1 %vm10340_vm0, %v10339_v2 }
0x2ea5   :  { %5838 = vrot.lane.b32.xlu1 %v5389_v39, %s12250_s18 }
0x2ea9   :  { %6004 = vrot.lane.b32.xlu1 %v5389_v39, %s12251_s23 }
0x2ecd   :  { %4361 = vadd.xlane.f32.xlu1 %v4360_v42 }
0x2f13   :  { %v5673_v45 = vpop.permute.xlu1 %5672 }
0x2f14   :  { %9646 = vmatmul.mubr.msk.f32.vlgmr.msra.gmra.mrb[40].mxu0 %vm72_vm2, %v5673_v45 }
0x2f15   :  { %9654 = vmatpush3.xpose.msk.msra.mxu0 %vm72_vm2, %v5841_v17  ;;  %9655 = vmatprep.mubr.msk.f32.mxu0 %vm10340_vm0, %v10339_v2 }
0x2f16   :  { %9663 = vmatprep.subr.mxu0 %v10339_v2 }
0x2f17   :  { %v5839_v63 = vpop.permute.xlu1 %5838 }
0x2f18   :  { %9656 = vmatmul.mubr.msk.f32.vlgmr.msra.gmra.mrb[42].mxu0 %vm72_vm2, %v5839_v63 }
0x2f19   :  { %9664 = vmatpush3.xpose.msk.msra.mxu0 %vm72_vm2, %v6007_v43  ;;  %9665 = vmatprep.mubr.msk.f32.mxu0 %vm10340_vm0, %v10339_v2 }
0x2f1a   :  { %10055 = vmatprep.subr.bf16.mxu0 %v10338_v1 }
0x2f1b   :  { %v6005_v3 = vpop.permute.xlu1 %6004 }
0x2f1c   :  { %9666 = vmatmul.mubr.msk.f32.vlgmr.msra.gmra.mrb[44].mxu0 %vm72_vm2, %v6005_v3 }
0x2f1d   :  { %9681 = vmatprep.mubr.msk.f32.mxu0 %vm10340_vm0, %v10339_v2 }
0x2f5a   :  { %v11571_v25 = vpop.xlane.xlu1 %4361 }
0x2f5b   :  { %vm4430_vm9 = vcmp.ne.f32.partialorder %v11571_v25, 0.0 }
0x2f5c   :  { %vm11574_vm11 = vmand %vm4436_vm10, %vm4430_vm9 }
0x2f74   :  { %v5580_v30 = vpop.f32.mrb[76].mxu1 }
0x2f75   :  { %v5584_v48 = vsel %vm11574_vm11, %v5580_v30, -10000.0  ;;  %v9637_v49 = vpop.f32.mrb[77].mxu1 }
0x2f76   :  { %v5585_v44 = vsel %vm72_vm2, %v5584_v48, -inf }
0x2f77   :  { %5586 = vmax.xlane.f32.xlu0 %v5585_v44 }
0x2fe7   :  { %v5746_v33 = vpop.f32.mrb[40].mxu0 }
0x2fe8   :  { %v5750_v54 = vsel %vm11574_vm11, %v5746_v33, -10000.0  ;;  %v9647_v52 = vpop.f32.mrb[41].mxu0  ;;  %v6186_v33 = vld [vmem:[%s12172_s12] sm:$0xff] }
0x2fe9   :  { %v5751_v55 = vsel %vm72_vm2, %v5750_v54, -inf }
0x2fea   :  { %5752 = vmax.xlane.f32.xlu1 %v5751_v55  ;;  %v6188_v55 = vld [vmem:[%s12172_s12 + $0x10] sm:$0xff] }
0x2feb   :  { %v5912_v56 = vpop.f32.mrb[42].mxu0 }
0x2fec   :  { %v5916_v57 = vsel %vm11574_vm11, %v5912_v56, -10000.0  ;;  %v9657_v47 = vpop.f32.mrb[43].mxu0  ;;  %v6189_v56 = vld [vmem:[%s12172_s12 + $0x18] sm:$0xff] }
0x2fed   :  { %v5917_v12 = vsel %vm72_vm2, %v5916_v57, -inf }
0x2fee   :  { %5918 = vmax.xlane.f32.xlu1 %v5917_v12 }
0x2fef   :  { %v6078_v60 = vpop.f32.mrb[44].mxu0 }
0x2ff0   :  { %v6082_v61 = vsel %vm11574_vm11, %v6078_v60, -10000.0  ;;  %v9667_v50 = vpop.f32.mrb[45].mxu0 }
0x2ff1   :  { %v6083_v0 = vsel %vm72_vm2, %v6082_v61, -inf }
0x2ff2   :  { %6084 = vmax.xlane.f32.xlu1 %v6083_v0 }
0x3003   :  { %5596 = vrot.lane.b32.xlu1 %v11528_v31, %s12247_s0 }
0x3004   :  { %v5587_v4 = vpop.xlane.xlu0 %5586 }
0x3005   :  { %v5588_v21 = vsub.f32 %v5584_v48, %v5587_v4 }
0x3007   :  { %v5589_v53 = vmul.f32 1.442695, %v5588_v21 }
0x3009   :  { %10270 = vpow2.f32 %v5589_v53 }
0x3013   :  { %v10271_v7 = vpop.eup %10270 }
0x3014   :  { %v5591_v10 = vsel %vm72_vm2, %v10271_v7, 0.0 }
0x3027   :  { %5592 = vadd.xlane.f32.xlu1 %v5591_v10 }
0x3077   :  { %v5753_v13 = vpop.xlane.xlu1 %5752 }
0x3078   :  { %v5754_v14 = vsub.f32 %v5750_v54, %v5753_v13  ;;  %v6187_v54 = vld [vmem:[%s12172_s12 + $0x8] sm:$0xff] }
0x3079   :  { %v10056_v52 = vpack.c.bf16 %v6187_v54, %v6186_v33  ;;  %v6419_v54 = vld [vmem:[%s12175_s16 + $0x20] sm:$0xff] }
0x307a   :  { %v5755_v9 = vmul.f32 1.442695, %v5754_v14  ;;  %v6185_v14 = vld [vmem:[%s12173_s13] sm:$0x7] }
0x307b   :  { %v5919_v15 = vpop.xlane.xlu1 %5918  ;;  %10057 = vmatpush3.bf16.msra.mxu0 %v10056_v52  ;;  %v6420_v52 = vld [vmem:[%s12175_s16 + $0x28] sm:$0xff] }
0x307c   :  { %10272 = vpow2.f32 %v5755_v9  ;;  %v5920_v16 = vsub.f32 %v5916_v57, %v5919_v15  ;;  %10058 = vmatprep.subr.bf16.mxu0 %v10338_v1  ;;  %v10059_v57 = vpack.c.bf16 %v6189_v56, %v6188_v55  ;;  %v6193_v9 = vrot.slane %v6185_v14, %v10476_v8  ;;  %v6421_v56 = vld [vmem:[%s12175_s16 + $0x30] sm:$0xff] }
0x307d   :  { %v10074_v55 = vpack.c.bf16 %v6420_v52, %v6419_v54 }
0x307e   :  { %v5921_v18 = vmul.f32 1.442695, %v5920_v16 }
0x307f   :  { %v6085_v19 = vpop.xlane.xlu1 %6084  ;;  %10060 = vmatpush3.bf16.msra.mxu0 %v10059_v57  ;;  %v6422_v57 = vld [vmem:[%s12175_s16 + $0x38] sm:$0xff] }
0x3080   :  { %10274 = vpow2.f32 %v5921_v18  ;;  %v6086_v20 = vsub.f32 %v6082_v61, %v6085_v19  ;;  %10067 = vmatprep.subr.bf16.mxu0 %v10338_v1 }
0x3082   :  { %v6087_v22 = vmul.f32 1.442695, %v6086_v20 }
0x3083   :  { %v5597_v24 = vpop.permute.xlu1 %5596 }
0x3084   :  { %10276 = vpow2.f32 %v6087_v22  ;;  %9639 = vmatpush3.msra.mxu1 %v5597_v24 }
0x3085   :  { %9648 = vmatprep.subr.mxu1 %v10339_v2 }
0x3086   :  { %v10273_v26 = vpop.eup %10272 }
0x3087   :  { %v5757_v28 = vsel %vm72_vm2, %v10273_v26, 0.0 }
0x3088   :  { %5758 = vadd.xlane.f32.xlu1 %v5757_v28 }
0x308a   :  { %v10275_v29 = vpop.eup %10274 }
0x308b   :  { %v5923_v32 = vsel %vm72_vm2, %v10275_v29, 0.0 }
0x308c   :  { %5924 = vadd.xlane.f32.xlu1 %v5923_v32  ;;  %v6292_v32 = vld [vmem:[%s12174_s14] sm:$0xff] }
0x308e   :  { %v10277_v11 = vpop.eup %10276 }
0x308f   :  { %v6089_v59 = vsel %vm72_vm2, %v10277_v11, 0.0 }
0x3090   :  { %6090 = vadd.xlane.f32.xlu0 %v6089_v59 }
0x309d   :  { %5928 = vrot.lane.b32.xlu1 %v11528_v31, %s12241_s27 }
0x30a1   :  { %6094 = vrot.lane.b32.xlu1 %v11528_v31, %s12242_s28 }
0x30a6   :  { %5762 = vrot.lane.b32.xlu0 %v11528_v31, %s12243_s4 }
0x30b4   :  { %v5593_v34 = vpop.xlane.xlu1 %5592 }
0x30b5   :  { %10278 = vrcp.f32 %v5593_v34  ;;  %v6295_v34 = vld [vmem:[%s12174_s14 + $0x18] sm:$0xff] }
0x30bf   :  { %v10279_v39 = vpop.eup %10278 }
0x30c0   :  { %v5595_v40 = vmul.f32 %v10279_v39, %v10271_v7 }
0x30c2   :  { %9641 = vmatmul.mubr.msk.f32.vlgmr.msra.gmra.mrb[78].mxu1 %vm72_vm2, %v5595_v40 }
0x30c3   :  { %9650 = vmatprep.mubr.msk.f32.mxu1 %vm10340_vm0, %v10339_v2 }
0x3115   :  { %v5759_v41 = vpop.xlane.xlu1 %5758 }
0x3116   :  { %10280 = vrcp.f32 %v5759_v41 }
0x3119   :  { %v5925_v42 = vpop.xlane.xlu1 %5924 }
0x311a   :  { %10282 = vrcp.f32 %v5925_v42 }
0x311d   :  { %v6091_v17 = vpop.xlane.xlu0 %6090  ;;  %v5929_v63 = vpop.permute.xlu1 %5928 }
0x311e   :  { %10284 = vrcp.f32 %v6091_v17  ;;  %v6284_v17 = vrot.slane %v6185_v14, %v10691_v35 }
0x3120   :  { %v10281_v43 = vpop.eup %10280 }
0x3121   :  { %v5761_v45 = vmul.f32 %v10281_v43, %v10273_v26  ;;  %v5763_v3 = vpop.permute.xlu0 %5762  ;;  %v6095_v51 = vpop.permute.xlu1 %6094 }
0x3122   :  { %9649 = vmatpush3.msra.mxu1 %v5763_v3 }
0x3123   :  { %9651 = vmatmul.mubr.msk.f32.vlgmr.msra.gmra.mrb[80].mxu1 %vm72_vm2, %v5761_v45  ;;  %9658 = vmatprep.subr.mxu1 %v10339_v2  ;;  %v6289_v45 = vrot.slane %v6185_v14, %v10694_v38 }
0x3124   :  { %v10283_v31 = vpop.eup %10282  ;;  %9659 = vmatpush3.msra.mxu1 %v5929_v63  ;;  %9660 = vmatprep.mubr.msk.f32.mxu1 %vm10340_vm0, %v10339_v2 }
0x3125   :  { %v5927_v36 = vmul.f32 %v10283_v31, %v10275_v29  ;;  %9668 = vmatprep.subr.mxu1 %v10339_v2 }
0x3127   :  { %9661 = vmatmul.mubr.msk.f32.vlgmr.msra.gmra.mrb[82].mxu1 %vm72_vm2, %v5927_v36 }
0x3128   :  { %v10285_v30 = vpop.eup %10284  ;;  %9669 = vmatpush3.msra.mxu1 %v6095_v51  ;;  %9670 = vmatprep.mubr.msk.f32.mxu1 %vm10340_vm0, %v10339_v2  ;;  %v6415_v51 = vld [vmem:[%s12175_s16] sm:$0xff] }
0x3129   :  { %v6093_v48 = vmul.f32 %v10285_v30, %v10277_v11  ;;  %10061 = vmatprep.subr.bf16.mxu1 %v10338_v1  ;;  %v6293_v11 = vld [vmem:[%s12174_s14 + $0x8] sm:$0xff] }
0x312a   :  { %v10062_v59 = vpack.c.bf16 %v6293_v11, %v6292_v32  ;;  %v6416_v30 = vld [vmem:[%s12175_s16 + $0x8] sm:$0xff] }
0x312b   :  { %9671 = vmatmul.mubr.msk.f32.vlgmr.msra.gmra.mrb[84].mxu1 %vm72_vm2, %v6093_v48  ;;  %v10068_v48 = vpack.c.bf16 %v6416_v30, %v6415_v51 }
0x312c   :  { %9692 = vmatprep.mubr.msk.f32.mxu1 %vm10340_vm0, %v10339_v2  ;;  %10063 = vmatpush3.bf16.msra.mxu1 %v10062_v59 }
0x312d   :  { %10064 = vmatprep.subr.bf16.mxu1 %v10338_v1 }
0x3195   :  { %v5668_v49 = vpop.f32.mrb[78].mxu1 }
0x3196   :  { %v9642_v44 = vpop.f32.mrb[79].mxu1 }
0x3197   :  { %v6418_v44 = vld [vmem:[%s12175_s16 + $0x18] sm:$0xff] }
0x31f6   :  { %v5834_v47 = vpop.f32.mrb[80].mxu1 }
0x31f7   :  { %6171 = vrot.lane.b32.xlu0 %v5834_v47, %s12244_s21  ;;  %v9652_v12 = vpop.f32.mrb[81].mxu1  ;;  %v10077_v47 = vpack.c.bf16 %v6422_v57, %v6421_v56 }
0x31f8   :  { %v6423_v12 = vld [vmem:[%s12175_s16 + $0x40] sm:$0xff] }
0x31fa   :  { %v6000_v60 = vpop.f32.mrb[82].mxu1 }
0x31fb   :  { %6175 = vrot.lane.b32.xlu1 %v6000_v60, %s12245_s24  ;;  %v9662_v61 = vpop.f32.mrb[83].mxu1  ;;  %v6424_v60 = vld [vmem:[%s12175_s16 + $0x48] sm:$0xff] }
0x31fc   :  { %v10080_v61 = vpack.c.bf16 %v6424_v60, %v6423_v12 }
0x31fe   :  { %v6166_v50 = vpop.f32.mrb[84].mxu1 }
0x31ff   :  { %6179 = vrot.lane.b32.xlu0 %v6166_v50, %s12246_s22  ;;  %v9672_v0 = vpop.f32.mrb[85].mxu1  ;;  %v6425_v50 = vld [vmem:[%s12175_s16 + $0x50] sm:$0xff] }
0x3200   :  { %v6426_v0 = vld [vmem:[%s12175_s16 + $0x58] sm:$0xff] }
0x3269   :  { %v6172_v4 = vpop.permute.xlu0 %6171 }
0x326a   :  { %v6182_v53 = vsel %vm72_vm2, %v5668_v49, %v6172_v4  ;;  %v6417_v49 = vld [vmem:[%s12175_s16 + $0x10] sm:$0xff]  ;;  %v10083_v4 = vpack.c.bf16 %v6426_v0, %v6425_v50 }
0x326b   :  { %v10071_v33 = vpack.c.bf16 %v6418_v44, %v6417_v49 }
0x326d   :  { %v6176_v21 = vpop.permute.xlu1 %6175 }
0x326e   :  { %v6183_v7 = vsel %vm912_vm7, %v6182_v53, %v6176_v21  ;;  %v6427_v21 = vld [vmem:[%s12175_s16 + $0x60] sm:$0xff]  ;;  %v6428_v53 = vld [vmem:[%s12175_s16 + $0x68] sm:$0xff] }
0x3271   :  { %v6180_v10 = vpop.permute.xlu0 %6179 }
0x3272   :  { %v6184_v13 = vsel %vm914_vm8, %v6183_v7, %v6180_v10  ;;  %v10086_v7 = vpack.c.bf16 %v6428_v53, %v6427_v21  ;;  %v6429_v10 = vld [vmem:[%s12175_s16 + $0x70] sm:$0xff] }
0x3273   :  { %9682 = vmatmul.mubr.msk.f32.vlgmr.msra.gmra.mrb[46].mxu0 %vm162_vm1, %v6184_v13  ;;  %v6430_v13 = vld [vmem:[%s12175_s16 + $0x78] sm:$0xff] }
0x3274   :  { %9727 = vmatprep.mubr.msk.f32.mxu0 %vm10340_vm0, %v10339_v2  ;;  %10069 = vmatpush3.bf16.msra.mxu0 %v10068_v48  ;;  %v10089_v14 = vpack.c.bf16 %v6430_v13, %v6429_v10 }
0x3275   :  { %10070 = vmatprep.subr.bf16.mxu0 %v10338_v1 }
0x3278   :  { %10072 = vmatpush3.bf16.msra.mxu0 %v10071_v33 }
0x3279   :  { %10073 = vmatprep.subr.bf16.mxu0 %v10338_v1 }
0x327c   :  { %10075 = vmatpush3.bf16.msra.mxu0 %v10074_v55 }
0x327d   :  { %10076 = vmatprep.subr.bf16.mxu0 %v10338_v1 }
0x3280   :  { %10078 = vmatpush3.bf16.msra.mxu0 %v10077_v47 }
0x3281   :  { %10079 = vmatprep.subr.bf16.mxu0 %v10338_v1 }
0x3284   :  { %10081 = vmatpush3.bf16.msra.mxu0 %v10080_v61  ;;  %v6413_v61 = vld [vmem:[%s12267_s26] sm:$0x7] }
0x3285   :  { %10082 = vmatprep.subr.bf16.mxu0 %v10338_v1  ;;  %v6434_v50 = vrot.slane %v6413_v61, %v10476_v8 }
0x3288   :  { %10084 = vmatpush3.bf16.msra.mxu0 %v10083_v4 }
0x3289   :  { %10085 = vmatprep.subr.bf16.mxu0 %v10338_v1 }
0x328c   :  { %10087 = vmatpush3.bf16.msra.mxu0 %v10086_v7 }
0x328d   :  { %10088 = vmatprep.subr.bf16.mxu0 %v10338_v1 }
0x3290   :  { %10090 = vmatpush3.bf16.msra.mxu0 %v10089_v14 }
0x3291   :  { %9771 = vmatprep.subr.mxu0 %v10339_v2 }
0x3346   :  { %v6263_v15 = vpop.f32.mrb[46].mxu0 }
0x3347   :  { %v6264_v16 = vadd.f32 %v6263_v15, %v6193_v9  ;;  %v9683_v18 = vpop.f32.mrb[47].mxu0  ;;  %v8784_v9 = vld [vmem:[%s12255_s17] ss:$0 sm:$0xff] }
0x3349   :  { %v6267_v19 = vadd.f32 %v6264_v16, %v11519_v27  ;;  %v6294_v27 = vld [vmem:[%s12174_s14 + $0x10] sm:$0xff] }
0x334a   :  { %v10065_v39 = vpack.c.bf16 %v6295_v34, %v6294_v27 }
0x334b   :  { %v6268_v20 = vsel %vm162_vm1, %v6267_v19, 0.0 }
0x334c   :  { %6269 = vadd.xlane.f32.xlu1 %v6268_v20  ;;  %10066 = vmatpush3.bf16.msra.mxu1 %v10065_v39 }
0x334d   :  { %10091 = vmatprep.subr.bf16.mxu1 %v10338_v1 }
0x33d9   :  { %v6270_v22 = vpop.xlane.xlu1 %6269 }
0x33da   :  { %v6271_v24 = vmul.f32 0.03125, %v6270_v22 }
0x33dc   :  { %v6272_v26 = vsub.f32 %v6267_v19, %v6271_v24 }
0x33de   :  { %v6273_v28 = vmul.f32 %v6272_v26, %v6272_v26 }
0x33e0   :  { %v6274_v29 = vsel %vm162_vm1, %v6273_v28, 0.0 }
0x33e1   :  { %6275 = vadd.xlane.f32.xlu0 %v6274_v29 }
0x346e   :  { %v6276_v40 = vpop.xlane.xlu0 %6275 }
0x346f   :  { %v6277_v41 = vmul.f32 0.03125, %v6276_v40 }
0x3471   :  { %v6278_v42 = vadd.f32 1e-05, %v6277_v41 }
0x3473   :  { %10286 = vrsqrt.f32 %v6278_v42 }
0x347d   :  { %v10287_v43 = vpop.eup %10286 }
0x347e   :  { %v6280_v63 = vmul.f32 %v10287_v43, %v6272_v26 }
0x3480   :  { %v6285_v3 = vmul.f32 %v6284_v17, %v6280_v63 }
0x3482   :  { %v11664_v31 = vadd.f32 %v6289_v45, %v6285_v3 }
0x3484   :  { %v6291_v36 = vmul.f32 %v11664_v31, %v11571_v25 }
0x3486   :  { %9693 = vmatmul.mubr.msk.f32.vlgmr.msra.gmra.mrb[86].mxu1 %vm162_vm1, %v6291_v36 }
0x3487   :  { %9738 = vmatprep.mubr.msk.f32.mxu1 %vm10340_vm0, %v10339_v2 }
0x3559   :  { %v6372_v15 = vpop.f32.mrb[86].mxu1 }
0x355a   :  { %v6373_v16 = vadd.f32 %v8784_v9, %v6372_v15  ;;  %v9694_v18 = vpop.f32.mrb[87].mxu1 }
0x355b   :  { %v8786_v18 = vld [vmem:[%s12235_s19 + $0x20] sm:$0xff] }
0x355c   :  { %v6377_v19 = vmul.f32 0.70710677, %v6373_v16  ;;  %v6376_v57 = vmul.f32 0.5, %v6373_v16 }
0x355e   :  { %v6378_v20 = vand.u32 2147483647, %v6377_v19  ;;  %vm6407_vm12 = vcmp.ge.f32.partialorder %v6377_v19, 0.0  ;;  %v8787_v19 = vld [vmem:[%s12235_s19 + $0x28] sm:$0xff] }
0x355f   :  { %v6408_v55 = vsel %vm6407_vm12, 1.0, %v10356_v6 }
0x3560   :  { %v6379_v22 = vmul.f32 0.5, %v6378_v20  ;;  %v6401_v36 = vsub.f32 0.0, %v6378_v20 }
0x3562   :  { %v6380_v24 = vadd.f32 1.0, %v6379_v22  ;;  %v6402_v48 = vmul.f32 %v6401_v36, %v6378_v20  ;;  %v10092_v20 = vpack.c.bf16 %v8787_v19, %v8786_v18  ;;  %v8789_v22 = vld [vmem:[%s12235_s19 + $0x38] sm:$0xff] }
0x3564   :  { %10288 = vrcp.f32 %v6380_v24  ;;  %10093 = vmatpush3.bf16.msra.mxu1 %v10092_v20 }
0x3565   :  { %10094 = vmatprep.subr.bf16.mxu1 %v10338_v1 }
0x356e   :  { %v10289_v26 = vpop.eup %10288 }
0x356f   :  { %v6383_v28 = vmul.f32 0.17087276, %v10289_v26 }
0x3571   :  { %v6384_v29 = vadd.f32 -0.82215226, %v6383_v28 }
0x3573   :  { %v6385_v32 = vmul.f32 %v10289_v26, %v6384_v29 }
0x3575   :  { %v6386_v11 = vadd.f32 1.4885159, %v6385_v32  ;;  %v6523_v32 = vrot.slane %v6413_v61, %v10691_v35 }
0x3577   :  { %v6387_v59 = vmul.f32 %v10289_v26, %v6386_v11 }
0x3579   :  { %v6388_v27 = vadd.f32 -1.135204, %v6387_v59  ;;  %v6528_v59 = vrot.slane %v6413_v61, %v10694_v38 }
0x357b   :  { %v6389_v34 = vmul.f32 %v10289_v26, %v6388_v27 }
0x357d   :  { %v6390_v39 = vadd.f32 0.27886808, %v6389_v34 }
0x357f   :  { %v6391_v40 = vmul.f32 %v10289_v26, %v6390_v39 }
0x3581   :  { %v6392_v41 = vadd.f32 -0.18628806, %v6391_v40  ;;  %v8791_v40 = vld [vmem:[%s12256_s15 + $0x1] ss:$0 sm:$0xff]  ;;  %s12268_s15 = smov 64  }
0x3583   :  { %v6393_v42 = vmul.f32 %v10289_v26, %v6392_v41 }
0x3585   :  { %v6394_v17 = vadd.f32 0.09678418, %v6393_v42 }
0x3587   :  { %v6395_v43 = vmul.f32 %v10289_v26, %v6394_v17 }
0x3589   :  { %v6396_v45 = vadd.f32 0.37409195, %v6395_v43 }
0x358b   :  { %v6397_v63 = vmul.f32 %v10289_v26, %v6396_v45 }
0x358d   :  { %v6398_v3 = vadd.f32 1.0000237, %v6397_v63 }
0x358f   :  { %v6399_v51 = vmul.f32 %v10289_v26, %v6398_v3 }
0x3591   :  { %v6400_v30 = vadd.f32 -1.2655122, %v6399_v51 }
0x3593   :  { %v6403_v49 = vadd.f32 %v6402_v48, %v6400_v30 }
0x3595   :  { %v6404_v44 = vmul.f32 1.442695, %v6403_v49 }
0x3597   :  { %10290 = vpow2.f32 %v6404_v44 }
0x35a1   :  { %v10291_v33 = vpop.eup %10290 }
0x35a2   :  { %v6406_v54 = vmul.f32 %v10291_v33, %v10289_v26 }
0x35a4   :  { %v6409_v52 = vsub.f32 1.0, %v6406_v54 }
0x35a6   :  { %v6410_v56 = vmul.f32 %v6409_v52, %v6408_v55 }
0x35a8   :  { %v6411_v47 = vadd.f32 1.0, %v6410_v56 }
0x35aa   :  { %v6412_v12 = vmul.f32 %v6411_v47, %v6376_v57 }
0x35ac   :  { %v6414_v60 = vmul.f32 %v6412_v12, %v11571_v25 }
0x35ae   :  { %9728 = vmatmul.mubr.f32.vlgmr.msra.gmra.mrb[48].mxu0 %v6414_v60 }
0x35af   :  { %9773 = vmatprep.mubr.msk.f32.mxu0 %vm10340_vm0, %v10339_v2 }
0x3681   :  { %v6501_v0 = vpop.f32.mrb[48].mxu0 }
0x3682   :  { %v6502_v4 = vadd.f32 %v6501_v0, %v6434_v50  ;;  %v9729_v21 = vpop.f32.mrb[49].mxu0 }
0x3684   :  { %v6505_v53 = vmul.f32 %v6502_v4, %v11571_v25 }
0x3686   :  { %v6506_v7 = vadd.f32 %v6505_v53, %v11664_v31  ;;  %v8788_v31 = vld [vmem:[%s12235_s19 + $0x30] sm:$0xff]  ;;  %s12274_s19 = sld [smem:[#allocation12_spill]] }
0x3687   :  { %v10095_v24 = vpack.c.bf16 %v8789_v22, %v8788_v31 }
0x3688   :  { %v6507_v10 = vsel %vm162_vm1, %v6506_v7, 0.0 }
0x3689   :  { %6508 = vadd.xlane.f32.xlu0 %v6507_v10  ;;  %10096 = vmatpush3.bf16.msra.mxu1 %v10095_v24 }
0x368a   :  { %9741 = vmatprep.subr.mxu1 %v10339_v2 }
0x3716   :  { %v6509_v13 = vpop.xlane.xlu0 %6508 }
0x3717   :  { %v6510_v14 = vmul.f32 0.03125, %v6509_v13 }
0x3719   :  { %v6511_v9 = vsub.f32 %v6506_v7, %v6510_v14 }
0x371b   :  { %v6512_v15 = vmul.f32 %v6511_v9, %v6511_v9 }
0x371d   :  { %v6513_v16 = vsel %vm162_vm1, %v6512_v15, 0.0 }
0x371e   :  { %6514 = vadd.xlane.f32.xlu1 %v6513_v16 }
0x37ab   :  { %v6515_v26 = vpop.xlane.xlu1 %6514 }
0x37ac   :  { %v6516_v28 = vmul.f32 0.03125, %v6515_v26 }
0x37ae   :  { %v6517_v29 = vadd.f32 1e-05, %v6516_v28 }
0x37b0   :  { %10292 = vrsqrt.f32 %v6517_v29 }
0x37ba   :  { %v10293_v11 = vpop.eup %10292 }
0x37bb   :  { %v6519_v27 = vmul.f32 %v10293_v11, %v6511_v9 }
0x37bd   :  { %v6524_v34 = vmul.f32 %v6523_v32, %v6519_v27 }
0x37bf   :  { %v11758_v39 = vadd.f32 %v6528_v59, %v6524_v34 }
0x37c1   :  { %9739 = vmatmul.mubr.msk.f32.vlgmr.msra.gmra.mrb[88].mxu1 %vm162_vm1, %v11758_v39 }
0x37c2   :  { %9743 = vmatprep.mubr.msk.f32.mxu1 %vm10340_vm0, %v10339_v2 }
0x3894   :  { %v6610_v41 = vpop.f32.mrb[88].mxu1 }
0x3895   :  { %v11767_v42 = vadd.f32 %v8791_v40, %v6610_v41  ;;  %v9740_v17 = vpop.f32.mrb[89].mxu1 }
0x3897   :  { %6615 = vrot.lane.b32.xlu0 %v11767_v42, %s12247_s0 }
0x389b   :  { %6781 = vrot.lane.b32.xlu0 %v11767_v42, %s12243_s4 }
0x389f   :  { %6779 = vrot.lane.b32.xlu0 %v11767_v42, %s12248_s25 }
0x3909   :  { %v6616_v43 = vpop.permute.xlu0 %6615 }
0x390a   :  { %9742 = vmatpush3.xpose.msk.msra.mxu1 %vm72_vm2, %v6616_v43 }
0x390b   :  { %9746 = vmatprep.subr.mxu1 %v10339_v2 }
0x390d   :  { %9744 = vmatmul.mubr.msk.f32.vlgmr.msra.gmra.mrb[90].mxu1 %vm72_vm2, %v11767_v42  ;;  %v6782_v55 = vpop.permute.xlu0 %6781 }
0x390e   :  { %9748 = vmatprep.mubr.msk.f32.mxu1 %vm10340_vm0, %v10339_v2 }
0x3911   :  { %v6780_v57 = vpop.permute.xlu0 %6779 }
0x39e0   :  { %v6687_v45 = vpop.f32.mrb[90].mxu1 }
0x39e1   :  { %v6691_v63 = vsel %vm11360_vm6, %v6687_v45, -10000.0  ;;  %v9745_v3 = vpop.f32.mrb[91].mxu1 }
0x39e2   :  { %v6692_v36 = vsel %vm72_vm2, %v6691_v63, -inf }
0x39e3   :  { %6693 = vmax.xlane.f32.xlu1 %v6692_v36 }
0x3a70   :  { %v6694_v51 = vpop.xlane.xlu1 %6693 }
0x3a71   :  { %v6695_v30 = vsub.f32 %v6691_v63, %v6694_v51 }
0x3a73   :  { %v6696_v48 = vmul.f32 1.442695, %v6695_v30 }
0x3a75   :  { %10294 = vpow2.f32 %v6696_v48 }
0x3a7f   :  { %v10295_v49 = vpop.eup %10294 }
0x3a80   :  { %v6698_v44 = vsel %vm72_vm2, %v10295_v49, 0.0 }
0x3a81   :  { %6699 = vadd.xlane.f32.xlu1 %v6698_v44 }
0x3a92   :  { %6703 = vrot.lane.b32.xlu1 %v11767_v42, %s12268_s15  ;;  %s12273_s15 = sld [smem:[#allocation6_spill]] }
0x3b0e   :  { %v6700_v33 = vpop.xlane.xlu1 %6699 }
0x3b0f   :  { %10296 = vrcp.f32 %v6700_v33 }
0x3b12   :  { %v6704_v54 = vpop.permute.xlu1 %6703 }
0x3b13   :  { %9747 = vmatpush3.msra.mxu1 %v6704_v54 }
0x3b14   :  { %9751 = vmatprep.subr.mxu1 %v10339_v2 }
0x3b19   :  { %v10297_v52 = vpop.eup %10296 }
0x3b1a   :  { %v6702_v56 = vmul.f32 %v10297_v52, %v10295_v49 }
0x3b1c   :  { %9749 = vmatmul.mubr.msk.f32.vlgmr.msra.gmra.mrb[92].mxu1 %vm72_vm2, %v6702_v56 }
0x3b1d   :  { %9752 = vmatpush3.xpose.msk.msra.mxu1 %vm72_vm2, %v6782_v55  ;;  %9753 = vmatprep.mubr.msk.f32.mxu1 %vm10340_vm0, %v10339_v2  ;;  %v8807_v55 = vld [vmem:[%s12164_s6 + $0x28] sm:$0xff] }
0x3b1e   :  { %9756 = vmatprep.subr.mxu1 %v10339_v2 }
0x3b20   :  { %9754 = vmatmul.mubr.msk.f32.vlgmr.msra.gmra.mrb[94].mxu1 %vm72_vm2, %v6780_v57  ;;  %v8808_v57 = vld [vmem:[%s12164_s6 + $0x30] sm:$0xff] }
0x3b21   :  { %9758 = vmatprep.mubr.msk.f32.mxu1 %vm10340_vm0, %v10339_v2 }
0x3bef   :  { %v11796_v47 = vpop.f32.mrb[92].mxu1 }
0x3bf0   :  { %v9750_v12 = vpop.f32.mrb[93].mxu1 }
0x3bf1   :  { %v8809_v12 = vld [vmem:[%s12164_s6 + $0x38] sm:$0xff] }
0x3bf3   :  { %v6853_v60 = vpop.f32.mrb[94].mxu1 }
0x3bf4   :  { %v6857_v61 = vsel %vm11360_vm6, %v6853_v60, -10000.0  ;;  %v9755_v50 = vpop.f32.mrb[95].mxu1  ;;  %v10101_v60 = vpack.c.bf16 %v8809_v12, %v8808_v57 }
0x3bf5   :  { %v6858_v0 = vsel %vm72_vm2, %v6857_v61, -inf }
0x3bf6   :  { %6859 = vmax.xlane.f32.xlu1 %v6858_v0 }
0x3c07   :  { %6947 = vrot.lane.b32.xlu1 %v11767_v42, %s12241_s27 }
0x3c0b   :  { %6945 = vrot.lane.b32.xlu1 %v11767_v42, %s12250_s18 }
0x3c0f   :  { %7111 = vrot.lane.b32.xlu1 %v11767_v42, %s12251_s23 }
0x3c83   :  { %v6860_v4 = vpop.xlane.xlu1 %6859 }
0x3c84   :  { %v6861_v21 = vsub.f32 %v6857_v61, %v6860_v4 }
0x3c86   :  { %v6862_v53 = vmul.f32 1.442695, %v6861_v21 }
0x3c87   :  { %v6948_v13 = vpop.permute.xlu1 %6947 }
0x3c88   :  { %10298 = vpow2.f32 %v6862_v53 }
0x3c8b   :  { %v6946_v15 = vpop.permute.xlu1 %6945 }
0x3c8f   :  { %v7112_v19 = vpop.permute.xlu1 %7111 }
0x3c92   :  { %v10299_v7 = vpop.eup %10298 }
0x3c93   :  { %v6864_v10 = vsel %vm72_vm2, %v10299_v7, 0.0 }
0x3c94   :  { %6865 = vadd.xlane.f32.xlu0 %v6864_v10 }
0x3caa   :  { %6869 = vrot.lane.b32.xlu0 %v11767_v42, %s12269_s30 }
0x3cae   :  { %7113 = vrot.lane.b32.xlu0 %v11767_v42, %s12242_s28 }
0x3d21   :  { %v6866_v14 = vpop.xlane.xlu0 %6865 }
0x3d22   :  { %10300 = vrcp.f32 %v6866_v14 }
0x3d25   :  { %v6870_v9 = vpop.permute.xlu0 %6869 }
0x3d26   :  { %9757 = vmatpush3.msra.mxu1 %v6870_v9 }
0x3d27   :  { %9761 = vmatprep.subr.mxu1 %v10339_v2 }
0x3d29   :  { %v7114_v16 = vpop.permute.xlu0 %7113 }
0x3d2a   :  { %9772 = vmatpush3.xpose.msk.msra.mxu0 %vm72_vm2, %v7114_v16 }
0x3d2b   :  { %10097 = vmatprep.subr.bf16.mxu0 %v10338_v1 }
0x3d2c   :  { %v10301_v18 = vpop.eup %10300 }
0x3d2d   :  { %v6868_v20 = vmul.f32 %v10301_v18, %v10299_v7  ;;  %9774 = vmatmul.mubr.msk.f32.vlgmr.msra.gmra.mrb[50].mxu0 %vm72_vm2, %v7112_v19 }
0x3d2e   :  { %9789 = vmatprep.mubr.msk.f32.mxu0 %vm10340_vm0, %v10339_v2 }
0x3d2f   :  { %9759 = vmatmul.mubr.msk.f32.vlgmr.msra.gmra.mrb[96].mxu1 %vm72_vm2, %v6868_v20 }
0x3d30   :  { %9762 = vmatpush3.xpose.msk.msra.mxu1 %vm72_vm2, %v6948_v13  ;;  %9763 = vmatprep.mubr.msk.f32.mxu1 %vm10340_vm0, %v10339_v2 }
0x3d31   :  { %9766 = vmatprep.subr.mxu1 %v10339_v2 }
0x3d33   :  { %9764 = vmatmul.mubr.msk.f32.vlgmr.msra.gmra.mrb[98].mxu1 %vm72_vm2, %v6946_v15 }
0x3d34   :  { %9768 = vmatprep.mubr.msk.f32.mxu1 %vm10340_vm0, %v10339_v2 }
0x3e00   :  { %v7185_v31 = vpop.f32.mrb[50].mxu0 }
0x3e01   :  { %v7189_v22 = vsel %vm11360_vm6, %v7185_v31, -10000.0  ;;  %v9775_v24 = vpop.f32.mrb[51].mxu0 }
0x3e02   :  { %v7190_v26 = vsel %vm72_vm2, %v7189_v22, -inf  ;;  %v6941_v28 = vpop.f32.mrb[96].mxu1 }
0x3e03   :  { %7191 = vmax.xlane.f32.xlu1 %v7190_v26  ;;  %v9760_v29 = vpop.f32.mrb[97].mxu1 }
0x3e06   :  { %v7019_v32 = vpop.f32.mrb[98].mxu1 }
0x3e07   :  { %v7023_v11 = vsel %vm11360_vm6, %v7019_v32, -10000.0  ;;  %v9765_v59 = vpop.f32.mrb[99].mxu1 }
0x3e08   :  { %v7024_v27 = vsel %vm72_vm2, %v7023_v11, -inf }
0x3e09   :  { %7025 = vmax.xlane.f32.xlu0 %v7024_v27 }
0x3e14   :  { %7035 = vrot.lane.b32.xlu1 %v11767_v42, %s12270_s2 }
0x3e18   :  { %7278 = vrot.lane.b32.xlu1 %v6941_v28, %s12244_s21 }
0x3e90   :  { %v7192_v34 = vpop.xlane.xlu1 %7191 }
0x3e91   :  { %v7193_v40 = vsub.f32 %v7189_v22, %v7192_v34 }
0x3e93   :  { %v7194_v41 = vmul.f32 1.442695, %v7193_v40 }
0x3e94   :  { %v7036_v17 = vpop.permute.xlu1 %7035 }
0x3e95   :  { %10302 = vpow2.f32 %v7194_v41  ;;  %9767 = vmatpush3.msra.mxu1 %v7036_v17  ;;  %v8823_v41 = vld [vmem:[%s12170_s11 + $0x1] ss:$0 sm:$0xff] }
0x3e96   :  { %v7026_v43 = vpop.xlane.xlu0 %7025  ;;  %9776 = vmatprep.subr.mxu1 %v10339_v2 }
0x3e97   :  { %v7027_v58 = vsub.f32 %v7023_v11, %v7026_v43  ;;  %v8812_v43 = vld [vmem:[%s12169_s8 + $0x28] sm:$0xff] }
0x3e98   :  { %v7279_v21 = vpop.permute.xlu1 %7278 }
0x3e99   :  { %v7028_v45 = vmul.f32 1.442695, %v7027_v58  ;;  %v7289_v13 = vsel %vm72_vm2, %v11796_v47, %v7279_v21  ;;  %v8805_v47 = vld [vmem:[%s12273_s15 + $0x4] sm:$0x7] }
0x3e9a   :  { %v7300_v31 = vrot.slane %v8805_v47, %v10476_v8 }
0x3e9b   :  { %10304 = vpow2.f32 %v7028_v45  ;;  %v8813_v45 = vld [vmem:[%s12169_s8 + $0x30] sm:$0xff] }
0x3e9f   :  { %v10303_v63 = vpop.eup %10302 }
0x3ea0   :  { %v7196_v3 = vsel %vm72_vm2, %v10303_v63, 0.0 }
0x3ea1   :  { %7197 = vadd.xlane.f32.xlu0 %v7196_v3 }
0x3ea5   :  { %v10305_v36 = vpop.eup %10304 }
0x3ea6   :  { %v7030_v51 = vsel %vm72_vm2, %v10305_v36, 0.0 }
0x3ea7   :  { %7031 = vadd.xlane.f32.xlu0 %v7030_v51 }
0x3ebd   :  { %7201 = vrot.lane.b32.xlu0 %v11767_v42, %s12271_s29  ;;  %v8806_v42 = vld [vmem:[%s12164_s6 + $0x20] sm:$0xff]  ;;  %s12272_s29 = sld [smem:[#allocation7_spill]] }
0x3ebe   :  { %v10098_v56 = vpack.c.bf16 %v8807_v55, %v8806_v42  ;;  %v8816_v55 = vld [vmem:[%s12171_s9 + $0x1] ss:$0 sm:$0xff] }
0x3ec0   :  { %10099 = vmatpush3.bf16.msra.mxu0 %v10098_v56 }
0x3ec1   :  { %10100 = vmatprep.subr.bf16.mxu0 %v10338_v1 }
0x3ec3   :  { %v8818_v53 = vld [vmem:[%s12272_s29 + $0x20] sm:$0xff]  ;;  %v8819_v7 = vld [vmem:[%s12272_s29 + $0x28] sm:$0xff]  ;;  %v8820_v16 = vld [vmem:[%s12272_s29 + $0x30] sm:$0xff] }
0x3ec4   :  { %10102 = vmatpush3.bf16.msra.mxu0 %v10101_v60  ;;  %v10110_v14 = vpack.c.bf16 %v8819_v7, %v8818_v53  ;;  %v8821_v18 = vld [vmem:[%s12272_s29 + $0x38] sm:$0xff] }
0x3ec5   :  { %10109 = vmatprep.subr.bf16.mxu0 %v10338_v1  ;;  %v10113_v20 = vpack.c.bf16 %v8821_v18, %v8820_v16 }
0x3f2e   :  { %v7198_v30 = vpop.xlane.xlu0 %7197 }
0x3f34   :  { %v7032_v48 = vpop.xlane.xlu0 %7031 }
0x3f35   :  { %10306 = vrcp.f32 %v7032_v48 }
0x3f36   :  { %10308 = vrcp.f32 %v7198_v30 }
0x3f38   :  { %v7202_v54 = vpop.permute.xlu0 %7201 }
0x3f3f   :  { %v10307_v49 = vpop.eup %10306 }
0x3f40   :  { %v7034_v44 = vmul.f32 %v10307_v49, %v10305_v36  ;;  %v10309_v33 = vpop.eup %10308  ;;  %v7391_v49 = vrot.slane %v8805_v47, %v10691_v35 }
0x3f41   :  { %v7200_v52 = vmul.f32 %v10309_v33, %v10303_v63  ;;  %v8814_v63 = vld [vmem:[%s12169_s8 + $0x38] sm:$0xff]  ;;  %v7396_v33 = vrot.slane %v8805_v47, %v10694_v38 }
0x3f42   :  { %9769 = vmatmul.mubr.msk.f32.vlgmr.msra.gmra.mrb[100].mxu1 %vm72_vm2, %v7034_v44  ;;  %v10107_v3 = vpack.c.bf16 %v8814_v63, %v8813_v45 }
0x3f43   :  { %9777 = vmatpush3.msra.mxu1 %v7202_v54  ;;  %9778 = vmatprep.mubr.msk.f32.mxu1 %vm10340_vm0, %v10339_v2 }
0x3f44   :  { %10103 = vmatprep.subr.bf16.mxu1 %v10338_v1 }
0x3f46   :  { %9779 = vmatmul.mubr.msk.f32.vlgmr.msra.gmra.mrb[102].mxu1 %vm72_vm2, %v7200_v52 }
0x3f47   :  { %9800 = vmatprep.mubr.msk.f32.mxu1 %vm10340_vm0, %v10339_v2 }
0x4015   :  { %v7107_v61 = vpop.f32.mrb[100].mxu1 }
0x4016   :  { %7282 = vrot.lane.b32.xlu1 %v7107_v61, %s12245_s24  ;;  %v9770_v50 = vpop.f32.mrb[101].mxu1 }
0x4019   :  { %v7273_v0 = vpop.f32.mrb[102].mxu1 }
0x401a   :  { %7286 = vrot.lane.b32.xlu0 %v7273_v0, %s12246_s22  ;;  %v9780_v4 = vpop.f32.mrb[103].mxu1 }
0x4088   :  { %v7283_v10 = vpop.permute.xlu1 %7282 }
0x4089   :  { %v7290_v9 = vsel %vm912_vm7, %v7289_v13, %v7283_v10 }
0x408c   :  { %v7287_v15 = vpop.permute.xlu0 %7286 }
0x408d   :  { %v7291_v19 = vsel %vm914_vm8, %v7290_v9, %v7287_v15 }
0x408e   :  { %9790 = vmatmul.mubr.msk.f32.vlgmr.msra.gmra.mrb[52].mxu0 %vm162_vm1, %v7291_v19 }
0x408f   :  { %10111 = vmatpush3.bf16.msra.mxu0 %v10110_v14  ;;  %9811 = vmatprep.mubr.msk.f32.mxu0 %vm10340_vm0, %v10339_v2 }
0x4090   :  { %10112 = vmatprep.subr.bf16.mxu0 %v10338_v1 }
0x4093   :  { %10114 = vmatpush3.bf16.msra.mxu0 %v10113_v20 }
0x4094   :  { %9824 = vmatprep.subr.mxu0 %v10339_v2 }
0x4096   :  { %9812 = vmatmul.mubr.msk.f32.vlgmr.msra.gmra.mrb[54].mxu0 %vm162_vm1, %v11497_v5 }
0x4097   :  { %9826 = vmatprep.mubr.msk.f32.mxu0 %vm10340_vm0, %v10339_v2 }
0x4161   :  { %v7370_v22 = vpop.f32.mrb[52].mxu0 }
0x4162   :  { %v7371_v24 = vadd.f32 %v7370_v22, %v7300_v31  ;;  %v9791_v26 = vpop.f32.mrb[53].mxu0 }
0x4164   :  { %v7374_v28 = vadd.f32 %v7371_v24, %v11758_v39  ;;  %v8811_v39 = vld [vmem:[%s12169_s8 + $0x20] sm:$0xff] }
0x4165   :  { %v10104_v58 = vpack.c.bf16 %v8812_v43, %v8811_v39 }
0x4166   :  { %v7375_v29 = vsel %vm162_vm1, %v7374_v28, 0.0 }
0x4167   :  { %7376 = vadd.xlane.f32.xlu1 %v7375_v29  ;;  %10105 = vmatpush3.bf16.msra.mxu1 %v10104_v58 }
0x4168   :  { %10106 = vmatprep.subr.bf16.mxu1 %v10338_v1 }
0x4169   :  { %v7559_v32 = vpop.f32.mrb[54].mxu0 }
0x416a   :  { %v9813_v11 = vpop.f32.mrb[55].mxu0  ;;  %v11898_v17 = vadd.f32 %v8823_v41, %v7559_v32 }
0x416b   :  { %10108 = vmatpush3.bf16.msra.mxu1 %v10107_v3 }
0x416c   :  { %9814 = vmatprep.subr.mxu1 %v10339_v2 }
0x41f4   :  { %v7377_v5 = vpop.xlane.xlu1 %7376 }
0x41f5   :  { %v7378_v59 = vmul.f32 0.03125, %v7377_v5 }
0x41f7   :  { %v7379_v27 = vsub.f32 %v7374_v28, %v7378_v59 }
0x41f9   :  { %v7380_v34 = vmul.f32 %v7379_v27, %v7379_v27 }
0x41fb   :  { %v7381_v40 = vsel %vm162_vm1, %v7380_v34, 0.0 }
0x41fc   :  { %7382 = vadd.xlane.f32.xlu0 %v7381_v40 }
0x4212   :  { %7729 = vrot.lane.b32.xlu0 %v11898_v17, %s12248_s25 }
0x4289   :  { %v7383_v36 = vpop.xlane.xlu0 %7382 }
0x428a   :  { %v7384_v51 = vmul.f32 0.03125, %v7383_v36 }
0x428c   :  { %v7385_v30 = vadd.f32 1e-05, %v7384_v51 }
0x428d   :  { %v7730_v48 = vpop.permute.xlu0 %7729 }
0x428e   :  { %10310 = vrsqrt.f32 %v7385_v30  ;;  %9825 = vmatpush3.xpose.msk.msra.mxu0 %vm72_vm2, %v7730_v48 }
0x428f   :  { %9834 = vmatprep.subr.mxu0 %v10339_v2 }
0x4298   :  { %v10311_v44 = vpop.eup %10310 }
0x4299   :  { %v7387_v54 = vmul.f32 %v10311_v44, %v7379_v27 }
0x429b   :  { %v7392_v52 = vmul.f32 %v7391_v49, %v7387_v54 }
0x429d   :  { %v11920_v42 = vadd.f32 %v7396_v33, %v7392_v52 }
0x429f   :  { %9801 = vmatmul.mubr.msk.f32.vlgmr.msra.gmra.mrb[104].mxu1 %vm162_vm1, %v11920_v42 }
0x42a0   :  { %9815 = vmatpush3.xpose.msk.msra.mxu1 %vm72_vm2, %v11898_v17  ;;  %9816 = vmatprep.mubr.msk.f32.mxu1 %vm10340_vm0, %v10339_v2 }
0x42a1   :  { %9819 = vmatprep.subr.mxu1 %v10339_v2 }
0x4372   :  { %v7478_v56 = vpop.f32.mrb[104].mxu1 }
0x4373   :  { %v7479_v57 = vadd.f32 %v8816_v55, %v7478_v56  ;;  %v9802_v12 = vpop.f32.mrb[105].mxu1 }
0x4375   :  { %7893 = vrot.lane.b32.xlu0 %v7479_v57, %s12250_s18  ;;  %7727 = vrot.lane.b32.xlu1 %v7479_v57, %s12248_s25 }
0x4376   :  { %9817 = vmatmul.mubr.msk.f32.vlgmr.msra.gmra.mrb[106].mxu1 %vm72_vm2, %v7479_v57 }
0x4377   :  { %9821 = vmatprep.mubr.msk.f32.mxu1 %vm10340_vm0, %v10339_v2 }
0x4379   :  { %8059 = vrot.lane.b32.xlu0 %v7479_v57, %s12251_s23  ;;  %7895 = vrot.lane.b32.xlu1 %v11898_v17, %s12250_s18 }
0x437d   :  { %8061 = vrot.lane.b32.xlu1 %v11898_v17, %s12251_s23 }
0x43e7   :  { %v7728_v60 = vpop.permute.xlu1 %7727  ;;  %v7894_v50 = vpop.permute.xlu0 %7893 }
0x43e8   :  { %9827 = vmatmul.mubr.msk.f32.vlgmr.msra.gmra.mrb[56].mxu0 %vm72_vm2, %v7728_v60 }
0x43e9   :  { %9836 = vmatprep.mubr.msk.f32.mxu0 %vm10340_vm0, %v10339_v2 }
0x43eb   :  { %v7896_v61 = vpop.permute.xlu1 %7895  ;;  %v8060_v4 = vpop.permute.xlu0 %8059 }
0x43ec   :  { %9835 = vmatpush3.xpose.msk.msra.mxu0 %vm72_vm2, %v7896_v61 }
0x43ed   :  { %9844 = vmatprep.subr.mxu0 %v10339_v2 }
0x43ef   :  { %9837 = vmatmul.mubr.msk.f32.vlgmr.msra.gmra.mrb[58].mxu0 %vm72_vm2, %v7894_v50  ;;  %v8062_v0 = vpop.permute.xlu1 %8061 }
0x43f0   :  { %9845 = vmatpush3.xpose.msk.msra.mxu0 %vm72_vm2, %v8062_v0  ;;  %9846 = vmatprep.mubr.msk.f32.mxu0 %vm10340_vm0, %v10339_v2 }
0x43f1   :  { %10115 = vmatprep.subr.bf16.mxu0 %v10338_v1 }
0x43f3   :  { %9847 = vmatmul.mubr.msk.f32.vlgmr.msra.gmra.mrb[60].mxu0 %vm72_vm2, %v8060_v4 }
0x43f4   :  { %9862 = vmatprep.mubr.msk.f32.mxu0 %vm10340_vm0, %v10339_v2 }
0x4449   :  { %v7635_v21 = vpop.f32.mrb[106].mxu1 }
0x444a   :  { %v7639_v53 = vsel %vm11574_vm11, %v7635_v21, -10000.0  ;;  %v9818_v7 = vpop.f32.mrb[107].mxu1 }
0x444b   :  { %v7640_v10 = vsel %vm72_vm2, %v7639_v53, -inf  ;;  %v8839_v7 = vld [vmem:[%s12172_s12 + $0x28] sm:$0xff] }
0x444c   :  { %7641 = vmax.xlane.f32.xlu1 %v7640_v10 }
0x44bb   :  { %v7801_v13 = vpop.f32.mrb[56].mxu0 }
0x44bc   :  { %v7805_v14 = vsel %vm11574_vm11, %v7801_v13, -10000.0  ;;  %v9828_v9 = vpop.f32.mrb[57].mxu0  ;;  %v8840_v13 = vld [vmem:[%s12172_s12 + $0x30] sm:$0xff] }
0x44bd   :  { %v7806_v15 = vsel %vm72_vm2, %v7805_v14, -inf }
0x44be   :  { %7807 = vmax.xlane.f32.xlu0 %v7806_v15 }
0x44c2   :  { %v7967_v16 = vpop.f32.mrb[58].mxu0 }
0x44c3   :  { %v7971_v18 = vsel %vm11574_vm11, %v7967_v16, -10000.0  ;;  %v9838_v19 = vpop.f32.mrb[59].mxu0 }
0x44c4   :  { %v7972_v20 = vsel %vm72_vm2, %v7971_v18, -inf }
0x44c5   :  { %7973 = vmax.xlane.f32.xlu0 %v7972_v20 }
0x44c6   :  { %v8133_v47 = vpop.f32.mrb[60].mxu0 }
0x44c7   :  { %v8137_v31 = vsel %vm11574_vm11, %v8133_v47, -10000.0  ;;  %v9848_v22 = vpop.f32.mrb[61].mxu0 }
0x44c8   :  { %v8138_v24 = vsel %vm72_vm2, %v8137_v31, -inf }
0x44c9   :  { %8139 = vmax.xlane.f32.xlu1 %v8138_v24 }
0x44d9   :  { %v7642_v26 = vpop.xlane.xlu1 %7641 }
0x44da   :  { %v7643_v28 = vsub.f32 %v7639_v53, %v7642_v26  ;;  %7817 = vrot.lane.b32.xlu1 %v11898_v17, %s12243_s4  ;;  %v8838_v53 = vld [vmem:[%s12172_s12 + $0x20] sm:$0xff] }
0x44db   :  { %v10116_v10 = vpack.c.bf16 %v8839_v7, %v8838_v53 }
0x44dc   :  { %v7644_v29 = vmul.f32 1.442695, %v7643_v28 }
0x44dd   :  { %10117 = vmatpush3.bf16.msra.mxu0 %v10116_v10 }
0x44de   :  { %10312 = vpow2.f32 %v7644_v29  ;;  %10118 = vmatprep.subr.bf16.mxu0 %v10338_v1 }
0x44e8   :  { %v10313_v32 = vpop.eup %10312 }
0x44e9   :  { %v7646_v11 = vsel %vm72_vm2, %v10313_v32, 0.0 }
0x44ea   :  { %7647 = vadd.xlane.f32.xlu0 %v7646_v11 }
0x4500   :  { %7651 = vrot.lane.b32.xlu0 %v11898_v17, %s12247_s0 }
0x454b   :  { %v7808_v46 = vpop.xlane.xlu0 %7807 }
0x454c   :  { %v7809_v5 = vsub.f32 %v7805_v14, %v7808_v46  ;;  %v8841_v14 = vld [vmem:[%s12172_s12 + $0x38] sm:$0xff]  ;;  %v8837_v46 = vld [vmem:[%s12173_s13 + $0x4] sm:$0x7] }
0x454d   :  { %v10119_v9 = vpack.c.bf16 %v8841_v14, %v8840_v13 }
0x454e   :  { %v7810_v59 = vmul.f32 1.442695, %v7809_v5 }
0x454f   :  { %10120 = vmatpush3.bf16.msra.mxu0 %v10119_v9 }
0x4550   :  { %10314 = vpow2.f32 %v7810_v59  ;;  %10127 = vmatprep.subr.bf16.mxu0 %v10338_v1  ;;  %v8248_v59 = vrot.slane %v8837_v46, %v10476_v8 }
0x4552   :  { %v7974_v27 = vpop.xlane.xlu0 %7973 }
0x4553   :  { %v7975_v34 = vsub.f32 %v7971_v18, %v7974_v27 }
0x4555   :  { %v7976_v40 = vmul.f32 1.442695, %v7975_v34 }
0x4556   :  { %v8140_v41 = vpop.xlane.xlu1 %8139 }
0x4557   :  { %10316 = vpow2.f32 %v7976_v40  ;;  %v8141_v39 = vsub.f32 %v8137_v31, %v8140_v41 }
0x4559   :  { %v8142_v43 = vmul.f32 1.442695, %v8141_v39 }
0x455a   :  { %v10315_v58 = vpop.eup %10314  ;;  %v7818_v33 = vpop.permute.xlu1 %7817 }
0x455b   :  { %10318 = vpow2.f32 %v8142_v43  ;;  %v7812_v45 = vsel %vm72_vm2, %v10315_v58, 0.0 }
0x455c   :  { %7813 = vadd.xlane.f32.xlu1 %v7812_v45 }
0x4561   :  { %v10317_v63 = vpop.eup %10316 }
0x4562   :  { %v7978_v3 = vsel %vm72_vm2, %v10317_v63, 0.0 }
0x4563   :  { %7979 = vadd.xlane.f32.xlu0 %v7978_v3 }
0x4565   :  { %v10319_v36 = vpop.eup %10318 }
0x4566   :  { %v8144_v51 = vsel %vm72_vm2, %v10319_v36, 0.0 }
0x4567   :  { %8145 = vadd.xlane.f32.xlu1 %v8144_v51 }
0x4577   :  { %v7648_v30 = vpop.xlane.xlu0 %7647 }
0x4578   :  { %10320 = vrcp.f32 %v7648_v30  ;;  %7983 = vrot.lane.b32.xlu1 %v11898_v17, %s12241_s27 }
0x4579   :  { %8149 = vrot.lane.b32.xlu0 %v11898_v17, %s12242_s28 }
0x457b   :  { %v7652_v48 = vpop.permute.xlu0 %7651 }
0x457c   :  { %9820 = vmatpush3.msra.mxu1 %v7652_v48 }
0x457d   :  { %9829 = vmatprep.subr.mxu1 %v10339_v2 }
0x4582   :  { %v10321_v49 = vpop.eup %10320 }
0x4583   :  { %v7650_v44 = vmul.f32 %v10321_v49, %v10313_v32  ;;  %v8725_v32 = vld [vmem:[%s12267_s26 + $0x4] sm:$0x7] }
0x4584   :  { %v4218_v11 = vrot.slane %v8725_v32, %v10476_v8  ;;  %v4307_v53 = vrot.slane %v8725_v32, %v10691_v35  ;;  %v4312_v13 = vrot.slane %v8725_v32, %v10694_v38  ;;  %v8857_v32 = vld [vmem:[%s12175_s16 + $0xb0] sm:$0xff] }
0x4585   :  { %9822 = vmatmul.mubr.msk.f32.vlgmr.msra.gmra.mrb[108].mxu1 %vm72_vm2, %v7650_v44  ;;  %v8844_v44 = vld [vmem:[%s12174_s14 + $0x28] sm:$0xff] }
0x4586   :  { %9830 = vmatpush3.msra.mxu1 %v7818_v33  ;;  %9831 = vmatprep.mubr.msk.f32.mxu1 %vm10340_vm0, %v10339_v2  ;;  %v4286_v5 = vadd.f32 %v11352_v37, %v4218_v11  ;;  %v8858_v11 = vld [vmem:[%s12175_s16 + $0xb8] sm:$0xff] }
0x4587   :  { %9839 = vmatprep.subr.mxu1 %v10339_v2 }
0x4588   :  { %v4289_v34 = vmul.f32 %v4286_v5, %v10754_v62  ;;  %v8859_v5 = vld [vmem:[%s12175_s16 + $0xc0] sm:$0xff] }
0x458a   :  { %v4290_v43 = vadd.f32 %v4289_v34, %v11255_v23  ;;  %v8843_v23 = vld [vmem:[%s12174_s14 + $0x20] sm:$0xff]  ;;  %v8861_v34 = vld [vmem:[%s12175_s16 + $0xd0] sm:$0xff] }
0x458b   :  { %v10122_v33 = vpack.c.bf16 %v8844_v44, %v8843_v23 }
0x45e9   :  { %v7814_v54 = vpop.xlane.xlu1 %7813 }
0x45ea   :  { %10322 = vrcp.f32 %v7814_v54  ;;  %v8845_v54 = vld [vmem:[%s12174_s14 + $0x30] sm:$0xff] }
0x45f0   :  { %v7980_v52 = vpop.xlane.xlu0 %7979 }
0x45f1   :  { %10324 = vrcp.f32 %v7980_v52  ;;  %v8846_v52 = vld [vmem:[%s12174_s14 + $0x38] sm:$0xff] }
0x45f4   :  { %v10323_v17 = vpop.eup %10322  ;;  %v8146_v55 = vpop.xlane.xlu1 %8145 }
0x45f5   :  { %v7816_v56 = vmul.f32 %v10323_v17, %v10315_v58  ;;  %10326 = vrcp.f32 %v8146_v55  ;;  %v8150_v61 = vpop.permute.xlu0 %8149  ;;  %v4291_v58 = vsel %vm162_vm1, %v4290_v43, 0.0  ;;  %v10125_v17 = vpack.c.bf16 %v8846_v52, %v8845_v54 }
0x45f7   :  { %9832 = vmatmul.mubr.msk.f32.vlgmr.msra.gmra.mrb[110].mxu1 %vm72_vm2, %v7816_v56 }
0x45f8   :  { %v7984_v57 = vpop.permute.xlu1 %7983  ;;  %9841 = vmatprep.mubr.msk.f32.mxu1 %vm10340_vm0, %v10339_v2 }
0x45f9   :  { %9840 = vmatpush3.msra.mxu1 %v7984_v57 }
0x45fa   :  { %9849 = vmatprep.subr.mxu1 %v10339_v2 }
0x45fb   :  { %v10325_v12 = vpop.eup %10324 }
0x45fc   :  { %v7982_v60 = vmul.f32 %v10325_v12, %v10317_v63 }
0x45fe   :  { %9842 = vmatmul.mubr.msk.f32.vlgmr.msra.gmra.mrb[112].mxu1 %vm72_vm2, %v7982_v60 }
0x45ff   :  { %v10327_v50 = vpop.eup %10326  ;;  %9850 = vmatpush3.msra.mxu1 %v8150_v61  ;;  %9851 = vmatprep.mubr.msk.f32.mxu1 %vm10340_vm0, %v10339_v2 }
0x4600   :  { %v8148_v0 = vmul.f32 %v10327_v50, %v10319_v36  ;;  %10121 = vmatprep.subr.bf16.mxu1 %v10338_v1  ;;  %v8339_v50 = vrot.slane %v8837_v46, %v10691_v35 }
0x4602   :  { %9852 = vmatmul.mubr.msk.f32.vlgmr.msra.gmra.mrb[114].mxu1 %vm72_vm2, %v8148_v0 }
0x4603   :  { %9873 = vmatprep.mubr.msk.f32.mxu1 %vm10340_vm0, %v10339_v2  ;;  %10123 = vmatpush3.bf16.msra.mxu1 %v10122_v33 }
0x4604   :  { %10124 = vmatprep.subr.bf16.mxu1 %v10338_v1 }
0x4607   :  { %10126 = vmatpush3.bf16.msra.mxu1 %v10125_v17 }
0x4658   :  { %v7723_v4 = vpop.f32.mrb[108].mxu1 }
0x4659   :  { %v9823_v21 = vpop.f32.mrb[109].mxu1 }
0x46ca   :  { %v7889_v15 = vpop.f32.mrb[110].mxu1 }
0x46cb   :  { %8226 = vrot.lane.b32.xlu1 %v7889_v15, %s12244_s21  ;;  %v9833_v16 = vpop.f32.mrb[111].mxu1 }
0x46d1   :  { %v8055_v18 = vpop.f32.mrb[112].mxu1 }
0x46d2   :  { %8230 = vrot.lane.b32.xlu0 %v8055_v18, %s12245_s24  ;;  %v9843_v19 = vpop.f32.mrb[113].mxu1 }
0x46d5   :  { %v8221_v20 = vpop.f32.mrb[114].mxu1 }
0x46d6   :  { %8234 = vrot.lane.b32.xlu1 %v8221_v20, %s12246_s22  ;;  %v9853_v47 = vpop.f32.mrb[115].mxu1  ;;  %v8851_v20 = vld [vmem:[%s12175_s16 + $0x80] sm:$0xff] }
0x46d7   :  { %v8852_v47 = vld [vmem:[%s12175_s16 + $0x88] sm:$0xff] }
0x473d   :  { %v8227_v31 = vpop.permute.xlu1 %8226 }
0x473e   :  { %v8237_v24 = vsel %vm72_vm2, %v7723_v4, %v8227_v31  ;;  %v8344_v4 = vrot.slane %v8837_v46, %v10694_v38  ;;  %v10128_v31 = vpack.c.bf16 %v8852_v47, %v8851_v20  ;;  %v10137_v46 = vpack.c.bf16 %v8858_v11, %v8857_v32 }
0x4744   :  { %v8231_v22 = vpop.permute.xlu0 %8230 }
0x4745   :  { %v8238_v26 = vsel %vm912_vm7, %v8237_v24, %v8231_v22  ;;  %v8853_v22 = vld [vmem:[%s12175_s16 + $0x90] sm:$0xff] }
0x4748   :  { %v8235_v28 = vpop.permute.xlu1 %8234 }
0x4749   :  { %v8239_v29 = vsel %vm914_vm8, %v8238_v26, %v8235_v28  ;;  %v8855_v26 = vld [vmem:[%s12175_s16 + $0xa0] sm:$0xff]  ;;  %v8856_v28 = vld [vmem:[%s12175_s16 + $0xa8] sm:$0xff] }
0x474a   :  { %9863 = vmatmul.mubr.msk.f32.vlgmr.msra.gmra.mrb[62].mxu0 %vm162_vm1, %v8239_v29  ;;  %v10134_v29 = vpack.c.bf16 %v8856_v28, %v8855_v26  ;;  %v8850_v26 = vld [vmem:[%s12267_s26 + $0x4] sm:$0x7] }
0x474b   :  { %9908 = vmatprep.mubr.msk.f32.mxu0 %vm10340_vm0, %v10339_v2  ;;  %10129 = vmatpush3.bf16.msra.mxu0 %v10128_v31  ;;  %v8489_v28 = vrot.slane %v8850_v26, %v10476_v8 }
0x474c   :  { %10130 = vmatprep.subr.bf16.mxu0 %v10338_v1 }
0x481d   :  { %v8318_v27 = vpop.f32.mrb[62].mxu0 }
0x481e   :  { %v8319_v40 = vadd.f32 %v8318_v27, %v8248_v59  ;;  %v9864_v41 = vpop.f32.mrb[63].mxu0  ;;  %v8860_v59 = vld [vmem:[%s12175_s16 + $0xc8] sm:$0xff] }
0x481f   :  { %v10140_v27 = vpack.c.bf16 %v8860_v59, %v8859_v5 }
0x4820   :  { %v8322_v2 = vadd.f32 %v8319_v40, %v11920_v42  ;;  %v8862_v40 = vld [vmem:[%s12175_s16 + $0xd8] sm:$0xff] }
0x4821   :  { %v10143_v41 = vpack.c.bf16 %v8862_v40, %v8861_v34 }
0x4822   :  { %v8323_v39 = vsel %vm162_vm1, %v8322_v2, 0.0 }
0x4823   :  { %8324 = vadd.xlane.f32.xlu0 %v8323_v39  ;;  %v8864_v39 = vld [vmem:[%s12175_s16 + $0xe8] sm:$0xff] }
0x4827   :  { %4292 = vadd.xlane.f32.xlu0 %v4291_v58  ;;  %v8865_v58 = vld [vmem:[%s12175_s16 + $0xf0] sm:$0xff] }
0x48b0   :  { %v8325_v45 = vpop.xlane.xlu0 %8324 }
0x48b1   :  { %v8326_v63 = vmul.f32 0.03125, %v8325_v45  ;;  %v8866_v45 = vld [vmem:[%s12175_s16 + $0xf8] sm:$0xff] }
0x48b3   :  { %v8327_v37 = vsub.f32 %v8322_v2, %v8326_v63  ;;  %v8863_v2 = vld [vmem:[%s12175_s16 + $0xe0] sm:$0xff]  ;;  %v10149_v63 = vpack.c.bf16 %v8866_v45, %v8865_v58  ;;  %v8583_v45 = vrot.slane %v8850_v26, %v10694_v38 }
0x48b4   :  { %v4293_v3 = vpop.xlane.xlu0 %4292 }
0x48b5   :  { %v4294_v36 = vmul.f32 0.03125, %v4293_v3  ;;  %v8328_v51 = vmul.f32 %v8327_v37, %v8327_v37 }
0x48b7   :  { %v4295_v30 = vsub.f32 %v4290_v43, %v4294_v36  ;;  %v8329_v48 = vsel %vm162_vm1, %v8328_v51, 0.0  ;;  %v10146_v43 = vpack.c.bf16 %v8864_v39, %v8863_v2 }
0x48b8   :  { %8330 = vadd.xlane.f32.xlu1 %v8329_v48 }
0x48b9   :  { %v4296_v49 = vmul.f32 %v4295_v30, %v4295_v30 }
0x48bb   :  { %v4297_v42 = vsel %vm162_vm1, %v4296_v49, 0.0 }
0x48bc   :  { %4298 = vadd.xlane.f32.xlu0 %v4297_v42 }
0x4945   :  { %v8331_v55 = vpop.xlane.xlu1 %8330 }
0x4946   :  { %v8332_v56 = vmul.f32 0.03125, %v8331_v55 }
0x4948   :  { %v8333_v57 = vadd.f32 1e-05, %v8332_v56 }
0x4949   :  { %v4299_v12 = vpop.xlane.xlu0 %4298 }
0x494a   :  { %10328 = vrsqrt.f32 %v8333_v57  ;;  %v4300_v60 = vmul.f32 0.03125, %v4299_v12 }
0x494c   :  { %v4301_v61 = vadd.f32 1e-05, %v4300_v60 }
0x494e   :  { %10330 = vrsqrt.f32 %v4301_v61 }
0x4954   :  { %v10329_v0 = vpop.eup %10328 }
0x4955   :  { %v8335_v21 = vmul.f32 %v10329_v0, %v8327_v37  ;;  %v8848_v37 = vld [vmem:[%s12255_s17 + $0x1] ss:$0 sm:$0xff] }
0x4957   :  { %v8340_v7 = vmul.f32 %v8339_v50, %v8335_v21 }
0x4958   :  { %v10331_v10 = vpop.eup %10330 }
0x4959   :  { %v12051_v14 = vadd.f32 %v8344_v4, %v8340_v7  ;;  %v4303_v9 = vmul.f32 %v10331_v10, %v4295_v30 }
0x495b   :  { %v8346_v15 = vmul.f32 %v12051_v14, %v11571_v25  ;;  %v4308_v16 = vmul.f32 %v4307_v53, %v4303_v9 }
0x495d   :  { %9874 = vmatmul.mubr.msk.f32.vlgmr.msra.gmra.mrb[116].mxu1 %vm162_vm1, %v8346_v15  ;;  %v4313_v18 = vadd.f32 %v4312_v13, %v4308_v16 }
0x495f   :  { %v4314_v19 = vmul.f32 %v4313_v18, %v10754_v62  ;;  %v8854_v62 = vld [vmem:[%s12175_s16 + $0x98] sm:$0xff] }
0x4960   :  { %v10131_v24 = vpack.c.bf16 %v8854_v62, %v8853_v22 }
0x4961   :  { %4315 = vxpose.xlu1.b32.start.end [1/1] (short) (narrow) %v4314_v19, 32 }
0x4962   :  { %10132 = vmatpush3.bf16.msra.mxu0 %v10131_v24 }
0x4963   :  { %10133 = vmatprep.subr.bf16.mxu0 %v10338_v1 }
0x4966   :  { %10135 = vmatpush3.bf16.msra.mxu0 %v10134_v29 }
0x4967   :  { %10136 = vmatprep.subr.bf16.mxu0 %v10338_v1 }
0x496a   :  { %10138 = vmatpush3.bf16.msra.mxu0 %v10137_v46 }
0x496b   :  { %10139 = vmatprep.subr.bf16.mxu0 %v10338_v1 }
0x496e   :  { %10141 = vmatpush3.bf16.msra.mxu0 %v10140_v27 }
0x496f   :  { %10142 = vmatprep.subr.bf16.mxu0 %v10338_v1 }
0x4972   :  { %10144 = vmatpush3.bf16.msra.mxu0 %v10143_v41 }
0x4973   :  { %10145 = vmatprep.subr.bf16.mxu0 %v10338_v1 }
0x4976   :  { %10147 = vmatpush3.bf16.msra.mxu0 %v10146_v43 }
0x4977   :  { %10148 = vmatprep.subr.bf16.mxu0 %v10338_v1 }
0x497a   :  { %10150 = vmatpush3.bf16.msra.mxu0 %v10149_v63 }
0x49e1   :  { %v4331_v2 = vpop.trf.xlu1 }
0x49e2   :  { %4347 = vst.msk [vmem:[%s12274_s19] sm:$0xff] %vm72_vm2, %v4331_v2 }
0x4a30   :  { %v8427_v3 = vpop.f32.mrb[116].mxu1 }
0x4a31   :  { %v8428_v36 = vadd.f32 %v8848_v37, %v8427_v3  ;;  %v9875_v51 = vpop.f32.mrb[117].mxu1 }
0x4a32   :  { %v4332_v51 = vpop.trf.xlu1 }
0x4a33   :  { %v8432_v30 = vmul.f32 0.70710677, %v8428_v36  ;;  %v8431_v31 = vmul.f32 0.5, %v8428_v36  ;;  %4348 = vst.msk [vmem:[%s12274_s19 + $0x8] sm:$0xff] %vm72_vm2, %v4332_v51 }
0x4a35   :  { %v8433_v48 = vand.u32 2147483647, %v8432_v30  ;;  %vm8462_vm0 = vcmp.ge.f32.partialorder %v8432_v30, 0.0 }
0x4a36   :  { %v8463_v20 = vsel %vm8462_vm0, 1.0, %v10356_v6  ;;  %v4333_v30 = vpop.trf.xlu1 }
0x4a37   :  { %v8434_v1 = vmul.f32 0.5, %v8433_v48  ;;  %v8456_v53 = vsub.f32 0.0, %v8433_v48  ;;  %4349 = vst.msk [vmem:[%s12274_s19 + $0x10] sm:$0xff] %vm72_vm2, %v4333_v30 }
0x4a39   :  { %v8435_v49 = vadd.f32 1.0, %v8434_v1  ;;  %v8457_v13 = vmul.f32 %v8456_v53, %v8433_v48 }
0x4a3b   :  { %10332 = vrcp.f32 %v8435_v49 }
0x4a45   :  { %v10333_v42 = vpop.eup %10332 }
0x4a46   :  { %v8438_v23 = vmul.f32 0.17087276, %v10333_v42 }
0x4a48   :  { %v8439_v44 = vadd.f32 -0.82215226, %v8438_v23 }
0x4a4a   :  { %v8440_v33 = vmul.f32 %v10333_v42, %v8439_v44 }
0x4a4c   :  { %v8441_v54 = vadd.f32 1.4885159, %v8440_v33 }
0x4a4e   :  { %v8442_v52 = vmul.f32 %v10333_v42, %v8441_v54 }
0x4a50   :  { %v8443_v17 = vadd.f32 -1.135204, %v8442_v52 }
0x4a52   :  { %v8444_v55 = vmul.f32 %v10333_v42, %v8443_v17 }
0x4a54   :  { %v8445_v56 = vadd.f32 0.27886808, %v8444_v55 }
0x4a56   :  { %v8446_v57 = vmul.f32 %v10333_v42, %v8445_v56 }
0x4a58   :  { %v8447_v12 = vadd.f32 -0.18628806, %v8446_v57 }
0x4a5a   :  { %v8448_v60 = vmul.f32 %v10333_v42, %v8447_v12 }
0x4a5c   :  { %v8449_v61 = vadd.f32 0.09678418, %v8448_v60 }
0x4a5e   :  { %v8450_v50 = vmul.f32 %v10333_v42, %v8449_v61 }
0x4a60   :  { %v8451_v0 = vadd.f32 0.37409195, %v8450_v50 }
0x4a62   :  { %v8452_v4 = vmul.f32 %v10333_v42, %v8451_v0 }
0x4a64   :  { %v8453_v21 = vadd.f32 1.0000237, %v8452_v4 }
0x4a66   :  { %v8454_v7 = vmul.f32 %v10333_v42, %v8453_v21 }
0x4a68   :  { %v8455_v10 = vadd.f32 -1.2655122, %v8454_v7 }
0x4a6a   :  { %v8458_v9 = vadd.f32 %v8457_v13, %v8455_v10 }
0x4a6c   :  { %v8459_v15 = vmul.f32 1.442695, %v8458_v9 }
0x4a6e   :  { %10334 = vpow2.f32 %v8459_v15 }
0x4a78   :  { %v10335_v16 = vpop.eup %10334 }
0x4a79   :  { %v8461_v18 = vmul.f32 %v10335_v16, %v10333_v42 }
0x4a7b   :  { %v8464_v19 = vsub.f32 1.0, %v8461_v18 }
0x4a7d   :  { %v8465_v47 = vmul.f32 %v8464_v19, %v8463_v20 }
0x4a7f   :  { %v8466_v22 = vadd.f32 1.0, %v8465_v47 }
0x4a81   :  { %v8467_v62 = vmul.f32 %v8466_v22, %v8431_v31 }
0x4a83   :  { %v8469_v24 = vmul.f32 %v8467_v62, %v11571_v25 }
0x4a85   :  { %9909 = vmatmul.mubr.f32.vlgmr.msra.gmra.mrb[64].mxu0 %v8469_v24 }
0x4b58   :  { %v8556_v29 = vpop.f32.mrb[64].mxu0 }
0x4b59   :  { %v8557_v32 = vadd.f32 %v8556_v29, %v8489_v28  ;;  %v9910_v11 = vpop.f32.mrb[65].mxu0 }
0x4b5b   :  { %v8560_v46 = vmul.f32 %v8557_v32, %v11571_v25 }
0x4b5d   :  { %v8561_v6 = vadd.f32 %v8560_v46, %v12051_v14  ;;  %v8578_v14 = vrot.slane %v8850_v26, %v10691_v35  ;;  %v4334_v35 = vpop.trf.xlu1 }
0x4b5e   :  { %4350 = vst.msk [vmem:[%s12274_s19 + $0x18] sm:$0xff] %vm72_vm2, %v4334_v35 }
0x4b5f   :  { %v8562_v5 = vsel %vm162_vm1, %v8561_v6, 0.0 }
0x4b60   :  { %8563 = vadd.xlane.f32.xlu0 %v8562_v5 }
0x4bed   :  { %v8564_v59 = vpop.xlane.xlu0 %8563 }
0x4bee   :  { %v8565_v27 = vmul.f32 0.03125, %v8564_v59 }
0x4bf0   :  { %v8566_v34 = vsub.f32 %v8561_v6, %v8565_v27 }
0x4bf2   :  { %v8567_v40 = vmul.f32 %v8566_v34, %v8566_v34 }
0x4bf4   :  { %v8568_v41 = vsel %vm162_vm1, %v8567_v40, 0.0 }
0x4bf5   :  { %8569 = vadd.xlane.f32.xlu0 %v8568_v41 }
0x4c82   :  { %v8570_v8 = vpop.xlane.xlu0 %8569 }
0x4c83   :  { %v8571_v39 = vmul.f32 0.03125, %v8570_v8 }
0x4c85   :  { %v8572_v43 = vadd.f32 1e-05, %v8571_v39 }
0x4c87   :  { %10336 = vrsqrt.f32 %v8572_v43 }
0x4c91   :  { %v10337_v58 = vpop.eup %10336 }
0x4c92   :  { %v8574_v63 = vmul.f32 %v10337_v58, %v8566_v34 }
0x4c94   :  { %v8579_v37 = vmul.f32 %v8578_v14, %v8574_v63 }
0x4c96   :  { %v8584_v3 = vadd.f32 %v8583_v45, %v8579_v37 }
0x4c98   :  { %v8585_v36 = vmul.f32 %v8584_v3, %v11571_v25 }
0x4c9a   :  { %8586 = vxpose.xlu0.b32.start.end [1/1] (short) (narrow) %v8585_v36, 32 }
0x4d1a   :  { %v8602_v38 = vpop.trf.xlu0 }
0x4d1b   :  { %8867 = vst.msk [vmem:[%s12274_s19 + $0x20] sm:$0xff] %vm72_vm2, %v8602_v38 }
0x4d1e   :  { %v8603_v25 = vpop.trf.xlu0 }
0x4d1f   :  { %8868 = vst.msk [vmem:[%s12274_s19 + $0x28] sm:$0xff] %vm72_vm2, %v8603_v25 }
0x4d22   :  { %v8604_v48 = vpop.trf.xlu0 }
0x4d23   :  { %8869 = vst.msk [vmem:[%s12274_s19 + $0x30] sm:$0xff] %vm72_vm2, %v8604_v48 }
0x4d26   :  { %v8605_v1 = vpop.trf.xlu0 }
0x4d27   :  { %8870 = vst.msk [vmem:[%s12274_s19 + $0x38] sm:$0xff] %vm72_vm2, %v8605_v1 }

</bundles_post_ra>
